<compile_context>
chip_gen: v5e
topology: v5e:2x2
jax: 0.10.0
libtpu: 0.0.40
codegen_flags: <defaults>
</compile_context>

<pallas_src>
import functools
import math

import jax
import jax.numpy as jnp
from jax.experimental import pallas as pl
from jax.experimental.pallas import tpu as pltpu

LRELU_SLOPE = 0.01      # nn.LeakyReLU default negative_slope
BN_EPS = 1e-5           # nn.BatchNorm2d default eps
SA_BETA = 0.2           # SpatialAttentionModule.beta
VMEM_LIMIT = 32 * 1024 * 1024

# Fixed geometry for the reference 16x16 input (16 -> 8 -> 4 -> 2 spatial).
_ROWS_B2 = 168          # rows of the padded/width-folded conv2-input scratch
_ROWS_B3 = 168          # rows of the padded/width-folded PyConv-input scratch
_COPY_B2 = 160          # rows touched by the shifted lane-block copies / conv windows
_COPY_B3 = 160


# ------------------------------ fused kernel --------------------------------

def _fused_chain_kernel(x_ref, w1_ref, sc1_ref, sh1_ref,
                        w2_ref, sc2_ref, sh2_ref,
                        w3_ref, ecaT_ref, saK_ref, sab_ref, sc3_ref, sh3_ref,
                        o_ref, buf2, buf3, ps1, ps2, ps3, *, fm, bounds):
    f32 = jnp.float32
    C1, C2, C3 = fm, 2 * fm, 4 * fm

    # ---------------- stage 1: conv1 (3x3) + BN + LeakyReLU ----------------
    # x_ref[0] is the full 3x3 im2col of the padded 16x16 input: (256, 9*Cin) bf16.
    y1 = jnp.dot(x_ref[0], w1_ref[...], preferred_element_type=f32)       # (256, 32)
    y1 = y1 * sc1_ref[...] + sh1_ref[...]
    y1 = jnp.where(y1 >= 0.0, y1, LRELU_SLOPE * y1)

    # MaxPool2d(2): vertical pair-max, horizontal pair-max, stride-2 row gather.
    vp1 = jnp.maximum(y1[0:240, :], y1[16:256, :])
    hp1 = jnp.maximum(vp1[0:239, :], vp1[1:240, :])
    ps1[0:239, :] = hp1

    # ----- build the zero-padded, width-im2col'd conv2 input in VMEM -----
    buf2[...] = jnp.zeros_like(buf2)
    for i in range(8):                                      # pooled 8x8 rows
        row = ps1[pl.ds(32 * i, 8, stride=2), :]            # pooled row i, (8, 32)
        r0 = (i + 1) * 16 + 1
        buf2[r0:r0 + 8, 0:C1] = row
    for j in range(1, 3):                                   # width taps 1,2 -> lane blocks
        buf2[0:_COPY_B2, C1 * j:C1 * (j + 1)] = buf2[j:j + _COPY_B2, 0:C1]

    # ---------------- stage 2: conv2 (3 folded taps) + BN + LeakyReLU ----------------
    b2 = buf2[...].astype(jnp.bfloat16)                     # single hoisted cast
    y2 = jnp.zeros((128, C2), f32)
    for di in range(3):
        y2 = y2 + jnp.dot(b2[di * 16:di * 16 + 128, :], w2_ref[di],
                          preferred_element_type=f32)
    y2 = y2 * sc2_ref[...] + sh2_ref[...]
    y2 = jnp.where(y2 >= 0.0, y2, LRELU_SLOPE * y2)

    # MaxPool2d(2)  (Dropout(0.5) is identity in eval mode)
    vp2 = jnp.maximum(y2[0:112, :], y2[16:128, :])
    hp2 = jnp.maximum(vp2[0:111, :], vp2[1:112, :])
    ps2[0:111, :] = hp2

    # ----- build the zero-padded, width-im2col'd PyConv input in VMEM -----
    buf3[...] = jnp.zeros_like(buf3)
    for i in range(4):                                      # pooled 4x4 rows
        row = ps2[pl.ds(32 * i, 4, stride=2), :]            # (4, 64)
        r0 = (i + 3) * 16 + 3
        buf3[r0:r0 + 4, 0:C2] = row
    for j in range(1, 7):
        buf3[0:_COPY_B3, C2 * j:C2 * (j + 1)] = buf3[j:j + _COPY_B3, 0:C2]

    # ------- stage 3a: fused PyConv (3x3/g1 + 5x5/g4 + 7x7/g8 as one 7x7) -------
    b3 = buf3[...].astype(jnp.bfloat16)
    y3 = jnp.zeros((64, C3), f32)
    for di in range(7):
        y3 = y3 + jnp.dot(b3[di * 16:di * 16 + 64, :], w3_ref[di],
                          preferred_element_type=f32)

    # Keep only the 16 valid spatial positions (drop padded-width garbage columns).
    xv = jnp.concatenate([y3[0:4, :], y3[16:20, :], y3[32:36, :], y3[48:52, :]],
                         axis=0)                             # (16, 128)

    # ------- stage 3b: per-branch EFR (ECA channel gate + spatial attention) -------
    v = jnp.mean(xv, axis=0, keepdims=True) + jnp.max(xv, axis=0, keepdims=True)
    v = jnp.dot(v, ecaT_ref[...], preferred_element_type=f32)   # block-diag Toeplitz conv1d
    xe = xv * jax.nn.sigmoid(v)

    ch = jax.lax.broadcasted_iota(jnp.int32, (16, C3), 1)
    gates = []
    for b, (lo, hi) in enumerate(bounds):
        mask = (ch >= lo) & (ch < hi)
        mean_c = jnp.sum(jnp.where(mask, xe, 0.0), axis=1, keepdims=True) * (1.0 / (hi - lo))
        max_c = jnp.max(jnp.where(mask, xe, -3.0e38), axis=1, keepdims=True)
        mm = jnp.concatenate([mean_c, max_c], axis=0)            # (32, 1)
        s = jnp.dot(saK_ref[b], mm, preferred_element_type=f32) + sab_ref[b]
        a = jax.nn.sigmoid(s)
        gates.append(jnp.where(a >= SA_BETA, a, 0.0))
    gate = jnp.where(ch < bounds[0][1], gates[0],
                     jnp.where(ch < bounds[1][1], gates[1], gates[2]))
    y = xe * gate

    # ------- stage 3c: BN + LeakyReLU + MaxPool2d(2) (tail of conv3/conv6) -------
    y = y * sc3_ref[...] + sh3_ref[...]
    y = jnp.where(y >= 0.0, y, LRELU_SLOPE * y)
    vp3 = jnp.maximum(y[0:12, :], y[4:16, :])
    hp3 = jnp.maximum(vp3[0:11, :], vp3[1:12, :])
    ps3[0:11, :] = hp3
    for i in range(2):
        o_ref[0, 2 * i:2 * i + 2, :] = ps3[pl.ds(8 * i, 2, stride=2), :]


# ------------------------------ pallas wrapper -------------------------------

def fused_chain(x_im2col, P, *, fm):
    N, M, K1 = x_im2col.shape
    Ct = 4 * fm
    bounds = ((0, fm), (fm, 2 * fm), (2 * fm, Ct))
    kernel = functools.partial(_fused_chain_kernel, fm=fm, bounds=bounds)

    def zero2(n):
        return (0, 0)

    def zero3(n):
        return (0, 0, 0)

    return pl.pallas_call(
        kernel,
        out_shape=jax.ShapeDtypeStruct((N, 4, Ct), jnp.float32),
        grid=(N,),
        in_specs=[
            pl.BlockSpec((1, M, K1), lambda n: (n, 0, 0)),
            pl.BlockSpec(P["w1"].shape, zero2),
            pl.BlockSpec(P["sc1"].shape, zero2),
            pl.BlockSpec(P["sh1"].shape, zero2),
            pl.BlockSpec(P["w2"].shape, zero3),
            pl.BlockSpec(P["sc2"].shape, zero2),
            pl.BlockSpec(P["sh2"].shape, zero2),
            pl.BlockSpec(P["w3"].shape, zero3),
            pl.BlockSpec(P["ecaT"].shape, zero2),
            pl.BlockSpec(P["saK"].shape, zero3),
            pl.BlockSpec(P["sab"].shape, zero3),
            pl.BlockSpec(P["sc3"].shape, zero2),
            pl.BlockSpec(P["sh3"].shape, zero2),
        ],
        out_specs=pl.BlockSpec((1, 4, Ct), lambda n: (n, 0, 0)),
        scratch_shapes=[
            pltpu.VMEM((_ROWS_B2, 3 * fm), jnp.float32),     # conv2 padded/width-folded input
            pltpu.VMEM((_ROWS_B3, 14 * fm), jnp.float32),    # PyConv padded/width-folded input
            pltpu.VMEM((240, fm), jnp.float32),              # stage-1 pool staging
            pltpu.VMEM((112, 2 * fm), jnp.float32),          # stage-2 pool staging
            pltpu.VMEM((16, 4 * fm), jnp.float32),           # stage-3 pool staging
        ],
        compiler_params=pltpu.CompilerParams(
            dimension_semantics=("parallel",),
            vmem_limit_bytes=VMEM_LIMIT,
        ),
    )(x_im2col, P["w1"], P["sc1"], P["sh1"], P["w2"], P["sc2"], P["sh2"],
      P["w3"], P["ecaT"], P["saK"], P["sab"], P["sc3"], P["sh3"])


# --------------------- parameter preprocessing (wrapper) ---------------------

def bn_fold(bn, conv_bias=None):
    scale = bn["gamma"] / jnp.sqrt(bn["var"] + BN_EPS)
    shift = bn["beta"] - bn["mean"] * scale
    if conv_bias is not None:
        shift = shift + conv_bias * scale
    return scale, shift


def eca_kernel_size(channels, gamma=2, b=1):
    k = int(abs((math.log(channels, 2) + b) / gamma))
    return k if k % 2 else k + 1


def eca_toeplitz(w, C):
    # conv1d over channels (1 in / 1 out channel, 'same' padding) as a (C, C) matrix
    k = w.shape[0]
    pad = (k - 1) // 2
    i = jnp.arange(C)[:, None]
    j = jnp.arange(C)[None, :]
    d = i - j + pad
    valid = (d >= 0) & (d < k)
    return jnp.where(valid, w[jnp.clip(d, 0, k - 1)], 0.0)


def sa_conv_matrix(sa_w, H, W):
    # 7x7 / pad 3 spatial conv on a 2-channel (mean,max) map as two (HW, HW) matrices
    w = sa_w[0]                                   # (2, 7, 7)
    pi, qi = jnp.arange(H), jnp.arange(H)
    di = qi[None, :] - pi[:, None] + 3
    vi = (di >= 0) & (di < 7)
    pj, qj = jnp.arange(W), jnp.arange(W)
    dj = qj[None, :] - pj[:, None] + 3
    vj = (dj >= 0) & (dj < 7)
    S = w[:, jnp.clip(di, 0, 6)[:, None, :, None], jnp.clip(dj, 0, 6)[None, :, None, :]]
    S = jnp.where((vi[:, None, :, None] & vj[None, :, None, :])[None], S, 0.0)
    return S.reshape(2, H * W, H * W)


def build_pyconv_T(w1, w2, w3):
    # fuse the 3 PyConv branches (3x3/g1, 5x5/g4, 7x7/g8) into one 7x7 conv weight
    Cin = w1.shape[1]
    C1, C2, C3 = w1.shape[0], w2.shape[0], w3.shape[0]
    Ct = C1 + C2 + C3
    T = jnp.zeros((7, 7, Cin, Ct), jnp.float32)
    T = T.at[2:5, 2:5, :, 0:C1].set(jnp.transpose(w1, (2, 3, 1, 0)))
    cig, cog = Cin // 4, C2 // 4
    for g in range(4):
        blk = jnp.transpose(w2[g * cog:(g + 1) * cog], (2, 3, 1, 0))
        T = T.at[1:6, 1:6, g * cig:(g + 1) * cig,
                 C1 + g * cog:C1 + (g + 1) * cog].set(blk)
    cig, cog = Cin // 8, C3 // 8
    for g in range(8):
        blk = jnp.transpose(w3[g * cog:(g + 1) * cog], (2, 3, 1, 0))
        T = T.at[:, :, g * cig:(g + 1) * cig,
                 C1 + C2 + g * cog:C1 + C2 + (g + 1) * cog].set(blk)
    return T


def _prep_modality(p_a, p_b, p_py, fm):
    # stage 1: full 3x3 im2col weight, (9*Cin, FM)
    wa = p_a["w"]
    w1 = jnp.transpose(wa, (2, 3, 1, 0)).reshape(9 * wa.shape[1], wa.shape[0]).astype(jnp.bfloat16)
    sc1, sh1 = bn_fold(p_a["bn"], p_a["b"])
    # stage 2: width-folded weight, (3, 3*Cin, 2*FM)
    wb = p_b["w"]
    w2 = jnp.transpose(wb, (2, 3, 1, 0)).reshape(3, 3 * wb.shape[1], wb.shape[0]).astype(jnp.bfloat16)
    sc2, sh2 = bn_fold(p_b["bn"], p_b["b"])
    # stage 3: fused dense PyConv, width-folded (7, 7*2FM, 4FM)
    py = p_py["py"]
    T = build_pyconv_T(py["w1"], py["w2"], py["w3"])
    Ct = T.shape[3]
    w3 = T.reshape(7, 7 * T.shape[2], Ct).astype(jnp.bfloat16)
    C1, C2 = py["w1"].shape[0], py["w2"].shape[0]
    bounds = ((0, C1), (C1, C1 + C2), (C1 + C2, Ct))
    ecaT = jnp.zeros((Ct, Ct), jnp.float32)
    for (lo, hi), e in zip(bounds, (py["efr1"], py["efr2"], py["efr3"])):
        ecaT = ecaT.at[lo:hi, lo:hi].set(eca_toeplitz(e["eca_w"], hi - lo))
    mats, biases = [], []
    for i in (1, 2, 3):
        S = sa_conv_matrix(py[f"efr{i}"]["sa_w"], 4, 4)
        mats.append(jnp.concatenate([S[0], S[1]], axis=1))        # (16, 32): [K_mean | K_max]
        biases.append(py[f"efr{i}"]["sa_b"][0])
    sc3, sh3 = bn_fold(p_py["bn"])

    def r1(a):
        return a.reshape(1, -1).astype(jnp.float32)

    return dict(
        w1=w1, sc1=r1(sc1), sh1=r1(sh1),
        w2=w2, sc2=r1(sc2), sh2=r1(sh2),
        w3=w3, ecaT=ecaT.astype(jnp.float32),
        saK=jnp.stack(mats).astype(jnp.float32),
        sab=jnp.stack(biases).astype(jnp.float32).reshape(3, 1, 1),
        sc3=r1(sc3), sh3=r1(sh3),
    )


def prepare_params(params, fm=32):
    return dict(
        m1=_prep_modality(params["conv1"], params["conv2"], params["conv3"], fm),
        m2=_prep_modality(params["conv4"], params["conv5"], params["conv6"], fm),
    )


# --------------------------------- forward ----------------------------------

def _im2col_3x3(x_nhwc):
    N, H, W, C = x_nhwc.shape
    xp = jnp.pad(x_nhwc, ((0, 0), (1, 1), (1, 1), (0, 0)))
    cols = [xp[:, di:di + H, dj:dj + W, :] for di in range(3) for dj in range(3)]
    out = jnp.concatenate(cols, axis=-1)
    return out.reshape(N, H * W, 9 * C).astype(jnp.bfloat16)


@functools.partial(jax.jit, static_argnames=("fm",))
def pycnn_forward(x1, x2, prep, *, fm=32):
    # TODO(synk): SA(x1, x2) / SE(x2, x1) cross-modal modules are not defined in
    # the provided source module; treated as identity passthrough.
    def run(x_nchw, P):
        assert x_nchw.shape[2] == 16 and x_nchw.shape[3] == 16, "kernel assumes 16x16 input"
        N = x_nchw.shape[0]
        xi = _im2col_3x3(jnp.transpose(x_nchw, (0, 2, 3, 1)))   # (N, 256, 9*Cin) bf16
        out = fused_chain(xi, P, fm=fm)                          # (N, 4, 4*FM) f32
        # match torch's NCHW .view(N, -1) channel-major flatten
        return jnp.transpose(out, (0, 2, 1)).reshape(N, -1)

    return run(x1, prep["m1"]), run(x2, prep["m2"])


# --------------------------- parameter construction --------------------------

def init_params(key, in_ch1, in_ch2, fm=32):
    keys = iter(jax.random.split(key, 96))

    def nk():
        return next(keys)

    def conv_w(co, ci, k):
        return 0.1 * jax.random.normal(nk(), (co, ci, k, k), jnp.float32)

    def bias(c):
        return 0.05 * jax.random.normal(nk(), (c,), jnp.float32)

    def bn_p(c):
        return dict(
            gamma=1.0 + 0.1 * jax.random.normal(nk(), (c,), jnp.float32),
            beta=0.05 * jax.random.normal(nk(), (c,), jnp.float32),
            mean=0.1 * jax.random.normal(nk(), (c,), jnp.float32),
            var=0.9 + 0.2 * jax.random.uniform(nk(), (c,), jnp.float32),
        )

    def efr_p(channel_arg):
        k = eca_kernel_size(channel_arg)
        return dict(
            eca_w=0.2 * jax.random.normal(nk(), (k,), jnp.float32),
            sa_w=0.1 * jax.random.normal(nk(), (1, 2, 7, 7), jnp.float32),
            sa_b=0.05 * jax.random.normal(nk(), (1,), jnp.float32),
        )

    def pyconv_p(inplans, planes):
        return dict(
            w1=conv_w(planes // 4, inplans, 3),            # k=3, groups=1
            w2=conv_w(planes // 4, inplans // 4, 5),       # k=5, groups=4
            w3=conv_w(planes // 2, inplans // 8, 7),       # k=7, groups=8
            efr1=efr_p(64), efr2=efr_p(64), efr3=efr_p(128),
        )

    return dict(
        conv1=dict(w=conv_w(fm, in_ch1, 3), b=bias(fm), bn=bn_p(fm)),
        conv2=dict(w=conv_w(fm * 2, fm, 3), b=bias(fm * 2), bn=bn_p(fm * 2)),
        conv3=dict(py=pyconv_p(fm * 2, fm * 4), bn=bn_p(fm * 4)),
        conv4=dict(w=conv_w(fm, in_ch2, 3), b=bias(fm), bn=bn_p(fm)),
        conv5=dict(w=conv_w(fm * 2, fm, 3), b=bias(fm * 2), bn=bn_p(fm * 2)),
        conv6=dict(py=pyconv_p(fm * 2, fm * 4), bn=bn_p(fm * 4)),
    )


# ----------------------------------- main ------------------------------------

if __name__ == "__main__":
    FM = 32
    in_ch1, in_ch2 = 4, 2
    key = jax.random.PRNGKey(0)
    kp, k1, k2 = jax.random.split(key, 3)
    params = init_params(kp, in_ch1, in_ch2, FM)
    prep = prepare_params(params, fm=FM)

    x1 = jax.random.normal(k1, (2, in_ch1, 16, 16), jnp.float32)
    x2 = jax.random.normal(k2, (2, in_ch2, 16, 16), jnp.float32)

    out1, out2 = pycnn_forward(x1, x2, prep, fm=FM)
    jax.block_until_ready((out1, out2))

    # 16 -> 8 -> 4 -> 2 spatial; 4*FM = 128 channels; flatten -> 128*2*2 = 512
    assert out1.shape == (2, 4 * FM * 2 * 2), out1.shape
    assert out2.shape == (2, 4 * FM * 2 * 2), out2.shape
    assert bool(jnp.all(jnp.isfinite(out1))) and bool(jnp.all(jnp.isfinite(out2)))
    print("KERNEL_OK")
</pallas_src>

<mosaic_0001>
module attributes {stable_mosaic.version = 11 : i64} {
  func.func @_fused_chain_kernel(%arg0: i32, %arg1: memref<1x256x36xbf16, #tpu.memory_space<vmem>>, %arg2: memref<36x32xbf16, #tpu.memory_space<vmem>>, %arg3: memref<1x32xf32, #tpu.memory_space<vmem>>, %arg4: memref<1x32xf32, #tpu.memory_space<vmem>>, %arg5: memref<3x96x64xbf16, #tpu.memory_space<vmem>>, %arg6: memref<1x64xf32, #tpu.memory_space<vmem>>, %arg7: memref<1x64xf32, #tpu.memory_space<vmem>>, %arg8: memref<7x448x128xbf16, #tpu.memory_space<vmem>>, %arg9: memref<128x128xf32, #tpu.memory_space<vmem>>, %arg10: memref<3x16x32xf32, #tpu.memory_space<vmem>>, %arg11: memref<3x1x1xf32, #tpu.memory_space<vmem>>, %arg12: memref<1x128xf32, #tpu.memory_space<vmem>>, %arg13: memref<1x128xf32, #tpu.memory_space<vmem>>, %arg14: memref<1x4x128xf32, #tpu.memory_space<vmem>>, %arg15: memref<168x96xf32, #tpu.memory_space<vmem>>, %arg16: memref<168x448xf32, #tpu.memory_space<vmem>>, %arg17: memref<240x32xf32, #tpu.memory_space<vmem>>, %arg18: memref<112x64xf32, #tpu.memory_space<vmem>>, %arg19: memref<16x128xf32, #tpu.memory_space<vmem>>) attributes {dimension_semantics = [#tpu.dimension_semantics<parallel>], iteration_bounds = array<i64: 2>, scalar_prefetch = 0 : i64, scratch_operands = 5 : i64, tpu.core_type = #tpu.core_type<tc>, window_params = [{transform_indices = @transform_0, window_bounds = array<i64: 1, 256, 36>}, {pipeline_mode = #tpu.pipeline_mode<synchronous>, transform_indices = @transform_1, window_bounds = array<i64: 36, 32>}, {pipeline_mode = #tpu.pipeline_mode<synchronous>, transform_indices = @transform_2, window_bounds = array<i64: 1, 32>}, {pipeline_mode = #tpu.pipeline_mode<synchronous>, transform_indices = @transform_3, window_bounds = array<i64: 1, 32>}, {pipeline_mode = #tpu.pipeline_mode<synchronous>, transform_indices = @transform_4, window_bounds = array<i64: 3, 96, 64>}, {pipeline_mode = #tpu.pipeline_mode<synchronous>, transform_indices = @transform_5, window_bounds = array<i64: 1, 64>}, {pipeline_mode = #tpu.pipeline_mode<synchronous>, transform_indices = @transform_6, window_bounds = array<i64: 1, 64>}, {pipeline_mode = #tpu.pipeline_mode<synchronous>, transform_indices = @transform_7, window_bounds = array<i64: 7, 448, 128>}, {pipeline_mode = #tpu.pipeline_mode<synchronous>, transform_indices = @transform_8, window_bounds = array<i64: 128, 128>}, {pipeline_mode = #tpu.pipeline_mode<synchronous>, transform_indices = @transform_9, window_bounds = array<i64: 3, 16, 32>}, {pipeline_mode = #tpu.pipeline_mode<synchronous>, transform_indices = @transform_10, window_bounds = array<i64: 3, 1, 1>}, {pipeline_mode = #tpu.pipeline_mode<synchronous>, transform_indices = @transform_11, window_bounds = array<i64: 1, 128>}, {pipeline_mode = #tpu.pipeline_mode<synchronous>, transform_indices = @transform_12, window_bounds = array<i64: 1, 128>}, {transform_indices = @transform_13, window_bounds = array<i64: 1, 4, 128>}]} {
    %c0 = arith.constant 0 : index
    %c0_0 = arith.constant 0 : index
    %c0_1 = arith.constant 0 : index
    %0 = vector.load %arg1[%c0, %c0_0, %c0_1] : memref<1x256x36xbf16, #tpu.memory_space<vmem>>, vector<1x256x36xbf16>
    %1 = vector.shape_cast %0 : vector<1x256x36xbf16> to vector<256x36xbf16>
    %c0_2 = arith.constant 0 : index
    %c0_3 = arith.constant 0 : index
    %2 = vector.load %arg2[%c0_2, %c0_3] : memref<36x32xbf16, #tpu.memory_space<vmem>>, vector<36x32xbf16>
    %cst = arith.constant dense<0.000000e+00> : vector<256x32xf32>
    %3 = tpu.matmul %1, %2, %cst {dimension_numbers = #tpu.dot_dimension_numbers<[1], [0], [0], [1], [0, 0, 1, 1], [], []>} : vector<256x36xbf16>, vector<36x32xbf16>, vector<256x32xf32> -> vector<256x32xf32>
    %c0_4 = arith.constant 0 : index
    %c0_5 = arith.constant 0 : index
    %4 = vector.load %arg3[%c0_4, %c0_5] : memref<1x32xf32, #tpu.memory_space<vmem>>, vector<1x32xf32>
    %5 = vector.broadcast %4 : vector<1x32xf32> to vector<256x32xf32>
    %6 = arith.mulf %3, %5 : vector<256x32xf32>
    %c0_6 = arith.constant 0 : index
    %c0_7 = arith.constant 0 : index
    %7 = vector.load %arg4[%c0_6, %c0_7] : memref<1x32xf32, #tpu.memory_space<vmem>>, vector<1x32xf32>
    %8 = vector.broadcast %7 : vector<1x32xf32> to vector<256x32xf32>
    %9 = arith.addf %6, %8 : vector<256x32xf32>
    %cst_8 = arith.constant 0.000000e+00 : f32
    %10 = vector.broadcast %cst_8 : f32 to vector<256x32xf32>
    %11 = arith.cmpf oge, %9, %10 : vector<256x32xf32>
    %cst_9 = arith.constant 0.00999999977 : f32
    %12 = vector.broadcast %cst_9 : f32 to vector<256x32xf32>
    %13 = arith.mulf %12, %9 : vector<256x32xf32>
    %14 = arith.select %11, %9, %13 : vector<256x32xi1>, vector<256x32xf32>
    %15 = vector.extract_strided_slice %14 {offsets = [0, 0], sizes = [240, 32], strides = [1, 1]} : vector<256x32xf32> to vector<240x32xf32>
    %16 = vector.extract_strided_slice %14 {offsets = [16, 0], sizes = [240, 32], strides = [1, 1]} : vector<256x32xf32> to vector<240x32xf32>
    %17 = arith.maximumf %15, %16 : vector<240x32xf32>
    %18 = vector.extract_strided_slice %17 {offsets = [0, 0], sizes = [239, 32], strides = [1, 1]} : vector<240x32xf32> to vector<239x32xf32>
    %19 = vector.extract_strided_slice %17 {offsets = [1, 0], sizes = [239, 32], strides = [1, 1]} : vector<240x32xf32> to vector<239x32xf32>
    %20 = arith.maximumf %18, %19 : vector<239x32xf32>
    %c0_10 = arith.constant 0 : index
    %c0_11 = arith.constant 0 : index
    %21 = vector.load %arg17[%c0_10, %c0_11] : memref<240x32xf32, #tpu.memory_space<vmem>>, vector<239x32xf32>
    tpu.vector_store %arg17[%c0_10, %c0_11], %20 {strides = array<i32>} : memref<240x32xf32, #tpu.memory_space<vmem>>, vector<239x32xf32>,
    %cst_12 = arith.constant 0.000000e+00 : f32
    %22 = vector.broadcast %cst_12 : f32 to vector<168x96xf32>
    %c0_13 = arith.constant 0 : index
    %c0_14 = arith.constant 0 : index
    %23 = vector.load %arg15[%c0_13, %c0_14] : memref<168x96xf32, #tpu.memory_space<vmem>>, vector<168x96xf32>
    tpu.vector_store %arg15[%c0_13, %c0_14], %22 {strides = array<i32>} : memref<168x96xf32, #tpu.memory_space<vmem>>, vector<168x96xf32>,
    %c0_15 = arith.constant 0 : index
    %c0_16 = arith.constant 0 : index
    %24 = tpu.strided_load %arg17[%c0_15, %c0_16] {strides = array<i32: 2, 1>} : memref<240x32xf32, #tpu.memory_space<vmem>>, vector<8x32xf32>
    %c17 = arith.constant 17 : index
    %c0_17 = arith.constant 0 : index
    %25 = vector.load %arg15[%c17, %c0_17] : memref<168x96xf32, #tpu.memory_space<vmem>>, vector<8x32xf32>
    tpu.vector_store %arg15[%c17, %c0_17], %24 {strides = array<i32>} : memref<168x96xf32, #tpu.memory_space<vmem>>, vector<8x32xf32>,
    %c32 = arith.constant 32 : index
    %c0_18 = arith.constant 0 : index
    %26 = tpu.strided_load %arg17[%c32, %c0_18] {strides = array<i32: 2, 1>} : memref<240x32xf32, #tpu.memory_space<vmem>>, vector<8x32xf32>
    %c33 = arith.constant 33 : index
    %c0_19 = arith.constant 0 : index
    %27 = vector.load %arg15[%c33, %c0_19] : memref<168x96xf32, #tpu.memory_space<vmem>>, vector<8x32xf32>
    tpu.vector_store %arg15[%c33, %c0_19], %26 {strides = array<i32>} : memref<168x96xf32, #tpu.memory_space<vmem>>, vector<8x32xf32>,
    %c64 = arith.constant 64 : index
    %c0_20 = arith.constant 0 : index
    %28 = tpu.strided_load %arg17[%c64, %c0_20] {strides = array<i32: 2, 1>} : memref<240x32xf32, #tpu.memory_space<vmem>>, vector<8x32xf32>
    %c49 = arith.constant 49 : index
    %c0_21 = arith.constant 0 : index
    %29 = vector.load %arg15[%c49, %c0_21] : memref<168x96xf32, #tpu.memory_space<vmem>>, vector<8x32xf32>
    tpu.vector_store %arg15[%c49, %c0_21], %28 {strides = array<i32>} : memref<168x96xf32, #tpu.memory_space<vmem>>, vector<8x32xf32>,
    %c96 = arith.constant 96 : index
    %c0_22 = arith.constant 0 : index
    %30 = tpu.strided_load %arg17[%c96, %c0_22] {strides = array<i32: 2, 1>} : memref<240x32xf32, #tpu.memory_space<vmem>>, vector<8x32xf32>
    %c65 = arith.constant 65 : index
    %c0_23 = arith.constant 0 : index
    %31 = vector.load %arg15[%c65, %c0_23] : memref<168x96xf32, #tpu.memory_space<vmem>>, vector<8x32xf32>
    tpu.vector_store %arg15[%c65, %c0_23], %30 {strides = array<i32>} : memref<168x96xf32, #tpu.memory_space<vmem>>, vector<8x32xf32>,
    %c128 = arith.constant 128 : index
    %c0_24 = arith.constant 0 : index
    %32 = tpu.strided_load %arg17[%c128, %c0_24] {strides = array<i32: 2, 1>} : memref<240x32xf32, #tpu.memory_space<vmem>>, vector<8x32xf32>
    %c81 = arith.constant 81 : index
    %c0_25 = arith.constant 0 : index
    %33 = vector.load %arg15[%c81, %c0_25] : memref<168x96xf32, #tpu.memory_space<vmem>>, vector<8x32xf32>
    tpu.vector_store %arg15[%c81, %c0_25], %32 {strides = array<i32>} : memref<168x96xf32, #tpu.memory_space<vmem>>, vector<8x32xf32>,
    %c160 = arith.constant 160 : index
    %c0_26 = arith.constant 0 : index
    %34 = tpu.strided_load %arg17[%c160, %c0_26] {strides = array<i32: 2, 1>} : memref<240x32xf32, #tpu.memory_space<vmem>>, vector<8x32xf32>
    %c97 = arith.constant 97 : index
    %c0_27 = arith.constant 0 : index
    %35 = vector.load %arg15[%c97, %c0_27] : memref<168x96xf32, #tpu.memory_space<vmem>>, vector<8x32xf32>
    tpu.vector_store %arg15[%c97, %c0_27], %34 {strides = array<i32>} : memref<168x96xf32, #tpu.memory_space<vmem>>, vector<8x32xf32>,
    %c192 = arith.constant 192 : index
    %c0_28 = arith.constant 0 : index
    %36 = tpu.strided_load %arg17[%c192, %c0_28] {strides = array<i32: 2, 1>} : memref<240x32xf32, #tpu.memory_space<vmem>>, vector<8x32xf32>
    %c113 = arith.constant 113 : index
    %c0_29 = arith.constant 0 : index
    %37 = vector.load %arg15[%c113, %c0_29] : memref<168x96xf32, #tpu.memory_space<vmem>>, vector<8x32xf32>
    tpu.vector_store %arg15[%c113, %c0_29], %36 {strides = array<i32>} : memref<168x96xf32, #tpu.memory_space<vmem>>, vector<8x32xf32>,
    %c224 = arith.constant 224 : index
    %c0_30 = arith.constant 0 : index
    %38 = tpu.strided_load %arg17[%c224, %c0_30] {strides = array<i32: 2, 1>} : memref<240x32xf32, #tpu.memory_space<vmem>>, vector<8x32xf32>
    %c129 = arith.constant 129 : index
    %c0_31 = arith.constant 0 : index
    %39 = vector.load %arg15[%c129, %c0_31] : memref<168x96xf32, #tpu.memory_space<vmem>>, vector<8x32xf32>
    tpu.vector_store %arg15[%c129, %c0_31], %38 {strides = array<i32>} : memref<168x96xf32, #tpu.memory_space<vmem>>, vector<8x32xf32>,
    %c1 = arith.constant 1 : index
    %c0_32 = arith.constant 0 : index
    %40 = vector.load %arg15[%c1, %c0_32] : memref<168x96xf32, #tpu.memory_space<vmem>>, vector<160x32xf32>
    %c0_33 = arith.constant 0 : index
    %c32_34 = arith.constant 32 : index
    %41 = vector.load %arg15[%c0_33, %c32_34] : memref<168x96xf32, #tpu.memory_space<vmem>>, vector<160x32xf32>
    tpu.vector_store %arg15[%c0_33, %c32_34], %40 {strides = array<i32>} : memref<168x96xf32, #tpu.memory_space<vmem>>, vector<160x32xf32>,
    %c2 = arith.constant 2 : index
    %c0_35 = arith.constant 0 : index
    %42 = vector.load %arg15[%c2, %c0_35] : memref<168x96xf32, #tpu.memory_space<vmem>>, vector<160x32xf32>
    %c0_36 = arith.constant 0 : index
    %c64_37 = arith.constant 64 : index
    %43 = vector.load %arg15[%c0_36, %c64_37] : memref<168x96xf32, #tpu.memory_space<vmem>>, vector<160x32xf32>
    tpu.vector_store %arg15[%c0_36, %c64_37], %42 {strides = array<i32>} : memref<168x96xf32, #tpu.memory_space<vmem>>, vector<160x32xf32>,
    %c0_38 = arith.constant 0 : index
    %c0_39 = arith.constant 0 : index
    %44 = vector.load %arg15[%c0_38, %c0_39] : memref<168x96xf32, #tpu.memory_space<vmem>>, vector<168x96xf32>
    %45 = arith.truncf %44 : vector<168x96xf32> to vector<168x96xbf16>
    %cst_40 = arith.constant 0.000000e+00 : f32
    %46 = vector.broadcast %cst_40 : f32 to vector<128x64xf32>
    %47 = vector.extract_strided_slice %45 {offsets = [0, 0], sizes = [128, 96], strides = [1, 1]} : vector<168x96xbf16> to vector<128x96xbf16>
    %c0_41 = arith.constant 0 : index
    %c0_42 = arith.constant 0 : index
    %c0_43 = arith.constant 0 : index
    %48 = vector.load %arg5[%c0_41, %c0_42, %c0_43] : memref<3x96x64xbf16, #tpu.memory_space<vmem>>, vector<1x96x64xbf16>
    %49 = vector.shape_cast %48 : vector<1x96x64xbf16> to vector<96x64xbf16>
    %cst_44 = arith.constant dense<0.000000e+00> : vector<128x64xf32>
    %50 = tpu.matmul %47, %49, %cst_44 {dimension_numbers = #tpu.dot_dimension_numbers<[1], [0], [0], [1], [0, 0, 1, 1], [], []>} : vector<128x96xbf16>, vector<96x64xbf16>, vector<128x64xf32> -> vector<128x64xf32>
    %51 = arith.addf %46, %50 : vector<128x64xf32>
    %52 = vector.extract_strided_slice %45 {offsets = [16, 0], sizes = [128, 96], strides = [1, 1]} : vector<168x96xbf16> to vector<128x96xbf16>
    %c1_45 = arith.constant 1 : index
    %c0_46 = arith.constant 0 : index
    %c0_47 = arith.constant 0 : index
    %53 = vector.load %arg5[%c1_45, %c0_46, %c0_47] : memref<3x96x64xbf16, #tpu.memory_space<vmem>>, vector<1x96x64xbf16>
    %54 = vector.shape_cast %53 : vector<1x96x64xbf16> to vector<96x64xbf16>
    %cst_48 = arith.constant dense<0.000000e+00> : vector<128x64xf32>
    %55 = tpu.matmul %52, %54, %cst_48 {dimension_numbers = #tpu.dot_dimension_numbers<[1], [0], [0], [1], [0, 0, 1, 1], [], []>} : vector<128x96xbf16>, vector<96x64xbf16>, vector<128x64xf32> -> vector<128x64xf32>
    %56 = arith.addf %51, %55 : vector<128x64xf32>
    %57 = vector.extract_strided_slice %45 {offsets = [32, 0], sizes = [128, 96], strides = [1, 1]} : vector<168x96xbf16> to vector<128x96xbf16>
    %c2_49 = arith.constant 2 : index
    %c0_50 = arith.constant 0 : index
    %c0_51 = arith.constant 0 : index
    %58 = vector.load %arg5[%c2_49, %c0_50, %c0_51] : memref<3x96x64xbf16, #tpu.memory_space<vmem>>, vector<1x96x64xbf16>
    %59 = vector.shape_cast %58 : vector<1x96x64xbf16> to vector<96x64xbf16>
    %cst_52 = arith.constant dense<0.000000e+00> : vector<128x64xf32>
    %60 = tpu.matmul %57, %59, %cst_52 {dimension_numbers = #tpu.dot_dimension_numbers<[1], [0], [0], [1], [0, 0, 1, 1], [], []>} : vector<128x96xbf16>, vector<96x64xbf16>, vector<128x64xf32> -> vector<128x64xf32>
    %61 = arith.addf %56, %60 : vector<128x64xf32>
    %c0_53 = arith.constant 0 : index
    %c0_54 = arith.constant 0 : index
    %62 = vector.load %arg6[%c0_53, %c0_54] : memref<1x64xf32, #tpu.memory_space<vmem>>, vector<1x64xf32>
    %63 = vector.broadcast %62 : vector<1x64xf32> to vector<128x64xf32>
    %64 = arith.mulf %61, %63 : vector<128x64xf32>
    %c0_55 = arith.constant 0 : index
    %c0_56 = arith.constant 0 : index
    %65 = vector.load %arg7[%c0_55, %c0_56] : memref<1x64xf32, #tpu.memory_space<vmem>>, vector<1x64xf32>
    %66 = vector.broadcast %65 : vector<1x64xf32> to vector<128x64xf32>
    %67 = arith.addf %64, %66 : vector<128x64xf32>
    %cst_57 = arith.constant 0.000000e+00 : f32
    %68 = vector.broadcast %cst_57 : f32 to vector<128x64xf32>
    %69 = arith.cmpf oge, %67, %68 : vector<128x64xf32>
    %cst_58 = arith.constant 0.00999999977 : f32
    %70 = vector.broadcast %cst_58 : f32 to vector<128x64xf32>
    %71 = arith.mulf %70, %67 : vector<128x64xf32>
    %72 = arith.select %69, %67, %71 : vector<128x64xi1>, vector<128x64xf32>
    %73 = vector.extract_strided_slice %72 {offsets = [0, 0], sizes = [112, 64], strides = [1, 1]} : vector<128x64xf32> to vector<112x64xf32>
    %74 = vector.extract_strided_slice %72 {offsets = [16, 0], sizes = [112, 64], strides = [1, 1]} : vector<128x64xf32> to vector<112x64xf32>
    %75 = arith.maximumf %73, %74 : vector<112x64xf32>
    %76 = vector.extract_strided_slice %75 {offsets = [0, 0], sizes = [111, 64], strides = [1, 1]} : vector<112x64xf32> to vector<111x64xf32>
    %77 = vector.extract_strided_slice %75 {offsets = [1, 0], sizes = [111, 64], strides = [1, 1]} : vector<112x64xf32> to vector<111x64xf32>
    %78 = arith.maximumf %76, %77 : vector<111x64xf32>
    %c0_59 = arith.constant 0 : index
    %c0_60 = arith.constant 0 : index
    %79 = vector.load %arg18[%c0_59, %c0_60] : memref<112x64xf32, #tpu.memory_space<vmem>>, vector<111x64xf32>
    tpu.vector_store %arg18[%c0_59, %c0_60], %78 {strides = array<i32>} : memref<112x64xf32, #tpu.memory_space<vmem>>, vector<111x64xf32>,
    %cst_61 = arith.constant 0.000000e+00 : f32
    %80 = vector.broadcast %cst_61 : f32 to vector<168x448xf32>
    %c0_62 = arith.constant 0 : index
    %c0_63 = arith.constant 0 : index
    %81 = vector.load %arg16[%c0_62, %c0_63] : memref<168x448xf32, #tpu.memory_space<vmem>>, vector<168x448xf32>
    tpu.vector_store %arg16[%c0_62, %c0_63], %80 {strides = array<i32>} : memref<168x448xf32, #tpu.memory_space<vmem>>, vector<168x448xf32>,
    %c0_64 = arith.constant 0 : index
    %c0_65 = arith.constant 0 : index
    %82 = tpu.strided_load %arg18[%c0_64, %c0_65] {strides = array<i32: 2, 1>} : memref<112x64xf32, #tpu.memory_space<vmem>>, vector<4x64xf32>
    %c51 = arith.constant 51 : index
    %c0_66 = arith.constant 0 : index
    %83 = vector.load %arg16[%c51, %c0_66] : memref<168x448xf32, #tpu.memory_space<vmem>>, vector<4x64xf32>
    tpu.vector_store %arg16[%c51, %c0_66], %82 {strides = array<i32>} : memref<168x448xf32, #tpu.memory_space<vmem>>, vector<4x64xf32>,
    %c32_67 = arith.constant 32 : index
    %c0_68 = arith.constant 0 : index
    %84 = tpu.strided_load %arg18[%c32_67, %c0_68] {strides = array<i32: 2, 1>} : memref<112x64xf32, #tpu.memory_space<vmem>>, vector<4x64xf32>
    %c67 = arith.constant 67 : index
    %c0_69 = arith.constant 0 : index
    %85 = vector.load %arg16[%c67, %c0_69] : memref<168x448xf32, #tpu.memory_space<vmem>>, vector<4x64xf32>
    tpu.vector_store %arg16[%c67, %c0_69], %84 {strides = array<i32>} : memref<168x448xf32, #tpu.memory_space<vmem>>, vector<4x64xf32>,
    %c64_70 = arith.constant 64 : index
    %c0_71 = arith.constant 0 : index
    %86 = tpu.strided_load %arg18[%c64_70, %c0_71] {strides = array<i32: 2, 1>} : memref<112x64xf32, #tpu.memory_space<vmem>>, vector<4x64xf32>
    %c83 = arith.constant 83 : index
    %c0_72 = arith.constant 0 : index
    %87 = vector.load %arg16[%c83, %c0_72] : memref<168x448xf32, #tpu.memory_space<vmem>>, vector<4x64xf32>
    tpu.vector_store %arg16[%c83, %c0_72], %86 {strides = array<i32>} : memref<168x448xf32, #tpu.memory_space<vmem>>, vector<4x64xf32>,
    %c96_73 = arith.constant 96 : index
    %c0_74 = arith.constant 0 : index
    %88 = tpu.strided_load %arg18[%c96_73, %c0_74] {strides = array<i32: 2, 1>} : memref<112x64xf32, #tpu.memory_space<vmem>>, vector<4x64xf32>
    %c99 = arith.constant 99 : index
    %c0_75 = arith.constant 0 : index
    %89 = vector.load %arg16[%c99, %c0_75] : memref<168x448xf32, #tpu.memory_space<vmem>>, vector<4x64xf32>
    tpu.vector_store %arg16[%c99, %c0_75], %88 {strides = array<i32>} : memref<168x448xf32, #tpu.memory_space<vmem>>, vector<4x64xf32>,
    %c1_76 = arith.constant 1 : index
    %c0_77 = arith.constant 0 : index
    %90 = vector.load %arg16[%c1_76, %c0_77] : memref<168x448xf32, #tpu.memory_space<vmem>>, vector<160x64xf32>
    %c0_78 = arith.constant 0 : index
    %c64_79 = arith.constant 64 : index
    %91 = vector.load %arg16[%c0_78, %c64_79] : memref<168x448xf32, #tpu.memory_space<vmem>>, vector<160x64xf32>
    tpu.vector_store %arg16[%c0_78, %c64_79], %90 {strides = array<i32>} : memref<168x448xf32, #tpu.memory_space<vmem>>, vector<160x64xf32>,
    %c2_80 = arith.constant 2 : index
    %c0_81 = arith.constant 0 : index
    %92 = vector.load %arg16[%c2_80, %c0_81] : memref<168x448xf32, #tpu.memory_space<vmem>>, vector<160x64xf32>
    %c0_82 = arith.constant 0 : index
    %c128_83 = arith.constant 128 : index
    %93 = vector.load %arg16[%c0_82, %c128_83] : memref<168x448xf32, #tpu.memory_space<vmem>>, vector<160x64xf32>
    tpu.vector_store %arg16[%c0_82, %c128_83], %92 {strides = array<i32>} : memref<168x448xf32, #tpu.memory_space<vmem>>, vector<160x64xf32>,
    %c3 = arith.constant 3 : index
    %c0_84 = arith.constant 0 : index
    %94 = vector.load %arg16[%c3, %c0_84] : memref<168x448xf32, #tpu.memory_space<vmem>>, vector<160x64xf32>
    %c0_85 = arith.constant 0 : index
    %c192_86 = arith.constant 192 : index
    %95 = vector.load %arg16[%c0_85, %c192_86] : memref<168x448xf32, #tpu.memory_space<vmem>>, vector<160x64xf32>
    tpu.vector_store %arg16[%c0_85, %c192_86], %94 {strides = array<i32>} : memref<168x448xf32, #tpu.memory_space<vmem>>, vector<160x64xf32>,
    %c4 = arith.constant 4 : index
    %c0_87 = arith.constant 0 : index
    %96 = vector.load %arg16[%c4, %c0_87] : memref<168x448xf32, #tpu.memory_space<vmem>>, vector<160x64xf32>
    %c0_88 = arith.constant 0 : index
    %c256 = arith.constant 256 : index
    %97 = vector.load %arg16[%c0_88, %c256] : memref<168x448xf32, #tpu.memory_space<vmem>>, vector<160x64xf32>
    tpu.vector_store %arg16[%c0_88, %c256], %96 {strides = array<i32>} : memref<168x448xf32, #tpu.memory_space<vmem>>, vector<160x64xf32>,
    %c5 = arith.constant 5 : index
    %c0_89 = arith.constant 0 : index
    %98 = vector.load %arg16[%c5, %c0_89] : memref<168x448xf32, #tpu.memory_space<vmem>>, vector<160x64xf32>
    %c0_90 = arith.constant 0 : index
    %c320 = arith.constant 320 : index
    %99 = vector.load %arg16[%c0_90, %c320] : memref<168x448xf32, #tpu.memory_space<vmem>>, vector<160x64xf32>
    tpu.vector_store %arg16[%c0_90, %c320], %98 {strides = array<i32>} : memref<168x448xf32, #tpu.memory_space<vmem>>, vector<160x64xf32>,
    %c6 = arith.constant 6 : index
    %c0_91 = arith.constant 0 : index
    %100 = vector.load %arg16[%c6, %c0_91] : memref<168x448xf32, #tpu.memory_space<vmem>>, vector<160x64xf32>
    %c0_92 = arith.constant 0 : index
    %c384 = arith.constant 384 : index
    %101 = vector.load %arg16[%c0_92, %c384] : memref<168x448xf32, #tpu.memory_space<vmem>>, vector<160x64xf32>
    tpu.vector_store %arg16[%c0_92, %c384], %100 {strides = array<i32>} : memref<168x448xf32, #tpu.memory_space<vmem>>, vector<160x64xf32>,
    %c0_93 = arith.constant 0 : index
    %c0_94 = arith.constant 0 : index
    %102 = vector.load %arg16[%c0_93, %c0_94] : memref<168x448xf32, #tpu.memory_space<vmem>>, vector<168x448xf32>
    %103 = arith.truncf %102 : vector<168x448xf32> to vector<168x448xbf16>
    %cst_95 = arith.constant 0.000000e+00 : f32
    %104 = vector.broadcast %cst_95 : f32 to vector<64x128xf32>
    %105 = vector.extract_strided_slice %103 {offsets = [0, 0], sizes = [64, 448], strides = [1, 1]} : vector<168x448xbf16> to vector<64x448xbf16>
    %c0_96 = arith.constant 0 : index
    %c0_97 = arith.constant 0 : index
    %c0_98 = arith.constant 0 : index
    %106 = vector.load %arg8[%c0_96, %c0_97, %c0_98] : memref<7x448x128xbf16, #tpu.memory_space<vmem>>, vector<1x448x128xbf16>
    %107 = vector.shape_cast %106 : vector<1x448x128xbf16> to vector<448x128xbf16>
    %cst_99 = arith.constant dense<0.000000e+00> : vector<64x128xf32>
    %108 = tpu.matmul %105, %107, %cst_99 {dimension_numbers = #tpu.dot_dimension_numbers<[1], [0], [0], [1], [0, 0, 1, 1], [], []>} : vector<64x448xbf16>, vector<448x128xbf16>, vector<64x128xf32> -> vector<64x128xf32>
    %109 = arith.addf %104, %108 : vector<64x128xf32>
    %110 = vector.extract_strided_slice %103 {offsets = [16, 0], sizes = [64, 448], strides = [1, 1]} : vector<168x448xbf16> to vector<64x448xbf16>
    %c1_100 = arith.constant 1 : index
    %c0_101 = arith.constant 0 : index
    %c0_102 = arith.constant 0 : index
    %111 = vector.load %arg8[%c1_100, %c0_101, %c0_102] : memref<7x448x128xbf16, #tpu.memory_space<vmem>>, vector<1x448x128xbf16>
    %112 = vector.shape_cast %111 : vector<1x448x128xbf16> to vector<448x128xbf16>
    %cst_103 = arith.constant dense<0.000000e+00> : vector<64x128xf32>
    %113 = tpu.matmul %110, %112, %cst_103 {dimension_numbers = #tpu.dot_dimension_numbers<[1], [0], [0], [1], [0, 0, 1, 1], [], []>} : vector<64x448xbf16>, vector<448x128xbf16>, vector<64x128xf32> -> vector<64x128xf32>
    %114 = arith.addf %109, %113 : vector<64x128xf32>
    %115 = vector.extract_strided_slice %103 {offsets = [32, 0], sizes = [64, 448], strides = [1, 1]} : vector<168x448xbf16> to vector<64x448xbf16>
    %c2_104 = arith.constant 2 : index
    %c0_105 = arith.constant 0 : index
    %c0_106 = arith.constant 0 : index
    %116 = vector.load %arg8[%c2_104, %c0_105, %c0_106] : memref<7x448x128xbf16, #tpu.memory_space<vmem>>, vector<1x448x128xbf16>
    %117 = vector.shape_cast %116 : vector<1x448x128xbf16> to vector<448x128xbf16>
    %cst_107 = arith.constant dense<0.000000e+00> : vector<64x128xf32>
    %118 = tpu.matmul %115, %117, %cst_107 {dimension_numbers = #tpu.dot_dimension_numbers<[1], [0], [0], [1], [0, 0, 1, 1], [], []>} : vector<64x448xbf16>, vector<448x128xbf16>, vector<64x128xf32> -> vector<64x128xf32>
    %119 = arith.addf %114, %118 : vector<64x128xf32>
    %120 = vector.extract_strided_slice %103 {offsets = [48, 0], sizes = [64, 448], strides = [1, 1]} : vector<168x448xbf16> to vector<64x448xbf16>
    %c3_108 = arith.constant 3 : index
    %c0_109 = arith.constant 0 : index
    %c0_110 = arith.constant 0 : index
    %121 = vector.load %arg8[%c3_108, %c0_109, %c0_110] : memref<7x448x128xbf16, #tpu.memory_space<vmem>>, vector<1x448x128xbf16>
    %122 = vector.shape_cast %121 : vector<1x448x128xbf16> to vector<448x128xbf16>
    %cst_111 = arith.constant dense<0.000000e+00> : vector<64x128xf32>
    %123 = tpu.matmul %120, %122, %cst_111 {dimension_numbers = #tpu.dot_dimension_numbers<[1], [0], [0], [1], [0, 0, 1, 1], [], []>} : vector<64x448xbf16>, vector<448x128xbf16>, vector<64x128xf32> -> vector<64x128xf32>
    %124 = arith.addf %119, %123 : vector<64x128xf32>
    %125 = vector.extract_strided_slice %103 {offsets = [64, 0], sizes = [64, 448], strides = [1, 1]} : vector<168x448xbf16> to vector<64x448xbf16>
    %c4_112 = arith.constant 4 : index
    %c0_113 = arith.constant 0 : index
    %c0_114 = arith.constant 0 : index
    %126 = vector.load %arg8[%c4_112, %c0_113, %c0_114] : memref<7x448x128xbf16, #tpu.memory_space<vmem>>, vector<1x448x128xbf16>
    %127 = vector.shape_cast %126 : vector<1x448x128xbf16> to vector<448x128xbf16>
    %cst_115 = arith.constant dense<0.000000e+00> : vector<64x128xf32>
    %128 = tpu.matmul %125, %127, %cst_115 {dimension_numbers = #tpu.dot_dimension_numbers<[1], [0], [0], [1], [0, 0, 1, 1], [], []>} : vector<64x448xbf16>, vector<448x128xbf16>, vector<64x128xf32> -> vector<64x128xf32>
    %129 = arith.addf %124, %128 : vector<64x128xf32>
    %130 = vector.extract_strided_slice %103 {offsets = [80, 0], sizes = [64, 448], strides = [1, 1]} : vector<168x448xbf16> to vector<64x448xbf16>
    %c5_116 = arith.constant 5 : index
    %c0_117 = arith.constant 0 : index
    %c0_118 = arith.constant 0 : index
    %131 = vector.load %arg8[%c5_116, %c0_117, %c0_118] : memref<7x448x128xbf16, #tpu.memory_space<vmem>>, vector<1x448x128xbf16>
    %132 = vector.shape_cast %131 : vector<1x448x128xbf16> to vector<448x128xbf16>
    %cst_119 = arith.constant dense<0.000000e+00> : vector<64x128xf32>
    %133 = tpu.matmul %130, %132, %cst_119 {dimension_numbers = #tpu.dot_dimension_numbers<[1], [0], [0], [1], [0, 0, 1, 1], [], []>} : vector<64x448xbf16>, vector<448x128xbf16>, vector<64x128xf32> -> vector<64x128xf32>
    %134 = arith.addf %129, %133 : vector<64x128xf32>
    %135 = vector.extract_strided_slice %103 {offsets = [96, 0], sizes = [64, 448], strides = [1, 1]} : vector<168x448xbf16> to vector<64x448xbf16>
    %c6_120 = arith.constant 6 : index
    %c0_121 = arith.constant 0 : index
    %c0_122 = arith.constant 0 : index
    %136 = vector.load %arg8[%c6_120, %c0_121, %c0_122] : memref<7x448x128xbf16, #tpu.memory_space<vmem>>, vector<1x448x128xbf16>
    %137 = vector.shape_cast %136 : vector<1x448x128xbf16> to vector<448x128xbf16>
    %cst_123 = arith.constant dense<0.000000e+00> : vector<64x128xf32>
    %138 = tpu.matmul %135, %137, %cst_123 {dimension_numbers = #tpu.dot_dimension_numbers<[1], [0], [0], [1], [0, 0, 1, 1], [], []>} : vector<64x448xbf16>, vector<448x128xbf16>, vector<64x128xf32> -> vector<64x128xf32>
    %139 = arith.addf %134, %138 : vector<64x128xf32>
    %140 = vector.extract_strided_slice %139 {offsets = [0, 0], sizes = [4, 128], strides = [1, 1]} : vector<64x128xf32> to vector<4x128xf32>
    %141 = vector.extract_strided_slice %139 {offsets = [16, 0], sizes = [4, 128], strides = [1, 1]} : vector<64x128xf32> to vector<4x128xf32>
    %142 = vector.extract_strided_slice %139 {offsets = [32, 0], sizes = [4, 128], strides = [1, 1]} : vector<64x128xf32> to vector<4x128xf32>
    %143 = vector.extract_strided_slice %139 {offsets = [48, 0], sizes = [4, 128], strides = [1, 1]} : vector<64x128xf32> to vector<4x128xf32>
    %144 = tpu.concatenate %140, %141, %142, %143 in 0 : vector<4x128xf32>, vector<4x128xf32>, vector<4x128xf32>, vector<4x128xf32> -> vector<16x128xf32>
    %cst_124 = arith.constant dense<0.000000e+00> : vector<128xf32>
    %145 = vector.multi_reduction <add>, %144, %cst_124 [0] : vector<16x128xf32> to vector<128xf32>
    %146 = vector.shape_cast %145 : vector<128xf32> to vector<1x128xf32>
    %cst_125 = arith.constant 1.600000e+01 : f32
    %147 = vector.broadcast %cst_125 : f32 to vector<1x128xf32>
    %148 = arith.divf %146, %147 : vector<1x128xf32>
    %cst_126 = arith.constant dense<0xFF800000> : vector<128xf32>
    %149 = vector.multi_reduction <maximumf>, %144, %cst_126 [0] : vector<16x128xf32> to vector<128xf32>
    %150 = vector.shape_cast %149 : vector<128xf32> to vector<1x128xf32>
    %151 = arith.addf %148, %150 : vector<1x128xf32>
    %c0_127 = arith.constant 0 : index
    %c0_128 = arith.constant 0 : index
    %152 = vector.load %arg9[%c0_127, %c0_128] : memref<128x128xf32, #tpu.memory_space<vmem>>, vector<128x128xf32>
    %cst_129 = arith.constant dense<0.000000e+00> : vector<1x128xf32>
    %153 = tpu.matmul %151, %152, %cst_129 {dimension_numbers = #tpu.dot_dimension_numbers<[1], [0], [0], [1], [0, 0, 1, 1], [], []>} : vector<1x128xf32>, vector<128x128xf32>, vector<1x128xf32> -> vector<1x128xf32>
    %154 = arith.negf %153 : vector<1x128xf32>
    %155 = math.exp %154 : vector<1x128xf32>
    %cst_130 = arith.constant 1.000000e+00 : f32
    %156 = vector.broadcast %cst_130 : f32 to vector<1x128xf32>
    %157 = arith.addf %156, %155 : vector<1x128xf32>
    %158 = arith.divf %156, %157 : vector<1x128xf32>
    %159 = vector.broadcast %158 : vector<1x128xf32> to vector<16x128xf32>
    %160 = arith.mulf %144, %159 : vector<16x128xf32>
    %161 = tpu.iota {dimensions = array<i32: 1>} : vector<16x128xi32>
    %c0_i32 = arith.constant 0 : i32
    %162 = vector.broadcast %c0_i32 : i32 to vector<16x128xi32>
    %163 = arith.cmpi sge, %161, %162 : vector<16x128xi32>
    %c32_i32 = arith.constant 32 : i32
    %164 = vector.broadcast %c32_i32 : i32 to vector<16x128xi32>
    %165 = arith.cmpi slt, %161, %164 : vector<16x128xi32>
    %166 = arith.andi %163, %165 : vector<16x128xi1>
    %cst_131 = arith.constant 0.000000e+00 : f32
    %167 = vector.broadcast %cst_131 : f32 to vector<16x128xf32>
    %168 = arith.select %166, %160, %167 : vector<16x128xi1>, vector<16x128xf32>
    %cst_132 = arith.constant dense<0.000000e+00> : vector<16xf32>
    %169 = vector.multi_reduction <add>, %168, %cst_132 [1] : vector<16x128xf32> to vector<16xf32>
    %170 = vector.shape_cast %169 : vector<16xf32> to vector<16x1xf32>
    %cst_133 = arith.constant 3.125000e-02 : f32
    %171 = vector.broadcast %cst_133 : f32 to vector<16x1xf32>
    %172 = arith.mulf %170, %171 : vector<16x1xf32>
    %cst_134 = arith.constant -3.000000e+38 : f32
    %173 = vector.broadcast %cst_134 : f32 to vector<16x128xf32>
    %174 = arith.select %166, %160, %173 : vector<16x128xi1>, vector<16x128xf32>
    %cst_135 = arith.constant dense<0xFF800000> : vector<16xf32>
    %175 = vector.multi_reduction <maximumf>, %174, %cst_135 [1] : vector<16x128xf32> to vector<16xf32>
    %176 = vector.shape_cast %175 : vector<16xf32> to vector<16x1xf32>
    %177 = tpu.concatenate %172, %176 in 0 : vector<16x1xf32>, vector<16x1xf32> -> vector<32x1xf32>
    %c0_136 = arith.constant 0 : index
    %c0_137 = arith.constant 0 : index
    %c0_138 = arith.constant 0 : index
    %178 = vector.load %arg10[%c0_136, %c0_137, %c0_138] : memref<3x16x32xf32, #tpu.memory_space<vmem>>, vector<1x16x32xf32>
    %179 = vector.shape_cast %178 : vector<1x16x32xf32> to vector<16x32xf32>
    %cst_139 = arith.constant dense<0.000000e+00> : vector<16x1xf32>
    %180 = tpu.matmul %179, %177, %cst_139 {dimension_numbers = #tpu.dot_dimension_numbers<[1], [0], [0], [1], [0, 0, 1, 1], [], []>} : vector<16x32xf32>, vector<32x1xf32>, vector<16x1xf32> -> vector<16x1xf32>
    %c0_140 = arith.constant 0 : index
    %c0_141 = arith.constant 0 : index
    %c0_142 = arith.constant 0 : index
    %181 = vector.load %arg11[%c0_140, %c0_141, %c0_142] : memref<3x1x1xf32, #tpu.memory_space<vmem>>, vector<1x1x1xf32>
    %182 = vector.shape_cast %181 : vector<1x1x1xf32> to vector<1x1xf32>
    %183 = vector.broadcast %182 : vector<1x1xf32> to vector<16x1xf32>
    %184 = arith.addf %180, %183 : vector<16x1xf32>
    %185 = arith.negf %184 : vector<16x1xf32>
    %186 = math.exp %185 : vector<16x1xf32>
    %cst_143 = arith.constant 1.000000e+00 : f32
    %187 = vector.broadcast %cst_143 : f32 to vector<16x1xf32>
    %188 = arith.addf %187, %186 : vector<16x1xf32>
    %189 = arith.divf %187, %188 : vector<16x1xf32>
    %cst_144 = arith.constant 2.000000e-01 : f32
    %190 = vector.broadcast %cst_144 : f32 to vector<16x1xf32>
    %191 = arith.cmpf oge, %189, %190 : vector<16x1xf32>
    %cst_145 = arith.constant 0.000000e+00 : f32
    %192 = vector.broadcast %cst_145 : f32 to vector<16x1xf32>
    %193 = arith.select %191, %189, %192 : vector<16x1xi1>, vector<16x1xf32>
    %c32_i32_146 = arith.constant 32 : i32
    %194 = vector.broadcast %c32_i32_146 : i32 to vector<16x128xi32>
    %195 = arith.cmpi sge, %161, %194 : vector<16x128xi32>
    %c64_i32 = arith.constant 64 : i32
    %196 = vector.broadcast %c64_i32 : i32 to vector<16x128xi32>
    %197 = arith.cmpi slt, %161, %196 : vector<16x128xi32>
    %198 = arith.andi %195, %197 : vector<16x128xi1>
    %cst_147 = arith.constant 0.000000e+00 : f32
    %199 = vector.broadcast %cst_147 : f32 to vector<16x128xf32>
    %200 = arith.select %198, %160, %199 : vector<16x128xi1>, vector<16x128xf32>
    %cst_148 = arith.constant dense<0.000000e+00> : vector<16xf32>
    %201 = vector.multi_reduction <add>, %200, %cst_148 [1] : vector<16x128xf32> to vector<16xf32>
    %202 = vector.shape_cast %201 : vector<16xf32> to vector<16x1xf32>
    %cst_149 = arith.constant 3.125000e-02 : f32
    %203 = vector.broadcast %cst_149 : f32 to vector<16x1xf32>
    %204 = arith.mulf %202, %203 : vector<16x1xf32>
    %cst_150 = arith.constant -3.000000e+38 : f32
    %205 = vector.broadcast %cst_150 : f32 to vector<16x128xf32>
    %206 = arith.select %198, %160, %205 : vector<16x128xi1>, vector<16x128xf32>
    %cst_151 = arith.constant dense<0xFF800000> : vector<16xf32>
    %207 = vector.multi_reduction <maximumf>, %206, %cst_151 [1] : vector<16x128xf32> to vector<16xf32>
    %208 = vector.shape_cast %207 : vector<16xf32> to vector<16x1xf32>
    %209 = tpu.concatenate %204, %208 in 0 : vector<16x1xf32>, vector<16x1xf32> -> vector<32x1xf32>
    %c1_152 = arith.constant 1 : index
    %c0_153 = arith.constant 0 : index
    %c0_154 = arith.constant 0 : index
    %210 = vector.load %arg10[%c1_152, %c0_153, %c0_154] : memref<3x16x32xf32, #tpu.memory_space<vmem>>, vector<1x16x32xf32>
    %211 = vector.shape_cast %210 : vector<1x16x32xf32> to vector<16x32xf32>
    %cst_155 = arith.constant dense<0.000000e+00> : vector<16x1xf32>
    %212 = tpu.matmul %211, %209, %cst_155 {dimension_numbers = #tpu.dot_dimension_numbers<[1], [0], [0], [1], [0, 0, 1, 1], [], []>} : vector<16x32xf32>, vector<32x1xf32>, vector<16x1xf32> -> vector<16x1xf32>
    %c1_156 = arith.constant 1 : index
    %c0_157 = arith.constant 0 : index
    %c0_158 = arith.constant 0 : index
    %213 = vector.load %arg11[%c1_156, %c0_157, %c0_158] : memref<3x1x1xf32, #tpu.memory_space<vmem>>, vector<1x1x1xf32>
    %214 = vector.shape_cast %213 : vector<1x1x1xf32> to vector<1x1xf32>
    %215 = vector.broadcast %214 : vector<1x1xf32> to vector<16x1xf32>
    %216 = arith.addf %212, %215 : vector<16x1xf32>
    %217 = arith.negf %216 : vector<16x1xf32>
    %218 = math.exp %217 : vector<16x1xf32>
    %cst_159 = arith.constant 1.000000e+00 : f32
    %219 = vector.broadcast %cst_159 : f32 to vector<16x1xf32>
    %220 = arith.addf %219, %218 : vector<16x1xf32>
    %221 = arith.divf %219, %220 : vector<16x1xf32>
    %cst_160 = arith.constant 2.000000e-01 : f32
    %222 = vector.broadcast %cst_160 : f32 to vector<16x1xf32>
    %223 = arith.cmpf oge, %221, %222 : vector<16x1xf32>
    %cst_161 = arith.constant 0.000000e+00 : f32
    %224 = vector.broadcast %cst_161 : f32 to vector<16x1xf32>
    %225 = arith.select %223, %221, %224 : vector<16x1xi1>, vector<16x1xf32>
    %c64_i32_162 = arith.constant 64 : i32
    %226 = vector.broadcast %c64_i32_162 : i32 to vector<16x128xi32>
    %227 = arith.cmpi sge, %161, %226 : vector<16x128xi32>
    %c128_i32 = arith.constant 128 : i32
    %228 = vector.broadcast %c128_i32 : i32 to vector<16x128xi32>
    %229 = arith.cmpi slt, %161, %228 : vector<16x128xi32>
    %230 = arith.andi %227, %229 : vector<16x128xi1>
    %cst_163 = arith.constant 0.000000e+00 : f32
    %231 = vector.broadcast %cst_163 : f32 to vector<16x128xf32>
    %232 = arith.select %230, %160, %231 : vector<16x128xi1>, vector<16x128xf32>
    %cst_164 = arith.constant dense<0.000000e+00> : vector<16xf32>
    %233 = vector.multi_reduction <add>, %232, %cst_164 [1] : vector<16x128xf32> to vector<16xf32>
    %234 = vector.shape_cast %233 : vector<16xf32> to vector<16x1xf32>
    %cst_165 = arith.constant 1.562500e-02 : f32
    %235 = vector.broadcast %cst_165 : f32 to vector<16x1xf32>
    %236 = arith.mulf %234, %235 : vector<16x1xf32>
    %cst_166 = arith.constant -3.000000e+38 : f32
    %237 = vector.broadcast %cst_166 : f32 to vector<16x128xf32>
    %238 = arith.select %230, %160, %237 : vector<16x128xi1>, vector<16x128xf32>
    %cst_167 = arith.constant dense<0xFF800000> : vector<16xf32>
    %239 = vector.multi_reduction <maximumf>, %238, %cst_167 [1] : vector<16x128xf32> to vector<16xf32>
    %240 = vector.shape_cast %239 : vector<16xf32> to vector<16x1xf32>
    %241 = tpu.concatenate %236, %240 in 0 : vector<16x1xf32>, vector<16x1xf32> -> vector<32x1xf32>
    %c2_168 = arith.constant 2 : index
    %c0_169 = arith.constant 0 : index
    %c0_170 = arith.constant 0 : index
    %242 = vector.load %arg10[%c2_168, %c0_169, %c0_170] : memref<3x16x32xf32, #tpu.memory_space<vmem>>, vector<1x16x32xf32>
    %243 = vector.shape_cast %242 : vector<1x16x32xf32> to vector<16x32xf32>
    %cst_171 = arith.constant dense<0.000000e+00> : vector<16x1xf32>
    %244 = tpu.matmul %243, %241, %cst_171 {dimension_numbers = #tpu.dot_dimension_numbers<[1], [0], [0], [1], [0, 0, 1, 1], [], []>} : vector<16x32xf32>, vector<32x1xf32>, vector<16x1xf32> -> vector<16x1xf32>
    %c2_172 = arith.constant 2 : index
    %c0_173 = arith.constant 0 : index
    %c0_174 = arith.constant 0 : index
    %245 = vector.load %arg11[%c2_172, %c0_173, %c0_174] : memref<3x1x1xf32, #tpu.memory_space<vmem>>, vector<1x1x1xf32>
    %246 = vector.shape_cast %245 : vector<1x1x1xf32> to vector<1x1xf32>
    %247 = vector.broadcast %246 : vector<1x1xf32> to vector<16x1xf32>
    %248 = arith.addf %244, %247 : vector<16x1xf32>
    %249 = arith.negf %248 : vector<16x1xf32>
    %250 = math.exp %249 : vector<16x1xf32>
    %cst_175 = arith.constant 1.000000e+00 : f32
    %251 = vector.broadcast %cst_175 : f32 to vector<16x1xf32>
    %252 = arith.addf %251, %250 : vector<16x1xf32>
    %253 = arith.divf %251, %252 : vector<16x1xf32>
    %cst_176 = arith.constant 2.000000e-01 : f32
    %254 = vector.broadcast %cst_176 : f32 to vector<16x1xf32>
    %255 = arith.cmpf oge, %253, %254 : vector<16x1xf32>
    %cst_177 = arith.constant 0.000000e+00 : f32
    %256 = vector.broadcast %cst_177 : f32 to vector<16x1xf32>
    %257 = arith.select %255, %253, %256 : vector<16x1xi1>, vector<16x1xf32>
    %c32_i32_178 = arith.constant 32 : i32
    %258 = vector.broadcast %c32_i32_178 : i32 to vector<16x128xi32>
    %259 = arith.cmpi slt, %161, %258 : vector<16x128xi32>
    %c64_i32_179 = arith.constant 64 : i32
    %260 = vector.broadcast %c64_i32_179 : i32 to vector<16x128xi32>
    %261 = arith.cmpi slt, %161, %260 : vector<16x128xi32>
    %262 = vector.shape_cast %225 : vector<16x1xf32> to vector<16x1xf32>
    %263 = vector.broadcast %262 : vector<16x1xf32> to vector<16x128xf32>
    %264 = vector.shape_cast %257 : vector<16x1xf32> to vector<16x1xf32>
    %265 = vector.broadcast %264 : vector<16x1xf32> to vector<16x128xf32>
    %266 = arith.select %261, %263, %265 : vector<16x128xi1>, vector<16x128xf32>
    %267 = vector.shape_cast %193 : vector<16x1xf32> to vector<16x1xf32>
    %268 = vector.broadcast %267 : vector<16x1xf32> to vector<16x128xf32>
    %269 = arith.select %259, %268, %266 : vector<16x128xi1>, vector<16x128xf32>
    %270 = arith.mulf %160, %269 : vector<16x128xf32>
    %c0_180 = arith.constant 0 : index
    %c0_181 = arith.constant 0 : index
    %271 = vector.load %arg12[%c0_180, %c0_181] : memref<1x128xf32, #tpu.memory_space<vmem>>, vector<1x128xf32>
    %272 = vector.broadcast %271 : vector<1x128xf32> to vector<16x128xf32>
    %273 = arith.mulf %270, %272 : vector<16x128xf32>
    %c0_182 = arith.constant 0 : index
    %c0_183 = arith.constant 0 : index
    %274 = vector.load %arg13[%c0_182, %c0_183] : memref<1x128xf32, #tpu.memory_space<vmem>>, vector<1x128xf32>
    %275 = vector.broadcast %274 : vector<1x128xf32> to vector<16x128xf32>
    %276 = arith.addf %273, %275 : vector<16x128xf32>
    %cst_184 = arith.constant 0.000000e+00 : f32
    %277 = vector.broadcast %cst_184 : f32 to vector<16x128xf32>
    %278 = arith.cmpf oge, %276, %277 : vector<16x128xf32>
    %cst_185 = arith.constant 0.00999999977 : f32
    %279 = vector.broadcast %cst_185 : f32 to vector<16x128xf32>
    %280 = arith.mulf %279, %276 : vector<16x128xf32>
    %281 = arith.select %278, %276, %280 : vector<16x128xi1>, vector<16x128xf32>
    %282 = vector.extract_strided_slice %281 {offsets = [0, 0], sizes = [12, 128], strides = [1, 1]} : vector<16x128xf32> to vector<12x128xf32>
    %283 = vector.extract_strided_slice %281 {offsets = [4, 0], sizes = [12, 128], strides = [1, 1]} : vector<16x128xf32> to vector<12x128xf32>
    %284 = arith.maximumf %282, %283 : vector<12x128xf32>
    %285 = vector.extract_strided_slice %284 {offsets = [0, 0], sizes = [11, 128], strides = [1, 1]} : vector<12x128xf32> to vector<11x128xf32>
    %286 = vector.extract_strided_slice %284 {offsets = [1, 0], sizes = [11, 128], strides = [1, 1]} : vector<12x128xf32> to vector<11x128xf32>
    %287 = arith.maximumf %285, %286 : vector<11x128xf32>
    %c0_186 = arith.constant 0 : index
    %c0_187 = arith.constant 0 : index
    %288 = vector.load %arg19[%c0_186, %c0_187] : memref<16x128xf32, #tpu.memory_space<vmem>>, vector<11x128xf32>
    tpu.vector_store %arg19[%c0_186, %c0_187], %287 {strides = array<i32>} : memref<16x128xf32, #tpu.memory_space<vmem>>, vector<11x128xf32>,
    %c0_188 = arith.constant 0 : index
    %c0_189 = arith.constant 0 : index
    %289 = tpu.strided_load %arg19[%c0_188, %c0_189] {strides = array<i32: 2, 1>} : memref<16x128xf32, #tpu.memory_space<vmem>>, vector<2x128xf32>
    %c0_190 = arith.constant 0 : index
    %c0_191 = arith.constant 0 : index
    %c0_192 = arith.constant 0 : index
    %290 = vector.load %arg14[%c0_190, %c0_191, %c0_192] : memref<1x4x128xf32, #tpu.memory_space<vmem>>, vector<1x2x128xf32>
    %291 = vector.shape_cast %290 : vector<1x2x128xf32> to vector<2x128xf32>
    %292 = vector.shape_cast %289 : vector<2x128xf32> to vector<1x2x128xf32>
    tpu.vector_store %arg14[%c0_190, %c0_191, %c0_192], %292 {strides = array<i32>} : memref<1x4x128xf32, #tpu.memory_space<vmem>>, vector<1x2x128xf32>,
    %c8 = arith.constant 8 : index
    %c0_193 = arith.constant 0 : index
    %293 = tpu.strided_load %arg19[%c8, %c0_193] {strides = array<i32: 2, 1>} : memref<16x128xf32, #tpu.memory_space<vmem>>, vector<2x128xf32>
    %c0_194 = arith.constant 0 : index
    %c2_195 = arith.constant 2 : index
    %c0_196 = arith.constant 0 : index
    %294 = vector.load %arg14[%c0_194, %c2_195, %c0_196] : memref<1x4x128xf32, #tpu.memory_space<vmem>>, vector<1x2x128xf32>
    %295 = vector.shape_cast %294 : vector<1x2x128xf32> to vector<2x128xf32>
    %296 = vector.shape_cast %293 : vector<2x128xf32> to vector<1x2x128xf32>
    tpu.vector_store %arg14[%c0_194, %c2_195, %c0_196], %296 {strides = array<i32>} : memref<1x4x128xf32, #tpu.memory_space<vmem>>, vector<1x2x128xf32>,
    return
  }
  func.func @transform_0(%arg0: i32) -> (i32, i32, i32) {
    %c0_i32 = arith.constant 0 : i32
    %c0_i32_0 = arith.constant 0 : i32
    %c0_i32_1 = arith.constant 0 : i32
    return %arg0, %c0_i32, %c0_i32_0 : i32, i32, i32
  }
  func.func @transform_1(%arg0: i32) -> (i32, i32) {
    %c0_i32 = arith.constant 0 : i32
    %c0_i32_0 = arith.constant 0 : i32
    %c0_i32_1 = arith.constant 0 : i32
    return %c0_i32, %c0_i32_0 : i32, i32
  }
  func.func @transform_2(%arg0: i32) -> (i32, i32) {
    %c0_i32 = arith.constant 0 : i32
    %c0_i32_0 = arith.constant 0 : i32
    %c0_i32_1 = arith.constant 0 : i32
    return %c0_i32, %c0_i32_0 : i32, i32
  }
  func.func @transform_3(%arg0: i32) -> (i32, i32) {
    %c0_i32 = arith.constant 0 : i32
    %c0_i32_0 = arith.constant 0 : i32
    %c0_i32_1 = arith.constant 0 : i32
    return %c0_i32, %c0_i32_0 : i32, i32
  }
  func.func @transform_4(%arg0: i32) -> (i32, i32, i32) {
    %c0_i32 = arith.constant 0 : i32
    %c0_i32_0 = arith.constant 0 : i32
    %c0_i32_1 = arith.constant 0 : i32
    %c0_i32_2 = arith.constant 0 : i32
    return %c0_i32, %c0_i32_0, %c0_i32_1 : i32, i32, i32
  }
  func.func @transform_5(%arg0: i32) -> (i32, i32) {
    %c0_i32 = arith.constant 0 : i32
    %c0_i32_0 = arith.constant 0 : i32
    %c0_i32_1 = arith.constant 0 : i32
    return %c0_i32, %c0_i32_0 : i32, i32
  }
  func.func @transform_6(%arg0: i32) -> (i32, i32) {
    %c0_i32 = arith.constant 0 : i32
    %c0_i32_0 = arith.constant 0 : i32
    %c0_i32_1 = arith.constant 0 : i32
    return %c0_i32, %c0_i32_0 : i32, i32
  }
  func.func @transform_7(%arg0: i32) -> (i32, i32, i32) {
    %c0_i32 = arith.constant 0 : i32
    %c0_i32_0 = arith.constant 0 : i32
    %c0_i32_1 = arith.constant 0 : i32
    %c0_i32_2 = arith.constant 0 : i32
    return %c0_i32, %c0_i32_0, %c0_i32_1 : i32, i32, i32
  }
  func.func @transform_8(%arg0: i32) -> (i32, i32) {
    %c0_i32 = arith.constant 0 : i32
    %c0_i32_0 = arith.constant 0 : i32
    %c0_i32_1 = arith.constant 0 : i32
    return %c0_i32, %c0_i32_0 : i32, i32
  }
  func.func @transform_9(%arg0: i32) -> (i32, i32, i32) {
    %c0_i32 = arith.constant 0 : i32
    %c0_i32_0 = arith.constant 0 : i32
    %c0_i32_1 = arith.constant 0 : i32
    %c0_i32_2 = arith.constant 0 : i32
    return %c0_i32, %c0_i32_0, %c0_i32_1 : i32, i32, i32
  }
  func.func @transform_10(%arg0: i32) -> (i32, i32, i32) {
    %c0_i32 = arith.constant 0 : i32
    %c0_i32_0 = arith.constant 0 : i32
    %c0_i32_1 = arith.constant 0 : i32
    %c0_i32_2 = arith.constant 0 : i32
    return %c0_i32, %c0_i32_0, %c0_i32_1 : i32, i32, i32
  }
  func.func @transform_11(%arg0: i32) -> (i32, i32) {
    %c0_i32 = arith.constant 0 : i32
    %c0_i32_0 = arith.constant 0 : i32
    %c0_i32_1 = arith.constant 0 : i32
    return %c0_i32, %c0_i32_0 : i32, i32
  }
  func.func @transform_12(%arg0: i32) -> (i32, i32) {
    %c0_i32 = arith.constant 0 : i32
    %c0_i32_0 = arith.constant 0 : i32
    %c0_i32_1 = arith.constant 0 : i32
    return %c0_i32, %c0_i32_0 : i32, i32
  }
  func.func @transform_13(%arg0: i32) -> (i32, i32, i32) {
    %c0_i32 = arith.constant 0 : i32
    %c0_i32_0 = arith.constant 0 : i32
    %c0_i32_1 = arith.constant 0 : i32
    return %arg0, %c0_i32, %c0_i32_0 : i32, i32, i32
  }
}

module attributes {stable_mosaic.version = 11 : i64} {
  func.func @_fused_chain_kernel(%arg0: i32, %arg1: memref<1x256x18xbf16, #tpu.memory_space<vmem>>, %arg2: memref<18x32xbf16, #tpu.memory_space<vmem>>, %arg3: memref<1x32xf32, #tpu.memory_space<vmem>>, %arg4: memref<1x32xf32, #tpu.memory_space<vmem>>, %arg5: memref<3x96x64xbf16, #tpu.memory_space<vmem>>, %arg6: memref<1x64xf32, #tpu.memory_space<vmem>>, %arg7: memref<1x64xf32, #tpu.memory_space<vmem>>, %arg8: memref<7x448x128xbf16, #tpu.memory_space<vmem>>, %arg9: memref<128x128xf32, #tpu.memory_space<vmem>>, %arg10: memref<3x16x32xf32, #tpu.memory_space<vmem>>, %arg11: memref<3x1x1xf32, #tpu.memory_space<vmem>>, %arg12: memref<1x128xf32, #tpu.memory_space<vmem>>, %arg13: memref<1x128xf32, #tpu.memory_space<vmem>>, %arg14: memref<1x4x128xf32, #tpu.memory_space<vmem>>, %arg15: memref<168x96xf32, #tpu.memory_space<vmem>>, %arg16: memref<168x448xf32, #tpu.memory_space<vmem>>, %arg17: memref<240x32xf32, #tpu.memory_space<vmem>>, %arg18: memref<112x64xf32, #tpu.memory_space<vmem>>, %arg19: memref<16x128xf32, #tpu.memory_space<vmem>>) attributes {dimension_semantics = [#tpu.dimension_semantics<parallel>], iteration_bounds = array<i64: 2>, scalar_prefetch = 0 : i64, scratch_operands = 5 : i64, tpu.core_type = #tpu.core_type<tc>, window_params = [{transform_indices = @transform_0, window_bounds = array<i64: 1, 256, 18>}, {pipeline_mode = #tpu.pipeline_mode<synchronous>, transform_indices = @transform_1, window_bounds = array<i64: 18, 32>}, {pipeline_mode = #tpu.pipeline_mode<synchronous>, transform_indices = @transform_2, window_bounds = array<i64: 1, 32>}, {pipeline_mode = #tpu.pipeline_mode<synchronous>, transform_indices = @transform_3, window_bounds = array<i64: 1, 32>}, {pipeline_mode = #tpu.pipeline_mode<synchronous>, transform_indices = @transform_4, window_bounds = array<i64: 3, 96, 64>}, {pipeline_mode = #tpu.pipeline_mode<synchronous>, transform_indices = @transform_5, window_bounds = array<i64: 1, 64>}, {pipeline_mode = #tpu.pipeline_mode<synchronous>, transform_indices = @transform_6, window_bounds = array<i64: 1, 64>}, {pipeline_mode = #tpu.pipeline_mode<synchronous>, transform_indices = @transform_7, window_bounds = array<i64: 7, 448, 128>}, {pipeline_mode = #tpu.pipeline_mode<synchronous>, transform_indices = @transform_8, window_bounds = array<i64: 128, 128>}, {pipeline_mode = #tpu.pipeline_mode<synchronous>, transform_indices = @transform_9, window_bounds = array<i64: 3, 16, 32>}, {pipeline_mode = #tpu.pipeline_mode<synchronous>, transform_indices = @transform_10, window_bounds = array<i64: 3, 1, 1>}, {pipeline_mode = #tpu.pipeline_mode<synchronous>, transform_indices = @transform_11, window_bounds = array<i64: 1, 128>}, {pipeline_mode = #tpu.pipeline_mode<synchronous>, transform_indices = @transform_12, window_bounds = array<i64: 1, 128>}, {transform_indices = @transform_13, window_bounds = array<i64: 1, 4, 128>}]} {
    %c0 = arith.constant 0 : index
    %c0_0 = arith.constant 0 : index
    %c0_1 = arith.constant 0 : index
    %0 = vector.load %arg1[%c0, %c0_0, %c0_1] : memref<1x256x18xbf16, #tpu.memory_space<vmem>>, vector<1x256x18xbf16>
    %1 = vector.shape_cast %0 : vector<1x256x18xbf16> to vector<256x18xbf16>
    %c0_2 = arith.constant 0 : index
    %c0_3 = arith.constant 0 : index
    %2 = vector.load %arg2[%c0_2, %c0_3] : memref<18x32xbf16, #tpu.memory_space<vmem>>, vector<18x32xbf16>
    %cst = arith.constant dense<0.000000e+00> : vector<256x32xf32>
    %3 = tpu.matmul %1, %2, %cst {dimension_numbers = #tpu.dot_dimension_numbers<[1], [0], [0], [1], [0, 0, 1, 1], [], []>} : vector<256x18xbf16>, vector<18x32xbf16>, vector<256x32xf32> -> vector<256x32xf32>
    %c0_4 = arith.constant 0 : index
    %c0_5 = arith.constant 0 : index
    %4 = vector.load %arg3[%c0_4, %c0_5] : memref<1x32xf32, #tpu.memory_space<vmem>>, vector<1x32xf32>
    %5 = vector.broadcast %4 : vector<1x32xf32> to vector<256x32xf32>
    %6 = arith.mulf %3, %5 : vector<256x32xf32>
    %c0_6 = arith.constant 0 : index
    %c0_7 = arith.constant 0 : index
    %7 = vector.load %arg4[%c0_6, %c0_7] : memref<1x32xf32, #tpu.memory_space<vmem>>, vector<1x32xf32>
    %8 = vector.broadcast %7 : vector<1x32xf32> to vector<256x32xf32>
    %9 = arith.addf %6, %8 : vector<256x32xf32>
    %cst_8 = arith.constant 0.000000e+00 : f32
    %10 = vector.broadcast %cst_8 : f32 to vector<256x32xf32>
    %11 = arith.cmpf oge, %9, %10 : vector<256x32xf32>
    %cst_9 = arith.constant 0.00999999977 : f32
    %12 = vector.broadcast %cst_9 : f32 to vector<256x32xf32>
    %13 = arith.mulf %12, %9 : vector<256x32xf32>
    %14 = arith.select %11, %9, %13 : vector<256x32xi1>, vector<256x32xf32>
    %15 = vector.extract_strided_slice %14 {offsets = [0, 0], sizes = [240, 32], strides = [1, 1]} : vector<256x32xf32> to vector<240x32xf32>
    %16 = vector.extract_strided_slice %14 {offsets = [16, 0], sizes = [240, 32], strides = [1, 1]} : vector<256x32xf32> to vector<240x32xf32>
    %17 = arith.maximumf %15, %16 : vector<240x32xf32>
    %18 = vector.extract_strided_slice %17 {offsets = [0, 0], sizes = [239, 32], strides = [1, 1]} : vector<240x32xf32> to vector<239x32xf32>
    %19 = vector.extract_strided_slice %17 {offsets = [1, 0], sizes = [239, 32], strides = [1, 1]} : vector<240x32xf32> to vector<239x32xf32>
    %20 = arith.maximumf %18, %19 : vector<239x32xf32>
    %c0_10 = arith.constant 0 : index
    %c0_11 = arith.constant 0 : index
    %21 = vector.load %arg17[%c0_10, %c0_11] : memref<240x32xf32, #tpu.memory_space<vmem>>, vector<239x32xf32>
    tpu.vector_store %arg17[%c0_10, %c0_11], %20 {strides = array<i32>} : memref<240x32xf32, #tpu.memory_space<vmem>>, vector<239x32xf32>,
    %cst_12 = arith.constant 0.000000e+00 : f32
    %22 = vector.broadcast %cst_12 : f32 to vector<168x96xf32>
    %c0_13 = arith.constant 0 : index
    %c0_14 = arith.constant 0 : index
    %23 = vector.load %arg15[%c0_13, %c0_14] : memref<168x96xf32, #tpu.memory_space<vmem>>, vector<168x96xf32>
    tpu.vector_store %arg15[%c0_13, %c0_14], %22 {strides = array<i32>} : memref<168x96xf32, #tpu.memory_space<vmem>>, vector<168x96xf32>,
    %c0_15 = arith.constant 0 : index
    %c0_16 = arith.constant 0 : index
    %24 = tpu.strided_load %arg17[%c0_15, %c0_16] {strides = array<i32: 2, 1>} : memref<240x32xf32, #tpu.memory_space<vmem>>, vector<8x32xf32>
    %c17 = arith.constant 17 : index
    %c0_17 = arith.constant 0 : index
    %25 = vector.load %arg15[%c17, %c0_17] : memref<168x96xf32, #tpu.memory_space<vmem>>, vector<8x32xf32>
    tpu.vector_store %arg15[%c17, %c0_17], %24 {strides = array<i32>} : memref<168x96xf32, #tpu.memory_space<vmem>>, vector<8x32xf32>,
    %c32 = arith.constant 32 : index
    %c0_18 = arith.constant 0 : index
    %26 = tpu.strided_load %arg17[%c32, %c0_18] {strides = array<i32: 2, 1>} : memref<240x32xf32, #tpu.memory_space<vmem>>, vector<8x32xf32>
    %c33 = arith.constant 33 : index
    %c0_19 = arith.constant 0 : index
    %27 = vector.load %arg15[%c33, %c0_19] : memref<168x96xf32, #tpu.memory_space<vmem>>, vector<8x32xf32>
    tpu.vector_store %arg15[%c33, %c0_19], %26 {strides = array<i32>} : memref<168x96xf32, #tpu.memory_space<vmem>>, vector<8x32xf32>,
    %c64 = arith.constant 64 : index
    %c0_20 = arith.constant 0 : index
    %28 = tpu.strided_load %arg17[%c64, %c0_20] {strides = array<i32: 2, 1>} : memref<240x32xf32, #tpu.memory_space<vmem>>, vector<8x32xf32>
    %c49 = arith.constant 49 : index
    %c0_21 = arith.constant 0 : index
    %29 = vector.load %arg15[%c49, %c0_21] : memref<168x96xf32, #tpu.memory_space<vmem>>, vector<8x32xf32>
    tpu.vector_store %arg15[%c49, %c0_21], %28 {strides = array<i32>} : memref<168x96xf32, #tpu.memory_space<vmem>>, vector<8x32xf32>,
    %c96 = arith.constant 96 : index
    %c0_22 = arith.constant 0 : index
    %30 = tpu.strided_load %arg17[%c96, %c0_22] {strides = array<i32: 2, 1>} : memref<240x32xf32, #tpu.memory_space<vmem>>, vector<8x32xf32>
    %c65 = arith.constant 65 : index
    %c0_23 = arith.constant 0 : index
    %31 = vector.load %arg15[%c65, %c0_23] : memref<168x96xf32, #tpu.memory_space<vmem>>, vector<8x32xf32>
    tpu.vector_store %arg15[%c65, %c0_23], %30 {strides = array<i32>} : memref<168x96xf32, #tpu.memory_space<vmem>>, vector<8x32xf32>,
    %c128 = arith.constant 128 : index
    %c0_24 = arith.constant 0 : index
    %32 = tpu.strided_load %arg17[%c128, %c0_24] {strides = array<i32: 2, 1>} : memref<240x32xf32, #tpu.memory_space<vmem>>, vector<8x32xf32>
    %c81 = arith.constant 81 : index
    %c0_25 = arith.constant 0 : index
    %33 = vector.load %arg15[%c81, %c0_25] : memref<168x96xf32, #tpu.memory_space<vmem>>, vector<8x32xf32>
    tpu.vector_store %arg15[%c81, %c0_25], %32 {strides = array<i32>} : memref<168x96xf32, #tpu.memory_space<vmem>>, vector<8x32xf32>,
    %c160 = arith.constant 160 : index
    %c0_26 = arith.constant 0 : index
    %34 = tpu.strided_load %arg17[%c160, %c0_26] {strides = array<i32: 2, 1>} : memref<240x32xf32, #tpu.memory_space<vmem>>, vector<8x32xf32>
    %c97 = arith.constant 97 : index
    %c0_27 = arith.constant 0 : index
    %35 = vector.load %arg15[%c97, %c0_27] : memref<168x96xf32, #tpu.memory_space<vmem>>, vector<8x32xf32>
    tpu.vector_store %arg15[%c97, %c0_27], %34 {strides = array<i32>} : memref<168x96xf32, #tpu.memory_space<vmem>>, vector<8x32xf32>,
    %c192 = arith.constant 192 : index
    %c0_28 = arith.constant 0 : index
    %36 = tpu.strided_load %arg17[%c192, %c0_28] {strides = array<i32: 2, 1>} : memref<240x32xf32, #tpu.memory_space<vmem>>, vector<8x32xf32>
    %c113 = arith.constant 113 : index
    %c0_29 = arith.constant 0 : index
    %37 = vector.load %arg15[%c113, %c0_29] : memref<168x96xf32, #tpu.memory_space<vmem>>, vector<8x32xf32>
    tpu.vector_store %arg15[%c113, %c0_29], %36 {strides = array<i32>} : memref<168x96xf32, #tpu.memory_space<vmem>>, vector<8x32xf32>,
    %c224 = arith.constant 224 : index
    %c0_30 = arith.constant 0 : index
    %38 = tpu.strided_load %arg17[%c224, %c0_30] {strides = array<i32: 2, 1>} : memref<240x32xf32, #tpu.memory_space<vmem>>, vector<8x32xf32>
    %c129 = arith.constant 129 : index
    %c0_31 = arith.constant 0 : index
    %39 = vector.load %arg15[%c129, %c0_31] : memref<168x96xf32, #tpu.memory_space<vmem>>, vector<8x32xf32>
    tpu.vector_store %arg15[%c129, %c0_31], %38 {strides = array<i32>} : memref<168x96xf32, #tpu.memory_space<vmem>>, vector<8x32xf32>,
    %c1 = arith.constant 1 : index
    %c0_32 = arith.constant 0 : index
    %40 = vector.load %arg15[%c1, %c0_32] : memref<168x96xf32, #tpu.memory_space<vmem>>, vector<160x32xf32>
    %c0_33 = arith.constant 0 : index
    %c32_34 = arith.constant 32 : index
    %41 = vector.load %arg15[%c0_33, %c32_34] : memref<168x96xf32, #tpu.memory_space<vmem>>, vector<160x32xf32>
    tpu.vector_store %arg15[%c0_33, %c32_34], %40 {strides = array<i32>} : memref<168x96xf32, #tpu.memory_space<vmem>>, vector<160x32xf32>,
    %c2 = arith.constant 2 : index
    %c0_35 = arith.constant 0 : index
    %42 = vector.load %arg15[%c2, %c0_35] : memref<168x96xf32, #tpu.memory_space<vmem>>, vector<160x32xf32>
    %c0_36 = arith.constant 0 : index
    %c64_37 = arith.constant 64 : index
    %43 = vector.load %arg15[%c0_36, %c64_37] : memref<168x96xf32, #tpu.memory_space<vmem>>, vector<160x32xf32>
    tpu.vector_store %arg15[%c0_36, %c64_37], %42 {strides = array<i32>} : memref<168x96xf32, #tpu.memory_space<vmem>>, vector<160x32xf32>,
    %c0_38 = arith.constant 0 : index
    %c0_39 = arith.constant 0 : index
    %44 = vector.load %arg15[%c0_38, %c0_39] : memref<168x96xf32, #tpu.memory_space<vmem>>, vector<168x96xf32>
    %45 = arith.truncf %44 : vector<168x96xf32> to vector<168x96xbf16>
    %cst_40 = arith.constant 0.000000e+00 : f32
    %46 = vector.broadcast %cst_40 : f32 to vector<128x64xf32>
    %47 = vector.extract_strided_slice %45 {offsets = [0, 0], sizes = [128, 96], strides = [1, 1]} : vector<168x96xbf16> to vector<128x96xbf16>
    %c0_41 = arith.constant 0 : index
    %c0_42 = arith.constant 0 : index
    %c0_43 = arith.constant 0 : index
    %48 = vector.load %arg5[%c0_41, %c0_42, %c0_43] : memref<3x96x64xbf16, #tpu.memory_space<vmem>>, vector<1x96x64xbf16>
    %49 = vector.shape_cast %48 : vector<1x96x64xbf16> to vector<96x64xbf16>
    %cst_44 = arith.constant dense<0.000000e+00> : vector<128x64xf32>
    %50 = tpu.matmul %47, %49, %cst_44 {dimension_numbers = #tpu.dot_dimension_numbers<[1], [0], [0], [1], [0, 0, 1, 1], [], []>} : vector<128x96xbf16>, vector<96x64xbf16>, vector<128x64xf32> -> vector<128x64xf32>
    %51 = arith.addf %46, %50 : vector<128x64xf32>
    %52 = vector.extract_strided_slice %45 {offsets = [16, 0], sizes = [128, 96], strides = [1, 1]} : vector<168x96xbf16> to vector<128x96xbf16>
    %c1_45 = arith.constant 1 : index
    %c0_46 = arith.constant 0 : index
    %c0_47 = arith.constant 0 : index
    %53 = vector.load %arg5[%c1_45, %c0_46, %c0_47] : memref<3x96x64xbf16, #tpu.memory_space<vmem>>, vector<1x96x64xbf16>
    %54 = vector.shape_cast %53 : vector<1x96x64xbf16> to vector<96x64xbf16>
    %cst_48 = arith.constant dense<0.000000e+00> : vector<128x64xf32>
    %55 = tpu.matmul %52, %54, %cst_48 {dimension_numbers = #tpu.dot_dimension_numbers<[1], [0], [0], [1], [0, 0, 1, 1], [], []>} : vector<128x96xbf16>, vector<96x64xbf16>, vector<128x64xf32> -> vector<128x64xf32>
    %56 = arith.addf %51, %55 : vector<128x64xf32>
    %57 = vector.extract_strided_slice %45 {offsets = [32, 0], sizes = [128, 96], strides = [1, 1]} : vector<168x96xbf16> to vector<128x96xbf16>
    %c2_49 = arith.constant 2 : index
    %c0_50 = arith.constant 0 : index
    %c0_51 = arith.constant 0 : index
    %58 = vector.load %arg5[%c2_49, %c0_50, %c0_51] : memref<3x96x64xbf16, #tpu.memory_space<vmem>>, vector<1x96x64xbf16>
    %59 = vector.shape_cast %58 : vector<1x96x64xbf16> to vector<96x64xbf16>
    %cst_52 = arith.constant dense<0.000000e+00> : vector<128x64xf32>
    %60 = tpu.matmul %57, %59, %cst_52 {dimension_numbers = #tpu.dot_dimension_numbers<[1], [0], [0], [1], [0, 0, 1, 1], [], []>} : vector<128x96xbf16>, vector<96x64xbf16>, vector<128x64xf32> -> vector<128x64xf32>
    %61 = arith.addf %56, %60 : vector<128x64xf32>
    %c0_53 = arith.constant 0 : index
    %c0_54 = arith.constant 0 : index
    %62 = vector.load %arg6[%c0_53, %c0_54] : memref<1x64xf32, #tpu.memory_space<vmem>>, vector<1x64xf32>
    %63 = vector.broadcast %62 : vector<1x64xf32> to vector<128x64xf32>
    %64 = arith.mulf %61, %63 : vector<128x64xf32>
    %c0_55 = arith.constant 0 : index
    %c0_56 = arith.constant 0 : index
    %65 = vector.load %arg7[%c0_55, %c0_56] : memref<1x64xf32, #tpu.memory_space<vmem>>, vector<1x64xf32>
    %66 = vector.broadcast %65 : vector<1x64xf32> to vector<128x64xf32>
    %67 = arith.addf %64, %66 : vector<128x64xf32>
    %cst_57 = arith.constant 0.000000e+00 : f32
    %68 = vector.broadcast %cst_57 : f32 to vector<128x64xf32>
    %69 = arith.cmpf oge, %67, %68 : vector<128x64xf32>
    %cst_58 = arith.constant 0.00999999977 : f32
    %70 = vector.broadcast %cst_58 : f32 to vector<128x64xf32>
    %71 = arith.mulf %70, %67 : vector<128x64xf32>
    %72 = arith.select %69, %67, %71 : vector<128x64xi1>, vector<128x64xf32>
    %73 = vector.extract_strided_slice %72 {offsets = [0, 0], sizes = [112, 64], strides = [1, 1]} : vector<128x64xf32> to vector<112x64xf32>
    %74 = vector.extract_strided_slice %72 {offsets = [16, 0], sizes = [112, 64], strides = [1, 1]} : vector<128x64xf32> to vector<112x64xf32>
    %75 = arith.maximumf %73, %74 : vector<112x64xf32>
    %76 = vector.extract_strided_slice %75 {offsets = [0, 0], sizes = [111, 64], strides = [1, 1]} : vector<112x64xf32> to vector<111x64xf32>
    %77 = vector.extract_strided_slice %75 {offsets = [1, 0], sizes = [111, 64], strides = [1, 1]} : vector<112x64xf32> to vector<111x64xf32>
    %78 = arith.maximumf %76, %77 : vector<111x64xf32>
    %c0_59 = arith.constant 0 : index
    %c0_60 = arith.constant 0 : index
    %79 = vector.load %arg18[%c0_59, %c0_60] : memref<112x64xf32, #tpu.memory_space<vmem>>, vector<111x64xf32>
    tpu.vector_store %arg18[%c0_59, %c0_60], %78 {strides = array<i32>} : memref<112x64xf32, #tpu.memory_space<vmem>>, vector<111x64xf32>,
    %cst_61 = arith.constant 0.000000e+00 : f32
    %80 = vector.broadcast %cst_61 : f32 to vector<168x448xf32>
    %c0_62 = arith.constant 0 : index
    %c0_63 = arith.constant 0 : index
    %81 = vector.load %arg16[%c0_62, %c0_63] : memref<168x448xf32, #tpu.memory_space<vmem>>, vector<168x448xf32>
    tpu.vector_store %arg16[%c0_62, %c0_63], %80 {strides = array<i32>} : memref<168x448xf32, #tpu.memory_space<vmem>>, vector<168x448xf32>,
    %c0_64 = arith.constant 0 : index
    %c0_65 = arith.constant 0 : index
    %82 = tpu.strided_load %arg18[%c0_64, %c0_65] {strides = array<i32: 2, 1>} : memref<112x64xf32, #tpu.memory_space<vmem>>, vector<4x64xf32>
    %c51 = arith.constant 51 : index
    %c0_66 = arith.constant 0 : index
    %83 = vector.load %arg16[%c51, %c0_66] : memref<168x448xf32, #tpu.memory_space<vmem>>, vector<4x64xf32>
    tpu.vector_store %arg16[%c51, %c0_66], %82 {strides = array<i32>} : memref<168x448xf32, #tpu.memory_space<vmem>>, vector<4x64xf32>,
    %c32_67 = arith.constant 32 : index
    %c0_68 = arith.constant 0 : index
    %84 = tpu.strided_load %arg18[%c32_67, %c0_68] {strides = array<i32: 2, 1>} : memref<112x64xf32, #tpu.memory_space<vmem>>, vector<4x64xf32>
    %c67 = arith.constant 67 : index
    %c0_69 = arith.constant 0 : index
    %85 = vector.load %arg16[%c67, %c0_69] : memref<168x448xf32, #tpu.memory_space<vmem>>, vector<4x64xf32>
    tpu.vector_store %arg16[%c67, %c0_69], %84 {strides = array<i32>} : memref<168x448xf32, #tpu.memory_space<vmem>>, vector<4x64xf32>,
    %c64_70 = arith.constant 64 : index
    %c0_71 = arith.constant 0 : index
    %86 = tpu.strided_load %arg18[%c64_70, %c0_71] {strides = array<i32: 2, 1>} : memref<112x64xf32, #tpu.memory_space<vmem>>, vector<4x64xf32>
    %c83 = arith.constant 83 : index
    %c0_72 = arith.constant 0 : index
    %87 = vector.load %arg16[%c83, %c0_72] : memref<168x448xf32, #tpu.memory_space<vmem>>, vector<4x64xf32>
    tpu.vector_store %arg16[%c83, %c0_72], %86 {strides = array<i32>} : memref<168x448xf32, #tpu.memory_space<vmem>>, vector<4x64xf32>,
    %c96_73 = arith.constant 96 : index
    %c0_74 = arith.constant 0 : index
    %88 = tpu.strided_load %arg18[%c96_73, %c0_74] {strides = array<i32: 2, 1>} : memref<112x64xf32, #tpu.memory_space<vmem>>, vector<4x64xf32>
    %c99 = arith.constant 99 : index
    %c0_75 = arith.constant 0 : index
    %89 = vector.load %arg16[%c99, %c0_75] : memref<168x448xf32, #tpu.memory_space<vmem>>, vector<4x64xf32>
    tpu.vector_store %arg16[%c99, %c0_75], %88 {strides = array<i32>} : memref<168x448xf32, #tpu.memory_space<vmem>>, vector<4x64xf32>,
    %c1_76 = arith.constant 1 : index
    %c0_77 = arith.constant 0 : index
    %90 = vector.load %arg16[%c1_76, %c0_77] : memref<168x448xf32, #tpu.memory_space<vmem>>, vector<160x64xf32>
    %c0_78 = arith.constant 0 : index
    %c64_79 = arith.constant 64 : index
    %91 = vector.load %arg16[%c0_78, %c64_79] : memref<168x448xf32, #tpu.memory_space<vmem>>, vector<160x64xf32>
    tpu.vector_store %arg16[%c0_78, %c64_79], %90 {strides = array<i32>} : memref<168x448xf32, #tpu.memory_space<vmem>>, vector<160x64xf32>,
    %c2_80 = arith.constant 2 : index
    %c0_81 = arith.constant 0 : index
    %92 = vector.load %arg16[%c2_80, %c0_81] : memref<168x448xf32, #tpu.memory_space<vmem>>, vector<160x64xf32>
    %c0_82 = arith.constant 0 : index
    %c128_83 = arith.constant 128 : index
    %93 = vector.load %arg16[%c0_82, %c128_83] : memref<168x448xf32, #tpu.memory_space<vmem>>, vector<160x64xf32>
    tpu.vector_store %arg16[%c0_82, %c128_83], %92 {strides = array<i32>} : memref<168x448xf32, #tpu.memory_space<vmem>>, vector<160x64xf32>,
    %c3 = arith.constant 3 : index
    %c0_84 = arith.constant 0 : index
    %94 = vector.load %arg16[%c3, %c0_84] : memref<168x448xf32, #tpu.memory_space<vmem>>, vector<160x64xf32>
    %c0_85 = arith.constant 0 : index
    %c192_86 = arith.constant 192 : index
    %95 = vector.load %arg16[%c0_85, %c192_86] : memref<168x448xf32, #tpu.memory_space<vmem>>, vector<160x64xf32>
    tpu.vector_store %arg16[%c0_85, %c192_86], %94 {strides = array<i32>} : memref<168x448xf32, #tpu.memory_space<vmem>>, vector<160x64xf32>,
    %c4 = arith.constant 4 : index
    %c0_87 = arith.constant 0 : index
    %96 = vector.load %arg16[%c4, %c0_87] : memref<168x448xf32, #tpu.memory_space<vmem>>, vector<160x64xf32>
    %c0_88 = arith.constant 0 : index
    %c256 = arith.constant 256 : index
    %97 = vector.load %arg16[%c0_88, %c256] : memref<168x448xf32, #tpu.memory_space<vmem>>, vector<160x64xf32>
    tpu.vector_store %arg16[%c0_88, %c256], %96 {strides = array<i32>} : memref<168x448xf32, #tpu.memory_space<vmem>>, vector<160x64xf32>,
    %c5 = arith.constant 5 : index
    %c0_89 = arith.constant 0 : index
    %98 = vector.load %arg16[%c5, %c0_89] : memref<168x448xf32, #tpu.memory_space<vmem>>, vector<160x64xf32>
    %c0_90 = arith.constant 0 : index
    %c320 = arith.constant 320 : index
    %99 = vector.load %arg16[%c0_90, %c320] : memref<168x448xf32, #tpu.memory_space<vmem>>, vector<160x64xf32>
    tpu.vector_store %arg16[%c0_90, %c320], %98 {strides = array<i32>} : memref<168x448xf32, #tpu.memory_space<vmem>>, vector<160x64xf32>,
    %c6 = arith.constant 6 : index
    %c0_91 = arith.constant 0 : index
    %100 = vector.load %arg16[%c6, %c0_91] : memref<168x448xf32, #tpu.memory_space<vmem>>, vector<160x64xf32>
    %c0_92 = arith.constant 0 : index
    %c384 = arith.constant 384 : index
    %101 = vector.load %arg16[%c0_92, %c384] : memref<168x448xf32, #tpu.memory_space<vmem>>, vector<160x64xf32>
    tpu.vector_store %arg16[%c0_92, %c384], %100 {strides = array<i32>} : memref<168x448xf32, #tpu.memory_space<vmem>>, vector<160x64xf32>,
    %c0_93 = arith.constant 0 : index
    %c0_94 = arith.constant 0 : index
    %102 = vector.load %arg16[%c0_93, %c0_94] : memref<168x448xf32, #tpu.memory_space<vmem>>, vector<168x448xf32>
    %103 = arith.truncf %102 : vector<168x448xf32> to vector<168x448xbf16>
    %cst_95 = arith.constant 0.000000e+00 : f32
    %104 = vector.broadcast %cst_95 : f32 to vector<64x128xf32>
    %105 = vector.extract_strided_slice %103 {offsets = [0, 0], sizes = [64, 448], strides = [1, 1]} : vector<168x448xbf16> to vector<64x448xbf16>
    %c0_96 = arith.constant 0 : index
    %c0_97 = arith.constant 0 : index
    %c0_98 = arith.constant 0 : index
    %106 = vector.load %arg8[%c0_96, %c0_97, %c0_98] : memref<7x448x128xbf16, #tpu.memory_space<vmem>>, vector<1x448x128xbf16>
    %107 = vector.shape_cast %106 : vector<1x448x128xbf16> to vector<448x128xbf16>
    %cst_99 = arith.constant dense<0.000000e+00> : vector<64x128xf32>
    %108 = tpu.matmul %105, %107, %cst_99 {dimension_numbers = #tpu.dot_dimension_numbers<[1], [0], [0], [1], [0, 0, 1, 1], [], []>} : vector<64x448xbf16>, vector<448x128xbf16>, vector<64x128xf32> -> vector<64x128xf32>
    %109 = arith.addf %104, %108 : vector<64x128xf32>
    %110 = vector.extract_strided_slice %103 {offsets = [16, 0], sizes = [64, 448], strides = [1, 1]} : vector<168x448xbf16> to vector<64x448xbf16>
    %c1_100 = arith.constant 1 : index
    %c0_101 = arith.constant 0 : index
    %c0_102 = arith.constant 0 : index
    %111 = vector.load %arg8[%c1_100, %c0_101, %c0_102] : memref<7x448x128xbf16, #tpu.memory_space<vmem>>, vector<1x448x128xbf16>
    %112 = vector.shape_cast %111 : vector<1x448x128xbf16> to vector<448x128xbf16>
    %cst_103 = arith.constant dense<0.000000e+00> : vector<64x128xf32>
    %113 = tpu.matmul %110, %112, %cst_103 {dimension_numbers = #tpu.dot_dimension_numbers<[1], [0], [0], [1], [0, 0, 1, 1], [], []>} : vector<64x448xbf16>, vector<448x128xbf16>, vector<64x128xf32> -> vector<64x128xf32>
    %114 = arith.addf %109, %113 : vector<64x128xf32>
    %115 = vector.extract_strided_slice %103 {offsets = [32, 0], sizes = [64, 448], strides = [1, 1]} : vector<168x448xbf16> to vector<64x448xbf16>
    %c2_104 = arith.constant 2 : index
    %c0_105 = arith.constant 0 : index
    %c0_106 = arith.constant 0 : index
    %116 = vector.load %arg8[%c2_104, %c0_105, %c0_106] : memref<7x448x128xbf16, #tpu.memory_space<vmem>>, vector<1x448x128xbf16>
    %117 = vector.shape_cast %116 : vector<1x448x128xbf16> to vector<448x128xbf16>
    %cst_107 = arith.constant dense<0.000000e+00> : vector<64x128xf32>
    %118 = tpu.matmul %115, %117, %cst_107 {dimension_numbers = #tpu.dot_dimension_numbers<[1], [0], [0], [1], [0, 0, 1, 1], [], []>} : vector<64x448xbf16>, vector<448x128xbf16>, vector<64x128xf32> -> vector<64x128xf32>
    %119 = arith.addf %114, %118 : vector<64x128xf32>
    %120 = vector.extract_strided_slice %103 {offsets = [48, 0], sizes = [64, 448], strides = [1, 1]} : vector<168x448xbf16> to vector<64x448xbf16>
    %c3_108 = arith.constant 3 : index
    %c0_109 = arith.constant 0 : index
    %c0_110 = arith.constant 0 : index
    %121 = vector.load %arg8[%c3_108, %c0_109, %c0_110] : memref<7x448x128xbf16, #tpu.memory_space<vmem>>, vector<1x448x128xbf16>
    %122 = vector.shape_cast %121 : vector<1x448x128xbf16> to vector<448x128xbf16>
    %cst_111 = arith.constant dense<0.000000e+00> : vector<64x128xf32>
    %123 = tpu.matmul %120, %122, %cst_111 {dimension_numbers = #tpu.dot_dimension_numbers<[1], [0], [0], [1], [0, 0, 1, 1], [], []>} : vector<64x448xbf16>, vector<448x128xbf16>, vector<64x128xf32> -> vector<64x128xf32>
    %124 = arith.addf %119, %123 : vector<64x128xf32>
    %125 = vector.extract_strided_slice %103 {offsets = [64, 0], sizes = [64, 448], strides = [1, 1]} : vector<168x448xbf16> to vector<64x448xbf16>
    %c4_112 = arith.constant 4 : index
    %c0_113 = arith.constant 0 : index
    %c0_114 = arith.constant 0 : index
    %126 = vector.load %arg8[%c4_112, %c0_113, %c0_114] : memref<7x448x128xbf16, #tpu.memory_space<vmem>>, vector<1x448x128xbf16>
    %127 = vector.shape_cast %126 : vector<1x448x128xbf16> to vector<448x128xbf16>
    %cst_115 = arith.constant dense<0.000000e+00> : vector<64x128xf32>
    %128 = tpu.matmul %125, %127, %cst_115 {dimension_numbers = #tpu.dot_dimension_numbers<[1], [0], [0], [1], [0, 0, 1, 1], [], []>} : vector<64x448xbf16>, vector<448x128xbf16>, vector<64x128xf32> -> vector<64x128xf32>
    %129 = arith.addf %124, %128 : vector<64x128xf32>
    %130 = vector.extract_strided_slice %103 {offsets = [80, 0], sizes = [64, 448], strides = [1, 1]} : vector<168x448xbf16> to vector<64x448xbf16>
    %c5_116 = arith.constant 5 : index
    %c0_117 = arith.constant 0 : index
    %c0_118 = arith.constant 0 : index
    %131 = vector.load %arg8[%c5_116, %c0_117, %c0_118] : memref<7x448x128xbf16, #tpu.memory_space<vmem>>, vector<1x448x128xbf16>
    %132 = vector.shape_cast %131 : vector<1x448x128xbf16> to vector<448x128xbf16>
    %cst_119 = arith.constant dense<0.000000e+00> : vector<64x128xf32>
    %133 = tpu.matmul %130, %132, %cst_119 {dimension_numbers = #tpu.dot_dimension_numbers<[1], [0], [0], [1], [0, 0, 1, 1], [], []>} : vector<64x448xbf16>, vector<448x128xbf16>, vector<64x128xf32> -> vector<64x128xf32>
    %134 = arith.addf %129, %133 : vector<64x128xf32>
    %135 = vector.extract_strided_slice %103 {offsets = [96, 0], sizes = [64, 448], strides = [1, 1]} : vector<168x448xbf16> to vector<64x448xbf16>
    %c6_120 = arith.constant 6 : index
    %c0_121 = arith.constant 0 : index
    %c0_122 = arith.constant 0 : index
    %136 = vector.load %arg8[%c6_120, %c0_121, %c0_122] : memref<7x448x128xbf16, #tpu.memory_space<vmem>>, vector<1x448x128xbf16>
    %137 = vector.shape_cast %136 : vector<1x448x128xbf16> to vector<448x128xbf16>
    %cst_123 = arith.constant dense<0.000000e+00> : vector<64x128xf32>
    %138 = tpu.matmul %135, %137, %cst_123 {dimension_numbers = #tpu.dot_dimension_numbers<[1], [0], [0], [1], [0, 0, 1, 1], [], []>} : vector<64x448xbf16>, vector<448x128xbf16>, vector<64x128xf32> -> vector<64x128xf32>
    %139 = arith.addf %134, %138 : vector<64x128xf32>
    %140 = vector.extract_strided_slice %139 {offsets = [0, 0], sizes = [4, 128], strides = [1, 1]} : vector<64x128xf32> to vector<4x128xf32>
    %141 = vector.extract_strided_slice %139 {offsets = [16, 0], sizes = [4, 128], strides = [1, 1]} : vector<64x128xf32> to vector<4x128xf32>
    %142 = vector.extract_strided_slice %139 {offsets = [32, 0], sizes = [4, 128], strides = [1, 1]} : vector<64x128xf32> to vector<4x128xf32>
    %143 = vector.extract_strided_slice %139 {offsets = [48, 0], sizes = [4, 128], strides = [1, 1]} : vector<64x128xf32> to vector<4x128xf32>
    %144 = tpu.concatenate %140, %141, %142, %143 in 0 : vector<4x128xf32>, vector<4x128xf32>, vector<4x128xf32>, vector<4x128xf32> -> vector<16x128xf32>
    %cst_124 = arith.constant dense<0.000000e+00> : vector<128xf32>
    %145 = vector.multi_reduction <add>, %144, %cst_124 [0] : vector<16x128xf32> to vector<128xf32>
    %146 = vector.shape_cast %145 : vector<128xf32> to vector<1x128xf32>
    %cst_125 = arith.constant 1.600000e+01 : f32
    %147 = vector.broadcast %cst_125 : f32 to vector<1x128xf32>
    %148 = arith.divf %146, %147 : vector<1x128xf32>
    %cst_126 = arith.constant dense<0xFF800000> : vector<128xf32>
    %149 = vector.multi_reduction <maximumf>, %144, %cst_126 [0] : vector<16x128xf32> to vector<128xf32>
    %150 = vector.shape_cast %149 : vector<128xf32> to vector<1x128xf32>
    %151 = arith.addf %148, %150 : vector<1x128xf32>
    %c0_127 = arith.constant 0 : index
    %c0_128 = arith.constant 0 : index
    %152 = vector.load %arg9[%c0_127, %c0_128] : memref<128x128xf32, #tpu.memory_space<vmem>>, vector<128x128xf32>
    %cst_129 = arith.constant dense<0.000000e+00> : vector<1x128xf32>
    %153 = tpu.matmul %151, %152, %cst_129 {dimension_numbers = #tpu.dot_dimension_numbers<[1], [0], [0], [1], [0, 0, 1, 1], [], []>} : vector<1x128xf32>, vector<128x128xf32>, vector<1x128xf32> -> vector<1x128xf32>
    %154 = arith.negf %153 : vector<1x128xf32>
    %155 = math.exp %154 : vector<1x128xf32>
    %cst_130 = arith.constant 1.000000e+00 : f32
    %156 = vector.broadcast %cst_130 : f32 to vector<1x128xf32>
    %157 = arith.addf %156, %155 : vector<1x128xf32>
    %158 = arith.divf %156, %157 : vector<1x128xf32>
    %159 = vector.broadcast %158 : vector<1x128xf32> to vector<16x128xf32>
    %160 = arith.mulf %144, %159 : vector<16x128xf32>
    %161 = tpu.iota {dimensions = array<i32: 1>} : vector<16x128xi32>
    %c0_i32 = arith.constant 0 : i32
    %162 = vector.broadcast %c0_i32 : i32 to vector<16x128xi32>
    %163 = arith.cmpi sge, %161, %162 : vector<16x128xi32>
    %c32_i32 = arith.constant 32 : i32
    %164 = vector.broadcast %c32_i32 : i32 to vector<16x128xi32>
    %165 = arith.cmpi slt, %161, %164 : vector<16x128xi32>
    %166 = arith.andi %163, %165 : vector<16x128xi1>
    %cst_131 = arith.constant 0.000000e+00 : f32
    %167 = vector.broadcast %cst_131 : f32 to vector<16x128xf32>
    %168 = arith.select %166, %160, %167 : vector<16x128xi1>, vector<16x128xf32>
    %cst_132 = arith.constant dense<0.000000e+00> : vector<16xf32>
    %169 = vector.multi_reduction <add>, %168, %cst_132 [1] : vector<16x128xf32> to vector<16xf32>
    %170 = vector.shape_cast %169 : vector<16xf32> to vector<16x1xf32>
    %cst_133 = arith.constant 3.125000e-02 : f32
    %171 = vector.broadcast %cst_133 : f32 to vector<16x1xf32>
    %172 = arith.mulf %170, %171 : vector<16x1xf32>
    %cst_134 = arith.constant -3.000000e+38 : f32
    %173 = vector.broadcast %cst_134 : f32 to vector<16x128xf32>
    %174 = arith.select %166, %160, %173 : vector<16x128xi1>, vector<16x128xf32>
    %cst_135 = arith.constant dense<0xFF800000> : vector<16xf32>
    %175 = vector.multi_reduction <maximumf>, %174, %cst_135 [1] : vector<16x128xf32> to vector<16xf32>
    %176 = vector.shape_cast %175 : vector<16xf32> to vector<16x1xf32>
    %177 = tpu.concatenate %172, %176 in 0 : vector<16x1xf32>, vector<16x1xf32> -> vector<32x1xf32>
    %c0_136 = arith.constant 0 : index
    %c0_137 = arith.constant 0 : index
    %c0_138 = arith.constant 0 : index
    %178 = vector.load %arg10[%c0_136, %c0_137, %c0_138] : memref<3x16x32xf32, #tpu.memory_space<vmem>>, vector<1x16x32xf32>
    %179 = vector.shape_cast %178 : vector<1x16x32xf32> to vector<16x32xf32>
    %cst_139 = arith.constant dense<0.000000e+00> : vector<16x1xf32>
    %180 = tpu.matmul %179, %177, %cst_139 {dimension_numbers = #tpu.dot_dimension_numbers<[1], [0], [0], [1], [0, 0, 1, 1], [], []>} : vector<16x32xf32>, vector<32x1xf32>, vector<16x1xf32> -> vector<16x1xf32>
    %c0_140 = arith.constant 0 : index
    %c0_141 = arith.constant 0 : index
    %c0_142 = arith.constant 0 : index
    %181 = vector.load %arg11[%c0_140, %c0_141, %c0_142] : memref<3x1x1xf32, #tpu.memory_space<vmem>>, vector<1x1x1xf32>
    %182 = vector.shape_cast %181 : vector<1x1x1xf32> to vector<1x1xf32>
    %183 = vector.broadcast %182 : vector<1x1xf32> to vector<16x1xf32>
    %184 = arith.addf %180, %183 : vector<16x1xf32>
    %185 = arith.negf %184 : vector<16x1xf32>
    %186 = math.exp %185 : vector<16x1xf32>
    %cst_143 = arith.constant 1.000000e+00 : f32
    %187 = vector.broadcast %cst_143 : f32 to vector<16x1xf32>
    %188 = arith.addf %187, %186 : vector<16x1xf32>
    %189 = arith.divf %187, %188 : vector<16x1xf32>
    %cst_144 = arith.constant 2.000000e-01 : f32
    %190 = vector.broadcast %cst_144 : f32 to vector<16x1xf32>
    %191 = arith.cmpf oge, %189, %190 : vector<16x1xf32>
    %cst_145 = arith.constant 0.000000e+00 : f32
    %192 = vector.broadcast %cst_145 : f32 to vector<16x1xf32>
    %193 = arith.select %191, %189, %192 : vector<16x1xi1>, vector<16x1xf32>
    %c32_i32_146 = arith.constant 32 : i32
    %194 = vector.broadcast %c32_i32_146 : i32 to vector<16x128xi32>
    %195 = arith.cmpi sge, %161, %194 : vector<16x128xi32>
    %c64_i32 = arith.constant 64 : i32
    %196 = vector.broadcast %c64_i32 : i32 to vector<16x128xi32>
    %197 = arith.cmpi slt, %161, %196 : vector<16x128xi32>
    %198 = arith.andi %195, %197 : vector<16x128xi1>
    %cst_147 = arith.constant 0.000000e+00 : f32
    %199 = vector.broadcast %cst_147 : f32 to vector<16x128xf32>
    %200 = arith.select %198, %160, %199 : vector<16x128xi1>, vector<16x128xf32>
    %cst_148 = arith.constant dense<0.000000e+00> : vector<16xf32>
    %201 = vector.multi_reduction <add>, %200, %cst_148 [1] : vector<16x128xf32> to vector<16xf32>
    %202 = vector.shape_cast %201 : vector<16xf32> to vector<16x1xf32>
    %cst_149 = arith.constant 3.125000e-02 : f32
    %203 = vector.broadcast %cst_149 : f32 to vector<16x1xf32>
    %204 = arith.mulf %202, %203 : vector<16x1xf32>
    %cst_150 = arith.constant -3.000000e+38 : f32
    %205 = vector.broadcast %cst_150 : f32 to vector<16x128xf32>
    %206 = arith.select %198, %160, %205 : vector<16x128xi1>, vector<16x128xf32>
    %cst_151 = arith.constant dense<0xFF800000> : vector<16xf32>
    %207 = vector.multi_reduction <maximumf>, %206, %cst_151 [1] : vector<16x128xf32> to vector<16xf32>
    %208 = vector.shape_cast %207 : vector<16xf32> to vector<16x1xf32>
    %209 = tpu.concatenate %204, %208 in 0 : vector<16x1xf32>, vector<16x1xf32> -> vector<32x1xf32>
    %c1_152 = arith.constant 1 : index
    %c0_153 = arith.constant 0 : index
    %c0_154 = arith.constant 0 : index
    %210 = vector.load %arg10[%c1_152, %c0_153, %c0_154] : memref<3x16x32xf32, #tpu.memory_space<vmem>>, vector<1x16x32xf32>
    %211 = vector.shape_cast %210 : vector<1x16x32xf32> to vector<16x32xf32>
    %cst_155 = arith.constant dense<0.000000e+00> : vector<16x1xf32>
    %212 = tpu.matmul %211, %209, %cst_155 {dimension_numbers = #tpu.dot_dimension_numbers<[1], [0], [0], [1], [0, 0, 1, 1], [], []>} : vector<16x32xf32>, vector<32x1xf32>, vector<16x1xf32> -> vector<16x1xf32>
    %c1_156 = arith.constant 1 : index
    %c0_157 = arith.constant 0 : index
    %c0_158 = arith.constant 0 : index
    %213 = vector.load %arg11[%c1_156, %c0_157, %c0_158] : memref<3x1x1xf32, #tpu.memory_space<vmem>>, vector<1x1x1xf32>
    %214 = vector.shape_cast %213 : vector<1x1x1xf32> to vector<1x1xf32>
    %215 = vector.broadcast %214 : vector<1x1xf32> to vector<16x1xf32>
    %216 = arith.addf %212, %215 : vector<16x1xf32>
    %217 = arith.negf %216 : vector<16x1xf32>
    %218 = math.exp %217 : vector<16x1xf32>
    %cst_159 = arith.constant 1.000000e+00 : f32
    %219 = vector.broadcast %cst_159 : f32 to vector<16x1xf32>
    %220 = arith.addf %219, %218 : vector<16x1xf32>
    %221 = arith.divf %219, %220 : vector<16x1xf32>
    %cst_160 = arith.constant 2.000000e-01 : f32
    %222 = vector.broadcast %cst_160 : f32 to vector<16x1xf32>
    %223 = arith.cmpf oge, %221, %222 : vector<16x1xf32>
    %cst_161 = arith.constant 0.000000e+00 : f32
    %224 = vector.broadcast %cst_161 : f32 to vector<16x1xf32>
    %225 = arith.select %223, %221, %224 : vector<16x1xi1>, vector<16x1xf32>
    %c64_i32_162 = arith.constant 64 : i32
    %226 = vector.broadcast %c64_i32_162 : i32 to vector<16x128xi32>
    %227 = arith.cmpi sge, %161, %226 : vector<16x128xi32>
    %c128_i32 = arith.constant 128 : i32
    %228 = vector.broadcast %c128_i32 : i32 to vector<16x128xi32>
    %229 = arith.cmpi slt, %161, %228 : vector<16x128xi32>
    %230 = arith.andi %227, %229 : vector<16x128xi1>
    %cst_163 = arith.constant 0.000000e+00 : f32
    %231 = vector.broadcast %cst_163 : f32 to vector<16x128xf32>
    %232 = arith.select %230, %160, %231 : vector<16x128xi1>, vector<16x128xf32>
    %cst_164 = arith.constant dense<0.000000e+00> : vector<16xf32>
    %233 = vector.multi_reduction <add>, %232, %cst_164 [1] : vector<16x128xf32> to vector<16xf32>
    %234 = vector.shape_cast %233 : vector<16xf32> to vector<16x1xf32>
    %cst_165 = arith.constant 1.562500e-02 : f32
    %235 = vector.broadcast %cst_165 : f32 to vector<16x1xf32>
    %236 = arith.mulf %234, %235 : vector<16x1xf32>
    %cst_166 = arith.constant -3.000000e+38 : f32
    %237 = vector.broadcast %cst_166 : f32 to vector<16x128xf32>
    %238 = arith.select %230, %160, %237 : vector<16x128xi1>, vector<16x128xf32>
    %cst_167 = arith.constant dense<0xFF800000> : vector<16xf32>
    %239 = vector.multi_reduction <maximumf>, %238, %cst_167 [1] : vector<16x128xf32> to vector<16xf32>
    %240 = vector.shape_cast %239 : vector<16xf32> to vector<16x1xf32>
    %241 = tpu.concatenate %236, %240 in 0 : vector<16x1xf32>, vector<16x1xf32> -> vector<32x1xf32>
    %c2_168 = arith.constant 2 : index
    %c0_169 = arith.constant 0 : index
    %c0_170 = arith.constant 0 : index
    %242 = vector.load %arg10[%c2_168, %c0_169, %c0_170] : memref<3x16x32xf32, #tpu.memory_space<vmem>>, vector<1x16x32xf32>
    %243 = vector.shape_cast %242 : vector<1x16x32xf32> to vector<16x32xf32>
    %cst_171 = arith.constant dense<0.000000e+00> : vector<16x1xf32>
    %244 = tpu.matmul %243, %241, %cst_171 {dimension_numbers = #tpu.dot_dimension_numbers<[1], [0], [0], [1], [0, 0, 1, 1], [], []>} : vector<16x32xf32>, vector<32x1xf32>, vector<16x1xf32> -> vector<16x1xf32>
    %c2_172 = arith.constant 2 : index
    %c0_173 = arith.constant 0 : index
    %c0_174 = arith.constant 0 : index
    %245 = vector.load %arg11[%c2_172, %c0_173, %c0_174] : memref<3x1x1xf32, #tpu.memory_space<vmem>>, vector<1x1x1xf32>
    %246 = vector.shape_cast %245 : vector<1x1x1xf32> to vector<1x1xf32>
    %247 = vector.broadcast %246 : vector<1x1xf32> to vector<16x1xf32>
    %248 = arith.addf %244, %247 : vector<16x1xf32>
    %249 = arith.negf %248 : vector<16x1xf32>
    %250 = math.exp %249 : vector<16x1xf32>
    %cst_175 = arith.constant 1.000000e+00 : f32
    %251 = vector.broadcast %cst_175 : f32 to vector<16x1xf32>
    %252 = arith.addf %251, %250 : vector<16x1xf32>
    %253 = arith.divf %251, %252 : vector<16x1xf32>
    %cst_176 = arith.constant 2.000000e-01 : f32
    %254 = vector.broadcast %cst_176 : f32 to vector<16x1xf32>
    %255 = arith.cmpf oge, %253, %254 : vector<16x1xf32>
    %cst_177 = arith.constant 0.000000e+00 : f32
    %256 = vector.broadcast %cst_177 : f32 to vector<16x1xf32>
    %257 = arith.select %255, %253, %256 : vector<16x1xi1>, vector<16x1xf32>
    %c32_i32_178 = arith.constant 32 : i32
    %258 = vector.broadcast %c32_i32_178 : i32 to vector<16x128xi32>
    %259 = arith.cmpi slt, %161, %258 : vector<16x128xi32>
    %c64_i32_179 = arith.constant 64 : i32
    %260 = vector.broadcast %c64_i32_179 : i32 to vector<16x128xi32>
    %261 = arith.cmpi slt, %161, %260 : vector<16x128xi32>
    %262 = vector.shape_cast %225 : vector<16x1xf32> to vector<16x1xf32>
    %263 = vector.broadcast %262 : vector<16x1xf32> to vector<16x128xf32>
    %264 = vector.shape_cast %257 : vector<16x1xf32> to vector<16x1xf32>
    %265 = vector.broadcast %264 : vector<16x1xf32> to vector<16x128xf32>
    %266 = arith.select %261, %263, %265 : vector<16x128xi1>, vector<16x128xf32>
    %267 = vector.shape_cast %193 : vector<16x1xf32> to vector<16x1xf32>
    %268 = vector.broadcast %267 : vector<16x1xf32> to vector<16x128xf32>
    %269 = arith.select %259, %268, %266 : vector<16x128xi1>, vector<16x128xf32>
    %270 = arith.mulf %160, %269 : vector<16x128xf32>
    %c0_180 = arith.constant 0 : index
    %c0_181 = arith.constant 0 : index
    %271 = vector.load %arg12[%c0_180, %c0_181] : memref<1x128xf32, #tpu.memory_space<vmem>>, vector<1x128xf32>
    %272 = vector.broadcast %271 : vector<1x128xf32> to vector<16x128xf32>
    %273 = arith.mulf %270, %272 : vector<16x128xf32>
    %c0_182 = arith.constant 0 : index
    %c0_183 = arith.constant 0 : index
    %274 = vector.load %arg13[%c0_182, %c0_183] : memref<1x128xf32, #tpu.memory_space<vmem>>, vector<1x128xf32>
    %275 = vector.broadcast %274 : vector<1x128xf32> to vector<16x128xf32>
    %276 = arith.addf %273, %275 : vector<16x128xf32>
    %cst_184 = arith.constant 0.000000e+00 : f32
    %277 = vector.broadcast %cst_184 : f32 to vector<16x128xf32>
    %278 = arith.cmpf oge, %276, %277 : vector<16x128xf32>
    %cst_185 = arith.constant 0.00999999977 : f32
    %279 = vector.broadcast %cst_185 : f32 to vector<16x128xf32>
    %280 = arith.mulf %279, %276 : vector<16x128xf32>
    %281 = arith.select %278, %276, %280 : vector<16x128xi1>, vector<16x128xf32>
    %282 = vector.extract_strided_slice %281 {offsets = [0, 0], sizes = [12, 128], strides = [1, 1]} : vector<16x128xf32> to vector<12x128xf32>
    %283 = vector.extract_strided_slice %281 {offsets = [4, 0], sizes = [12, 128], strides = [1, 1]} : vector<16x128xf32> to vector<12x128xf32>
    %284 = arith.maximumf %282, %283 : vector<12x128xf32>
    %285 = vector.extract_strided_slice %284 {offsets = [0, 0], sizes = [11, 128], strides = [1, 1]} : vector<12x128xf32> to vector<11x128xf32>
    %286 = vector.extract_strided_slice %284 {offsets = [1, 0], sizes = [11, 128], strides = [1, 1]} : vector<12x128xf32> to vector<11x128xf32>
    %287 = arith.maximumf %285, %286 : vector<11x128xf32>
    %c0_186 = arith.constant 0 : index
    %c0_187 = arith.constant 0 : index
    %288 = vector.load %arg19[%c0_186, %c0_187] : memref<16x128xf32, #tpu.memory_space<vmem>>, vector<11x128xf32>
    tpu.vector_store %arg19[%c0_186, %c0_187], %287 {strides = array<i32>} : memref<16x128xf32, #tpu.memory_space<vmem>>, vector<11x128xf32>,
    %c0_188 = arith.constant 0 : index
    %c0_189 = arith.constant 0 : index
    %289 = tpu.strided_load %arg19[%c0_188, %c0_189] {strides = array<i32: 2, 1>} : memref<16x128xf32, #tpu.memory_space<vmem>>, vector<2x128xf32>
    %c0_190 = arith.constant 0 : index
    %c0_191 = arith.constant 0 : index
    %c0_192 = arith.constant 0 : index
    %290 = vector.load %arg14[%c0_190, %c0_191, %c0_192] : memref<1x4x128xf32, #tpu.memory_space<vmem>>, vector<1x2x128xf32>
    %291 = vector.shape_cast %290 : vector<1x2x128xf32> to vector<2x128xf32>
    %292 = vector.shape_cast %289 : vector<2x128xf32> to vector<1x2x128xf32>
    tpu.vector_store %arg14[%c0_190, %c0_191, %c0_192], %292 {strides = array<i32>} : memref<1x4x128xf32, #tpu.memory_space<vmem>>, vector<1x2x128xf32>,
    %c8 = arith.constant 8 : index
    %c0_193 = arith.constant 0 : index
    %293 = tpu.strided_load %arg19[%c8, %c0_193] {strides = array<i32: 2, 1>} : memref<16x128xf32, #tpu.memory_space<vmem>>, vector<2x128xf32>
    %c0_194 = arith.constant 0 : index
    %c2_195 = arith.constant 2 : index
    %c0_196 = arith.constant 0 : index
    %294 = vector.load %arg14[%c0_194, %c2_195, %c0_196] : memref<1x4x128xf32, #tpu.memory_space<vmem>>, vector<1x2x128xf32>
    %295 = vector.shape_cast %294 : vector<1x2x128xf32> to vector<2x128xf32>
    %296 = vector.shape_cast %293 : vector<2x128xf32> to vector<1x2x128xf32>
    tpu.vector_store %arg14[%c0_194, %c2_195, %c0_196], %296 {strides = array<i32>} : memref<1x4x128xf32, #tpu.memory_space<vmem>>, vector<1x2x128xf32>,
    return
  }
  func.func @transform_0(%arg0: i32) -> (i32, i32, i32) {
    %c0_i32 = arith.constant 0 : i32
    %c0_i32_0 = arith.constant 0 : i32
    %c0_i32_1 = arith.constant 0 : i32
    return %arg0, %c0_i32, %c0_i32_0 : i32, i32, i32
  }
  func.func @transform_1(%arg0: i32) -> (i32, i32) {
    %c0_i32 = arith.constant 0 : i32
    %c0_i32_0 = arith.constant 0 : i32
    %c0_i32_1 = arith.constant 0 : i32
    return %c0_i32, %c0_i32_0 : i32, i32
  }
  func.func @transform_2(%arg0: i32) -> (i32, i32) {
    %c0_i32 = arith.constant 0 : i32
    %c0_i32_0 = arith.constant 0 : i32
    %c0_i32_1 = arith.constant 0 : i32
    return %c0_i32, %c0_i32_0 : i32, i32
  }
  func.func @transform_3(%arg0: i32) -> (i32, i32) {
    %c0_i32 = arith.constant 0 : i32
    %c0_i32_0 = arith.constant 0 : i32
    %c0_i32_1 = arith.constant 0 : i32
    return %c0_i32, %c0_i32_0 : i32, i32
  }
  func.func @transform_4(%arg0: i32) -> (i32, i32, i32) {
    %c0_i32 = arith.constant 0 : i32
    %c0_i32_0 = arith.constant 0 : i32
    %c0_i32_1 = arith.constant 0 : i32
    %c0_i32_2 = arith.constant 0 : i32
    return %c0_i32, %c0_i32_0, %c0_i32_1 : i32, i32, i32
  }
  func.func @transform_5(%arg0: i32) -> (i32, i32) {
    %c0_i32 = arith.constant 0 : i32
    %c0_i32_0 = arith.constant 0 : i32
    %c0_i32_1 = arith.constant 0 : i32
    return %c0_i32, %c0_i32_0 : i32, i32
  }
  func.func @transform_6(%arg0: i32) -> (i32, i32) {
    %c0_i32 = arith.constant 0 : i32
    %c0_i32_0 = arith.constant 0 : i32
    %c0_i32_1 = arith.constant 0 : i32
    return %c0_i32, %c0_i32_0 : i32, i32
  }
  func.func @transform_7(%arg0: i32) -> (i32, i32, i32) {
    %c0_i32 = arith.constant 0 : i32
    %c0_i32_0 = arith.constant 0 : i32
    %c0_i32_1 = arith.constant 0 : i32
    %c0_i32_2 = arith.constant 0 : i32
    return %c0_i32, %c0_i32_0, %c0_i32_1 : i32, i32, i32
  }
  func.func @transform_8(%arg0: i32) -> (i32, i32) {
    %c0_i32 = arith.constant 0 : i32
    %c0_i32_0 = arith.constant 0 : i32
    %c0_i32_1 = arith.constant 0 : i32
    return %c0_i32, %c0_i32_0 : i32, i32
  }
  func.func @transform_9(%arg0: i32) -> (i32, i32, i32) {
    %c0_i32 = arith.constant 0 : i32
    %c0_i32_0 = arith.constant 0 : i32
    %c0_i32_1 = arith.constant 0 : i32
    %c0_i32_2 = arith.constant 0 : i32
    return %c0_i32, %c0_i32_0, %c0_i32_1 : i32, i32, i32
  }
  func.func @transform_10(%arg0: i32) -> (i32, i32, i32) {
    %c0_i32 = arith.constant 0 : i32
    %c0_i32_0 = arith.constant 0 : i32
    %c0_i32_1 = arith.constant 0 : i32
    %c0_i32_2 = arith.constant 0 : i32
    return %c0_i32, %c0_i32_0, %c0_i32_1 : i32, i32, i32
  }
  func.func @transform_11(%arg0: i32) -> (i32, i32) {
    %c0_i32 = arith.constant 0 : i32
    %c0_i32_0 = arith.constant 0 : i32
    %c0_i32_1 = arith.constant 0 : i32
    return %c0_i32, %c0_i32_0 : i32, i32
  }
  func.func @transform_12(%arg0: i32) -> (i32, i32) {
    %c0_i32 = arith.constant 0 : i32
    %c0_i32_0 = arith.constant 0 : i32
    %c0_i32_1 = arith.constant 0 : i32
    return %c0_i32, %c0_i32_0 : i32, i32
  }
  func.func @transform_13(%arg0: i32) -> (i32, i32, i32) {
    %c0_i32 = arith.constant 0 : i32
    %c0_i32_0 = arith.constant 0 : i32
    %c0_i32_1 = arith.constant 0 : i32
    return %arg0, %c0_i32, %c0_i32_0 : i32, i32, i32
  }
}

</mosaic_0001>

<bundles_post_ra>
// kernel: pycnn_forward.2
= control target key start
LH: loop header
LB: loop body
LE: loop exit
PB: predicated region body
PF: predicated region fallthrough
CT: control target
= control target key end

     0   :  { %s7894_s25 = smov 0   ;;  %s10138_s0 = inlined_call_operand.vmem [shape: bf16[2,256,36], index: 0, kind: input, shape index: {}]   ;;  %s10139_s1 = inlined_call_operand.vmem [shape: bf16[36,32], index: 1, kind: input, shape index: {}]   ;;  %s10140_s2 = inlined_call_operand.vmem [shape: f32[1,32], index: 2, kind: input, shape index: {}]   ;;  %s10141_s3 = inlined_call_operand.vmem [shape: f32[1,32], index: 3, kind: input, shape index: {}]   ;;  %s10142_s4 = inlined_call_operand.vmem [shape: bf16[3,96,64], index: 4, kind: input, shape index: {}]   ;;  %s10143_s5 = inlined_call_operand.vmem [shape: f32[1,64], index: 5, kind: input, shape index: {}]   ;;  %s10144_s6 = inlined_call_operand.vmem [shape: f32[1,64], index: 6, kind: input, shape index: {}]   ;;  %s10145_s7 = inlined_call_operand.vmem [shape: bf16[7,448,128], index: 7, kind: input, shape index: {}]   ;;  %s10146_s8 = inlined_call_operand.vmem [shape: f32[128,128], index: 8, kind: input, shape index: {}]   ;;  %s10147_s9 = inlined_call_operand.vmem [shape: f32[3,16,32], index: 9, kind: input, shape index: {}]   ;;  %s10148_s10 = inlined_call_operand.vmem [shape: f32[3,1,1], index: 10, kind: input, shape index: {}]   ;;  %s10149_s11 = inlined_call_operand.vmem [shape: f32[1,128], index: 11, kind: input, shape index: {}]   ;;  %s10150_s12 = inlined_call_operand.vmem [shape: f32[1,128], index: 12, kind: input, shape index: {}]   ;;  %s10151_s13 = inlined_call_operand.vmem [shape: f32[2,4,128], index: 13, kind: output, shape index: {}]  }
   0x1 LB: > { %s6111_s26 = sadd.s32 4294967295, %s7817_s25   ;;  %p6115_p0 = scmp.ge.s32.totalorder %s7817_s25, 1  ;;  %s7817_s25 = sphi %s7894_s25, %s23_s25  }
   0x2   : > { %p387_p1 = scmp.lt.s32.totalorder %s7817_s25, 3 }
   0x4   : > { %p388_p2 = pnand %p6115_p0, %p387_p1 }
   0x5   : > { %p430_p3 = scmp.lt.s32.totalorder (!%p388_p2), %s6111_s26, 1  ;;  %s7820_s22 = smov (!%p388_p2), 32  }
   0x6   : > { %391 = sbr.rel (%p388_p2) target bundleno = 2707 (0xa93), region = 72  ;;  %s7821_s27 = smov (!%p388_p2), 64  }
   0xb   : > { %v476_v0 = vld [vmem:[%s10139_s1 + $0x10] sm:$0x3]  ;;  %vm621_vm0 = vcmask 1041408   ;;  %s10159_s26 = smov (!%p430_p3, %s6111_s26), 1  ;;  %v7514_v4 = vld [vmem:[%s10139_s1 + $0x8] sm:$0xff]  ;;  %v7513_v5 = vld [vmem:[%s10139_s1] sm:$0xff] }
   0xc   : > { %v566_v1 = vunpack.c.l.b16 %v476_v0  ;;  %s7496_s14 = sshll.u32 %s10159_s26, 7  ;;  %vm572_vm1 = vcmask 293888   ;;  %vm1094_vm2 = vcmask 785408   ;;  %v7819_v16 = vmov 0.0   ;;  %v7953_v18 = vld [vmem:[%s10140_s2] ss:$0 sm:$0xff] }
   0xd   : > { %s7918_s19 = scalar_lea.vmem %s10138_s0, %s7496_s14  ;;  %1095 = vst.msk [vmem:[#allocation2] sm:$0xff] %vm1094_vm2, %v7819_v16  ;;  %v7969_v23 = vld [vmem:[%s10141_s3] ss:$0 sm:$0xff]  ;;  %vm942_vm7 = vcmask 1046528   ;;  %vm1062_vm8 = vcmask 261120  }
   0xe   : > { %v569_v2 = vpack.c.b16 %v566_v1, %v566_v1  ;;  %v7497_v6 = vld [vmem:[%s7918_s19] sm:$0xff]  ;;  %v7498_v7 = vld [vmem:[%s7918_s19 + $0x8] sm:$0xff]  ;;  %v7499_v8 = vld [vmem:[%s7918_s19 + $0x10] sm:$0xff]  ;;  %1096 = vst.msk [vmem:[#allocation2 + $0x8] sm:$0xff] %vm1094_vm2, %v7819_v16 }
   0xf   : > { %v7500_v9 = vld [vmem:[%s7918_s19 + $0x18] sm:$0xff]  ;;  %v7501_v10 = vld [vmem:[%s7918_s19 + $0x20] sm:$0xff]  ;;  %v7502_v11 = vld [vmem:[%s7918_s19 + $0x28] sm:$0xff]  ;;  %1097 = vst.msk [vmem:[#allocation2 + $0x10] sm:$0xff] %vm1094_vm2, %v7819_v16 }
  0x10   : > { %v623_v3 = vsel %vm621_vm0, %v569_v2, 0  ;;  %v7503_v12 = vld [vmem:[%s7918_s19 + $0x30] sm:$0xff]  ;;  %v7504_v13 = vld [vmem:[%s7918_s19 + $0x38] sm:$0xff]  ;;  %v7505_v14 = vld [vmem:[%s7918_s19 + $0x40] sm:$0xff]  ;;  %1098 = vst.msk [vmem:[#allocation2 + $0x18] sm:$0xff] %vm1094_vm2, %v7819_v16 }
  0x11   : > { %630 = vmatpush.bf16.msra.mxu0 %v623_v3  ;;  %1099 = vst.msk [vmem:[#allocation2 + $0x20] sm:$0xff] %vm1094_vm2, %v7819_v16  ;;  %v7506_v19 = vld [vmem:[%s7918_s19 + $0x48] sm:$0xff]  ;;  %v7507_v41 = vld [vmem:[%s7918_s19 + $0x50] sm:$0xff]  ;;  %v7508_v61 = vld [vmem:[%s7918_s19 + $0x58] sm:$0xff] }
  0x12   : > { %1100 = vst.msk [vmem:[#allocation2 + $0x28] sm:$0xff] %vm1094_vm2, %v7819_v16 }
  0x13   : > { %1101 = vst.msk [vmem:[#allocation2 + $0x30] sm:$0xff] %vm1094_vm2, %v7819_v16 }
  0x14   : > { %1102 = vst.msk [vmem:[#allocation2 + $0x38] sm:$0xff] %vm1094_vm2, %v7819_v16 }
  0x15   : > { %631 = vmatpush.bf16.msra.mxu0 %v7514_v4  ;;  %v1139_v20 = vld [vmem:[#allocation2 + $0x1] sm:$0xff]  ;;  %1103 = vst.msk [vmem:[#allocation2 + $0x40] sm:$0xff] %vm1094_vm2, %v7819_v16 }
  0x16   : > { %1179 = vrot.lane.b32.xlu0 %v1139_v20, %s7820_s22  ;;  %1104 = vst.msk [vmem:[#allocation2 + $0x48] sm:$0xff] %vm1094_vm2, %v7819_v16  ;;  %v1140_v63 = vld [vmem:[#allocation2 + $0x9] sm:$0xff] }
  0x17   : > { %1105 = vst.msk [vmem:[#allocation2 + $0x50] sm:$0xff] %vm1094_vm2, %v7819_v16 }
  0x18   : > { %1106 = vst.msk [vmem:[#allocation2 + $0x58] sm:$0xff] %vm1094_vm2, %v7819_v16  ;;  %v1142_v0 = vld [vmem:[#allocation2 + $0x19] sm:$0xff] }
  0x19   : > { %632 = vmatpush.bf16.msra.mxu0 %v7513_v5  ;;  %1107 = vst.msk [vmem:[#allocation2 + $0x60] sm:$0xff] %vm1094_vm2, %v7819_v16 }
  0x1a   : > { %1108 = vst.msk [vmem:[#allocation2 + $0x68] sm:$0xff] %vm1094_vm2, %v7819_v16 }
  0x1b   : > { %1109 = vst.msk [vmem:[#allocation2 + $0x70] sm:$0xff] %vm1094_vm2, %v7819_v16 }
  0x1c   : > { %6191 = vmatmul.msk.bf16.vlgmr.msra.gmra.mxu0 %vm572_vm1, %v7497_v6  ;;  %1110 = vst.msk [vmem:[#allocation2 + $0x78] sm:$0xff] %vm1094_vm2, %v7819_v16 }
  0x1d   : > { %1111 = vst.msk [vmem:[#allocation2 + $0x80] sm:$0xff] %vm1094_vm2, %v7819_v16 }
  0x1e   : > { %1112 = vst.msk [vmem:[#allocation2 + $0x88] sm:$0xff] %vm1094_vm2, %v7819_v16  ;;  %1181 = vrot.lane.b32.xlu0 %v1140_v63, %s7820_s22 }
  0x1f   : > { %1113 = vst.msk [vmem:[#allocation2 + $0x90] sm:$0xff] %vm1094_vm2, %v7819_v16 }
  0x20   : > { %1114 = vst.msk [vmem:[#allocation2 + $0x98] sm:$0xff] %vm1094_vm2, %v7819_v16 }
  0x21   : > { %1115 = vst.msk [vmem:[#allocation2 + $0xa0] sm:$0xff] %vm1094_vm2, %v7819_v16 }
  0x22   : > { %1997 = vst [vmem:[#allocation3] sm:$0xff] %v7819_v16 }
  0x23   : > { %1998 = vst [vmem:[#allocation3 + $0x8] sm:$0xff] %v7819_v16 }
  0x24   : > { %1999 = vst [vmem:[#allocation3 + $0x10] sm:$0xff] %v7819_v16 }
  0x25   : > { %2001 = vst [vmem:[#allocation3 + $0x20] sm:$0xff] %v7819_v16 }
  0x26   : > { %2002 = vst [vmem:[#allocation3 + $0x28] sm:$0xff] %v7819_v16  ;;  %1185 = vrot.lane.b32.xlu0 %v1142_v0, %s7820_s22 }
  0x27   : > { %2003 = vst [vmem:[#allocation3 + $0x30] sm:$0xff] %v7819_v16 }
  0x28   : > { %2005 = vst [vmem:[#allocation3 + $0x40] sm:$0xff] %v7819_v16 }
  0x29   : > { %2006 = vst [vmem:[#allocation3 + $0x48] sm:$0xff] %v7819_v16 }
  0x2a   : > { %2007 = vst [vmem:[#allocation3 + $0x50] sm:$0xff] %v7819_v16 }
  0x2b   : > { %2009 = vst [vmem:[#allocation3 + $0x60] sm:$0xff] %v7819_v16 }
  0x2c   : > { %6192 = vmatmul.msk.bf16.gmra.mxu0 %vm572_vm1, %v7498_v7  ;;  %2010 = vst [vmem:[#allocation3 + $0x68] sm:$0xff] %v7819_v16 }
  0x2d   : > { %2011 = vst [vmem:[#allocation3 + $0x70] sm:$0xff] %v7819_v16 }
  0x2e   : > { %2013 = vst [vmem:[#allocation3 + $0x80] sm:$0xff] %v7819_v16 }
  0x2f   : > { %2014 = vst [vmem:[#allocation3 + $0x88] sm:$0xff] %v7819_v16 }
  0x30   : > { %2015 = vst [vmem:[#allocation3 + $0x90] sm:$0xff] %v7819_v16 }
  0x31   : > { %2017 = vst [vmem:[#allocation3 + $0xa0] sm:$0xff] %v7819_v16 }
  0x32   : > { %2018 = vst [vmem:[#allocation3 + $0xa8] sm:$0xff] %v7819_v16 }
  0x33   : > { %2019 = vst [vmem:[#allocation3 + $0xb0] sm:$0xff] %v7819_v16 }
  0x34   : > { %2021 = vst [vmem:[#allocation3 + $0xc0] sm:$0xff] %v7819_v16 }
  0x35   : > { %2022 = vst [vmem:[#allocation3 + $0xc8] sm:$0xff] %v7819_v16 }
  0x36   : > { %2023 = vst [vmem:[#allocation3 + $0xd0] sm:$0xff] %v7819_v16 }
  0x37   : > { %2025 = vst [vmem:[#allocation3 + $0xe0] sm:$0xff] %v7819_v16 }
  0x38   : > { %2026 = vst [vmem:[#allocation3 + $0xe8] sm:$0xff] %v7819_v16 }
  0x39   : > { %2027 = vst [vmem:[#allocation3 + $0xf0] sm:$0xff] %v7819_v16 }
  0x3a   : > { %2029 = vst [vmem:[#allocation3 + $0x100] sm:$0xff] %v7819_v16 }
  0x3b   : > { %2030 = vst [vmem:[#allocation3 + $0x108] sm:$0xff] %v7819_v16 }
  0x3c   : > { %6193 = vmatmul.msk.bf16.gmra.mxu0 %vm572_vm1, %v7499_v8  ;;  %2031 = vst [vmem:[#allocation3 + $0x110] sm:$0xff] %v7819_v16  ;;  %v7509_v8 = vld [vmem:[%s7918_s19 + $0x60] sm:$0xff] }
  0x3d   : > { %2033 = vst [vmem:[#allocation3 + $0x120] sm:$0xff] %v7819_v16 }
  0x3e   : > { %2034 = vst [vmem:[#allocation3 + $0x128] sm:$0xff] %v7819_v16 }
  0x3f   : > { %2035 = vst [vmem:[#allocation3 + $0x130] sm:$0xff] %v7819_v16 }
  0x40   : > { %2037 = vst [vmem:[#allocation3 + $0x140] sm:$0xff] %v7819_v16 }
  0x41   : > { %2038 = vst [vmem:[#allocation3 + $0x148] sm:$0xff] %v7819_v16 }
  0x42   : > { %2039 = vst [vmem:[#allocation3 + $0x150] sm:$0xff] %v7819_v16 }
  0x43   : > { %2041 = vst [vmem:[#allocation3 + $0x160] sm:$0xff] %v7819_v16 }
  0x44   : > { %2042 = vst [vmem:[#allocation3 + $0x168] sm:$0xff] %v7819_v16 }
  0x45   : > { %2043 = vst [vmem:[#allocation3 + $0x170] sm:$0xff] %v7819_v16 }
  0x46   : > { %2045 = vst [vmem:[#allocation3 + $0x180] sm:$0xff] %v7819_v16 }
  0x47   : > { %2046 = vst [vmem:[#allocation3 + $0x188] sm:$0xff] %v7819_v16 }
  0x48   : > { %2047 = vst [vmem:[#allocation3 + $0x190] sm:$0xff] %v7819_v16 }
  0x49   : > { %2049 = vst [vmem:[#allocation3 + $0x1a0] sm:$0xff] %v7819_v16 }
  0x4a   : > { %2050 = vst [vmem:[#allocation3 + $0x1a8] sm:$0xff] %v7819_v16 }
  0x4b   : > { %2051 = vst [vmem:[#allocation3 + $0x1b0] sm:$0xff] %v7819_v16 }
  0x4c   : > { %6194 = vmatmul.msk.bf16.gmra.mxu0 %vm572_vm1, %v7500_v9  ;;  %2053 = vst [vmem:[#allocation3 + $0x1c0] sm:$0xff] %v7819_v16 }
  0x4d   : > { %2054 = vst [vmem:[#allocation3 + $0x1c8] sm:$0xff] %v7819_v16 }
  0x4e   : > { %2055 = vst [vmem:[#allocation3 + $0x1d0] sm:$0xff] %v7819_v16 }
  0x4f   : > { %2057 = vst [vmem:[#allocation3 + $0x1e0] sm:$0xff] %v7819_v16 }
  0x50   : > { %2058 = vst [vmem:[#allocation3 + $0x1e8] sm:$0xff] %v7819_v16 }
  0x51   : > { %2059 = vst [vmem:[#allocation3 + $0x1f0] sm:$0xff] %v7819_v16 }
  0x52   : > { %2061 = vst [vmem:[#allocation3 + $0x200] sm:$0xff] %v7819_v16 }
  0x53   : > { %2062 = vst [vmem:[#allocation3 + $0x208] sm:$0xff] %v7819_v16 }
  0x54   : > { %2063 = vst [vmem:[#allocation3 + $0x210] sm:$0xff] %v7819_v16 }
  0x55   : > { %2065 = vst [vmem:[#allocation3 + $0x220] sm:$0xff] %v7819_v16 }
  0x56   : > { %2066 = vst [vmem:[#allocation3 + $0x228] sm:$0xff] %v7819_v16 }
  0x57   : > { %2067 = vst [vmem:[#allocation3 + $0x230] sm:$0xff] %v7819_v16 }
  0x58   : > { %2069 = vst [vmem:[#allocation3 + $0x240] sm:$0xff] %v7819_v16 }
  0x59   : > { %2070 = vst [vmem:[#allocation3 + $0x248] sm:$0xff] %v7819_v16 }
  0x5a   : > { %2071 = vst [vmem:[#allocation3 + $0x250] sm:$0xff] %v7819_v16 }
  0x5b   : > { %2073 = vst [vmem:[#allocation3 + $0x260] sm:$0xff] %v7819_v16 }
  0x5c   : > { %6195 = vmatmul.msk.bf16.gmra.mxu0 %vm572_vm1, %v7501_v10  ;;  %2074 = vst [vmem:[#allocation3 + $0x268] sm:$0xff] %v7819_v16 }
  0x5d   : > { %2075 = vst [vmem:[#allocation3 + $0x270] sm:$0xff] %v7819_v16 }
  0x5e   : > { %2077 = vst [vmem:[#allocation3 + $0x280] sm:$0xff] %v7819_v16 }
  0x6c   : > { %6196 = vmatmul.msk.bf16.gmra.mxu0 %vm572_vm1, %v7502_v11 }
  0x7c   : > { %6197 = vmatmul.msk.bf16.gmra.mxu0 %vm572_vm1, %v7503_v12 }
  0x8c   : > { %6198 = vmatmul.msk.bf16.gmra.mxu0 %vm572_vm1, %v7504_v13 }
  0x99   : > { %v634_v15 = vpop.f32.mrf.mxu0 }
  0x9a   : > { %v718_v22 = vmul.f32 %v7953_v18, %v634_v15 }
  0x9c   : > { %6199 = vmatmul.msk.bf16.gmra.mxu0 %vm572_vm1, %v7505_v14  ;;  %v754_v27 = vadd.f32 %v7969_v23, %v718_v22 }
  0x9e   : > { %v818_v31 = vmul.f32 0.01, %v754_v27  ;;  %vm786_vm4 = vcmp.ge.f32.partialorder %v754_v27, 0.0 }
  0xa0   : > { %v850_v36 = vsel %vm786_vm4, %v754_v27, %v818_v31 }
  0xa1   : > { %v636_v17 = vpop.f32.mrf.mxu0 }
  0xa2   : > { %v719_v25 = vmul.f32 %v7953_v18, %v636_v17 }
  0xa4   : > { %v755_v28 = vadd.f32 %v7969_v23, %v719_v25 }
  0xa6   : > { %v819_v33 = vmul.f32 0.01, %v755_v28  ;;  %vm787_vm5 = vcmp.ge.f32.partialorder %v755_v28, 0.0 }
  0xa8   : > { %v851_v39 = vsel %vm787_vm5, %v755_v28, %v819_v33 }
  0xa9   : > { %v639_v21 = vpop.f32.mrf.mxu0 }
  0xaa   : > { %v720_v24 = vmul.f32 %v7953_v18, %v639_v21 }
  0xac   : > { %v756_v26 = vadd.f32 %v7969_v23, %v720_v24  ;;  %6200 = vmatmul.msk.bf16.gmra.mxu0 %vm572_vm1, %v7506_v19 }
  0xae   : > { %v820_v29 = vmul.f32 0.01, %v756_v26  ;;  %vm788_vm3 = vcmp.ge.f32.partialorder %v756_v26, 0.0 }
  0xb0   : > { %v852_v34 = vsel %vm788_vm3, %v756_v26, %v820_v29  ;;  %v7510_v29 = vld [vmem:[%s7918_s19 + $0x68] sm:$0xff] }
  0xb1   : > { %v641_v30 = vpop.f32.mrf.mxu0  ;;  %v882_v38 = vmax.f32 %v850_v36, %v852_v34 }
  0xb2   : > { %v721_v32 = vmul.f32 %v7953_v18, %v641_v30 }
  0xb3   : > { %v943_v45 = vrot.slane %v882_v38, 1 }
  0xb4   : > { %v757_v35 = vadd.f32 %v7969_v23, %v721_v32 }
  0xb6   : > { %vm789_vm6 = vcmp.ge.f32.partialorder %v757_v35, 0.0  ;;  %v821_v37 = vmul.f32 0.01, %v757_v35 }
  0xb8   : > { %v853_v40 = vsel %vm789_vm6, %v757_v35, %v821_v37 }
  0xb9   : > { %v883_v42 = vmax.f32 %v851_v39, %v853_v40  ;;  %v644_v43 = vpop.f32.mrf.mxu0 }
  0xba   : > { %v722_v44 = vmul.f32 %v7953_v18, %v644_v43 }
  0xbb   : > { %v944_v46 = vrot.slane %v883_v42, 1 }
  0xbc   : > { %v758_v47 = vadd.f32 %v7969_v23, %v722_v44  ;;  %6201 = vmatmul.msk.bf16.gmra.mxu0 %vm572_vm1, %v7507_v41 }
  0xbd   : > { %v945_v48 = vsel %vm942_vm7, %v943_v45, %v944_v46 }
  0xbe   : > { %v1032_v49 = vmax.f32 %v882_v38, %v945_v48  ;;  %vm790_vm9 = vcmp.ge.f32.partialorder %v758_v47, 0.0  ;;  %v822_v50 = vmul.f32 0.01, %v758_v47 }
  0xc0   : > { %1063 = vst.msk [vmem:[#allocation4] sm:$0xff] %vm1062_vm8, %v1032_v49  ;;  %v8018_v51 = vsel %vm790_vm9, %v758_v47, %v822_v50  ;;  %v1144_v49 = vld [vmem:[#allocation2 + $0x29] sm:$0xff] }
  0xc1   : > { %v884_v52 = vmax.f32 %v852_v34, %v8018_v51  ;;  %v646_v53 = vpop.f32.mrf.mxu0  ;;  %1189 = vrot.lane.b32.xlu2 %v1144_v49, %s7820_s22 }
  0xc2   : > { %v723_v54 = vmul.f32 %v7953_v18, %v646_v53 }
  0xc3   : > { %v946_v55 = vrot.slane %v884_v52, 1 }
  0xc4   : > { %v759_v56 = vadd.f32 %v7969_v23, %v723_v54 }
  0xc5   : > { %v947_v57 = vsel %vm942_vm7, %v944_v46, %v946_v55  ;;  %v7511_v46 = vld [vmem:[%s7918_s19 + $0x70] sm:$0xff] }
  0xc6   : > { %v1033_v58 = vmax.f32 %v883_v42, %v947_v57  ;;  %vm791_vm10 = vcmp.ge.f32.partialorder %v759_v56, 0.0  ;;  %v823_v59 = vmul.f32 0.01, %v759_v56 }
  0xc8   : > { %1064 = vst.msk [vmem:[#allocation4 + $0x8] sm:$0xff] %vm1062_vm8, %v1033_v58  ;;  %v855_v60 = vsel %vm791_vm10, %v759_v56, %v823_v59 }
  0xc9   : > { %v649_v62 = vpop.f32.mrf.mxu0 }
  0xca   : > { %v724_v2 = vmul.f32 %v7953_v18, %v649_v62 }
  0xcc   : > { %6202 = vmatmul.msk.bf16.gmra.mxu0 %vm572_vm1, %v7508_v61  ;;  %v760_v4 = vadd.f32 %v7969_v23, %v724_v2 }
  0xce   : > { %v824_v6 = vmul.f32 0.01, %v760_v4  ;;  %vm792_vm11 = vcmp.ge.f32.partialorder %v760_v4, 0.0 }
  0xcf   : > { %v1116_v37 = vld [vmem:[#allocation4] ss:$2 sm:$0xff] }
  0xd0   : > { %v856_v12 = vsel %vm792_vm11, %v760_v4, %v824_v6  ;;  %1117 = vst.msk [vmem:[#allocation2 + $0x11] sm:$0xff] %vm1062_vm8, %v1116_v37  ;;  %v7512_v6 = vld [vmem:[%s7918_s19 + $0x78] sm:$0xff]  ;;  %vm1239_vm11 = vcmask 523520   ;;  %s6118_s19 = sshll.u32 %s10159_s26, 2 }
  0xd1   : > { %v651_v1 = vpop.f32.mrf.mxu0  ;;  %v886_v15 = vmax.f32 %v8018_v51, %v856_v12  ;;  %s438_s21 = scalar_lea.vmem %s10151_s13, %s6118_s19 }
  0xd2   : > { %v725_v3 = vmul.f32 %v7953_v18, %v651_v1 }
  0xd3   : > { %v950_v24 = vrot.slane %v886_v15, 1 }
  0xd4   : > { %v761_v5 = vadd.f32 %v7969_v23, %v725_v3 }
  0xd6   : > { %v825_v9 = vmul.f32 0.01, %v761_v5  ;;  %vm793_vm12 = vcmp.ge.f32.partialorder %v761_v5, 0.0 }
  0xd7   : > { %v1141_v47 = vld [vmem:[#allocation2 + $0x11] sm:$0xff] }
  0xd8   : > { %v857_v13 = vsel %vm793_vm12, %v761_v5, %v825_v9  ;;  %1183 = vrot.lane.b32.xlu1 %v1141_v47, %s7820_s22  ;;  %v1146_v5 = vld [vmem:[#allocation2 + $0x39] sm:$0xff] }
  0xd9   : > { %v654_v7 = vpop.f32.mrf.mxu0  ;;  %v887_v19 = vmax.f32 %v855_v60, %v857_v13 }
  0xda   : > { %v726_v10 = vmul.f32 %v7953_v18, %v654_v7 }
  0xdb   : > { %v952_v26 = vrot.slane %v887_v19, 1 }
  0xdc   : > { %6203 = vmatmul.msk.bf16.gmra.mxu0 %vm572_vm1, %v7509_v8  ;;  %v762_v11 = vadd.f32 %v7969_v23, %v726_v10  ;;  %v1148_v8 = vld [vmem:[#allocation2 + $0x49] sm:$0xff] }
  0xdd   : > { %v953_v31 = vsel %vm942_vm7, %v950_v24, %v952_v26  ;;  %1197 = vrot.lane.b32.xlu0 %v1148_v8, %s7820_s22 }
  0xde   : > { %vm794_vm13 = vcmp.ge.f32.partialorder %v762_v11, 0.0  ;;  %v826_v14 = vmul.f32 0.01, %v762_v11  ;;  %v1036_v35 = vmax.f32 %v886_v15, %v953_v31 }
  0xe0   : > { %v858_v17 = vsel %vm794_vm13, %v762_v11, %v826_v14  ;;  %1067 = vst.msk [vmem:[#allocation4 + $0x20] sm:$0xff] %vm1062_vm8, %v1036_v35 }
  0xe1   : > { %v656_v20 = vpop.f32.mrf.mxu0  ;;  %v888_v22 = vmax.f32 %v856_v12, %v858_v17 }
  0xe2   : > { %v727_v21 = vmul.f32 %v7953_v18, %v656_v20 }
  0xe3   : > { %v954_v28 = vrot.slane %v888_v22, 1 }
  0xe4   : > { %v763_v25 = vadd.f32 %v7969_v23, %v727_v21 }
  0xe5   : > { %v955_v34 = vsel %vm942_vm7, %v952_v26, %v954_v28 }
  0xe6   : > { %vm795_vm14 = vcmp.ge.f32.partialorder %v763_v25, 0.0  ;;  %v827_v27 = vmul.f32 0.01, %v763_v25  ;;  %v1037_v38 = vmax.f32 %v887_v19, %v955_v34 }
  0xe8   : > { %v859_v30 = vsel %vm795_vm14, %v763_v25, %v827_v27  ;;  %1068 = vst.msk [vmem:[#allocation4 + $0x28] sm:$0xff] %vm1062_vm8, %v1037_v38 }
  0xe9   : > { %v659_v32 = vpop.f32.mrf.mxu0 }
  0xea   : > { %v728_v33 = vmul.f32 %v7953_v18, %v659_v32 }
  0xec   : > { %6204 = vmatmul.msk.bf16.gmra.mxu0 %vm572_vm1, %v7510_v29  ;;  %v764_v36 = vadd.f32 %v7969_v23, %v728_v33 }
  0xee   : > { %vm796_vm15 = vcmp.ge.f32.partialorder %v764_v36, 0.0  ;;  %v828_v39 = vmul.f32 0.01, %v764_v36 }
  0xef   : > { %v1119_v51 = vld [vmem:[#allocation4 + $0x20] ss:$2 sm:$0xff] }
  0xf0   : > { %v860_v40 = vsel %vm796_vm15, %v764_v36, %v828_v39  ;;  %1120 = vst.msk [vmem:[#allocation2 + $0x21] sm:$0xff] %vm1062_vm8, %v1119_v51 }
  0xf1   : > { %v890_v41 = vmax.f32 %v858_v17, %v860_v40  ;;  %v661_v42 = vpop.f32.mrf.mxu0 }
  0xf2   : > { %v729_v43 = vmul.f32 %v7953_v18, %v661_v42 }
  0xf3   : > { %v958_v16 = vrot.slane %v890_v41, 1 }
  0xf4   : > { %v765_v44 = vadd.f32 %v7969_v23, %v729_v43 }
  0xf6   : > { %vm797_vm3 = vcmp.ge.f32.partialorder %v765_v44, 0.0  ;;  %v829_v45 = vmul.f32 0.01, %v765_v44 }
  0xf7   : > { %v1143_v60 = vld [vmem:[#allocation2 + $0x21] sm:$0xff] }
  0xf8   : > { %v861_v48 = vsel %vm797_vm3, %v765_v44, %v829_v45  ;;  %1187 = vrot.lane.b32.xlu1 %v1143_v60, %s7820_s22 }
  0xf9   : > { %v891_v50 = vmax.f32 %v859_v30, %v861_v48  ;;  %v664_v52 = vpop.f32.mrf.mxu0 }
  0xfa   : > { %v730_v53 = vmul.f32 %v7953_v18, %v664_v52 }
  0xfb   : > { %v960_v54 = vrot.slane %v891_v50, 1 }
  0xfc   : > { %6205 = vmatmul.msk.bf16.gmra.mxu0 %vm572_vm1, %v7511_v46  ;;  %v766_v55 = vadd.f32 %v7969_v23, %v730_v53 }
  0xfd   : > { %v961_v56 = vsel %vm942_vm7, %v958_v16, %v960_v54  ;;  %v1180_v16 = vpop.permute.xlu0 %1179 }
  0xfe   : > { %v1040_v57 = vmax.f32 %v890_v41, %v961_v56  ;;  %vm798_vm4 = vcmp.ge.f32.partialorder %v766_v55, 0.0  ;;  %v830_v58 = vmul.f32 0.01, %v766_v55  ;;  %1240 = vst.msk [vmem:[#allocation2] sm:$0xff] %vm1239_vm11, %v1180_v16 }
 0x100   : > { %1071 = vst.msk [vmem:[#allocation4 + $0x40] sm:$0xff] %vm1062_vm8, %v1040_v57  ;;  %v862_v59 = vsel %vm798_vm4, %v766_v55, %v830_v58  ;;  %1193 = vrot.lane.b32.xlu1 %v1146_v5, %s7820_s22 }
 0x101   : > { %v892_v61 = vmax.f32 %v860_v40, %v862_v59  ;;  %v666_v62 = vpop.f32.mrf.mxu0 }
 0x102   : > { %v731_v63 = vmul.f32 %v7953_v18, %v666_v62 }
 0x103   : > { %v962_v0 = vrot.slane %v892_v61, 1 }
 0x104   : > { %v767_v1 = vadd.f32 %v7969_v23, %v731_v63 }
 0x105   : > { %v963_v2 = vsel %vm942_vm7, %v960_v54, %v962_v0  ;;  %v1182_v60 = vpop.permute.xlu0 %1181 }
 0x106   : > { %v1041_v3 = vmax.f32 %v891_v50, %v963_v2  ;;  %vm799_vm5 = vcmp.ge.f32.partialorder %v767_v1, 0.0  ;;  %v831_v4 = vmul.f32 0.01, %v767_v1  ;;  %1241 = vst.msk [vmem:[#allocation2 + $0x8] sm:$0xff] %vm1239_vm11, %v1182_v60 }
 0x108   : > { %1072 = vst.msk [vmem:[#allocation4 + $0x48] sm:$0xff] %vm1062_vm8, %v1041_v3  ;;  %v863_v7 = vsel %vm799_vm5, %v767_v1, %v831_v4 }
 0x109   : > { %v669_v9 = vpop.f32.mrf.mxu0 }
 0x10a   : > { %v732_v10 = vmul.f32 %v7953_v18, %v669_v9 }
 0x10c   : > { %6206 = vmatmul.msk.bf16.gmra.mxu0 %vm572_vm1, %v7512_v6  ;;  %v768_v11 = vadd.f32 %v7969_v23, %v732_v10 }
 0x10d   : > { %v1186_v6 = vpop.permute.xlu0 %1185 }
 0x10e   : > { %vm800_vm6 = vcmp.ge.f32.partialorder %v768_v11, 0.0  ;;  %v832_v12 = vmul.f32 0.01, %v768_v11  ;;  %1243 = vst.msk [vmem:[#allocation2 + $0x18] sm:$0xff] %vm1239_vm11, %v1186_v6 }
 0x10f   : > { %v1122_v13 = vld [vmem:[#allocation4 + $0x40] ss:$2 sm:$0xff] }
 0x110   : > { %v864_v14 = vsel %vm800_vm6, %v768_v11, %v832_v12  ;;  %1123 = vst.msk [vmem:[#allocation2 + $0x31] sm:$0xff] %vm1062_vm8, %v1122_v13 }
 0x111   : > { %v894_v15 = vmax.f32 %v862_v59, %v864_v14  ;;  %v671_v17 = vpop.f32.mrf.mxu0 }
 0x112   : > { %v733_v19 = vmul.f32 %v7953_v18, %v671_v17  ;;  %v1150_v17 = vld [vmem:[#allocation2 + $0x59] sm:$0xff] }
 0x113   : > { %v966_v20 = vrot.slane %v894_v15, 1  ;;  %1201 = vrot.lane.b32.xlu0 %v1150_v17, %s7820_s22 }
 0x114   : > { %v769_v21 = vadd.f32 %v7969_v23, %v733_v19 }
 0x116   : > { %vm801_vm9 = vcmp.ge.f32.partialorder %v769_v21, 0.0  ;;  %v833_v22 = vmul.f32 0.01, %v769_v21 }
 0x117   : > { %v1145_v25 = vld [vmem:[#allocation2 + $0x31] sm:$0xff] }
 0x118   : > { %v865_v24 = vsel %vm801_vm9, %v769_v21, %v833_v22  ;;  %1191 = vrot.lane.b32.xlu2 %v1145_v25, %s7820_s22 }
 0x119   : > { %v895_v26 = vmax.f32 %v863_v7, %v865_v24  ;;  %v674_v27 = vpop.f32.mrf.mxu0 }
 0x11a   : > { %v734_v28 = vmul.f32 %v7953_v18, %v674_v27 }
 0x11b   : > { %v968_v29 = vrot.slane %v895_v26, 1 }
 0x11c   : > { %v770_v30 = vadd.f32 %v7969_v23, %v734_v28 }
 0x11d   : > { %v969_v31 = vsel %vm942_vm7, %v966_v20, %v968_v29 }
 0x11e   : > { %v1044_v32 = vmax.f32 %v894_v15, %v969_v31  ;;  %vm802_vm1 = vcmp.ge.f32.partialorder %v770_v30, 0.0  ;;  %v834_v33 = vmul.f32 0.01, %v770_v30 }
 0x120   : > { %1075 = vst.msk [vmem:[#allocation4 + $0x60] sm:$0xff] %vm1062_vm8, %v1044_v32  ;;  %v866_v34 = vsel %vm802_vm1, %v770_v30, %v834_v33  ;;  %v1190_v32 = vpop.permute.xlu2 %1189  ;;  %v1260_v33 = vld [vmem:[#allocation2 + $0x2] sm:$0xff] }
 0x121   : > { %v896_v35 = vmax.f32 %v864_v14, %v866_v34  ;;  %v676_v36 = vpop.f32.mrf.mxu0  ;;  %1245 = vst.msk [vmem:[#allocation2 + $0x28] sm:$0xff] %vm1239_vm11, %v1190_v32 }
 0x122   : > { %v735_v37 = vmul.f32 %v7953_v18, %v676_v36 }
 0x123   : > { %v970_v38 = vrot.slane %v896_v35, 1 }
 0x124   : > { %v771_v39 = vadd.f32 %v7969_v23, %v735_v37 }
 0x125   : > { %v971_v40 = vsel %vm942_vm7, %v968_v29, %v970_v38 }
 0x126   : > { %v1045_v41 = vmax.f32 %v895_v26, %v971_v40  ;;  %vm803_vm10 = vcmp.ge.f32.partialorder %v771_v39, 0.0  ;;  %v835_v42 = vmul.f32 0.01, %v771_v39 }
 0x128   : > { %1076 = vst.msk [vmem:[#allocation4 + $0x68] sm:$0xff] %vm1062_vm8, %v1045_v41  ;;  %v867_v43 = vsel %vm803_vm10, %v771_v39, %v835_v42 }
 0x129   : > { %v679_v44 = vpop.f32.mrf.mxu0 }
 0x12a   : > { %v736_v45 = vmul.f32 %v7953_v18, %v679_v44 }
 0x12c   : > { %v772_v46 = vadd.f32 %v7969_v23, %v736_v45 }
 0x12e   : > { %vm804_vm12 = vcmp.ge.f32.partialorder %v772_v46, 0.0  ;;  %v836_v47 = vmul.f32 0.01, %v772_v46 }
 0x12f   : > { %v1125_v48 = vld [vmem:[#allocation4 + $0x60] ss:$2 sm:$0xff] }
 0x130   : > { %v868_v49 = vsel %vm804_vm12, %v772_v46, %v836_v47  ;;  %1126 = vst.msk [vmem:[#allocation2 + $0x41] sm:$0xff] %vm1062_vm8, %v1125_v48 }
 0x131   : > { %v898_v50 = vmax.f32 %v866_v34, %v868_v49  ;;  %v681_v51 = vpop.f32.mrf.mxu0 }
 0x132   : > { %v737_v52 = vmul.f32 %v7953_v18, %v681_v51 }
 0x133   : > { %v974_v53 = vrot.slane %v898_v50, 1 }
 0x134   : > { %v773_v54 = vadd.f32 %v7969_v23, %v737_v52 }
 0x136   : > { %vm805_vm13 = vcmp.ge.f32.partialorder %v773_v54, 0.0  ;;  %v837_v55 = vmul.f32 0.01, %v773_v54 }
 0x137   : > { %v1147_v57 = vld [vmem:[#allocation2 + $0x41] sm:$0xff] }
 0x138   : > { %v869_v56 = vsel %vm805_vm13, %v773_v54, %v837_v55  ;;  %1195 = vrot.lane.b32.xlu2 %v1147_v57, %s7820_s22 }
 0x139   : > { %v899_v58 = vmax.f32 %v867_v43, %v869_v56  ;;  %v684_v59 = vpop.f32.mrf.mxu0 }
 0x13a   : > { %v738_v61 = vmul.f32 %v7953_v18, %v684_v59 }
 0x13b   : > { %v976_v62 = vrot.slane %v899_v58, 1 }
 0x13c   : > { %v774_v63 = vadd.f32 %v7969_v23, %v738_v61 }
 0x13d   : > { %v977_v0 = vsel %vm942_vm7, %v974_v53, %v976_v62 }
 0x13e   : > { %v1048_v1 = vmax.f32 %v898_v50, %v977_v0  ;;  %vm806_vm14 = vcmp.ge.f32.partialorder %v774_v63, 0.0  ;;  %v838_v2 = vmul.f32 0.01, %v774_v63 }
 0x140   : > { %1079 = vst.msk [vmem:[#allocation4 + $0x80] sm:$0xff] %vm1062_vm8, %v1048_v1  ;;  %v870_v3 = vsel %vm806_vm14, %v774_v63, %v838_v2  ;;  %1300 = vrot.lane.b32.xlu2 %v1260_v33, %s7821_s27 }
 0x141   : > { %v900_v4 = vmax.f32 %v868_v49, %v870_v3  ;;  %v686_v5 = vpop.f32.mrf.mxu0 }
 0x142   : > { %v739_v7 = vmul.f32 %v7953_v18, %v686_v5 }
 0x143   : > { %v978_v8 = vrot.slane %v900_v4, 1 }
 0x144   : > { %v775_v9 = vadd.f32 %v7969_v23, %v739_v7 }
 0x145   : > { %v979_v10 = vsel %vm942_vm7, %v976_v62, %v978_v8 }
 0x146   : > { %v1049_v11 = vmax.f32 %v899_v58, %v979_v10  ;;  %vm807_vm15 = vcmp.ge.f32.partialorder %v775_v9, 0.0  ;;  %v839_v12 = vmul.f32 0.01, %v775_v9 }
 0x148   : > { %1080 = vst.msk [vmem:[#allocation4 + $0x88] sm:$0xff] %vm1062_vm8, %v1049_v11  ;;  %v871_v13 = vsel %vm807_vm15, %v775_v9, %v839_v12  ;;  %vm1092_vm15 = vcmask 260096  }
 0x149   : > { %v689_v14 = vpop.f32.mrf.mxu0 }
 0x14a   : > { %v740_v15 = vmul.f32 %v7953_v18, %v689_v14  ;;  %v1184_v53 = vpop.permute.xlu1 %1183 }
 0x14b   : > { %1242 = vst.msk [vmem:[#allocation2 + $0x10] sm:$0xff] %vm1239_vm11, %v1184_v53 }
 0x14c   : > { %v776_v19 = vadd.f32 %v7969_v23, %v740_v15 }
 0x14e   : > { %vm808_vm3 = vcmp.ge.f32.partialorder %v776_v19, 0.0  ;;  %v840_v20 = vmul.f32 0.01, %v776_v19 }
 0x14f   : > { %v1128_v22 = vld [vmem:[#allocation4 + $0x80] ss:$2 sm:$0xff] }
 0x150   : > { %v872_v21 = vsel %vm808_vm3, %v776_v19, %v840_v20  ;;  %1129 = vst.msk [vmem:[#allocation2 + $0x51] sm:$0xff] %vm1062_vm8, %v1128_v22  ;;  %v1198_v19 = vpop.permute.xlu0 %1197  ;;  %v1152_v22 = vld [vmem:[#allocation2 + $0x69] sm:$0xff]  ;;  %vm1360_vm3 = vcmask 785920  }
 0x151   : > { %v902_v24 = vmax.f32 %v870_v3, %v872_v21  ;;  %v691_v25 = vpop.f32.mrf.mxu0  ;;  %1249 = vst.msk [vmem:[#allocation2 + $0x48] sm:$0xff] %vm1239_vm11, %v1198_v19  ;;  %v7527_v19 = vld [vmem:[%s10142_s4 + $0x60] sm:$0xff] }
 0x152   : > { %v741_v26 = vmul.f32 %v7953_v18, %v691_v25  ;;  %v1261_v61 = vld [vmem:[#allocation2 + $0xa] sm:$0xff] }
 0x153   : > { %v982_v27 = vrot.slane %v902_v24, 1  ;;  %1302 = vrot.lane.b32.xlu0 %v1261_v61, %s7821_s27  ;;  %v7517_v61 = vld [vmem:[%s10142_s4 + $0x10] sm:$0xff] }
 0x154   : > { %v777_v28 = vadd.f32 %v7969_v23, %v741_v26  ;;  %v1262_v26 = vld [vmem:[#allocation2 + $0x12] sm:$0xff] }
 0x156   : > { %vm809_vm4 = vcmp.ge.f32.partialorder %v777_v28, 0.0  ;;  %v841_v29 = vmul.f32 0.01, %v777_v28 }
 0x157   : > { %v1149_v31 = vld [vmem:[#allocation2 + $0x51] sm:$0xff] }
 0x158   : > { %v873_v30 = vsel %vm809_vm4, %v777_v28, %v841_v29  ;;  %1199 = vrot.lane.b32.xlu1 %v1149_v31, %s7820_s22  ;;  %vm1981_vm4 = vcmask 523264  }
 0x159   : > { %v903_v34 = vmax.f32 %v871_v13, %v873_v30  ;;  %v694_v35 = vpop.f32.mrf.mxu0 }
 0x15a   : > { %v742_v36 = vmul.f32 %v7953_v18, %v694_v35 }
 0x15b   : > { %v984_v37 = vrot.slane %v903_v34, 1 }
 0x15c   : > { %v778_v38 = vadd.f32 %v7969_v23, %v742_v36 }
 0x15d   : > { %v985_v39 = vsel %vm942_vm7, %v982_v27, %v984_v37 }
 0x15e   : > { %v1052_v40 = vmax.f32 %v902_v24, %v985_v39  ;;  %vm810_vm5 = vcmp.ge.f32.partialorder %v778_v38, 0.0  ;;  %v842_v41 = vmul.f32 0.01, %v778_v38 }
 0x160   : > { %1083 = vst.msk [vmem:[#allocation4 + $0xa0] sm:$0xff] %vm1062_vm8, %v1052_v40  ;;  %v874_v42 = vsel %vm810_vm5, %v778_v38, %v842_v41  ;;  %v7520_v40 = vld [vmem:[%s10142_s4 + $0x28] sm:$0xff] }
 0x161   : > { %v904_v43 = vmax.f32 %v872_v21, %v874_v42  ;;  %v696_v16 = vpop.f32.mrf.mxu0  ;;  %1641 = vmatpush.bf16.msra.mxu2 %v7520_v40 }
 0x162   : > { %v743_v44 = vmul.f32 %v7953_v18, %v696_v16 }
 0x163   : > { %v986_v45 = vrot.slane %v904_v43, 1 }
 0x164   : > { %v779_v46 = vadd.f32 %v7969_v23, %v743_v44 }
 0x165   : > { %v987_v47 = vsel %vm942_vm7, %v984_v37, %v986_v45 }
 0x166   : > { %v1053_v48 = vmax.f32 %v903_v34, %v987_v47  ;;  %vm811_vm6 = vcmp.ge.f32.partialorder %v779_v46, 0.0  ;;  %v843_v49 = vmul.f32 0.01, %v779_v46 }
 0x168   : > { %1084 = vst.msk [vmem:[#allocation4 + $0xa8] sm:$0xff] %vm1062_vm8, %v1053_v48  ;;  %v875_v50 = vsel %vm811_vm6, %v779_v46, %v843_v49 }
 0x169   : > { %v699_v51 = vpop.f32.mrf.mxu0 }
 0x16a   : > { %v744_v52 = vmul.f32 %v7953_v18, %v699_v51  ;;  %v1188_v0 = vpop.permute.xlu1 %1187 }
 0x16b   : > { %1244 = vst.msk [vmem:[#allocation2 + $0x20] sm:$0xff] %vm1239_vm11, %v1188_v0  ;;  %v7515_v0 = vld [vmem:[%s10142_s4] sm:$0xff] }
 0x16c   : > { %v780_v54 = vadd.f32 %v7969_v23, %v744_v52 }
 0x16e   : > { %vm812_vm9 = vcmp.ge.f32.partialorder %v780_v54, 0.0  ;;  %v844_v55 = vmul.f32 0.01, %v780_v54 }
 0x16f   : > { %v1131_v56 = vld [vmem:[#allocation4 + $0xa0] ss:$2 sm:$0xff] }
 0x170   : > { %v876_v57 = vsel %vm812_vm9, %v780_v54, %v844_v55  ;;  %1132 = vst.msk [vmem:[#allocation2 + $0x61] sm:$0xff] %vm1062_vm8, %v1131_v56  ;;  %v1154_v54 = vld [vmem:[#allocation2 + $0x79] sm:$0xff] }
 0x171   : > { %v906_v58 = vmax.f32 %v874_v42, %v876_v57  ;;  %v701_v59 = vpop.f32.mrf.mxu0  ;;  %v7518_v55 = vld [vmem:[%s10142_s4 + $0x18] sm:$0xff] }
 0x172   : > { %v745_v60 = vmul.f32 %v7953_v18, %v701_v59  ;;  %v1192_v63 = vpop.permute.xlu2 %1191  ;;  %v1194_v9 = vpop.permute.xlu1 %1193  ;;  %v1263_v10 = vld [vmem:[#allocation2 + $0x1a] sm:$0xff]  ;;  %v1264_v11 = vld [vmem:[#allocation2 + $0x22] sm:$0xff] }
 0x173   : > { %v990_v62 = vrot.slane %v906_v58, 1  ;;  %1246 = vst.msk [vmem:[#allocation2 + $0x30] sm:$0xff] %vm1239_vm11, %v1192_v63  ;;  %1306 = vrot.lane.b32.xlu0 %v1263_v10, %s7821_s27  ;;  %1308 = vrot.lane.b32.xlu1 %v1264_v11, %s7821_s27  ;;  %v7523_v11 = vld [vmem:[%s10142_s4 + $0x40] sm:$0xff] }
 0x174   : > { %v781_v1 = vadd.f32 %v7969_v23, %v745_v60  ;;  %1247 = vst.msk [vmem:[#allocation2 + $0x38] sm:$0xff] %vm1239_vm11, %v1194_v9  ;;  %v7530_v9 = vld [vmem:[%s10142_s4 + $0x78] sm:$0xff] }
 0x176   : > { %vm813_vm1 = vcmp.ge.f32.partialorder %v781_v1, 0.0  ;;  %v845_v2 = vmul.f32 0.01, %v781_v1 }
 0x177   : > { %v1151_v27 = vld [vmem:[#allocation2 + $0x61] sm:$0xff] }
 0x178   : > { %v877_v3 = vsel %vm813_vm1, %v781_v1, %v845_v2  ;;  %v7526_v2 = vld [vmem:[%s10142_s4 + $0x58] sm:$0xff] }
 0x179   : > { %v907_v4 = vmax.f32 %v875_v50, %v877_v3  ;;  %v704_v5 = vpop.f32.mrf.mxu0  ;;  %v7532_v3 = vld [vmem:[%s10142_s4 + $0x88] sm:$0xff]  ;;  %1548 = vmatpush.bf16.msra.mxu1 %v7526_v2 }
 0x17a   : > { %v746_v6 = vmul.f32 %v7953_v18, %v704_v5  ;;  %v1265_v8 = vld [vmem:[#allocation2 + $0x2a] sm:$0xff]  ;;  %1747 = vmatpush.bf16.msra.mxu3 %v7532_v3 }
 0x17b   : > { %v992_v7 = vrot.slane %v907_v4, 1  ;;  %1310 = vrot.lane.b32.xlu2 %v1265_v8, %s7821_s27  ;;  %1205 = vrot.lane.b32.xlu0 %v1152_v22, %s7820_s22  ;;  %v1266_v35 = vld [vmem:[#allocation2 + $0x32] sm:$0xff]  ;;  %v7524_v8 = vld [vmem:[%s10142_s4 + $0x48] sm:$0xff] }
 0x17c   : > { %v782_v12 = vadd.f32 %v7969_v23, %v746_v6  ;;  %1203 = vrot.lane.b32.xlu1 %v1151_v27, %s7820_s22  ;;  %v7525_v5 = vld [vmem:[%s10142_s4 + $0x50] sm:$0xff]  ;;  %v7531_v6 = vld [vmem:[%s10142_s4 + $0x80] sm:$0xff] }
 0x17d   : > { %v993_v13 = vsel %vm942_vm7, %v990_v62, %v992_v7  ;;  %v7516_v62 = vld [vmem:[%s10142_s4 + $0x8] sm:$0xff]  ;;  %1549 = vmatpush.bf16.msra.mxu1 %v7525_v5 }
 0x17e   : > { %v1056_v14 = vmax.f32 %v906_v58, %v993_v13  ;;  %vm814_vm10 = vcmp.ge.f32.partialorder %v782_v12, 0.0  ;;  %v846_v15 = vmul.f32 0.01, %v782_v12  ;;  %1748 = vmatpush.bf16.msra.mxu3 %v7531_v6  ;;  %v7522_v13 = vld [vmem:[%s10142_s4 + $0x38] sm:$0xff] }
 0x180   : > { %1087 = vst.msk [vmem:[#allocation4 + $0xc0] sm:$0xff] %vm1062_vm8, %v1056_v14  ;;  %v878_v17 = vsel %vm814_vm10, %v782_v12, %v846_v15  ;;  %v7529_v12 = vld [vmem:[%s10142_s4 + $0x70] sm:$0xff]  ;;  %v7528_v14 = vld [vmem:[%s10142_s4 + $0x68] sm:$0xff] }
 0x181   : > { %v908_v20 = vmax.f32 %v876_v57, %v878_v17  ;;  %v706_v21 = vpop.f32.mrf.mxu0  ;;  %1550 = vmatpush.bf16.msra.mxu1 %v7524_v8 }
 0x182   : > { %v747_v24 = vmul.f32 %v7953_v18, %v706_v21  ;;  %1749 = vmatpush.bf16.msra.mxu3 %v7530_v9 }
 0x183   : > { %v994_v25 = vrot.slane %v908_v20, 1  ;;  %1304 = vrot.lane.b32.xlu2 %v1262_v26, %s7821_s27 }
 0x184   : > { %v783_v28 = vadd.f32 %v7969_v23, %v747_v24  ;;  %1312 = vrot.lane.b32.xlu1 %v1266_v35, %s7821_s27 }
 0x185   : > { %v995_v29 = vsel %vm942_vm7, %v992_v7, %v994_v25  ;;  %v1202_v59 = vpop.permute.xlu0 %1201  ;;  %1551 = vmatpush.bf16.msra.mxu1 %v7523_v11 }
 0x186   : > { %v1057_v30 = vmax.f32 %v907_v4, %v995_v29  ;;  %vm815_vm12 = vcmp.ge.f32.partialorder %v783_v28, 0.0  ;;  %v847_v31 = vmul.f32 0.01, %v783_v28  ;;  %1251 = vst.msk [vmem:[#allocation2 + $0x58] sm:$0xff] %vm1239_vm11, %v1202_v59  ;;  %1750 = vmatpush.bf16.msra.mxu3 %v7529_v12  ;;  %v1156_v59 = vld [vmem:[#allocation2 + $0x89] sm:$0xff] }
 0x188   : > { %1088 = vst.msk [vmem:[#allocation4 + $0xc8] sm:$0xff] %vm1062_vm8, %v1057_v30  ;;  %v879_v32 = vsel %vm815_vm12, %v783_v28, %v847_v31 }
 0x189   : > { %v709_v33 = vpop.f32.mrf.mxu0  ;;  %1552 = vmatpush.bf16.msra.mxu1 %v7522_v13 }
 0x18a   : > { %v748_v34 = vmul.f32 %v7953_v18, %v709_v33  ;;  %1751 = vmatpush.bf16.msra.mxu3 %v7528_v14 }
 0x18c   : > { %v784_v36 = vadd.f32 %v7969_v23, %v748_v34 }
 0x18e   : > { %vm816_vm13 = vcmp.ge.f32.partialorder %v784_v36, 0.0  ;;  %v848_v37 = vmul.f32 0.01, %v784_v36  ;;  %1752 = vmatpush.bf16.msra.mxu3 %v7527_v19 }
 0x18f   : > { %v1134_v38 = vld [vmem:[#allocation4 + $0xc0] ss:$2 sm:$0xff] }
 0x190   : > { %v880_v39 = vsel %vm816_vm13, %v784_v36, %v848_v37  ;;  %1135 = vst.msk [vmem:[#allocation2 + $0x71] sm:$0xff] %vm1062_vm8, %v1134_v38 }
 0x191   : > { %v910_v41 = vmax.f32 %v878_v17, %v880_v39  ;;  %v711_v42 = vpop.f32.mrf.mxu0  ;;  %v7521_v17 = vld [vmem:[%s10142_s4 + $0x30] sm:$0xff] }
 0x192   : > { %v749_v43 = vmul.f32 %v7953_v18, %v711_v42  ;;  %v1196_v44 = vpop.permute.xlu2 %1195  ;;  %1553 = vmatpush.bf16.msra.mxu1 %v7521_v17 }
 0x193   : > { %v998_v16 = vrot.slane %v910_v41, 1  ;;  %1248 = vst.msk [vmem:[#allocation2 + $0x40] sm:$0xff] %vm1239_vm11, %v1196_v44 }
 0x194   : > { %v785_v45 = vadd.f32 %v7969_v23, %v749_v43  ;;  %v7519_v23 = vld [vmem:[%s10142_s4 + $0x20] sm:$0xff] }
 0x195   : > { %1642 = vmatpush.bf16.msra.mxu2 %v7519_v23 }
 0x196   : > { %vm817_vm14 = vcmp.ge.f32.partialorder %v785_v45, 0.0  ;;  %v849_v46 = vmul.f32 0.01, %v785_v45 }
 0x197   : > { %v1153_v48 = vld [vmem:[#allocation2 + $0x71] sm:$0xff] }
 0x198   : > { %v881_v47 = vsel %vm817_vm14, %v785_v45, %v849_v46  ;;  %1207 = vrot.lane.b32.xlu1 %v1153_v48, %s7820_s22 }
 0x199   : > { %v911_v49 = vmax.f32 %v879_v32, %v881_v47  ;;  %1643 = vmatpush.bf16.msra.mxu2 %v7518_v55 }
 0x19a   : > { %v1267_v51 = vld [vmem:[#allocation2 + $0x3a] sm:$0xff]  ;;  %v1268_v56 = vld [vmem:[#allocation2 + $0x42] sm:$0xff]  ;;  %v1301_v60 = vpop.permute.xlu2 %1300 }
 0x19b   : > { %v1000_v50 = vrot.slane %v911_v49, 1  ;;  %1314 = vrot.lane.b32.xlu2 %v1267_v51, %s7821_s27  ;;  %1361 = vst.msk [vmem:[#allocation2] sm:$0xff] %vm1360_vm3, %v1301_v60 }
 0x19d   : > { %v1001_v18 = vsel %vm942_vm7, %v998_v16, %v1000_v50  ;;  %v1061_v52 = vmax.f32 %v911_v49, %v1000_v50  ;;  %1644 = vmatpush.bf16.msra.mxu2 %v7517_v61 }
 0x19e   : > { %v1060_v53 = vmax.f32 %v910_v41, %v1001_v18 }
 0x19f   : > { %1093 = vst.msk [vmem:[#allocation4 + $0xe8] sm:$0x7f] %vm1092_vm15, %v1061_v52  ;;  %vm2248_vm15 = vcmask 1048064  }
 0x1a0   : > { %1091 = vst.msk [vmem:[#allocation4 + $0xe0] sm:$0xff] %vm1062_vm8, %v1060_v53  ;;  %1209 = vrot.lane.b32.xlu1 %v1154_v54, %s7820_s22 }
 0x1a1   : > { %1645 = vmatpush.bf16.msra.mxu2 %v7516_v62  ;;  %v1157_v62 = vld [vmem:[#allocation2 + $0x91] sm:$0xff] }
 0x1a2   : > { %v1381_v20 = vld [vmem:[#allocation2] sm:$0xff] }
 0x1a3   : > { %1316 = vrot.lane.b32.xlu2 %v1268_v56, %s7821_s27  ;;  %v1401_v21 = vpack.c.bf16 %v1381_v20, %v1381_v20 }
 0x1a5   : > { %1646 = vmatpush.bf16.msra.mxu2 %v7515_v0  ;;  %v1597_v25 = vunpack.c.l.b16 %v1401_v21 }
 0x1a7   : > { %v1137_v57 = vld [vmem:[#allocation4 + $0xe0] ss:$2 sm:$0xff] }
 0x1a8   : > { %1138 = vst.msk [vmem:[#allocation2 + $0x81] sm:$0xff] %vm1062_vm8, %v1137_v57 }
 0x1af   : > { %v1155_v58 = vld [vmem:[#allocation2 + $0x81] sm:$0xff] }
 0x1b0   : > { %1211 = vrot.lane.b32.xlu2 %v1155_v58, %s7820_s22 }
 0x1c5   : > { %v1303_v15 = vpop.permute.xlu0 %1302 }
 0x1c6   : > { %1362 = vst.msk [vmem:[#allocation2 + $0x8] sm:$0xff] %vm1360_vm3, %v1303_v15 }
 0x1ca   : > { %v1200_v63 = vpop.permute.xlu1 %1199 }
 0x1cb   : > { %1250 = vst.msk [vmem:[#allocation2 + $0x50] sm:$0xff] %vm1239_vm11, %v1200_v63  ;;  %v1158_v63 = vld [vmem:[#allocation2 + $0x99] sm:$0xff] }
 0x1cd   : > { %v1382_v22 = vld [vmem:[#allocation2 + $0x8] sm:$0xff] }
 0x1ce   : > { %v1402_v24 = vpack.c.bf16 %v1382_v22, %v1382_v22 }
 0x1d0   : > { %v1598_v28 = vunpack.c.l.b16 %v1402_v24 }
 0x1d2   : > { %v1269_v1 = vld [vmem:[#allocation2 + $0x4a] sm:$0xff]  ;;  %v1270_v7 = vld [vmem:[#allocation2 + $0x52] sm:$0xff]  ;;  %v1599_v29 = vpack.c.b16 %v1598_v28, %v1597_v25 }
 0x1d3   : > { %1318 = vrot.lane.b32.xlu0 %v1269_v1, %s7821_s27 }
 0x1d4   : > { %6275 = vmatmul.msk.bf16.vlgmr.msra.gmra.mxu2 %vm1094_vm2, %v1599_v29 }
 0x1d5   : > { %v1311_v4 = vpop.permute.xlu2 %1310 }
 0x1d6   : > { %1366 = vst.msk [vmem:[#allocation2 + $0x28] sm:$0xff] %vm1360_vm3, %v1311_v4 }
 0x1db   : > { %1320 = vrot.lane.b32.xlu0 %v1270_v7, %s7821_s27 }
 0x1dd   : > { %v1305_v10 = vpop.permute.xlu2 %1304  ;;  %v1386_v31 = vld [vmem:[#allocation2 + $0x28] sm:$0xff] }
 0x1de   : > { %1363 = vst.msk [vmem:[#allocation2 + $0x10] sm:$0xff] %vm1360_vm3, %v1305_v10  ;;  %v1406_v37 = vpack.c.bf16 %v1386_v31, %v1386_v31 }
 0x1e0   : > { %v1465_v16 = vunpack.c.l.b16 %v1406_v37 }
 0x1e5   : > { %v1307_v26 = vpop.permute.xlu0 %1306  ;;  %v1309_v27 = vpop.permute.xlu1 %1308  ;;  %v1383_v30 = vld [vmem:[#allocation2 + $0x10] sm:$0xff] }
 0x1e6   : > { %1364 = vst.msk [vmem:[#allocation2 + $0x18] sm:$0xff] %vm1360_vm3, %v1307_v26  ;;  %v1403_v32 = vpack.c.bf16 %v1383_v30, %v1383_v30  ;;  %v8308_v30 = vld [vmem:[#allocation3] sm:$0xff] }
 0x1e7   : > { %1365 = vst.msk [vmem:[#allocation2 + $0x20] sm:$0xff] %vm1360_vm3, %v1309_v27 }
 0x1e8   : > { %v1462_v41 = vunpack.c.l.b16 %v1403_v32  ;;  %2000 = vst.msk [vmem:[#allocation3 + $0x18] sm:$0xff] %vm1981_vm4, %v8308_v30 }
 0x1e9   : > { %2004 = vst.msk [vmem:[#allocation3 + $0x38] sm:$0xff] %vm1981_vm4, %v8308_v30 }
 0x1ea   : > { %2008 = vst.msk [vmem:[#allocation3 + $0x58] sm:$0xff] %vm1981_vm4, %v8308_v30 }
 0x1eb   : > { %2012 = vst.msk [vmem:[#allocation3 + $0x78] sm:$0xff] %vm1981_vm4, %v8308_v30 }
 0x1ec   : > { %2016 = vst.msk [vmem:[#allocation3 + $0x98] sm:$0xff] %vm1981_vm4, %v8308_v30 }
 0x1ed   : > { %v1206_v34 = vpop.permute.xlu0 %1205  ;;  %v1384_v36 = vld [vmem:[#allocation2 + $0x18] sm:$0xff]  ;;  %2020 = vst.msk [vmem:[#allocation3 + $0xb8] sm:$0xff] %vm1981_vm4, %v8308_v30 }
 0x1ee   : > { %v1204_v35 = vpop.permute.xlu1 %1203  ;;  %1253 = vst.msk [vmem:[#allocation2 + $0x68] sm:$0xff] %vm1239_vm11, %v1206_v34  ;;  %v1404_v38 = vpack.c.bf16 %v1384_v36, %v1384_v36  ;;  %v1385_v39 = vld [vmem:[#allocation2 + $0x20] sm:$0xff] }
 0x1ef   : > { %1252 = vst.msk [vmem:[#allocation2 + $0x60] sm:$0xff] %vm1239_vm11, %v1204_v35  ;;  %v1405_v40 = vpack.c.bf16 %v1385_v39, %v1385_v39 }
 0x1f0   : > { %v1463_v42 = vunpack.c.l.b16 %v1404_v38  ;;  %2024 = vst.msk [vmem:[#allocation3 + $0xd8] sm:$0xff] %vm1981_vm4, %v8308_v30 }
 0x1f1   : > { %v1464_v43 = vunpack.c.l.b16 %v1405_v40  ;;  %2028 = vst.msk [vmem:[#allocation3 + $0xf8] sm:$0xff] %vm1981_vm4, %v8308_v30 }
 0x1f2   : > { %v1478_v44 = vpack.c.b16 %v1463_v42, %v1462_v41  ;;  %v8325_v41 = vld [vmem:[%s10143_s5] ss:$0 sm:$0xff]  ;;  %2032 = vst.msk [vmem:[#allocation3 + $0x118] sm:$0xff] %vm1981_vm4, %v8308_v30 }
 0x1f3   : > { %v1479_v45 = vpack.c.b16 %v1465_v16, %v1464_v43  ;;  %2036 = vst.msk [vmem:[#allocation3 + $0x138] sm:$0xff] %vm1981_vm4, %v8308_v30 }
 0x1f4   : > { %6243 = vmatmul.msk.bf16.vlgmr.msra.gmra.mxu1 %vm1094_vm2, %v1478_v44  ;;  %6276 = vmatmul.msk.bf16.gmra.mxu2 %vm1094_vm2, %v1478_v44  ;;  %2040 = vst.msk [vmem:[#allocation3 + $0x158] sm:$0xff] %vm1981_vm4, %v8308_v30 }
 0x1f5   : > { %v1315_v33 = vpop.permute.xlu2 %1314  ;;  %6319 = vmatmul.msk.bf16.vlgmr.msra.gmra.mxu3 %vm1094_vm2, %v1479_v45  ;;  %2044 = vst.msk [vmem:[#allocation3 + $0x178] sm:$0xff] %vm1981_vm4, %v8308_v30 }
 0x1f6   : > { %1368 = vst.msk [vmem:[#allocation2 + $0x38] sm:$0xff] %vm1360_vm3, %v1315_v33  ;;  %v1313_v47 = vpop.permute.xlu1 %1312  ;;  %v1271_v48 = vld [vmem:[#allocation2 + $0x5a] sm:$0xff]  ;;  %v1272_v49 = vld [vmem:[#allocation2 + $0x62] sm:$0xff] }
 0x1f7   : > { %1367 = vst.msk [vmem:[#allocation2 + $0x30] sm:$0xff] %vm1360_vm3, %v1313_v47  ;;  %1322 = vrot.lane.b32.xlu1 %v1271_v48, %s7821_s27  ;;  %1324 = vrot.lane.b32.xlu2 %v1272_v49, %s7821_s27  ;;  %v8339_v49 = vld [vmem:[%s10144_s6] ss:$0 sm:$0xff] }
 0x1f8   : > { %2048 = vst.msk [vmem:[#allocation3 + $0x198] sm:$0xff] %vm1981_vm4, %v8308_v30 }
 0x1f9   : > { %2052 = vst.msk [vmem:[#allocation3 + $0x1b8] sm:$0xff] %vm1981_vm4, %v8308_v30 }
 0x1fa   : > { %2056 = vst.msk [vmem:[#allocation3 + $0x1d8] sm:$0xff] %vm1981_vm4, %v8308_v30 }
 0x1fb   : > { %2060 = vst.msk [vmem:[#allocation3 + $0x1f8] sm:$0xff] %vm1981_vm4, %v8308_v30 }
 0x1fc   : > { %2064 = vst.msk [vmem:[#allocation3 + $0x218] sm:$0xff] %vm1981_vm4, %v8308_v30 }
 0x1fd   : > { %v1317_v46 = vpop.permute.xlu2 %1316  ;;  %v1388_v50 = vld [vmem:[#allocation2 + $0x38] sm:$0xff]  ;;  %2068 = vst.msk [vmem:[#allocation3 + $0x238] sm:$0xff] %vm1981_vm4, %v8308_v30 }
 0x1fe   : > { %1369 = vst.msk [vmem:[#allocation2 + $0x40] sm:$0xff] %vm1360_vm3, %v1317_v46  ;;  %v1408_v51 = vpack.c.bf16 %v1388_v50, %v1388_v50  ;;  %v1387_v18 = vld [vmem:[#allocation2 + $0x30] sm:$0xff] }
 0x1ff   : > { %v1407_v52 = vpack.c.bf16 %v1387_v18, %v1387_v18  ;;  %2072 = vst.msk [vmem:[#allocation3 + $0x258] sm:$0xff] %vm1981_vm4, %v8308_v30 }
 0x200   : > { %v1467_v53 = vunpack.c.l.b16 %v1408_v51  ;;  %2076 = vst.msk [vmem:[#allocation3 + $0x278] sm:$0xff] %vm1981_vm4, %v8308_v30 }
 0x201   : > { %v1466_v54 = vunpack.c.l.b16 %v1407_v52 }
 0x203   : > { %v1480_v56 = vpack.c.b16 %v1467_v53, %v1466_v54 }
 0x204   : > { %6244 = vmatmul.msk.bf16.gmra.mxu1 %vm1094_vm2, %v1479_v45  ;;  %6277 = vmatmul.msk.bf16.gmra.mxu2 %vm1094_vm2, %v1479_v45 }
 0x205   : > { %6320 = vmatmul.msk.bf16.gmra.mxu3 %vm1094_vm2, %v1480_v56  ;;  %v1389_v1 = vld [vmem:[#allocation2 + $0x40] sm:$0xff] }
 0x206   : > { %v1409_v2 = vpack.c.bf16 %v1389_v1, %v1389_v1 }
 0x208   : > { %v1468_v6 = vunpack.c.l.b16 %v1409_v2 }
 0x20a   : > { %v1212_v23 = vpop.permute.xlu2 %1211  ;;  %v1208_v55 = vpop.permute.xlu1 %1207 }
 0x20b   : > { %1256 = vst.msk [vmem:[#allocation2 + $0x80] sm:$0xff] %vm1239_vm11, %v1212_v23 }
 0x20c   : > { %1254 = vst.msk [vmem:[#allocation2 + $0x70] sm:$0xff] %vm1239_vm11, %v1208_v55 }
 0x212   : > { %v1210_v57 = vpop.permute.xlu1 %1209 }
 0x213   : > { %v1273_v58 = vld [vmem:[#allocation2 + $0x6a] sm:$0xff]  ;;  %1255 = vst.msk [vmem:[#allocation2 + $0x78] sm:$0xff] %vm1239_vm11, %v1210_v57 }
 0x214   : > { %1326 = vrot.lane.b32.xlu0 %v1273_v58, %s7821_s27  ;;  %6245 = vmatmul.msk.bf16.gmra.mxu1 %vm1094_vm2, %v1480_v56 }
 0x215   : > { %6278 = vmatmul.msk.bf16.gmra.mxu2 %vm1094_vm2, %v1480_v56 }
 0x21a   : > { %v1274_v60 = vld [vmem:[#allocation2 + $0x72] sm:$0xff]  ;;  %v1275_v61 = vld [vmem:[#allocation2 + $0x7a] sm:$0xff] }
 0x21b   : > { %1328 = vrot.lane.b32.xlu1 %v1274_v60, %s7821_s27  ;;  %1330 = vrot.lane.b32.xlu2 %v1275_v61, %s7821_s27 }
 0x21c   : > { %1213 = vrot.lane.b32.xlu0 %v1156_v59, %s7820_s22 }
 0x223   : > { %1215 = vrot.lane.b32.xlu1 %v1157_v62, %s7820_s22  ;;  %1217 = vrot.lane.b32.xlu2 %v1158_v63, %s7820_s22 }
 0x245   : > { %v1319_v0 = vpop.permute.xlu0 %1318 }
 0x246   : > { %1370 = vst.msk [vmem:[#allocation2 + $0x48] sm:$0xff] %vm1360_vm3, %v1319_v0 }
 0x24d   : > { %v1321_v3 = vpop.permute.xlu0 %1320  ;;  %v1390_v4 = vld [vmem:[#allocation2 + $0x48] sm:$0xff] }
 0x24e   : > { %1371 = vst.msk [vmem:[#allocation2 + $0x50] sm:$0xff] %vm1360_vm3, %v1321_v3  ;;  %v1410_v5 = vpack.c.bf16 %v1390_v4, %v1390_v4 }
 0x250   : > { %v1469_v7 = vunpack.c.l.b16 %v1410_v5 }
 0x251   : > { %v1325_v9 = vpop.permute.xlu2 %1324 }
 0x252   : > { %v1481_v8 = vpack.c.b16 %v1469_v7, %v1468_v6  ;;  %1373 = vst.msk [vmem:[#allocation2 + $0x60] sm:$0xff] %vm1360_vm3, %v1325_v9 }
 0x254   : > { %6246 = vmatmul.msk.bf16.gmra.mxu1 %vm1094_vm2, %v1481_v8  ;;  %6279 = vmatmul.msk.bf16.gmra.mxu2 %vm1094_vm2, %v1481_v8 }
 0x255   : > { %6321 = vmatmul.msk.bf16.gmra.mxu3 %vm1094_vm2, %v1481_v8  ;;  %v1391_v12 = vld [vmem:[#allocation2 + $0x50] sm:$0xff] }
 0x256   : > { %v1411_v13 = vpack.c.bf16 %v1391_v12, %v1391_v12 }
 0x257   : > { %v1648_v14 = vpop.f32.mrf.mxu2 }
 0x258   : > { %v1470_v20 = vunpack.c.l.b16 %v1411_v13 }
 0x259   : > { %v1393_v28 = vld [vmem:[#allocation2 + $0x60] sm:$0xff] }
 0x25a   : > { %v1413_v32 = vpack.c.bf16 %v1393_v28, %v1393_v28 }
 0x25c   : > { %v1472_v39 = vunpack.c.l.b16 %v1413_v32 }
 0x25f   : > { %v1650_v26 = vpop.f32.mrf.mxu2 }
 0x269   : > { %v1323_v10 = vpop.permute.xlu1 %1322 }
 0x26a   : > { %1372 = vst.msk [vmem:[#allocation2 + $0x58] sm:$0xff] %vm1360_vm3, %v1323_v10 }
 0x271   : > { %v1555_v15 = vpop.f32.mrf.mxu1  ;;  %v1392_v17 = vld [vmem:[#allocation2 + $0x58] sm:$0xff] }
 0x272   : > { %v1412_v19 = vpack.c.bf16 %v1392_v17, %v1392_v17  ;;  %v1649_v37 = vadd.f32 %v1648_v14, %v1555_v15 }
 0x274   : > { %v1471_v21 = vunpack.c.l.b16 %v1412_v19 }
 0x275   : > { %v1331_v11 = vpop.permute.xlu2 %1330 }
 0x276   : > { %1376 = vst.msk [vmem:[#allocation2 + $0x78] sm:$0xff] %vm1360_vm3, %v1331_v11  ;;  %v1482_v22 = vpack.c.b16 %v1471_v21, %v1470_v20  ;;  %v8380_v20 = vrot.slane %v8308_v30, 1 }
 0x277   : > { %v1653_v33 = vpop.f32.mrf.mxu2 }
 0x278   : > { %6247 = vmatmul.msk.bf16.gmra.mxu1 %vm1094_vm2, %v1482_v22  ;;  %6280 = vmatmul.msk.bf16.gmra.mxu2 %vm1094_vm2, %v1482_v22  ;;  %v1754_v24 = vpop.f32.mrf.mxu3 }
 0x279   : > { %6322 = vmatmul.msk.bf16.gmra.mxu3 %vm1094_vm2, %v1482_v22  ;;  %v1557_v25 = vpop.f32.mrf.mxu1  ;;  %v1794_v40 = vadd.f32 %v1754_v24, %v1649_v37 }
 0x27a   : > { %v1651_v42 = vadd.f32 %v1650_v26, %v1557_v25 }
 0x27b   : > { %v1814_v48 = vmul.f32 %v8325_v41, %v1794_v40 }
 0x27d   : > { %v1834_v55 = vadd.f32 %v8339_v49, %v1814_v48  ;;  %v1396_v58 = vld [vmem:[#allocation2 + $0x78] sm:$0xff]  ;;  %v1218_v7 = vpop.permute.xlu2 %1217 }
 0x27e   : > { %v1416_v1 = vpack.c.bf16 %v1396_v58, %v1396_v58  ;;  %1259 = vst.msk [vmem:[#allocation2 + $0x98] sm:$0xff] %vm1239_vm11, %v1218_v7 }
 0x27f   : > { %v1655_v54 = vpop.f32.mrf.mxu2  ;;  %v1866_v63 = vmul.f32 0.01, %v1834_v55  ;;  %vm1850_vm6 = vcmp.ge.f32.partialorder %v1834_v55, 0.0 }
 0x280   : > { %v1756_v29 = vpop.f32.mrf.mxu3  ;;  %v1475_v10 = vunpack.c.l.b16 %v1416_v1 }
 0x281   : > { %v1560_v31 = vpop.f32.mrf.mxu1  ;;  %v1795_v45 = vadd.f32 %v1756_v29, %v1651_v42  ;;  %v1882_v8 = vsel %vm1850_vm6, %v1834_v55, %v1866_v63 }
 0x282   : > { %v1654_v43 = vadd.f32 %v1653_v33, %v1560_v31 }
 0x283   : > { %v1815_v52 = vmul.f32 %v8325_v41, %v1795_v45 }
 0x285   : > { %v1835_v59 = vadd.f32 %v8339_v49, %v1815_v52  ;;  %v1279_v25 = vld [vmem:[#allocation2 + $0x9a] sm:$0xff] }
 0x286   : > { %v1327_v27 = vpop.permute.xlu0 %1326 }
 0x287   : > { %1374 = vst.msk [vmem:[#allocation2 + $0x68] sm:$0xff] %vm1360_vm3, %v1327_v27  ;;  %v1867_v3 = vmul.f32 0.01, %v1835_v59  ;;  %vm1851_vm9 = vcmp.ge.f32.partialorder %v1835_v59, 0.0  ;;  %v7742_v27 = vpack.i.bf16 %v8380_v20, %v8380_v20 }
 0x288   : > { %v1759_v44 = vpop.f32.mrf.mxu3 }
 0x289   : > { %v1796_v46 = vadd.f32 %v1759_v44, %v1654_v43  ;;  %v1562_v51 = vpop.f32.mrf.mxu1  ;;  %v1883_v12 = vsel %vm1851_vm9, %v1835_v59, %v1867_v3  ;;  %vm2435_vm9 = vcmask 1044480  }
 0x28a   : > { %v1656_v56 = vadd.f32 %v1655_v54, %v1562_v51 }
 0x28b   : > { %v1816_v50 = vmul.f32 %v8325_v41, %v1796_v46 }
 0x28d   : > { %v1329_v35 = vpop.permute.xlu1 %1328  ;;  %v1836_v53 = vadd.f32 %v8339_v49, %v1816_v50 }
 0x28e   : > { %v1214_v34 = vpop.permute.xlu0 %1213  ;;  %v1394_v36 = vld [vmem:[#allocation2 + $0x68] sm:$0xff]  ;;  %1375 = vst.msk [vmem:[#allocation2 + $0x70] sm:$0xff] %vm1360_vm3, %v1329_v35  ;;  %v1658_v35 = vpop.f32.mrf.mxu2 }
 0x28f   : > { %1257 = vst.msk [vmem:[#allocation2 + $0x88] sm:$0xff] %vm1239_vm11, %v1214_v34  ;;  %v1414_v38 = vpack.c.bf16 %v1394_v36, %v1394_v36  ;;  %v1868_v60 = vmul.f32 0.01, %v1836_v53  ;;  %vm1852_vm5 = vcmp.ge.f32.partialorder %v1836_v53, 0.0 }
 0x290   : > { %v1761_v57 = vpop.f32.mrf.mxu3 }
 0x291   : > { %v1473_v16 = vunpack.c.l.b16 %v1414_v38  ;;  %v1797_v61 = vadd.f32 %v1761_v57, %v1656_v56  ;;  %v1884_v4 = vsel %vm1852_vm5, %v1836_v53, %v1868_v60  ;;  %v1565_v34 = vpop.f32.mrf.mxu1 }
 0x292   : > { %v1898_v11 = vmax.f32 %v1882_v8, %v1884_v4  ;;  %v1659_v36 = vadd.f32 %v1658_v35, %v1565_v34 }
 0x293   : > { %v1483_v47 = vpack.c.b16 %v1473_v16, %v1472_v39  ;;  %v1817_v0 = vmul.f32 %v8325_v41, %v1797_v61 }
 0x294   : > { %v1926_v17 = vrot.slane %v1898_v11, 1 }
 0x295   : > { %6248 = vmatmul.msk.bf16.gmra.mxu1 %vm1094_vm2, %v1483_v47  ;;  %6281 = vmatmul.msk.bf16.gmra.mxu2 %vm1094_vm2, %v1483_v47  ;;  %v1395_v23 = vld [vmem:[#allocation2 + $0x70] sm:$0xff]  ;;  %v1216_v2 = vpop.permute.xlu1 %1215  ;;  %v1837_v5 = vadd.f32 %v8339_v49, %v1817_v0 }
 0x296   : > { %6323 = vmatmul.msk.bf16.gmra.mxu3 %vm1094_vm2, %v1483_v47  ;;  %v1276_v18 = vld [vmem:[#allocation2 + $0x82] sm:$0xff]  ;;  %v1415_v62 = vpack.c.bf16 %v1395_v23, %v1395_v23  ;;  %1258 = vst.msk [vmem:[#allocation2 + $0x90] sm:$0xff] %vm1239_vm11, %v1216_v2  ;;  %vm2085_vm11 = vcmask 522243   ;;  %v1660_v43 = vpop.f32.mrf.mxu2 }
 0x297   : > { %1332 = vrot.lane.b32.xlu0 %v1276_v18, %s7821_s27  ;;  %vm1853_vm1 = vcmp.ge.f32.partialorder %v1837_v5, 0.0  ;;  %v1869_v9 = vmul.f32 0.01, %v1837_v5 }
 0x298   : > { %v1474_v6 = vunpack.c.l.b16 %v1415_v62 }
 0x299   : > { %v1885_v13 = vsel %vm1853_vm1, %v1837_v5, %v1869_v9  ;;  %v1567_v40 = vpop.f32.mrf.mxu1 }
 0x29a   : > { %v1484_v14 = vpack.c.b16 %v1475_v10, %v1474_v6  ;;  %v1899_v15 = vmax.f32 %v1883_v12, %v1885_v13  ;;  %v1661_v16 = vadd.f32 %v1660_v43, %v1567_v40 }
 0x29c   : > { %v1927_v19 = vrot.slane %v1899_v15, 1 }
 0x29d   : > { %v1277_v22 = vld [vmem:[#allocation2 + $0x8a] sm:$0xff]  ;;  %v1278_v26 = vld [vmem:[#allocation2 + $0x92] sm:$0xff] }
 0x29e   : > { %v1928_v21 = vsel %vm942_vm7, %v1926_v17, %v1927_v19  ;;  %1334 = vrot.lane.b32.xlu1 %v1277_v22, %s7821_s27  ;;  %1336 = vrot.lane.b32.xlu2 %v1278_v26, %s7821_s27  ;;  %v1663_v53 = vpop.f32.mrf.mxu2 }
 0x29f   : > { %v1967_v24 = vmax.f32 %v1898_v11, %v1928_v21  ;;  %1338 = vrot.lane.b32.xlu0 %v1279_v25, %s7821_s27 }
 0x2a1   : > { %1982 = vst.msk [vmem:[#allocation5] sm:$0xff] %vm1981_vm4, %v1967_v24 }
 0x2a5   : > { %6249 = vmatmul.msk.bf16.gmra.mxu1 %vm1094_vm2, %v1484_v14  ;;  %6282 = vmatmul.msk.bf16.gmra.mxu2 %vm1094_vm2, %v1484_v14 }
 0x2a6   : > { %6324 = vmatmul.msk.bf16.gmra.mxu3 %vm1094_vm2, %v1484_v14  ;;  %7743 = vrot.lane.b32.xlu1 %v7742_v27, %s7821_s27  ;;  %v1665_v59 = vpop.f32.mrf.mxu2 }
 0x2a7   : > { %2196 = vrot.lane.b32.xlu2 %v8380_v20, %s7821_s27 }
 0x2a8   : > { %v2081_v28 = vld [vmem:[#allocation5] ss:$2 sm:$0xf] }
 0x2a9   : > { %v2083_v29 = vrot.slane %v2081_v28, 5 }
 0x2ab   : > { %2086 = vst.msk [vmem:[#allocation3 + $0xc0] sm:$0x78] %vm2085_vm11, %v2083_v29 }
 0x2b2   : > { %v2111_v30 = vld [vmem:[#allocation3 + $0xc0] sm:$0xff] }
 0x2b3   : > { %v2158_v31 = vrot.slane %v2111_v30, 1 }
 0x2b5   : > { %v2161_v32 = vsel %vm942_vm7, %v2158_v31, %v8380_v20  ;;  %v2159_v33 = vsel %vm942_vm7, %v8380_v20, %v2158_v31 }
 0x2b6   : > { %2200 = vrot.lane.b32.xlu1 %v2161_v32, %s7821_s27  ;;  %2198 = vrot.lane.b32.xlu0 %v2159_v33, %s7821_s27 }
 0x2d1   : > { %v1570_v52 = vpop.f32.mrf.mxu1 }
 0x2d2   : > { %v1664_v54 = vadd.f32 %v1663_v53, %v1570_v52 }
 0x2d7   : > { %v1668_v5 = vpop.f32.mrf.mxu2 }
 0x2d8   : > { %v1764_v37 = vpop.f32.mrf.mxu3 }
 0x2d9   : > { %v1798_v38 = vadd.f32 %v1764_v37, %v1659_v36  ;;  %v1572_v56 = vpop.f32.mrf.mxu1 }
 0x2da   : > { %v1666_v61 = vadd.f32 %v1665_v59, %v1572_v56 }
 0x2db   : > { %v1818_v39 = vmul.f32 %v8325_v41, %v1798_v38 }
 0x2dd   : > { %v1838_v42 = vadd.f32 %v8339_v49, %v1818_v39 }
 0x2df   : > { %vm1854_vm10 = vcmp.ge.f32.partialorder %v1838_v42, 0.0  ;;  %v1870_v44 = vmul.f32 0.01, %v1838_v42  ;;  %v1670_v22 = vpop.f32.mrf.mxu2 }
 0x2e0   : > { %v1766_v45 = vpop.f32.mrf.mxu3 }
 0x2e1   : > { %v1886_v46 = vsel %vm1854_vm10, %v1838_v42, %v1870_v44  ;;  %v1799_v47 = vadd.f32 %v1766_v45, %v1661_v16  ;;  %vm2311_vm10 = vcmask 1045504  }
 0x2e3   : > { %v1819_v48 = vmul.f32 %v8325_v41, %v1799_v47 }
 0x2e5   : > { %v1839_v50 = vadd.f32 %v8339_v49, %v1819_v48 }
 0x2e7   : > { %vm1855_vm12 = vcmp.ge.f32.partialorder %v1839_v50, 0.0  ;;  %v1871_v51 = vmul.f32 0.01, %v1839_v50 }
 0x2e9   : > { %v1887_v18 = vsel %vm1855_vm12, %v1839_v50, %v1871_v51 }
 0x2f5   : > { %v1575_v2 = vpop.f32.mrf.mxu1 }
 0x2f6   : > { %v1669_v11 = vadd.f32 %v1668_v5, %v1575_v2 }
 0x2f8   : > { %v1337_v7 = vpop.permute.xlu2 %1336 }
 0x2f9   : > { %1379 = vst.msk [vmem:[#allocation2 + $0x90] sm:$0xff] %vm1360_vm3, %v1337_v7 }
 0x2fb   : > { %v1673_v39 = vpop.f32.mrf.mxu2 }
 0x2fc   : > { %v1769_v23 = vpop.f32.mrf.mxu3 }
 0x2fd   : > { %v1800_v55 = vadd.f32 %v1769_v23, %v1664_v54  ;;  %v1577_v14 = vpop.f32.mrf.mxu1 }
 0x2fe   : > { %v1671_v30 = vadd.f32 %v1670_v22, %v1577_v14 }
 0x2ff   : > { %v1820_v57 = vmul.f32 %v8325_v41, %v1800_v55 }
 0x300   : > { %v1399_v55 = vld [vmem:[#allocation2 + $0x90] sm:$0xff] }
 0x301   : > { %v1840_v60 = vadd.f32 %v8339_v49, %v1820_v57  ;;  %v2197_v19 = vpop.permute.xlu2 %2196 }
 0x302   : > { %2253 = vst.msk [vmem:[#allocation3 + $0x80] sm:$0xff] %vm2248_vm15, %v2197_v19 }
 0x303   : > { %vm1856_vm13 = vcmp.ge.f32.partialorder %v1840_v60, 0.0  ;;  %v1872_v62 = vmul.f32 0.01, %v1840_v60 }
 0x304   : > { %v1771_v63 = vpop.f32.mrf.mxu3 }
 0x305   : > { %v1888_v0 = vsel %vm1856_vm13, %v1840_v60, %v1872_v62  ;;  %v1801_v1 = vadd.f32 %v1771_v63, %v1666_v61  ;;  %v1675_v61 = vpop.f32.mrf.mxu2  ;;  %vm2723_vm13 = vcmask 1042432  }
 0x306   : > { %v1902_v3 = vmax.f32 %v1886_v46, %v1888_v0  ;;  %v1419_v0 = vpack.c.bf16 %v1399_v55, %v1399_v55 }
 0x307   : > { %v1821_v4 = vmul.f32 %v8325_v41, %v1801_v1 }
 0x308   : > { %v1933_v6 = vrot.slane %v1902_v3, 1 }
 0x309   : > { %v1333_v58 = vpop.permute.xlu0 %1332  ;;  %v1841_v8 = vadd.f32 %v8339_v49, %v1821_v4  ;;  %v8423_v23 = vld [vmem:[#allocation3 + $0x80] sm:$0xff] }
 0x30a   : > { %1377 = vst.msk [vmem:[#allocation2 + $0x80] sm:$0xff] %vm1360_vm3, %v1333_v58  ;;  %v2894_v60 = vrot.slane %v8423_v23, 6 }
 0x30b   : > { %vm1857_vm14 = vcmp.ge.f32.partialorder %v1841_v8, 0.0  ;;  %v1873_v9 = vmul.f32 0.01, %v1841_v8 }
 0x30d   : > { %v1889_v10 = vsel %vm1857_vm14, %v1841_v8, %v1873_v9 }
 0x30e   : > { %v1903_v12 = vmax.f32 %v1887_v18, %v1889_v10 }
 0x310   : > { %v1935_v15 = vrot.slane %v1903_v12, 1  ;;  %v1335_v21 = vpop.permute.xlu1 %1334 }
 0x311   : > { %1378 = vst.msk [vmem:[#allocation2 + $0x88] sm:$0xff] %vm1360_vm3, %v1335_v21  ;;  %v1339_v26 = vpop.permute.xlu0 %1338  ;;  %v1397_v29 = vld [vmem:[#allocation2 + $0x80] sm:$0xff] }
 0x312   : > { %v1936_v24 = vsel %vm942_vm7, %v1933_v6, %v1935_v15  ;;  %1380 = vst.msk [vmem:[#allocation2 + $0x98] sm:$0xff] %vm1360_vm3, %v1339_v26  ;;  %v1580_v33 = vpop.f32.mrf.mxu1  ;;  %v1417_v36 = vpack.c.bf16 %v1397_v29, %v1397_v29 }
 0x313   : > { %v1971_v27 = vmax.f32 %v1902_v3, %v1936_v24  ;;  %v1674_v48 = vadd.f32 %v1673_v39, %v1580_v33 }
 0x314   : > { %v1476_v45 = vunpack.c.l.b16 %v1417_v36 }
 0x315   : > { %1986 = vst.msk [vmem:[#allocation5 + $0x20] sm:$0xff] %vm1981_vm4, %v1971_v27 }
 0x318   : > { %v7744_v37 = vpop.permute.xlu1 %7743  ;;  %v1398_v38 = vld [vmem:[#allocation2 + $0x88] sm:$0xff] }
 0x319   : > { %v1774_v13 = vpop.f32.mrf.mxu3  ;;  %v7746_v42 = vunpack.i.h.bf16 %v7744_v37  ;;  %v7745_v43 = vunpack.i.l.bf16 %v7744_v37  ;;  %v1418_v16 = vpack.c.bf16 %v1398_v38, %v1398_v38  ;;  %v1400_v56 = vld [vmem:[#allocation2 + $0x98] sm:$0xff]  ;;  %v2319_v38 = vrot.slane %v8423_v23, 2 }
 0x31a   : > { %v1802_v17 = vadd.f32 %v1774_v13, %v1669_v11  ;;  %v1582_v57 = vpop.f32.mrf.mxu1  ;;  %v1420_v1 = vpack.c.bf16 %v1400_v56, %v1400_v56  ;;  %v1703_v13 = vunpack.c.l.b16 %v1419_v0 }
 0x31b   : > { %2252 = vst.msk [vmem:[#allocation3 + $0x60] sm:$0xff] %vm2248_vm15, %v7746_v42  ;;  %v1477_v46 = vunpack.c.l.b16 %v1418_v16  ;;  %v1676_v2 = vadd.f32 %v1675_v61, %v1582_v57  ;;  %v2443_v61 = vrot.slane %v8423_v23, 3 }
 0x31c   : > { %v1822_v25 = vmul.f32 %v8325_v41, %v1802_v17  ;;  %v2088_v47 = vld [vmem:[#allocation5 + $0x20] ss:$2 sm:$0xf]  ;;  %2251 = vst.msk [vmem:[#allocation3 + $0x40] sm:$0xff] %vm2248_vm15, %v7745_v43  ;;  %v1704_v14 = vunpack.c.l.b16 %v1420_v1 }
 0x31d   : > { %v2090_v50 = vrot.slane %v2088_v47, 5  ;;  %v1485_v18 = vpack.c.b16 %v1477_v46, %v1476_v45 }
 0x31e   : > { %v1842_v28 = vadd.f32 %v8339_v49, %v1822_v25  ;;  %v1705_v27 = vpack.c.b16 %v1704_v14, %v1703_v13 }
 0x31f   : > { %2092 = vst.msk [vmem:[#allocation3 + $0x100] sm:$0x78] %vm2085_vm11, %v2090_v50  ;;  %6250 = vmatmul.msk.bf16.gmra.mxu1 %vm1094_vm2, %v1485_v18  ;;  %6325 = vmatmul.msk.bf16.gmra.mxu3 %vm1094_vm2, %v1485_v18 }
 0x320   : > { %vm1858_vm5 = vcmp.ge.f32.partialorder %v1842_v28, 0.0  ;;  %v1874_v31 = vmul.f32 0.01, %v1842_v28 }
 0x321   : > { %v1776_v32 = vpop.f32.mrf.mxu3 }
 0x322   : > { %v1890_v34 = vsel %vm1858_vm5, %v1842_v28, %v1874_v31  ;;  %v1803_v35 = vadd.f32 %v1776_v32, %v1671_v30  ;;  %v8426_v59 = vld [vmem:[#allocation3 + $0x60] sm:$0xff] }
 0x323   : > { %v2892_v62 = vrot.slane %v8426_v59, 6  ;;  %v8435_v8 = vld [vmem:[#allocation3 + $0x40] sm:$0xff]  ;;  %v2441_v25 = vrot.slane %v8426_v59, 3 }
 0x324   : > { %v1823_v40 = vmul.f32 %v8325_v41, %v1803_v35  ;;  %v2439_v24 = vrot.slane %v8435_v8, 3 }
 0x325   : > { %v2895_v4 = vsel %vm621_vm0, %v2892_v62, %v2894_v60 }
 0x326   : > { %v1843_v44 = vadd.f32 %v8339_v49, %v1823_v40  ;;  %v2113_v5 = vld [vmem:[#allocation3 + $0x100] sm:$0xff]  ;;  %2951 = vst.msk [vmem:[#allocation3 + $0x78] sm:$0xff] %vm1981_vm4, %v2895_v4  ;;  %v2442_v29 = vsel %vm2435_vm9, %v2439_v24, %v2441_v25  ;;  %v2607_v40 = vrot.slane %v8423_v23, 4 }
 0x327   : > { %v2162_v6 = vrot.slane %v2113_v5, 1 }
 0x328   : > { %vm1859_vm3 = vcmp.ge.f32.partialorder %v1843_v44, 0.0  ;;  %v1875_v51 = vmul.f32 0.01, %v1843_v44  ;;  %v2201_v10 = vpop.permute.xlu1 %2200  ;;  %v2199_v11 = vpop.permute.xlu0 %2198 }
 0x329   : > { %v1779_v52 = vpop.f32.mrf.mxu3  ;;  %2255 = vst.msk [vmem:[#allocation3 + $0xc0] sm:$0xff] %vm2248_vm15, %v2201_v10  ;;  %v2163_v17 = vsel %vm942_vm7, %v8380_v20, %v2162_v6  ;;  %v2165_v19 = vsel %vm942_vm7, %v2162_v6, %v8380_v20 }
 0x32a   : > { %v1891_v53 = vsel %vm1859_vm3, %v1843_v44, %v1875_v51  ;;  %v1804_v54 = vadd.f32 %v1779_v52, %v1674_v48  ;;  %2254 = vst.msk [vmem:[#allocation3 + $0xa0] sm:$0xff] %vm2248_vm15, %v2199_v11  ;;  %2202 = vrot.lane.b32.xlu2 %v2163_v17, %s7821_s27  ;;  %2204 = vrot.lane.b32.xlu0 %v2165_v19, %s7821_s27  ;;  %v1585_v17 = vpop.f32.mrf.mxu1 }
 0x32c   : > { %v1824_v58 = vmul.f32 %v8325_v41, %v1804_v54 }
 0x32e   : > { %v1844_v63 = vadd.f32 %v8339_v49, %v1824_v58 }
 0x32f   : > { %6326 = vmatmul.msk.bf16.gmra.mxu3 %vm1094_vm2, %v1705_v27  ;;  %vm2599_vm2 = vcmask 1043456  }
 0x330   : > { %vm1860_vm6 = vcmp.ge.f32.partialorder %v1844_v63, 0.0  ;;  %v1876_v3 = vmul.f32 0.01, %v1844_v63  ;;  %v8452_v30 = vld [vmem:[#allocation3 + $0xc0] sm:$0xff] }
 0x331   : > { %v1781_v7 = vpop.f32.mrf.mxu3  ;;  %v2898_v32 = vrot.slane %v8452_v30, 6  ;;  %v8456_v33 = vld [vmem:[#allocation3 + $0xa0] sm:$0xff]  ;;  %v2323_v35 = vrot.slane %v8452_v30, 2  ;;  %v2611_v44 = vrot.slane %v8452_v30, 4  ;;  %v2447_v47 = vrot.slane %v8452_v30, 3 }
 0x332   : > { %v1892_v9 = vsel %vm1860_vm6, %v1844_v63, %v1876_v3  ;;  %v1805_v12 = vadd.f32 %v1781_v7, %v1676_v2  ;;  %v2896_v36 = vrot.slane %v8456_v33, 6  ;;  %2481 = vrot.lane.b32.xlu0 %v2442_v29, %s7821_s27  ;;  %v2321_v37 = vrot.slane %v8456_v33, 2  ;;  %v1587_v29 = vpop.f32.mrf.mxu1 }
 0x333   : > { %v1906_v15 = vmax.f32 %v1890_v34, %v1892_v9  ;;  %v2609_v42 = vrot.slane %v8456_v33, 4  ;;  %v2445_v46 = vrot.slane %v8456_v33, 3  ;;  %v2444_v63 = vsel %vm2435_vm9, %v2441_v25, %v2443_v61 }
 0x334   : > { %v1825_v21 = vmul.f32 %v8325_v41, %v1805_v12  ;;  %v2897_v43 = vsel %vm621_vm0, %v2894_v60, %v2896_v36  ;;  %v2899_v16 = vsel %vm621_vm0, %v2896_v36, %v2898_v32  ;;  %v2324_v48 = vsel %vm2311_vm10, %v2321_v37, %v2323_v35 }
 0x335   : > { %v1941_v22 = vrot.slane %v1906_v15, 1  ;;  %2952 = vst.msk [vmem:[#allocation3 + $0x98] sm:$0xff] %vm1981_vm4, %v2897_v43  ;;  %v2322_v51 = vsel %vm2311_vm10, %v2319_v38, %v2321_v37  ;;  %v2610_v18 = vsel %vm2599_vm2, %v2607_v40, %v2609_v42  ;;  %v2612_v52 = vsel %vm2599_vm2, %v2609_v42, %v2611_v44 }
 0x336   : > { %v1845_v26 = vadd.f32 %v8339_v49, %v1825_v21  ;;  %2953 = vst.msk [vmem:[#allocation3 + $0xb8] sm:$0xff] %vm1981_vm4, %v2899_v16  ;;  %v2446_v0 = vsel %vm2435_vm9, %v2443_v61, %v2445_v46  ;;  %v2315_v2 = vrot.slane %v8435_v8, 2  ;;  %v2317_v3 = vrot.slane %v8426_v59, 2 }
 0x337   : > { %2378 = vst.msk [vmem:[#allocation3 + $0xa8] sm:$0xff] %vm1981_vm4, %v2324_v48 }
 0x338   : > { %vm1861_vm1 = vcmp.ge.f32.partialorder %v1845_v26, 0.0  ;;  %v1877_v28 = vmul.f32 0.01, %v1845_v26  ;;  %2377 = vst.msk [vmem:[#allocation3 + $0x88] sm:$0xff] %vm1981_vm4, %v2322_v51  ;;  %v2318_v4 = vsel %vm2311_vm10, %v2315_v2, %v2317_v3  ;;  %v2320_v61 = vsel %vm2311_vm10, %v2317_v3, %v2319_v38  ;;  %v7574_v38 = vld [vmem:[%s10145_s7 + $0x148] sm:$0xff] }
 0x339   : > { %2665 = vst.msk [vmem:[#allocation3 + $0x90] sm:$0xff] %vm1981_vm4, %v2610_v18 }
 0x33a   : > { %v1893_v31 = vsel %vm1861_vm1, %v1845_v26, %v1877_v28  ;;  %2666 = vst.msk [vmem:[#allocation3 + $0xb0] sm:$0xff] %vm1981_vm4, %v2612_v52 }
 0x33b   : > { %v1907_v34 = vmax.f32 %v1891_v53, %v1893_v31  ;;  %v2448_v53 = vsel %vm2435_vm9, %v2445_v46, %v2447_v47  ;;  %2375 = vst.msk [vmem:[#allocation3 + $0x48] sm:$0xff] %vm1981_vm4, %v2318_v4  ;;  %v2729_v46 = vrot.slane %v8426_v59, 5 }
 0x33c   : > { %2487 = vrot.lane.b32.xlu0 %v2448_v53, %s7821_s27  ;;  %v7568_v53 = vld [vmem:[%s10145_s7 + $0x118] sm:$0xff]  ;;  %2376 = vst.msk [vmem:[#allocation3 + $0x68] sm:$0xff] %vm1981_vm4, %v2320_v61 }
 0x33d   : > { %v1943_v39 = vrot.slane %v1907_v34, 1  ;;  %3457 = vmatpush.bf16.msrb.mxu1 %v7568_v53  ;;  %v7563_v53 = vld [vmem:[%s10145_s7 + $0xf0] sm:$0xff] }
 0x33f   : > { %v1944_v45 = vsel %vm942_vm7, %v1941_v22, %v1943_v39 }
 0x340   : > { %v1975_v50 = vmax.f32 %v1906_v15, %v1944_v45  ;;  %v1678_v15 = vpop.f32.mrf.mxu2  ;;  %v2727_v45 = vrot.slane %v8435_v8, 5 }
 0x341   : > { %v1679_v21 = vadd.f32 %v1678_v15, %v1585_v17  ;;  %v7565_v15 = vld [vmem:[%s10145_s7 + $0x100] sm:$0xff] }
 0x342   : > { %1990 = vst.msk [vmem:[#allocation5 + $0x40] sm:$0xff] %vm1981_vm4, %v1975_v50  ;;  %v7573_v17 = vld [vmem:[%s10145_s7 + $0x140] sm:$0xff] }
 0x348   : > { %v1680_v28 = vpop.f32.mrf.mxu2 }
 0x349   : > { %v2094_v54 = vld [vmem:[#allocation5 + $0x40] ss:$2 sm:$0xf] }
 0x34a   : > { %v2096_v55 = vrot.slane %v2094_v54, 5  ;;  %v7576_v54 = vld [vmem:[%s10145_s7 + $0x158] sm:$0xff] }
 0x34b   : > { %3482 = vmatpush.bf16.msrb.mxu2 %v7576_v54  ;;  %v7571_v54 = vld [vmem:[%s10145_s7 + $0x130] sm:$0xff] }
 0x34c   : > { %2098 = vst.msk [vmem:[#allocation3 + $0x140] sm:$0x78] %vm2085_vm11, %v2096_v55 }
 0x353   : > { %v2115_v56 = vld [vmem:[#allocation3 + $0x140] sm:$0xff] }
 0x354   : > { %v2166_v57 = vrot.slane %v2115_v56, 1  ;;  %v2730_v56 = vsel %vm2723_vm13, %v2727_v45, %v2729_v46 }
 0x356   : > { %v2169_v58 = vsel %vm942_vm7, %v2166_v57, %v8380_v20  ;;  %v2167_v60 = vsel %vm942_vm7, %v8380_v20, %v2166_v57 }
 0x357   : > { %2208 = vrot.lane.b32.xlu2 %v2169_v58, %s7821_s27  ;;  %2206 = vrot.lane.b32.xlu1 %v2167_v60, %s7821_s27  ;;  %v7567_v58 = vld [vmem:[%s10145_s7 + $0x110] sm:$0xff] }
 0x358   : > { %v7575_v60 = vld [vmem:[%s10145_s7 + $0x150] sm:$0xff]  ;;  %3458 = vmatpush.bf16.msrb.mxu1 %v7567_v58  ;;  %v7570_v58 = vld [vmem:[%s10145_s7 + $0x128] sm:$0xff] }
 0x359   : > { %3483 = vmatpush.bf16.msrb.mxu2 %v7575_v60 }
 0x35d   : > { %3484 = vmatpush.bf16.msrb.mxu2 %v7574_v38  ;;  %v7569_v38 = vld [vmem:[%s10145_s7 + $0x120] sm:$0xff] }
 0x35f   : > { %2483 = vrot.lane.b32.xlu1 %v2444_v63, %s7821_s27  ;;  %2485 = vrot.lane.b32.xlu2 %v2446_v0, %s7821_s27  ;;  %v1683_v63 = vpop.f32.mrf.mxu2 }
 0x361   : > { %3485 = vmatpush.bf16.msrb.mxu2 %v7573_v17 }
 0x384   : > { %v2203_v1 = vpop.permute.xlu2 %2202 }
 0x385   : > { %2256 = vst.msk [vmem:[#allocation3 + $0xe0] sm:$0xff] %vm2248_vm15, %v2203_v1 }
 0x38c   : > { %v8509_v5 = vld [vmem:[#allocation3 + $0xe0] sm:$0xff] }
 0x38d   : > { %v2900_v6 = vrot.slane %v8509_v5, 6  ;;  %v2449_v7 = vrot.slane %v8509_v5, 3  ;;  %v2325_v9 = vrot.slane %v8509_v5, 2  ;;  %v2613_v10 = vrot.slane %v8509_v5, 4 }
 0x38f   : > { %v2901_v11 = vsel %vm621_vm0, %v2898_v32, %v2900_v6  ;;  %v2450_v12 = vsel %vm2435_vm9, %v2447_v47, %v2449_v7  ;;  %v2326_v13 = vsel %vm2311_vm10, %v2323_v35, %v2325_v9  ;;  %v2614_v14 = vsel %vm2599_vm2, %v2611_v44, %v2613_v10 }
 0x390   : > { %2954 = vst.msk [vmem:[#allocation3 + $0xd8] sm:$0xff] %vm1981_vm4, %v2901_v11  ;;  %2489 = vrot.lane.b32.xlu1 %v2450_v12, %s7821_s27  ;;  %v1681_v47 = vadd.f32 %v1680_v28, %v1587_v29  ;;  %v2605_v28 = vrot.slane %v8426_v59, 4 }
 0x391   : > { %2379 = vst.msk [vmem:[#allocation3 + $0xc8] sm:$0xff] %vm1981_vm4, %v2326_v13  ;;  %v2890_v13 = vrot.slane %v8435_v8, 6 }
 0x392   : > { %2667 = vst.msk [vmem:[#allocation3 + $0xd0] sm:$0xff] %vm1981_vm4, %v2614_v14 }
 0x393   : > { %v2893_v29 = vsel %vm621_vm0, %v2890_v13, %v2892_v62 }
 0x394   : > { %2950 = vst.msk [vmem:[#allocation3 + $0x58] sm:$0xff] %vm1981_vm4, %v2893_v29 }
 0x39c   : > { %v2205_v19 = vpop.permute.xlu0 %2204  ;;  %v1590_v55 = vpop.f32.mrf.mxu1 }
 0x39d   : > { %2257 = vst.msk [vmem:[#allocation3 + $0x100] sm:$0xff] %vm2248_vm15, %v2205_v19  ;;  %v1684_v4 = vadd.f32 %v1683_v63, %v1590_v55  ;;  %v2105_v63 = vld [vmem:[#allocation3] sm:$0xfe] }
 0x3a2   : > { %v1784_v22 = vpop.f32.mrf.mxu3 }
 0x3a3   : > { %v1806_v27 = vadd.f32 %v1784_v22, %v1679_v21 }
 0x3a4   : > { %v8524_v25 = vld [vmem:[#allocation3 + $0x100] sm:$0xff]  ;;  %v2482_v26 = vpop.permute.xlu0 %2481  ;;  %v1592_v19 = vpop.f32.mrf.mxu1 }
 0x3a5   : > { %v2902_v31 = vrot.slane %v8524_v25, 6  ;;  %2539 = vst.msk [vmem:[#allocation3 + $0x48] sm:$0xff] %vm2248_vm15, %v2482_v26  ;;  %v2451_v32 = vrot.slane %v8524_v25, 3  ;;  %v2327_v34 = vrot.slane %v8524_v25, 2  ;;  %v1826_v35 = vmul.f32 %v8325_v41, %v1806_v27  ;;  %v1685_v27 = vpop.f32.mrf.mxu2 }
 0x3a6   : > { %v2615_v36 = vrot.slane %v8524_v25, 4  ;;  %v2603_v26 = vrot.slane %v8435_v8, 4 }
 0x3a7   : > { %v2903_v37 = vsel %vm621_vm0, %v2900_v6, %v2902_v31  ;;  %v2452_v39 = vsel %vm2435_vm9, %v2449_v7, %v2451_v32  ;;  %v2328_v43 = vsel %vm2311_vm10, %v2325_v9, %v2327_v34  ;;  %v1846_v16 = vadd.f32 %v8339_v49, %v1826_v35  ;;  %v7566_v7 = vld [vmem:[%s10145_s7 + $0x108] sm:$0xff] }
 0x3a8   : > { %2955 = vst.msk [vmem:[#allocation3 + $0xf8] sm:$0xff] %vm1981_vm4, %v2903_v37  ;;  %2491 = vrot.lane.b32.xlu2 %v2452_v39, %s7821_s27  ;;  %v2616_v44 = vsel %vm2599_vm2, %v2613_v10, %v2615_v36  ;;  %v2731_v9 = vrot.slane %v8423_v23, 5  ;;  %v2733_v10 = vrot.slane %v8456_v33, 5  ;;  %3459 = vmatpush.bf16.msrb.mxu1 %v7566_v7  ;;  %v1686_v35 = vadd.f32 %v1685_v27, %v1592_v19  ;;  %v7564_v39 = vld [vmem:[%s10145_s7 + $0xf8] sm:$0xff] }
 0x3a9   : > { %vm1862_vm12 = vcmp.ge.f32.partialorder %v1846_v16, 0.0  ;;  %v1878_v48 = vmul.f32 0.01, %v1846_v16  ;;  %2380 = vst.msk [vmem:[#allocation3 + $0xe8] sm:$0xff] %vm1981_vm4, %v2328_v43  ;;  %v2606_v62 = vsel %vm2599_vm2, %v2603_v26, %v2605_v28 }
 0x3aa   : > { %v1786_v50 = vpop.f32.mrf.mxu3  ;;  %2668 = vst.msk [vmem:[#allocation3 + $0xf0] sm:$0xff] %vm1981_vm4, %v2616_v44  ;;  %v2734_v21 = vsel %vm2723_vm13, %v2731_v9, %v2733_v10  ;;  %v2608_v44 = vsel %vm2599_vm2, %v2605_v28, %v2607_v40 }
 0x3ab   : > { %v1894_v51 = vsel %vm1862_vm12, %v1846_v16, %v1878_v48  ;;  %v1807_v52 = vadd.f32 %v1786_v50, %v1681_v47  ;;  %v2739_v16 = vrot.slane %v8524_v25, 5  ;;  %2663 = vst.msk [vmem:[#allocation3 + $0x50] sm:$0xff] %vm1981_vm4, %v2606_v62 }
 0x3ac   : > { %3460 = vmatpush.bf16.msrb.mxu1 %v7565_v15  ;;  %2664 = vst.msk [vmem:[#allocation3 + $0x70] sm:$0xff] %vm1981_vm4, %v2608_v44 }
 0x3ad   : > { %v1827_v57 = vmul.f32 %v8325_v41, %v1807_v52 }
 0x3ae   : > { %v2488_v18 = vpop.permute.xlu0 %2487 }
 0x3af   : > { %2542 = vst.msk [vmem:[#allocation3 + $0xa8] sm:$0xff] %vm2248_vm15, %v2488_v18  ;;  %v1847_v1 = vadd.f32 %v8339_v49, %v1827_v57  ;;  %v2737_v18 = vrot.slane %v8509_v5, 5  ;;  %v7562_v57 = vld [vmem:[%s10145_s7 + $0xe8] sm:$0xff] }
 0x3b0   : > { %2769 = vrot.lane.b32.xlu2 %v2730_v56, %s7821_s27  ;;  %3461 = vmatpush.bf16.msrb.mxu1 %v7564_v39 }
 0x3b1   : > { %v2209_v42 = vpop.permute.xlu2 %2208  ;;  %vm1863_vm14 = vcmp.ge.f32.partialorder %v1847_v1, 0.0  ;;  %v1879_v6 = vmul.f32 0.01, %v1847_v1 }
 0x3b2   : > { %2259 = vst.msk [vmem:[#allocation3 + $0x140] sm:$0xff] %vm2248_vm15, %v2209_v42  ;;  %v1789_v3 = vpop.f32.mrf.mxu3  ;;  %v7572_v42 = vld [vmem:[%s10145_s7 + $0x138] sm:$0xff] }
 0x3b3   : > { %v1895_v11 = vsel %vm1863_vm14, %v1847_v1, %v1879_v6  ;;  %v1808_v12 = vadd.f32 %v1789_v3, %v1684_v4  ;;  %3486 = vmatpush.bf16.msrb.mxu2 %v7572_v42 }
 0x3b4   : > { %3462 = vmatpush.bf16.msrb.mxu1 %v7563_v53 }
 0x3b5   : > { %v1828_v14 = vmul.f32 %v8325_v41, %v1808_v12  ;;  %v2147_v12 = vrot.slane %v2105_v63, 1 }
 0x3b7   : > { %v1848_v22 = vadd.f32 %v8339_v49, %v1828_v14  ;;  %3487 = vmatpush.bf16.msrb.mxu2 %v7571_v54 }
 0x3b8   : > { %2773 = vrot.lane.b32.xlu2 %v2734_v21, %s7821_s27  ;;  %3463 = vmatpush.bf16.msrb.mxu1 %v7562_v57 }
 0x3b9   : > { %v2486_v0 = vpop.permute.xlu2 %2485  ;;  %vm1864_vm5 = vcmp.ge.f32.partialorder %v1848_v22, 0.0  ;;  %v1880_v37 = vmul.f32 0.01, %v1848_v22  ;;  %v8648_v60 = vld [vmem:[#allocation3 + $0x140] sm:$0xff] }
 0x3ba   : > { %2541 = vst.msk [vmem:[#allocation3 + $0x88] sm:$0xff] %vm2248_vm15, %v2486_v0  ;;  %v1791_v43 = vpop.f32.mrf.mxu3  ;;  %v7561_v0 = vld [vmem:[%s10145_s7 + $0xe0] sm:$0xff]  ;;  %v2455_v7 = vrot.slane %v8648_v60, 3  ;;  %v2906_v15 = vrot.slane %v8648_v60, 6  ;;  %v2331_v19 = vrot.slane %v8648_v60, 2  ;;  %v2619_v42 = vrot.slane %v8648_v60, 4 }
 0x3bb   : > { %v1896_v47 = vsel %vm1864_vm5, %v1848_v22, %v1880_v37  ;;  %v1809_v48 = vadd.f32 %v1791_v43, %v1686_v35  ;;  %3488 = vmatpush.bf16.msrb.mxu2 %v7570_v58  ;;  %v2977_v37 = vld [vmem:[#allocation3 + $0x48] sm:$0xff]  ;;  %v2743_v63 = vrot.slane %v8648_v60, 5  ;;  %v7610_v60 = vld [vmem:[%s10145_s7 + $0x268] sm:$0xff] }
 0x3bc   : > { %v1910_v50 = vmax.f32 %v1894_v51, %v1896_v47  ;;  %v2740_v51 = vsel %vm2723_vm13, %v2737_v18, %v2739_v16  ;;  %3464 = vmatpush.bf16.msrb.mxu1 %v7561_v0  ;;  %v3052_v43 = vpack.c.bf16 %v2977_v37, %v8435_v8 }
 0x3bd   : > { %v1829_v52 = vmul.f32 %v8325_v41, %v1809_v48 }
 0x3be   : > { %v1949_v40 = vrot.slane %v1910_v50, 1  ;;  %v3218_v53 = vunpack.c.h.b16 %v3052_v43 }
 0x3bf   : > { %v1849_v55 = vadd.f32 %v8339_v49, %v1829_v52  ;;  %3489 = vmatpush.bf16.msrb.mxu2 %v7569_v38 }
 0x3c0   : > { %2779 = vrot.lane.b32.xlu2 %v2740_v51, %s7821_s27 }
 0x3c1   : > { %vm1865_vm3 = vcmp.ge.f32.partialorder %v1849_v55, 0.0  ;;  %v1881_v56 = vmul.f32 0.01, %v1849_v55  ;;  %v2985_v57 = vld [vmem:[#allocation3 + $0x88] sm:$0xff] }
 0x3c2   : > { %v3056_v58 = vpack.c.bf16 %v2985_v57, %v8423_v23 }
 0x3c3   : > { %v1897_v61 = vsel %vm1865_vm3, %v1849_v55, %v1881_v56  ;;  %v2735_v56 = vrot.slane %v8452_v30, 5 }
 0x3c4   : > { %v1911_v49 = vmax.f32 %v1895_v11, %v1897_v61  ;;  %v3225_v0 = vunpack.c.l.b16 %v3056_v58 }
 0x3c6   : > { %v1951_v1 = vrot.slane %v1911_v49, 1 }
 0x3c8   : > { %v1952_v17 = vsel %vm942_vm7, %v1949_v40, %v1951_v1  ;;  %v3226_v1 = vunpack.c.h.b16 %v3056_v58 }
 0x3c9   : > { %v2207_v41 = vpop.permute.xlu1 %2206  ;;  %v1979_v21 = vmax.f32 %v1910_v50, %v1952_v17 }
 0x3ca   : > { %2258 = vst.msk [vmem:[#allocation3 + $0x120] sm:$0xff] %vm2248_vm15, %v2207_v41 }
 0x3cb   : > { %1994 = vst.msk [vmem:[#allocation5 + $0x60] sm:$0xff] %vm1981_vm4, %v1979_v21 }
 0x3d1   : > { %v8653_v4 = vld [vmem:[#allocation3 + $0x120] sm:$0xff]  ;;  %v2484_v6 = vpop.permute.xlu1 %2483 }
 0x3d2   : > { %v2904_v3 = vrot.slane %v8653_v4, 6  ;;  %2540 = vst.msk [vmem:[#allocation3 + $0x68] sm:$0xff] %vm2248_vm15, %v2484_v6  ;;  %v2453_v11 = vrot.slane %v8653_v4, 3  ;;  %v2329_v14 = vrot.slane %v8653_v4, 2  ;;  %v2617_v28 = vrot.slane %v8653_v4, 4 }
 0x3d3   : > { %v2100_v40 = vld [vmem:[#allocation5 + $0x60] ss:$2 sm:$0xf]  ;;  %v2741_v61 = vrot.slane %v8653_v4, 5 }
 0x3d4   : > { %v2905_v22 = vsel %vm621_vm0, %v2902_v31, %v2904_v3  ;;  %v2456_v27 = vsel %vm2435_vm9, %v2453_v11, %v2455_v7  ;;  %v2907_v29 = vsel %vm621_vm0, %v2904_v3, %v2906_v15  ;;  %v2454_v35 = vsel %vm2435_vm9, %v2451_v32, %v2453_v11  ;;  %v7584_v3 = vld [vmem:[%s10145_s7 + $0x198] sm:$0xff]  ;;  %v7583_v11 = vld [vmem:[%s10145_s7 + $0x190] sm:$0xff] }
 0x3d5   : > { %2495 = vrot.lane.b32.xlu1 %v2456_v27, %s7821_s27  ;;  %2493 = vrot.lane.b32.xlu0 %v2454_v35, %s7821_s27  ;;  %v2149_v31 = vsel %vm942_vm7, %v2147_v12, %v8380_v20  ;;  %v2332_v39 = vsel %vm2311_vm10, %v2329_v14, %v2331_v19  ;;  %2956 = vst.msk [vmem:[#allocation3 + $0x118] sm:$0xff] %vm1981_vm4, %v2905_v22  ;;  %v2102_v55 = vrot.slane %v2100_v40, 5 }
 0x3d6   : > { %v2330_v32 = vsel %vm2311_vm10, %v2327_v34, %v2329_v14  ;;  %2957 = vst.msk [vmem:[#allocation3 + $0x138] sm:$0xff] %vm1981_vm4, %v2907_v29  ;;  %v2620_v62 = vsel %vm2599_vm2, %v2617_v28, %v2619_v42  ;;  %v7747_v44 = vpack.i.bf16 %v8380_v20, %v2149_v31  ;;  %v2618_v48 = vsel %vm2599_vm2, %v2615_v36, %v2617_v28 }
 0x3d7   : > { %2382 = vst.msk [vmem:[#allocation3 + $0x128] sm:$0xff] %vm1981_vm4, %v2332_v39  ;;  %v3217_v34 = vunpack.c.l.b16 %v3052_v43  ;;  %v2732_v36 = vsel %vm2723_vm13, %v2729_v46, %v2731_v9  ;;  %v2736_v46 = vsel %vm2723_vm13, %v2733_v10, %v2735_v56  ;;  %v2989_v9 = vld [vmem:[#allocation3 + $0xa8] sm:$0xff]  ;;  %v2742_v23 = vsel %vm2723_vm13, %v2739_v16, %v2741_v61  ;;  %3507 = vmatpush.bf16.msrb.mxu3 %v7584_v3  ;;  %v7582_v16 = vld [vmem:[%s10145_s7 + $0x188] sm:$0xff] }
 0x3d8   : > { %2381 = vst.msk [vmem:[#allocation3 + $0x108] sm:$0xff] %vm1981_vm4, %v2330_v32  ;;  %v3058_v49 = vpack.c.bf16 %v2989_v9, %v8456_v33 }
 0x3d9   : > { %v2981_v47 = vld [vmem:[#allocation3 + $0x68] sm:$0xff]  ;;  %2670 = vst.msk [vmem:[#allocation3 + $0x130] sm:$0xff] %vm1981_vm4, %v2620_v62 }
 0x3da   : > { %v3054_v50 = vpack.c.bf16 %v2981_v47, %v8426_v59  ;;  %2669 = vst.msk [vmem:[#allocation3 + $0x110] sm:$0xff] %vm1981_vm4, %v2618_v48  ;;  %v2738_v59 = vsel %vm2723_vm13, %v2735_v56, %v2737_v18  ;;  %v2744_v18 = vsel %vm2723_vm13, %v2741_v61, %v2743_v63  ;;  %v3229_v6 = vunpack.c.l.b16 %v3058_v49  ;;  %v7588_v47 = vld [vmem:[%s10145_s7 + $0x1b8] sm:$0xff]  ;;  %v7578_v48 = vld [vmem:[%s10145_s7 + $0x168] sm:$0xff] }
 0x3db   : > { %2104 = vst.msk [vmem:[#allocation3 + $0x180] sm:$0x78] %vm2085_vm11, %v2102_v55  ;;  %v3230_v38 = vunpack.c.h.b16 %v3058_v49  ;;  %3508 = vmatpush.bf16.msrb.mxu3 %v7583_v11  ;;  %3536 = vmatpush.bf16.msra.mxu1 %v7588_v47 }
 0x3dc   : > { %v3221_v52 = vunpack.c.l.b16 %v3054_v50  ;;  %v3222_v54 = vunpack.c.h.b16 %v3054_v50  ;;  %v8741_v10 = vpack.c.b16 %v3229_v6, %v3225_v0  ;;  %v7587_v50 = vld [vmem:[%s10145_s7 + $0x1b0] sm:$0xff] }
 0x3dd   : > { %7748 = vrot.lane.b32.xlu1 %v7747_v44, %s7821_s27  ;;  %2771 = vrot.lane.b32.xlu0 %v2732_v36, %s7821_s27  ;;  %v8743_v33 = vpack.c.b16 %v3230_v38, %v3226_v1  ;;  %v7579_v44 = vld [vmem:[%s10145_s7 + $0x170] sm:$0xff]  ;;  %v7585_v36 = vld [vmem:[%s10145_s7 + $0x1a0] sm:$0xff] }
 0x3de   : > { %v8713_v51 = vpack.c.b16 %v3221_v52, %v3217_v34  ;;  %v8715_v41 = vpack.c.b16 %v3222_v54, %v3218_v53  ;;  %v7577_v34 = vld [vmem:[%s10145_s7 + $0x160] sm:$0xff]  ;;  %v7586_v52 = vld [vmem:[%s10145_s7 + $0x1a8] sm:$0xff] }
 0x3df   : > { %3509 = vmatpush.bf16.msrb.mxu3 %v7582_v16  ;;  %3537 = vmatpush.bf16.msra.mxu1 %v7587_v50  ;;  %v2983_v16 = vld [vmem:[#allocation3 + $0x78] sm:$0xff] }
 0x3e0   : > { %3465 = vmatmul.bf16.vlgmr.msrb.gmra.mxu1 %v8713_v51  ;;  %3490 = vmatmul.bf16.vlgmr.msrb.gmra.mxu2 %v8715_v41 }
 0x3e3   : > { %3538 = vmatpush.bf16.msra.mxu1 %v7586_v52 }
 0x3e5   : > { %2777 = vrot.lane.b32.xlu1 %v2738_v59, %s7821_s27  ;;  %2775 = vrot.lane.b32.xlu0 %v2736_v46, %s7821_s27 }
 0x3e7   : > { %3539 = vmatpush.bf16.msra.mxu1 %v7585_v36 }
 0x3ed   : > { %2783 = vrot.lane.b32.xlu1 %v2744_v18, %s7821_s27  ;;  %2781 = vrot.lane.b32.xlu0 %v2742_v23, %s7821_s27  ;;  %v2979_v23 = vld [vmem:[#allocation3 + $0x58] sm:$0xff] }
 0x3f0   : > { %3469 = vmatmul.bf16.gmra.mxu1 %v8741_v10  ;;  %3494 = vmatmul.bf16.gmra.mxu2 %v8743_v33 }
 0x402   : > { %v2490_v12 = vpop.permute.xlu1 %2489  ;;  %v2492_v14 = vpop.permute.xlu2 %2491 }
 0x403   : > { %2543 = vst.msk [vmem:[#allocation3 + $0xc8] sm:$0xff] %vm2248_vm15, %v2490_v12 }
 0x404   : > { %2544 = vst.msk [vmem:[#allocation3 + $0xe8] sm:$0xff] %vm2248_vm15, %v2492_v14 }
 0x40a   : > { %v2770_v17 = vpop.permute.xlu2 %2769  ;;  %v2993_v21 = vld [vmem:[#allocation3 + $0xc8] sm:$0xff] }
 0x40b   : > { %2827 = vst.msk [vmem:[#allocation3 + $0x50] sm:$0xff] %vm2248_vm15, %v2770_v17  ;;  %v2997_v22 = vld [vmem:[#allocation3 + $0xe8] sm:$0xff]  ;;  %v3060_v27 = vpack.c.bf16 %v2993_v21, %v8452_v30  ;;  %v7581_v30 = vld [vmem:[%s10145_s7 + $0x180] sm:$0xff] }
 0x40c   : > { %v3062_v28 = vpack.c.bf16 %v2997_v22, %v8509_v5  ;;  %3510 = vmatpush.bf16.msrb.mxu3 %v7581_v30  ;;  %v7580_v5 = vld [vmem:[%s10145_s7 + $0x178] sm:$0xff] }
 0x40d   : > { %v3233_v29 = vunpack.c.l.b16 %v3060_v27  ;;  %v3234_v35 = vunpack.c.h.b16 %v3060_v27 }
 0x40e   : > { %v3237_v37 = vunpack.c.l.b16 %v3062_v28  ;;  %v3238_v31 = vunpack.c.h.b16 %v3062_v28 }
 0x410   : > { %v8761_v39 = vpack.c.b16 %v3237_v37, %v3233_v29  ;;  %v8763_v32 = vpack.c.b16 %v3238_v31, %v3234_v35  ;;  %3511 = vmatpush.bf16.msrb.mxu3 %v7580_v5 }
 0x412   : > { %3473 = vmatmul.bf16.gmra.mxu1 %v8761_v39  ;;  %3498 = vmatmul.bf16.gmra.mxu2 %v8763_v32  ;;  %v2774_v43 = vpop.permute.xlu2 %2773  ;;  %v2978_v18 = vld [vmem:[#allocation3 + $0x50] sm:$0xff] }
 0x413   : > { %2829 = vst.msk [vmem:[#allocation3 + $0x90] sm:$0xff] %vm2248_vm15, %v2774_v43  ;;  %v8807_v3 = vpack.c.bf16 %v2979_v23, %v2978_v18 }
 0x414   : > { %3512 = vmatpush.bf16.msrb.mxu3 %v7579_v44 }
 0x415   : > { %v3219_v28 = vunpack.c.l.b16 %v8807_v3  ;;  %v3220_v18 = vunpack.c.h.b16 %v8807_v3 }
 0x418   : > { %3513 = vmatpush.bf16.msrb.mxu3 %v7578_v48 }
 0x41a   : > { %v2780_v62 = vpop.permute.xlu2 %2779 }
 0x41b   : > { %2832 = vst.msk [vmem:[#allocation3 + $0xf0] sm:$0xff] %vm2248_vm15, %v2780_v62 }
 0x41c   : > { %3514 = vmatpush.bf16.msrb.mxu3 %v7577_v34 }
 0x447   : > { %v2496_v53 = vpop.permute.xlu1 %2495  ;;  %v2494_v54 = vpop.permute.xlu0 %2493 }
 0x448   : > { %2546 = vst.msk [vmem:[#allocation3 + $0x128] sm:$0xff] %vm2248_vm15, %v2496_v53  ;;  %v2117_v53 = vld [vmem:[#allocation3 + $0x180] sm:$0xff] }
 0x449   : > { %2545 = vst.msk [vmem:[#allocation3 + $0x108] sm:$0xff] %vm2248_vm15, %v2494_v54 }
 0x44f   : > { %v7749_v40 = vpop.permute.xlu1 %7748  ;;  %v3005_v55 = vld [vmem:[#allocation3 + $0x128] sm:$0xff]  ;;  %v2772_v59 = vpop.permute.xlu0 %2771 }
 0x450   : > { %v7751_v56 = vunpack.i.h.bf16 %v7749_v40  ;;  %v7750_v57 = vunpack.i.l.bf16 %v7749_v40  ;;  %v3001_v46 = vld [vmem:[#allocation3 + $0x108] sm:$0xff]  ;;  %v3066_v9 = vpack.c.bf16 %v3005_v55, %v8653_v4  ;;  %2828 = vst.msk [vmem:[#allocation3 + $0x70] sm:$0xff] %vm2248_vm15, %v2772_v59 }
 0x451   : > { %v3064_v58 = vpack.c.bf16 %v3001_v46, %v8524_v25 }
 0x452   : > { %2250 = vst.msk [vmem:[#allocation3 + $0x20] sm:$0xff] %vm2248_vm15, %v7751_v56  ;;  %v3245_v61 = vunpack.c.l.b16 %v3066_v9  ;;  %v3246_v49 = vunpack.c.h.b16 %v3066_v9 }
 0x453   : > { %2249 = vst.msk [vmem:[#allocation3] sm:$0xff] %vm2248_vm15, %v7750_v57  ;;  %v3241_v0 = vunpack.c.l.b16 %v3064_v58  ;;  %v3242_v1 = vunpack.c.h.b16 %v3064_v58  ;;  %v7810_v57 = vld [vmem:[#allocation3 + $0x8] sm:$0xff]  ;;  %v2170_v58 = vrot.slane %v2117_v53, 1 }
 0x454   : > { %v8839_v59 = vrot.slane %v7810_v57, 1  ;;  %v3007_v57 = vld [vmem:[#allocation3 + $0x138] sm:$0xff] }
 0x455   : > { %v8803_v6 = vpack.c.b16 %v3245_v61, %v3241_v0  ;;  %v8805_v38 = vpack.c.b16 %v3246_v49, %v3242_v1 }
 0x457   : > { %3477 = vmatmul.bf16.gmra.mxu1 %v8803_v6  ;;  %3502 = vmatmul.bf16.gmra.mxu2 %v8805_v38  ;;  %v2778_v25 = vpop.permute.xlu1 %2777  ;;  %v2776_v4 = vpop.permute.xlu0 %2775  ;;  %v2982_v11 = vld [vmem:[#allocation3 + $0x70] sm:$0xff] }
 0x458   : > { %2831 = vst.msk [vmem:[#allocation3 + $0xd0] sm:$0xff] %vm2248_vm15, %v2778_v25  ;;  %v3055_v14 = vpack.c.bf16 %v2983_v16, %v2982_v11  ;;  %v2991_v11 = vld [vmem:[#allocation3 + $0xb8] sm:$0xff] }
 0x459   : > { %v8812_v12 = vld [vmem:[#allocation3 + $0x20] sm:$0xff]  ;;  %2830 = vst.msk [vmem:[#allocation3 + $0xb0] sm:$0xff] %vm2248_vm15, %v2776_v4  ;;  %v2986_v4 = vld [vmem:[#allocation3 + $0x90] sm:$0xff] }
 0x45a   : > { %v2888_v17 = vrot.slane %v8812_v12, 6  ;;  %v2845_v21 = vld [vmem:[#allocation3] sm:$0xc0]  ;;  %v2725_v27 = vrot.slane %v8812_v12, 5  ;;  %v2437_v37 = vrot.slane %v8812_v12, 3  ;;  %v3223_v43 = vunpack.c.l.b16 %v3055_v14 }
 0x45b   : > { %v2681_v22 = vld [vmem:[#allocation3] sm:$0xe0]  ;;  %v2887_v29 = vrot.slane %v2845_v21, 6  ;;  %v2313_v36 = vrot.slane %v8812_v12, 2  ;;  %v2601_v40 = vrot.slane %v8812_v12, 4  ;;  %v3224_v9 = vunpack.c.h.b16 %v3055_v14  ;;  %v2987_v21 = vld [vmem:[#allocation3 + $0x98] sm:$0xff] }
 0x45c   : > { %v2724_v35 = vrot.slane %v2681_v22, 5  ;;  %v2393_v31 = vld [vmem:[#allocation3] sm:$0xf8]  ;;  %v2891_v62 = vsel %vm621_vm0, %v2888_v17, %v2890_v13  ;;  %v2440_v50 = vsel %vm2435_vm9, %v2437_v37, %v2439_v24  ;;  %v8828_v52 = vpack.c.b16 %v3223_v43, %v3219_v28 }
 0x45d   : > { %v2436_v30 = vrot.slane %v2393_v31, 3  ;;  %v2269_v5 = vld [vmem:[#allocation3] sm:$0xfc]  ;;  %v2889_v47 = vsel %vm621_vm0, %v2887_v29, %v2888_v17  ;;  %2949 = vst.msk [vmem:[#allocation3 + $0x38] sm:$0xff] %vm1981_vm4, %v2891_v62  ;;  %v3466_v34 = vpop.f32.mrf.mxu1  ;;  %2479 = vrot.lane.b32.xlu0 %v2440_v50, %s7821_s27  ;;  %v2604_v61 = vsel %vm2599_vm2, %v2601_v40, %v2603_v26  ;;  %v2316_v1 = vsel %vm2311_vm10, %v2313_v36, %v2315_v2  ;;  %v2995_v62 = vld [vmem:[#allocation3 + $0xd8] sm:$0xff] }
 0x45e   : > { %v2557_v44 = vld [vmem:[#allocation3] sm:$0xf0]  ;;  %v2726_v48 = vsel %vm2723_vm13, %v2724_v35, %v2725_v27  ;;  %2948 = vst.msk [vmem:[#allocation3 + $0x18] sm:$0xff] %vm1981_vm4, %v2889_v47  ;;  %v2312_v54 = vrot.slane %v2269_v5, 2  ;;  %3515 = vmatmul.bf16.vlgmr.msrb.gmra.mxu3 %v8828_v52  ;;  %v8856_v26 = vpack.c.b16 %v3224_v9, %v3220_v18  ;;  %v2173_v14 = vsel %vm942_vm7, %v2170_v58, %v8839_v59 }
 0x45f   : > { %2765 = vrot.lane.b32.xlu1 %v2726_v48, %s7821_s27  ;;  %v2438_v13 = vsel %vm2435_vm9, %v2436_v30, %v2437_v37  ;;  %v2784_v24 = vpop.permute.xlu1 %2783  ;;  %v2600_v55 = vrot.slane %v2557_v44, 4  ;;  %v2782_v56 = vpop.permute.xlu0 %2781  ;;  %2662 = vst.msk [vmem:[#allocation3 + $0x30] sm:$0xff] %vm1981_vm4, %v2604_v61  ;;  %v2171_v2 = vsel %vm942_vm7, %v8380_v20, %v2170_v58  ;;  %v2728_v3 = vsel %vm2723_vm13, %v2725_v27, %v2727_v45  ;;  %v2994_v45 = vld [vmem:[#allocation3 + $0xd0] sm:$0xff]  ;;  %v2999_v48 = vld [vmem:[#allocation3 + $0xf8] sm:$0xff] }
 0x460   : > { %2477 = vrot.lane.b32.xlu2 %v2438_v13, %s7821_s27  ;;  %2834 = vst.msk [vmem:[#allocation3 + $0x130] sm:$0xff] %vm2248_vm15, %v2784_v24  ;;  %v2314_v46 = vsel %vm2311_vm10, %v2312_v54, %v2313_v36  ;;  %v2990_v0 = vld [vmem:[#allocation3 + $0xb0] sm:$0xff]  ;;  %v3057_v22 = vpack.c.bf16 %v2987_v21, %v2986_v4  ;;  %v3061_v47 = vpack.c.bf16 %v2995_v62, %v2994_v45  ;;  %v7539_v21 = vld [vmem:[%s10145_s7 + $0x30] sm:$0xff]  ;;  %v7537_v45 = vld [vmem:[%s10145_s7 + $0x20] sm:$0xff] }
 0x461   : > { %2833 = vst.msk [vmem:[#allocation3 + $0x110] sm:$0xff] %vm2248_vm15, %v2782_v56  ;;  %v2602_v49 = vsel %vm2599_vm2, %v2600_v55, %v2601_v40  ;;  %v3059_v17 = vpack.c.bf16 %v2991_v11, %v2990_v0  ;;  %v2998_v30 = vld [vmem:[#allocation3 + $0xf0] sm:$0xff]  ;;  %v3003_v56 = vld [vmem:[#allocation3 + $0x118] sm:$0xff] }
 0x462   : > { %2373 = vst.msk [vmem:[#allocation3 + $0x8] sm:$0xff] %vm1981_vm4, %v2314_v46  ;;  %v3227_v29 = vunpack.c.l.b16 %v3057_v22  ;;  %v3228_v31 = vunpack.c.h.b16 %v3057_v22  ;;  %v3063_v50 = vpack.c.bf16 %v2999_v48, %v2998_v30  ;;  %v3236_v36 = vunpack.c.h.b16 %v3061_v47  ;;  %v7540_v11 = vld [vmem:[%s10145_s7 + $0x38] sm:$0xff]  ;;  %v7547_v22 = vld [vmem:[%s10145_s7 + $0x70] sm:$0xff] }
 0x463   : > { %v3491_v23 = vpop.f32.mrf.mxu2  ;;  %2661 = vst.msk [vmem:[#allocation3 + $0x10] sm:$0xff] %vm1981_vm4, %v2602_v49  ;;  %v3231_v28 = vunpack.c.l.b16 %v3059_v17  ;;  %v3232_v8 = vunpack.c.h.b16 %v3059_v17  ;;  %3747 = vmatpush.bf16.msra.mxu2 %v7540_v11  ;;  %v7536_v62 = vld [vmem:[%s10145_s7 + $0x18] sm:$0xff]  ;;  %v7535_v48 = vld [vmem:[%s10145_s7 + $0x10] sm:$0xff] }
 0x464   : > { %v8853_v25 = vadd.f32 %v3491_v23, %v3466_v34  ;;  %2374 = vst.msk [vmem:[#allocation3 + $0x28] sm:$0xff] %vm1981_vm4, %v2316_v1  ;;  %v3235_v34 = vunpack.c.l.b16 %v3061_v47  ;;  %v3239_v53 = vunpack.c.l.b16 %v3063_v50  ;;  %v3240_v55 = vunpack.c.h.b16 %v3063_v50  ;;  %v7544_v30 = vld [vmem:[%s10145_s7 + $0x58] sm:$0xff]  ;;  %v7543_v50 = vld [vmem:[%s10145_s7 + $0x50] sm:$0xff] }
 0x465   : > { %v3468_v16 = vpop.f32.mrf.mxu1  ;;  %2210 = vrot.lane.b32.xlu0 %v2171_v2, %s7821_s27  ;;  %v8871_v37 = vpack.c.b16 %v3231_v28, %v3227_v29  ;;  %v8876_v44 = vpack.c.b16 %v3232_v8, %v3228_v31  ;;  %v7555_v28 = vld [vmem:[%s10145_s7 + $0xb0] sm:$0xff]  ;;  %v7546_v29 = vld [vmem:[%s10145_s7 + $0x68] sm:$0xff]  ;;  %v7553_v31 = vld [vmem:[%s10145_s7 + $0xa0] sm:$0xff] }
 0x466   : > { %v8880_v54 = vpack.c.b16 %v3239_v53, %v3235_v34  ;;  %v8883_v46 = vpack.c.b16 %v3240_v55, %v3236_v36  ;;  %v7548_v16 = vld [vmem:[%s10145_s7 + $0x78] sm:$0xff]  ;;  %v7551_v34 = vld [vmem:[%s10145_s7 + $0x90] sm:$0xff]  ;;  %v7534_v53 = vld [vmem:[%s10145_s7 + $0x8] sm:$0xff] }
 0x467   : > { %2212 = vrot.lane.b32.xlu1 %v2173_v14, %s7821_s27  ;;  %6495 = vmatmul.msk.bf16.vlgmr.msra.gmra.mxu1 %vm1981_vm4, %v8856_v26  ;;  %v3006_v40 = vld [vmem:[#allocation3 + $0x130] sm:$0xff]  ;;  %v7542_v36 = vld [vmem:[%s10145_s7 + $0x48] sm:$0xff] }
 0x468   : > { %2767 = vrot.lane.b32.xlu2 %v2728_v3, %s7821_s27  ;;  %v3002_v24 = vld [vmem:[#allocation3 + $0x110] sm:$0xff]  ;;  %v3067_v58 = vpack.c.bf16 %v3007_v57, %v3006_v40  ;;  %3772 = vmatpush.bf16.msra.mxu3 %v7548_v16  ;;  %v7558_v40 = vld [vmem:[%s10145_s7 + $0xc8] sm:$0xff]  ;;  %v7533_v57 = vld [vmem:[%s10145_s7] sm:$0xff] }
 0x469   : > { %v3065_v9 = vpack.c.bf16 %v3003_v56, %v3002_v24  ;;  %v7556_v14 = vld [vmem:[%s10145_s7 + $0xb8] sm:$0xff]  ;;  %3748 = vmatpush.bf16.msra.mxu2 %v7539_v21  ;;  %v7550_v24 = vld [vmem:[%s10145_s7 + $0x88] sm:$0xff]  ;;  %v2975_v16 = vld [vmem:[#allocation3 + $0x38] sm:$0xff] }
 0x46a   : > { %v3247_v49 = vunpack.c.l.b16 %v3067_v58  ;;  %v3248_v18 = vunpack.c.h.b16 %v3067_v58  ;;  %3797 = vmatpush.bf16.msrb.mxu0 %v7556_v14  ;;  %v7560_v47 = vld [vmem:[%s10145_s7 + $0xd8] sm:$0xff]  ;;  %v7549_v58 = vld [vmem:[%s10145_s7 + $0x80] sm:$0xff] }
 0x46b   : > { %v3493_v20 = vpop.f32.mrf.mxu2  ;;  %v3243_v61 = vunpack.c.l.b16 %v3065_v9  ;;  %v3244_v1 = vunpack.c.h.b16 %v3065_v9  ;;  %3826 = vmatpush.bf16.msrb.mxu1 %v7560_v47  ;;  %v7541_v9 = vld [vmem:[%s10145_s7 + $0x40] sm:$0xff] }
 0x46c   : > { %3773 = vmatpush.bf16.msra.mxu3 %v7547_v22  ;;  %v7538_v20 = vld [vmem:[%s10145_s7 + $0x28] sm:$0xff] }
 0x46d   : > { %v3470_v35 = vpop.f32.mrf.mxu1  ;;  %v8887_v0 = vpack.c.b16 %v3247_v49, %v3243_v61  ;;  %v8890_v23 = vpack.c.b16 %v3248_v18, %v3244_v1  ;;  %3749 = vmatpush.bf16.msra.mxu2 %v7538_v20  ;;  %v7557_v61 = vld [vmem:[%s10145_s7 + $0xc0] sm:$0xff] }
 0x46e   : > { %3519 = vmatmul.bf16.gmra.mxu3 %v8871_v37  ;;  %3798 = vmatpush.bf16.msrb.mxu0 %v7555_v28  ;;  %v2971_v20 = vld [vmem:[#allocation3 + $0x18] sm:$0xff] }
 0x470   : > { %3774 = vmatpush.bf16.msra.mxu3 %v7546_v29 }
 0x471   : > { %3750 = vmatpush.bf16.msra.mxu2 %v7537_v45 }
 0x473   : > { %v3495_v27 = vpop.f32.mrf.mxu2 }
 0x474   : > { %v8874_v43 = vadd.f32 %v3495_v27, %v3470_v35  ;;  %v7554_v35 = vld [vmem:[%s10145_s7 + $0xa8] sm:$0xff]  ;;  %v7545_v27 = vld [vmem:[%s10145_s7 + $0x60] sm:$0xff] }
 0x475   : > { %v3472_v5 = vpop.f32.mrf.mxu1  ;;  %3799 = vmatpush.bf16.msrb.mxu0 %v7554_v35  ;;  %3775 = vmatpush.bf16.msra.mxu3 %v7545_v27 }
 0x476   : > { %v7552_v5 = vld [vmem:[%s10145_s7 + $0x98] sm:$0xff]  ;;  %3751 = vmatpush.bf16.msra.mxu2 %v7536_v62 }
 0x477   : > { %6496 = vmatmul.msk.bf16.gmra.mxu1 %vm1981_vm4, %v8876_v44 }
 0x479   : > { %3800 = vmatpush.bf16.msrb.mxu0 %v7553_v31  ;;  %3776 = vmatpush.bf16.msra.mxu3 %v7544_v30 }
 0x47a   : > { %3752 = vmatpush.bf16.msra.mxu2 %v7535_v48 }
 0x47b   : > { %v3497_v13 = vpop.f32.mrf.mxu2 }
 0x47c   : > { %v7559_v13 = vld [vmem:[%s10145_s7 + $0xd0] sm:$0xff] }
 0x47d   : > { %3801 = vmatpush.bf16.msrb.mxu0 %v7552_v5  ;;  %3777 = vmatpush.bf16.msra.mxu3 %v7543_v50 }
 0x47e   : > { %3523 = vmatmul.bf16.gmra.mxu3 %v8880_v54  ;;  %3827 = vmatpush.bf16.msrb.mxu1 %v7559_v13 }
 0x47f   : > { %3753 = vmatpush.bf16.msra.mxu2 %v7534_v53 }
 0x481   : > { %3802 = vmatpush.bf16.msrb.mxu0 %v7551_v34  ;;  %3778 = vmatpush.bf16.msra.mxu3 %v7542_v36 }
 0x482   : > { %3828 = vmatpush.bf16.msrb.mxu1 %v7558_v40 }
 0x483   : > { %3754 = vmatpush.bf16.msra.mxu2 %v7533_v57 }
 0x485   : > { %3803 = vmatpush.bf16.msrb.mxu0 %v7550_v24  ;;  %3779 = vmatpush.bf16.msra.mxu3 %v7541_v9 }
 0x486   : > { %3829 = vmatpush.bf16.msrb.mxu1 %v7557_v61  ;;  %v7612_v61 = vld [vmem:[%s10145_s7 + $0x278] sm:$0xff] }
 0x487   : > { %6497 = vmatmul.msk.bf16.gmra.mxu1 %vm1981_vm4, %v8883_v46 }
 0x489   : > { %3804 = vmatpush.bf16.msrb.mxu0 %v7549_v58 }
 0x48d   : > { %4144 = vmatpush.bf16.msra.mxu0 %v7612_v61  ;;  %v7591_v61 = vld [vmem:[%s10145_s7 + $0x1d0] sm:$0xff] }
 0x48e   : > { %3527 = vmatmul.bf16.gmra.mxu3 %v8887_v0 }
 0x48f   : > { %v3474_v4 = vpop.f32.mrf.mxu1 }
 0x495   : > { %v3499_v2 = vpop.f32.mrf.mxu2 }
 0x496   : > { %v8903_v17 = vadd.f32 %v3499_v2, %v3474_v4  ;;  %v2968_v2 = vld [vmem:[#allocation3] sm:$0xff] }
 0x497   : > { %6498 = vmatmul.msk.bf16.gmra.mxu1 %vm1981_vm4, %v8890_v23  ;;  %v3476_v3 = vpop.f32.mrf.mxu1 }
 0x49d   : > { %v3501_v8 = vpop.f32.mrf.mxu2 }
 0x4ba   : > { %v2478_v55 = vpop.permute.xlu2 %2477 }
 0x4bb   : > { %2537 = vst.msk [vmem:[#allocation3 + $0x8] sm:$0xff] %vm2248_vm15, %v2478_v55 }
 0x4c2   : > { %v2768_v56 = vpop.permute.xlu2 %2767  ;;  %v2969_v11 = vld [vmem:[#allocation3 + $0x8] sm:$0xff] }
 0x4c3   : > { %2826 = vst.msk [vmem:[#allocation3 + $0x30] sm:$0xff] %vm2248_vm15, %v2768_v56  ;;  %v3048_v22 = vpack.c.bf16 %v2969_v11, %v2968_v2  ;;  %v7604_v56 = vld [vmem:[%s10145_s7 + $0x238] sm:$0xff] }
 0x4c4   : > { %4119 = vmatpush.bf16.msrb.mxu3 %v7604_v56 }
 0x4c5   : > { %v3561_v48 = vunpack.c.l.b16 %v3048_v22  ;;  %v3562_v34 = vunpack.c.h.b16 %v3048_v22 }
 0x4ca   : > { %v2974_v18 = vld [vmem:[#allocation3 + $0x30] sm:$0xff] }
 0x4cb   : > { %v3051_v14 = vpack.c.bf16 %v2975_v16, %v2974_v18 }
 0x4cd   : > { %v3567_v27 = vunpack.c.l.b16 %v3051_v14  ;;  %v3568_v5 = vunpack.c.h.b16 %v3051_v14 }
 0x4cf   : > { %v2480_v1 = vpop.permute.xlu0 %2479 }
 0x4d0   : > { %2538 = vst.msk [vmem:[#allocation3 + $0x28] sm:$0xff] %vm2248_vm15, %v2480_v1 }
 0x4d1   : > { %v2766_v49 = vpop.permute.xlu1 %2765 }
 0x4d2   : > { %2825 = vst.msk [vmem:[#allocation3 + $0x10] sm:$0xff] %vm2248_vm15, %v2766_v49 }
 0x4d4   : > { %v3478_v4 = vpop.f32.mrf.mxu1 }
 0x4d7   : > { %v2211_v21 = vpop.permute.xlu0 %2210  ;;  %v2973_v29 = vld [vmem:[#allocation3 + $0x28] sm:$0xff] }
 0x4d8   : > { %2260 = vst.msk [vmem:[#allocation3 + $0x160] sm:$0xff] %vm2248_vm15, %v2211_v21  ;;  %v3050_v45 = vpack.c.bf16 %v2973_v29, %v8812_v12  ;;  %v7596_v12 = vld [vmem:[%s10145_s7 + $0x1f8] sm:$0xff] }
 0x4d9   : > { %v2213_v3 = vpop.permute.xlu1 %2212  ;;  %v2970_v28 = vld [vmem:[#allocation3 + $0x10] sm:$0xff]  ;;  %4094 = vmatpush.bf16.msrb.mxu2 %v7596_v12 }
 0x4da   : > { %2261 = vst.msk [vmem:[#allocation3 + $0x180] sm:$0xff] %vm2248_vm15, %v2213_v3  ;;  %v3049_v35 = vpack.c.bf16 %v2971_v20, %v2970_v28  ;;  %v3503_v8 = vpop.f32.mrf.mxu2  ;;  %v3565_v50 = vunpack.c.l.b16 %v3050_v45  ;;  %v3566_v13 = vunpack.c.h.b16 %v3050_v45  ;;  %v7611_v45 = vld [vmem:[%s10145_s7 + $0x270] sm:$0xff] }
 0x4db   : > { %v8987_v31 = vadd.f32 %v3503_v8, %v3478_v4  ;;  %v7603_v8 = vld [vmem:[%s10145_s7 + $0x230] sm:$0xff]  ;;  %4145 = vmatpush.bf16.msra.mxu0 %v7611_v45 }
 0x4dc   : > { %v3563_v62 = vunpack.c.l.b16 %v3049_v35  ;;  %v3564_v30 = vunpack.c.h.b16 %v3049_v35  ;;  %v3480_v47 = vpop.f32.mrf.mxu1  ;;  %v3569_v24 = vpack.c.b16 %v3565_v50, %v3561_v48  ;;  %v3570_v40 = vpack.c.b16 %v3566_v13, %v3562_v34  ;;  %4120 = vmatpush.bf16.msrb.mxu3 %v7603_v8  ;;  %v7593_v13 = vld [vmem:[%s10145_s7 + $0x1e0] sm:$0xff] }
 0x4de   : > { %v3571_v53 = vpack.c.b16 %v3567_v27, %v3563_v62  ;;  %v3572_v36 = vpack.c.b16 %v3568_v5, %v3564_v30  ;;  %3755 = vmatmul.bf16.vlgmr.msra.gmra.mxu2 %v3569_v24  ;;  %3780 = vmatmul.bf16.vlgmr.msra.gmra.mxu3 %v3570_v40  ;;  %v7594_v30 = vld [vmem:[%s10145_s7 + $0x1e8] sm:$0xff]  ;;  %v7592_v24 = vld [vmem:[%s10145_s7 + $0x1d8] sm:$0xff] }
 0x4df   : > { %v8999_v9 = vld [vmem:[#allocation3 + $0x160] sm:$0xff]  ;;  %4146 = vmatpush.bf16.msra.mxu0 %v7610_v60  ;;  %v7600_v40 = vld [vmem:[%s10145_s7 + $0x218] sm:$0xff] }
 0x4e0   : > { %3805 = vmatmul.bf16.vlgmr.msrb.gmra.mxu0 %v3571_v53  ;;  %6611 = vmatmul.msk.bf16.vlgmr.msrb.gmra.mxu1 %vm1981_vm4, %v3572_v36  ;;  %v2908_v1 = vrot.slane %v8999_v9, 6  ;;  %v2745_v11 = vrot.slane %v8999_v9, 5  ;;  %v2457_v16 = vrot.slane %v8999_v9, 3  ;;  %v2333_v14 = vrot.slane %v8999_v9, 2  ;;  %v7602_v5 = vld [vmem:[%s10145_s7 + $0x228] sm:$0xff]  ;;  %v7601_v53 = vld [vmem:[%s10145_s7 + $0x220] sm:$0xff] }
 0x4e1   : > { %v8990_v55 = vld [vmem:[#allocation3 + $0x180] sm:$0xff]  ;;  %v3516_v4 = vpop.f32.mrf.mxu3  ;;  %v2621_v3 = vrot.slane %v8999_v9, 4  ;;  %4121 = vmatpush.bf16.msrb.mxu3 %v7602_v5  ;;  %v7609_v36 = vld [vmem:[%s10145_s7 + $0x260] sm:$0xff]  ;;  %v7624_v60 = vld [vmem:[%s10145_s7 + $0x2d8] sm:$0xff] }
 0x4e2   : > { %v2910_v57 = vrot.slane %v8990_v55, 6  ;;  %v2459_v58 = vrot.slane %v8990_v55, 3  ;;  %v2623_v49 = vrot.slane %v8990_v55, 4  ;;  %v3505_v18 = vpop.f32.mrf.mxu2  ;;  %v3517_v2 = vadd.f32 %v3516_v4, %v8853_v25  ;;  %v7614_v4 = vld [vmem:[%s10145_s7 + $0x288] sm:$0xff] }
 0x4e3   : > { %v2335_v21 = vrot.slane %v8990_v55, 2  ;;  %v2909_v22 = vsel %vm621_vm0, %v2906_v15, %v2908_v1  ;;  %v2746_v29 = vsel %vm2723_vm13, %v2743_v63, %v2745_v11  ;;  %v2458_v15 = vsel %vm2435_vm9, %v2455_v7, %v2457_v16  ;;  %v7595_v63 = vld [vmem:[%s10145_s7 + $0x1f0] sm:$0xff]  ;;  %4147 = vmatpush.bf16.msra.mxu0 %v7609_v36  ;;  %v7621_v36 = vld [vmem:[%s10145_s7 + $0x2c0] sm:$0xff] }
 0x4e4   : > { %v2911_v28 = vsel %vm621_vm0, %v2908_v1, %v2910_v57  ;;  %v3541_v20 = vpop.f32.mrf.mxu1  ;;  %v2460_v25 = vsel %vm2435_vm9, %v2457_v16, %v2459_v58  ;;  %2958 = vst.msk [vmem:[#allocation3 + $0x158] sm:$0xff] %vm1981_vm4, %v2909_v22  ;;  %2785 = vrot.lane.b32.xlu1 %v2746_v29, %s7821_s27  ;;  %2497 = vrot.lane.b32.xlu2 %v2458_v15, %s7821_s27  ;;  %v2747_v47 = vrot.slane %v8990_v55, 5  ;;  %v7599_v1 = vld [vmem:[%s10145_s7 + $0x210] sm:$0xff]  ;;  %v7598_v16 = vld [vmem:[%s10145_s7 + $0x208] sm:$0xff] }
 0x4e5   : > { %v9026_v35 = vadd.f32 %v3541_v20, %v3517_v2  ;;  %2499 = vrot.lane.b32.xlu0 %v2460_v25, %s7821_s27  ;;  %2959 = vst.msk [vmem:[#allocation3 + $0x178] sm:$0xff] %vm1981_vm4, %v2911_v28  ;;  %v2334_v7 = vsel %vm2311_vm10, %v2331_v19, %v2333_v14  ;;  %v2624_v27 = vsel %vm2599_vm2, %v2621_v3, %v2623_v49  ;;  %v7607_v18 = vld [vmem:[%s10145_s7 + $0x250] sm:$0xff]  ;;  %v7606_v2 = vld [vmem:[%s10145_s7 + $0x248] sm:$0xff]  ;;  %v7589_v22 = vld [vmem:[%s10145_s7 + $0x1c0] sm:$0xff] }
 0x4e6   : > { %v2622_v62 = vsel %vm2599_vm2, %v2619_v42, %v2621_v3  ;;  %4095 = vmatpush.bf16.msrb.mxu2 %v7595_v63  ;;  %2383 = vst.msk [vmem:[#allocation3 + $0x148] sm:$0xff] %vm1981_vm4, %v2334_v7  ;;  %v2336_v19 = vsel %vm2311_vm10, %v2333_v14, %v2335_v21  ;;  %v9069_v42 = vpack.i.bf16 %v8839_v59, %v8839_v59  ;;  %v7597_v28 = vld [vmem:[%s10145_s7 + $0x200] sm:$0xff] }
 0x4e7   : > { %2672 = vst.msk [vmem:[#allocation3 + $0x170] sm:$0xff] %vm1981_vm4, %v2624_v27  ;;  %v2748_v34 = vsel %vm2723_vm13, %v2745_v11, %v2747_v47  ;;  %4122 = vmatpush.bf16.msrb.mxu3 %v7601_v53  ;;  %v7590_v11 = vld [vmem:[%s10145_s7 + $0x1c8] sm:$0xff]  ;;  %v7605_v20 = vld [vmem:[%s10145_s7 + $0x240] sm:$0xff] }
 0x4e8   : > { %2671 = vst.msk [vmem:[#allocation3 + $0x150] sm:$0xff] %vm1981_vm4, %v2622_v62  ;;  %v7613_v29 = vld [vmem:[%s10145_s7 + $0x280] sm:$0xff] }
 0x4e9   : > { %v3518_v48 = vpop.f32.mrf.mxu3  ;;  %2384 = vst.msk [vmem:[#allocation3 + $0x168] sm:$0xff] %vm1981_vm4, %v2336_v19 }
 0x4ea   : > { %4096 = vmatpush.bf16.msrb.mxu2 %v7594_v30  ;;  %v7640_v48 = vld [vmem:[%s10145_s7 + $0x358] sm:$0xff] }
 0x4eb   : > { %4123 = vmatpush.bf16.msrb.mxu3 %v7600_v40  ;;  %v7637_v40 = vld [vmem:[%s10145_s7 + $0x340] sm:$0xff] }
 0x4ec   : > { %v3543_v50 = vpop.f32.mrf.mxu1  ;;  %2787 = vrot.lane.b32.xlu2 %v2748_v34, %s7821_s27  ;;  %v7638_v34 = vld [vmem:[%s10145_s7 + $0x348] sm:$0xff] }
 0x4ed   : > { %7753 = vrot.lane.b32.xlu0 %v9069_v42, %s7821_s27  ;;  %v7630_v50 = vld [vmem:[%s10145_s7 + $0x308] sm:$0xff] }
 0x4ee   : > { %3759 = vmatmul.bf16.gmra.mxu2 %v8713_v51  ;;  %3784 = vmatmul.bf16.gmra.mxu3 %v8715_v41  ;;  %v7608_v51 = vld [vmem:[%s10145_s7 + $0x258] sm:$0xff] }
 0x4ef   : > { %4097 = vmatpush.bf16.msrb.mxu2 %v7593_v13  ;;  %4148 = vmatpush.bf16.msra.mxu0 %v7608_v51  ;;  %v7644_v51 = vld [vmem:[%s10145_s7 + $0x378] sm:$0xff] }
 0x4f0   : > { %3809 = vmatmul.bf16.gmra.mxu0 %v8828_v52  ;;  %6612 = vmatmul.msk.bf16.gmra.mxu1 %vm1981_vm4, %v8856_v26  ;;  %v7616_v52 = vld [vmem:[%s10145_s7 + $0x298] sm:$0xff] }
 0x4f1   : > { %v3520_v12 = vpop.f32.mrf.mxu3  ;;  %4173 = vmatpush.bf16.msra.mxu1 %v7616_v52  ;;  %4124 = vmatpush.bf16.msrb.mxu3 %v7599_v1  ;;  %v7620_v52 = vld [vmem:[%s10145_s7 + $0x2b8] sm:$0xff]  ;;  %v7627_v1 = vld [vmem:[%s10145_s7 + $0x2f0] sm:$0xff] }
 0x4f2   : > { %v3521_v41 = vadd.f32 %v3520_v12, %v8874_v43  ;;  %v7615_v43 = vld [vmem:[%s10145_s7 + $0x290] sm:$0xff]  ;;  %v7628_v12 = vld [vmem:[%s10145_s7 + $0x2f8] sm:$0xff] }
 0x4f3   : > { %4098 = vmatpush.bf16.msrb.mxu2 %v7592_v24  ;;  %4149 = vmatpush.bf16.msra.mxu0 %v7607_v18  ;;  %v7629_v24 = vld [vmem:[%s10145_s7 + $0x300] sm:$0xff]  ;;  %v7635_v18 = vld [vmem:[%s10145_s7 + $0x330] sm:$0xff] }
 0x4f4   : > { %v3545_v26 = vpop.f32.mrf.mxu1 }
 0x4f5   : > { %v9107_v56 = vadd.f32 %v3545_v26, %v3521_v41  ;;  %4174 = vmatpush.bf16.msra.mxu1 %v7615_v43  ;;  %4125 = vmatpush.bf16.msrb.mxu3 %v7598_v16  ;;  %v7636_v41 = vld [vmem:[%s10145_s7 + $0x338] sm:$0xff]  ;;  %v7643_v26 = vld [vmem:[%s10145_s7 + $0x370] sm:$0xff]  ;;  %v7618_v16 = vld [vmem:[%s10145_s7 + $0x2a8] sm:$0xff] }
 0x4f7   : > { %4099 = vmatpush.bf16.msrb.mxu2 %v7591_v61  ;;  %4150 = vmatpush.bf16.msra.mxu0 %v7606_v2  ;;  %v7619_v61 = vld [vmem:[%s10145_s7 + $0x2b0] sm:$0xff]  ;;  %v7634_v2 = vld [vmem:[%s10145_s7 + $0x328] sm:$0xff] }
 0x4f9   : > { %v3522_v14 = vpop.f32.mrf.mxu3  ;;  %4175 = vmatpush.bf16.msra.mxu1 %v7614_v4  ;;  %4126 = vmatpush.bf16.msrb.mxu3 %v7597_v28 }
 0x4fa   : > { %v7626_v14 = vld [vmem:[%s10145_s7 + $0x2e8] sm:$0xff] }
 0x4fb   : > { %4100 = vmatpush.bf16.msrb.mxu2 %v7590_v11  ;;  %4151 = vmatpush.bf16.msra.mxu0 %v7605_v20  ;;  %v7642_v11 = vld [vmem:[%s10145_s7 + $0x368] sm:$0xff] }
 0x4fc   : > { %v3547_v3 = vpop.f32.mrf.mxu1 }
 0x4fd   : > { %4176 = vmatpush.bf16.msra.mxu1 %v7613_v29 }
 0x4fe   : > { %3763 = vmatmul.bf16.gmra.mxu2 %v8741_v10  ;;  %3788 = vmatmul.bf16.gmra.mxu3 %v8743_v33 }
 0x4ff   : > { %4101 = vmatpush.bf16.msrb.mxu2 %v7589_v22  ;;  %4495 = vmatpush.bf16.msrb.mxu0 %v7640_v48  ;;  %v7641_v22 = vld [vmem:[%s10145_s7 + $0x360] sm:$0xff] }
 0x500   : > { %3813 = vmatmul.bf16.gmra.mxu0 %v8871_v37  ;;  %6613 = vmatmul.msk.bf16.gmra.mxu1 %vm1981_vm4, %v8876_v44 }
 0x501   : > { %v3524_v25 = vpop.f32.mrf.mxu3  ;;  %4524 = vmatpush.bf16.msrb.mxu1 %v7644_v51 }
 0x502   : > { %v3525_v15 = vadd.f32 %v3524_v25, %v8903_v17  ;;  %v3015_v25 = vld [vmem:[#allocation3 + $0x178] sm:$0xff] }
 0x503   : > { %4445 = vmatpush.bf16.msra.mxu2 %v7624_v60 }
 0x504   : > { %v3549_v63 = vpop.f32.mrf.mxu1 }
 0x505   : > { %v9151_v8 = vadd.f32 %v3549_v63, %v3525_v15  ;;  %4525 = vmatpush.bf16.msrb.mxu1 %v7643_v26  ;;  %v7617_v15 = vld [vmem:[%s10145_s7 + $0x2a0] sm:$0xff] }
 0x506   : > { %v7625_v63 = vld [vmem:[%s10145_s7 + $0x2e0] sm:$0xff] }
 0x509   : > { %v3526_v45 = vpop.f32.mrf.mxu3  ;;  %4526 = vmatpush.bf16.msrb.mxu1 %v7642_v11 }
 0x50a   : > { %v3008_v45 = vld [vmem:[#allocation3 + $0x140] sm:$0xff] }
 0x50c   : > { %v3551_v7 = vpop.f32.mrf.mxu1 }
 0x50d   : > { %4527 = vmatpush.bf16.msrb.mxu1 %v7641_v22 }
 0x50e   : > { %3767 = vmatmul.bf16.gmra.mxu2 %v8761_v39  ;;  %3792 = vmatmul.bf16.gmra.mxu3 %v8763_v32 }
 0x510   : > { %3817 = vmatmul.bf16.gmra.mxu0 %v8880_v54  ;;  %6614 = vmatmul.msk.bf16.gmra.mxu1 %vm1981_vm4, %v8883_v46 }
 0x511   : > { %v3528_v27 = vpop.f32.mrf.mxu3 }
 0x512   : > { %v3529_v62 = vadd.f32 %v3528_v27, %v8987_v31  ;;  %v7632_v31 = vld [vmem:[%s10145_s7 + $0x318] sm:$0xff]  ;;  %v7633_v27 = vld [vmem:[%s10145_s7 + $0x320] sm:$0xff] }
 0x513   : > { %4470 = vmatpush.bf16.msra.mxu3 %v7632_v31 }
 0x514   : > { %v3553_v30 = vpop.f32.mrf.mxu1 }
 0x515   : > { %v9159_v5 = vadd.f32 %v3553_v30, %v3529_v62 }
 0x519   : > { %v3530_v17 = vpop.f32.mrf.mxu3 }
 0x51c   : > { %v3555_v19 = vpop.f32.mrf.mxu1 }
 0x51d   : > { %v3011_v19 = vld [vmem:[#allocation3 + $0x158] sm:$0xff] }
 0x51e   : > { %4102 = vmatmul.bf16.vlgmr.msrb.gmra.mxu2 %v8741_v10  ;;  %4127 = vmatmul.bf16.vlgmr.msrb.gmra.mxu3 %v8743_v33  ;;  %v7623_v10 = vld [vmem:[%s10145_s7 + $0x2d0] sm:$0xff] }
 0x51f   : > { %v7631_v33 = vld [vmem:[%s10145_s7 + $0x310] sm:$0xff]  ;;  %4446 = vmatpush.bf16.msra.mxu2 %v7623_v10 }
 0x520   : > { %4152 = vmatmul.bf16.vlgmr.msra.gmra.mxu0 %v8871_v37  ;;  %6783 = vmatmul.msk.bf16.vlgmr.msra.gmra.mxu1 %vm1981_vm4, %v8876_v44  ;;  %v7639_v37 = vld [vmem:[%s10145_s7 + $0x350] sm:$0xff]  ;;  %v7622_v44 = vld [vmem:[%s10145_s7 + $0x2c8] sm:$0xff] }
 0x521   : > { %4471 = vmatpush.bf16.msra.mxu3 %v7631_v33  ;;  %4496 = vmatpush.bf16.msrb.mxu0 %v7639_v37 }
 0x523   : > { %4447 = vmatpush.bf16.msra.mxu2 %v7622_v44 }
 0x525   : > { %4472 = vmatpush.bf16.msra.mxu3 %v7630_v50  ;;  %4497 = vmatpush.bf16.msrb.mxu0 %v7638_v34 }
 0x527   : > { %4448 = vmatpush.bf16.msra.mxu2 %v7621_v36 }
 0x529   : > { %4473 = vmatpush.bf16.msra.mxu3 %v7629_v24  ;;  %4498 = vmatpush.bf16.msrb.mxu0 %v7637_v40 }
 0x52b   : > { %4449 = vmatpush.bf16.msra.mxu2 %v7620_v52 }
 0x52d   : > { %4474 = vmatpush.bf16.msra.mxu3 %v7628_v12  ;;  %4499 = vmatpush.bf16.msrb.mxu0 %v7636_v41 }
 0x52e   : > { %4106 = vmatmul.bf16.gmra.mxu2 %v8761_v39  ;;  %4131 = vmatmul.bf16.gmra.mxu3 %v8763_v32 }
 0x52f   : > { %4450 = vmatpush.bf16.msra.mxu2 %v7619_v61 }
 0x530   : > { %4156 = vmatmul.bf16.gmra.mxu0 %v8880_v54  ;;  %6784 = vmatmul.msk.bf16.gmra.mxu1 %vm1981_vm4, %v8883_v46 }
 0x531   : > { %4475 = vmatpush.bf16.msra.mxu3 %v7627_v1  ;;  %4500 = vmatpush.bf16.msrb.mxu0 %v7635_v18 }
 0x533   : > { %4451 = vmatpush.bf16.msra.mxu2 %v7618_v16 }
 0x535   : > { %4476 = vmatpush.bf16.msra.mxu3 %v7626_v14  ;;  %4501 = vmatpush.bf16.msrb.mxu0 %v7634_v2 }
 0x537   : > { %4452 = vmatpush.bf16.msra.mxu2 %v7617_v15 }
 0x539   : > { %4477 = vmatpush.bf16.msra.mxu3 %v7625_v63  ;;  %4502 = vmatpush.bf16.msrb.mxu0 %v7633_v27 }
 0x53e   : > { %v2498_v13 = vpop.permute.xlu2 %2497  ;;  %4110 = vmatmul.bf16.gmra.mxu2 %v8803_v6  ;;  %4135 = vmatmul.bf16.gmra.mxu3 %v8805_v38 }
 0x53f   : > { %2547 = vst.msk [vmem:[#allocation3 + $0x148] sm:$0xff] %vm2248_vm15, %v2498_v13 }
 0x540   : > { %4160 = vmatmul.bf16.gmra.mxu0 %v8887_v0  ;;  %6785 = vmatmul.msk.bf16.gmra.mxu1 %vm1981_vm4, %v8890_v23 }
 0x546   : > { %v2788_v53 = vpop.permute.xlu2 %2787  ;;  %v3009_v29 = vld [vmem:[#allocation3 + $0x148] sm:$0xff] }
 0x547   : > { %2836 = vst.msk [vmem:[#allocation3 + $0x170] sm:$0xff] %vm2248_vm15, %v2788_v53  ;;  %v3068_v30 = vpack.c.bf16 %v3009_v29, %v3008_v45 }
 0x549   : > { %v3908_v36 = vunpack.c.l.b16 %v3068_v30  ;;  %v3909_v40 = vunpack.c.h.b16 %v3068_v30 }
 0x54e   : > { %v3014_v3 = vld [vmem:[#allocation3 + $0x170] sm:$0xff] }
 0x54f   : > { %v3071_v7 = vpack.c.bf16 %v3015_v25, %v3014_v3 }
 0x551   : > { %v3914_v44 = vunpack.c.l.b16 %v3071_v7  ;;  %v3915_v34 = vunpack.c.h.b16 %v3071_v7 }
 0x556   : > { %v2786_v43 = vpop.permute.xlu1 %2785 }
 0x557   : > { %v2500_v4 = vpop.permute.xlu0 %2499  ;;  %2835 = vst.msk [vmem:[#allocation3 + $0x150] sm:$0xff] %vm2248_vm15, %v2786_v43 }
 0x558   : > { %2548 = vst.msk [vmem:[#allocation3 + $0x168] sm:$0xff] %vm2248_vm15, %v2500_v4 }
 0x55d   : > { %v3806_v28 = vpop.f32.mrf.mxu0  ;;  %v3831_v20 = vpop.f32.mrf.mxu1 }
 0x55e   : > { %v3010_v17 = vld [vmem:[#allocation3 + $0x150] sm:$0xff] }
 0x55f   : > { %v7754_v62 = vpop.permute.xlu0 %7753  ;;  %v3013_v48 = vld [vmem:[#allocation3 + $0x168] sm:$0xff]  ;;  %v3069_v10 = vpack.c.bf16 %v3011_v19, %v3010_v17 }
 0x560   : > { %v7756_v60 = vunpack.i.h.bf16 %v7754_v62  ;;  %v7755_v31 = vunpack.i.l.bf16 %v7754_v62  ;;  %v3070_v33 = vpack.c.bf16 %v3013_v48, %v8999_v9 }
 0x561   : > { %v3910_v37 = vunpack.c.l.b16 %v3069_v10  ;;  %v3911_v50 = vunpack.c.h.b16 %v3069_v10  ;;  %v3756_v13 = vpop.f32.mrf.mxu2  ;;  %v3781_v53 = vpop.f32.mrf.mxu3 }
 0x562   : > { %2263 = vst.msk [vmem:[#allocation3 + $0x1c0] sm:$0xff] %vm2248_vm15, %v7756_v60  ;;  %v3912_v24 = vunpack.c.l.b16 %v3070_v33  ;;  %v3913_v52 = vunpack.c.h.b16 %v3070_v33  ;;  %v3757_v12 = vadd.f32 %v3756_v13, %v9026_v35  ;;  %v2179_v60 = vsel %vm942_vm7, %v8839_v59, %v8839_v59 }
 0x563   : > { %2262 = vst.msk [vmem:[#allocation3 + $0x1a0] sm:$0xff] %vm2248_vm15, %v7755_v31  ;;  %v9268_v41 = vpack.c.b16 %v3914_v44, %v3910_v37  ;;  %v9270_v26 = vpack.c.b16 %v3915_v34, %v3911_v50 }
 0x564   : > { %v9272_v61 = vpack.c.b16 %v3912_v24, %v3908_v36  ;;  %v9274_v1 = vpack.c.b16 %v3913_v52, %v3909_v40  ;;  %v3782_v18 = vadd.f32 %v3781_v53, %v3757_v12 }
 0x565   : > { %v3808_v9 = vpop.f32.mrf.mxu0  ;;  %v3833_v51 = vpop.f32.mrf.mxu1  ;;  %4164 = vmatmul.bf16.gmra.mxu0 %v9268_v41  ;;  %6786 = vmatmul.msk.bf16.gmra.mxu1 %vm1981_vm4, %v9270_v26 }
 0x566   : > { %4114 = vmatmul.bf16.gmra.mxu2 %v9272_v61  ;;  %4139 = vmatmul.bf16.gmra.mxu3 %v9274_v1  ;;  %v3807_v35 = vadd.f32 %v3806_v28, %v3782_v18 }
 0x568   : > { %v9286_v16 = vadd.f32 %v3831_v20, %v3807_v35 }
 0x569   : > { %v9281_v43 = vld [vmem:[#allocation3 + $0x1c0] sm:$0xff]  ;;  %v3758_v3 = vpop.f32.mrf.mxu2  ;;  %v3783_v22 = vpop.f32.mrf.mxu3 }
 0x56a   : > { %v2914_v4 = vrot.slane %v9281_v43, 6  ;;  %v9284_v11 = vld [vmem:[#allocation3 + $0x1a0] sm:$0xff]  ;;  %v2463_v14 = vrot.slane %v9281_v43, 3  ;;  %v2339_v45 = vrot.slane %v9281_v43, 2  ;;  %v2627_v20 = vrot.slane %v9281_v43, 4 }
 0x56b   : > { %v2912_v2 = vrot.slane %v9284_v11, 6  ;;  %v2749_v29 = vrot.slane %v9284_v11, 5  ;;  %v2461_v25 = vrot.slane %v9284_v11, 3  ;;  %v2337_v28 = vrot.slane %v9284_v11, 2 }
 0x56c   : > { %v2625_v7 = vrot.slane %v9284_v11, 4  ;;  %v2751_v48 = vrot.slane %v9281_v43, 5  ;;  %v7669_v43 = vld [vmem:[%s10145_s7 + $0x440] sm:$0xff] }
 0x56d   : > { %v3810_v15 = vpop.f32.mrf.mxu0  ;;  %v3835_v63 = vpop.f32.mrf.mxu1  ;;  %v2913_v27 = vsel %vm621_vm0, %v2910_v57, %v2912_v2  ;;  %v2915_v62 = vsel %vm621_vm0, %v2912_v2, %v2914_v4  ;;  %v2750_v30 = vsel %vm2723_vm13, %v2747_v47, %v2749_v29  ;;  %v2462_v17 = vsel %vm2435_vm9, %v2459_v58, %v2461_v25 }
 0x56e   : > { %2960 = vst.msk [vmem:[#allocation3 + $0x198] sm:$0xff] %vm1981_vm4, %v2913_v27  ;;  %2789 = vrot.lane.b32.xlu0 %v2750_v30, %s7821_s27  ;;  %2501 = vrot.lane.b32.xlu1 %v2462_v17, %s7821_s27  ;;  %v2464_v57 = vsel %vm2435_vm9, %v2461_v25, %v2463_v14  ;;  %v2340_v19 = vsel %vm2311_vm10, %v2337_v28, %v2339_v45 }
 0x56f   : > { %2961 = vst.msk [vmem:[#allocation3 + $0x1b8] sm:$0xff] %vm1981_vm4, %v2915_v62  ;;  %2503 = vrot.lane.b32.xlu2 %v2464_v57, %s7821_s27  ;;  %v2626_v58 = vsel %vm2599_vm2, %v2623_v49, %v2625_v7  ;;  %v2338_v47 = vsel %vm2311_vm10, %v2335_v21, %v2337_v28  ;;  %v2628_v31 = vsel %vm2599_vm2, %v2625_v7, %v2627_v20 }
 0x570   : > { %2386 = vst.msk [vmem:[#allocation3 + $0x1a8] sm:$0xff] %vm1981_vm4, %v2340_v19  ;;  %v7757_v21 = vpack.i.bf16 %v8839_v59, %v2179_v60  ;;  %v2752_v44 = vsel %vm2723_vm13, %v2749_v29, %v2751_v48 }
 0x571   : > { %2673 = vst.msk [vmem:[#allocation3 + $0x190] sm:$0xff] %vm1981_vm4, %v2626_v58  ;;  %v3760_v49 = vpop.f32.mrf.mxu2  ;;  %v3785_v55 = vpop.f32.mrf.mxu3 }
 0x572   : > { %2385 = vst.msk [vmem:[#allocation3 + $0x188] sm:$0xff] %vm1981_vm4, %v2338_v47  ;;  %v3761_v10 = vadd.f32 %v3760_v49, %v9107_v56 }
 0x573   : > { %2674 = vst.msk [vmem:[#allocation3 + $0x1b0] sm:$0xff] %vm1981_vm4, %v2628_v31 }
 0x574   : > { %v3786_v50 = vadd.f32 %v3785_v55, %v3761_v10 }
 0x575   : > { %v3812_v33 = vpop.f32.mrf.mxu0  ;;  %v3837_v37 = vpop.f32.mrf.mxu1  ;;  %4503 = vmatmul.bf16.vlgmr.msrb.gmra.mxu0 %v8880_v54  ;;  %6955 = vmatmul.msk.bf16.vlgmr.msrb.gmra.mxu1 %vm1981_vm4, %v8883_v46 }
 0x576   : > { %2791 = vrot.lane.b32.xlu1 %v2752_v44, %s7821_s27  ;;  %4453 = vmatmul.bf16.vlgmr.msra.gmra.mxu2 %v8761_v39  ;;  %v3811_v34 = vadd.f32 %v3810_v15, %v3786_v50 }
 0x577   : > { %7758 = vrot.lane.b32.xlu2 %v7757_v21, %s7821_s27  ;;  %4478 = vmatmul.bf16.vlgmr.msra.gmra.mxu3 %v8763_v32 }
 0x578   : > { %v3836_v56 = vadd.f32 %v3835_v63, %v3811_v34 }
 0x579   : > { %v3762_v13 = vpop.f32.mrf.mxu2  ;;  %v3787_v53 = vpop.f32.mrf.mxu3 }
 0x57d   : > { %v3814_v36 = vpop.f32.mrf.mxu0  ;;  %v3839_v24 = vpop.f32.mrf.mxu1 }
 0x581   : > { %v3764_v40 = vpop.f32.mrf.mxu2  ;;  %v3789_v52 = vpop.f32.mrf.mxu3 }
 0x582   : > { %v3765_v12 = vadd.f32 %v3764_v40, %v9151_v8 }
 0x584   : > { %v3790_v51 = vadd.f32 %v3789_v52, %v3765_v12 }
 0x585   : > { %v3816_v54 = vpop.f32.mrf.mxu0  ;;  %v3841_v9 = vpop.f32.mrf.mxu1  ;;  %4507 = vmatmul.bf16.gmra.mxu0 %v8887_v0  ;;  %6956 = vmatmul.msk.bf16.gmra.mxu1 %vm1981_vm4, %v8890_v23 }
 0x586   : > { %4457 = vmatmul.bf16.gmra.mxu2 %v8803_v6  ;;  %v3815_v39 = vadd.f32 %v3814_v36, %v3790_v51  ;;  %v7660_v54 = vld [vmem:[%s10145_s7 + $0x3f8] sm:$0xff] }
 0x587   : > { %4482 = vmatmul.bf16.gmra.mxu3 %v8805_v38 }
 0x588   : > { %v9354_v32 = vadd.f32 %v3839_v24, %v3815_v39  ;;  %4821 = vmatpush.bf16.msrb.mxu3 %v7660_v54  ;;  %v7659_v39 = vld [vmem:[%s10145_s7 + $0x3f0] sm:$0xff] }
 0x589   : > { %v3766_v46 = vpop.f32.mrf.mxu2  ;;  %v3791_v18 = vpop.f32.mrf.mxu3 }
 0x58c   : > { %4822 = vmatpush.bf16.msrb.mxu3 %v7659_v39  ;;  %v7653_v39 = vld [vmem:[%s10145_s7 + $0x3c0] sm:$0xff] }
 0x58d   : > { %v3818_v35 = vpop.f32.mrf.mxu0  ;;  %v3843_v2 = vpop.f32.mrf.mxu1 }
 0x591   : > { %v3768_v8 = vpop.f32.mrf.mxu2  ;;  %v3793_v3 = vpop.f32.mrf.mxu3 }
 0x592   : > { %v3769_v22 = vadd.f32 %v3768_v8, %v9159_v5 }
 0x594   : > { %v3794_v28 = vadd.f32 %v3793_v3, %v3769_v22  ;;  %v7650_v22 = vld [vmem:[%s10145_s7 + $0x3a8] sm:$0xff] }
 0x595   : > { %v3820_v29 = vpop.f32.mrf.mxu0  ;;  %v3845_v25 = vpop.f32.mrf.mxu1  ;;  %4511 = vmatmul.bf16.gmra.mxu0 %v9268_v41  ;;  %6957 = vmatmul.msk.bf16.gmra.mxu1 %vm1981_vm4, %v9270_v26 }
 0x596   : > { %4461 = vmatmul.bf16.gmra.mxu2 %v9272_v61  ;;  %v3819_v15 = vadd.f32 %v3818_v35, %v3794_v28  ;;  %v7658_v29 = vld [vmem:[%s10145_s7 + $0x3e8] sm:$0xff]  ;;  %v7668_v25 = vld [vmem:[%s10145_s7 + $0x438] sm:$0xff] }
 0x597   : > { %4486 = vmatmul.bf16.gmra.mxu3 %v9274_v1  ;;  %4846 = vmatpush.bf16.msra.mxu0 %v7668_v25 }
 0x598   : > { %v9362_v63 = vadd.f32 %v3843_v2, %v3819_v15  ;;  %4823 = vmatpush.bf16.msrb.mxu3 %v7658_v29  ;;  %v7670_v29 = vld [vmem:[%s10145_s7 + $0x448] sm:$0xff] }
 0x599   : > { %v3770_v7 = vpop.f32.mrf.mxu2  ;;  %v3795_v27 = vpop.f32.mrf.mxu3 }
 0x59a   : > { %v7649_v27 = vld [vmem:[%s10145_s7 + $0x3a0] sm:$0xff] }
 0x59d   : > { %v4153_v62 = vpop.f32.mrf.mxu0  ;;  %v4178_v30 = vpop.f32.mrf.mxu1 }
 0x5a1   : > { %v4103_v5 = vpop.f32.mrf.mxu2  ;;  %v4128_v17 = vpop.f32.mrf.mxu3 }
 0x5a2   : > { %v4129_v57 = vadd.f32 %v4128_v17, %v4103_v5  ;;  %v7656_v17 = vld [vmem:[%s10145_s7 + $0x3d8] sm:$0xff] }
 0x5a4   : > { %v4154_v47 = vadd.f32 %v4153_v62, %v4129_v57  ;;  %v7657_v62 = vld [vmem:[%s10145_s7 + $0x3e0] sm:$0xff] }
 0x5a5   : > { %v4155_v19 = vpop.f32.mrf.mxu0  ;;  %v4180_v58 = vpop.f32.mrf.mxu1  ;;  %4824 = vmatpush.bf16.msrb.mxu3 %v7657_v62  ;;  %v7661_v62 = vld [vmem:[%s10145_s7 + $0x400] sm:$0xff] }
 0x5a6   : > { %v4179_v60 = vadd.f32 %v4178_v30, %v4154_v47  ;;  %v7667_v30 = vld [vmem:[%s10145_s7 + $0x430] sm:$0xff]  ;;  %v7666_v58 = vld [vmem:[%s10145_s7 + $0x428] sm:$0xff] }
 0x5a7   : > { %4847 = vmatpush.bf16.msra.mxu0 %v7667_v30  ;;  %v7647_v47 = vld [vmem:[%s10145_s7 + $0x390] sm:$0xff] }
 0x5a8   : > { %v9365_v31 = vadd.f32 %v4179_v60, %v9286_v16  ;;  %v7652_v16 = vld [vmem:[%s10145_s7 + $0x3b8] sm:$0xff]  ;;  %v7655_v60 = vld [vmem:[%s10145_s7 + $0x3d0] sm:$0xff] }
 0x5a9   : > { %v4105_v49 = vpop.f32.mrf.mxu2  ;;  %v4130_v55 = vpop.f32.mrf.mxu3  ;;  %4796 = vmatpush.bf16.msrb.mxu2 %v7652_v16  ;;  %4825 = vmatpush.bf16.msrb.mxu3 %v7656_v17 }
 0x5aa   : > { %v7665_v49 = vld [vmem:[%s10145_s7 + $0x420] sm:$0xff]  ;;  %v7672_v55 = vld [vmem:[%s10145_s7 + $0x458] sm:$0xff] }
 0x5ab   : > { %4848 = vmatpush.bf16.msra.mxu0 %v7666_v58  ;;  %4875 = vmatpush.bf16.msra.mxu1 %v7672_v55 }
 0x5ad   : > { %v4157_v21 = vpop.f32.mrf.mxu0  ;;  %v4182_v10 = vpop.f32.mrf.mxu1  ;;  %4826 = vmatpush.bf16.msrb.mxu3 %v7655_v60 }
 0x5af   : > { %4849 = vmatpush.bf16.msra.mxu0 %v7665_v49 }
 0x5b1   : > { %v4107_v33 = vpop.f32.mrf.mxu2  ;;  %v4132_v37 = vpop.f32.mrf.mxu3 }
 0x5b2   : > { %v4133_v44 = vadd.f32 %v4132_v37, %v4107_v33  ;;  %v7664_v33 = vld [vmem:[%s10145_s7 + $0x418] sm:$0xff] }
 0x5b3   : > { %4850 = vmatpush.bf16.msra.mxu0 %v7664_v33 }
 0x5b4   : > { %v4158_v13 = vadd.f32 %v4157_v21, %v4133_v44  ;;  %v7646_v21 = vld [vmem:[%s10145_s7 + $0x388] sm:$0xff] }
 0x5b5   : > { %v4159_v50 = vpop.f32.mrf.mxu0  ;;  %v4184_v34 = vpop.f32.mrf.mxu1 }
 0x5b6   : > { %v4183_v53 = vadd.f32 %v4182_v10, %v4158_v13  ;;  %v7654_v10 = vld [vmem:[%s10145_s7 + $0x3c8] sm:$0xff] }
 0x5b7   : > { %4827 = vmatpush.bf16.msrb.mxu3 %v7654_v10 }
 0x5b8   : > { %v9367_v36 = vadd.f32 %v4183_v53, %v3836_v56  ;;  %v7651_v56 = vld [vmem:[%s10145_s7 + $0x3b0] sm:$0xff] }
 0x5b9   : > { %v4109_v24 = vpop.f32.mrf.mxu2  ;;  %v4134_v40 = vpop.f32.mrf.mxu3  ;;  %4797 = vmatpush.bf16.msrb.mxu2 %v7651_v56 }
 0x5bb   : > { %4828 = vmatpush.bf16.msrb.mxu3 %v7653_v39 }
 0x5bd   : > { %v4161_v52 = vpop.f32.mrf.mxu0  ;;  %v4186_v12 = vpop.f32.mrf.mxu1  ;;  %4798 = vmatpush.bf16.msrb.mxu2 %v7650_v22  ;;  %v7662_v22 = vld [vmem:[%s10145_s7 + $0x408] sm:$0xff] }
 0x5c1   : > { %v4111_v9 = vpop.f32.mrf.mxu2  ;;  %v4136_v51 = vpop.f32.mrf.mxu3  ;;  %4799 = vmatpush.bf16.msrb.mxu2 %v7649_v27 }
 0x5c2   : > { %v4137_v46 = vadd.f32 %v4136_v51, %v4111_v9 }
 0x5c4   : > { %v4162_v2 = vadd.f32 %v4161_v52, %v4137_v46 }
 0x5c5   : > { %v4163_v18 = vpop.f32.mrf.mxu0  ;;  %v4188_v35 = vpop.f32.mrf.mxu1 }
 0x5c6   : > { %v4187_v8 = vadd.f32 %v4186_v12, %v4162_v2  ;;  %v7663_v18 = vld [vmem:[%s10145_s7 + $0x410] sm:$0xff] }
 0x5c7   : > { %v7671_v35 = vld [vmem:[%s10145_s7 + $0x450] sm:$0xff]  ;;  %4851 = vmatpush.bf16.msra.mxu0 %v7663_v18 }
 0x5c8   : > { %v9392_v28 = vadd.f32 %v4187_v8, %v9354_v32  ;;  %v7648_v32 = vld [vmem:[%s10145_s7 + $0x398] sm:$0xff]  ;;  %4876 = vmatpush.bf16.msra.mxu1 %v7671_v35 }
 0x5c9   : > { %v2504_v3 = vpop.permute.xlu2 %2503  ;;  %v4113_v15 = vpop.f32.mrf.mxu2  ;;  %4800 = vmatpush.bf16.msrb.mxu2 %v7648_v32  ;;  %v3016_v32 = vld [vmem:[#allocation3 + $0x180] sm:$0xff] }
 0x5ca   : > { %2550 = vst.msk [vmem:[#allocation3 + $0x1a8] sm:$0xff] %vm2248_vm15, %v2504_v3  ;;  %v4138_v7 = vpop.f32.mrf.mxu3 }
 0x5cb   : > { %4852 = vmatpush.bf16.msra.mxu0 %v7662_v22 }
 0x5cc   : > { %4877 = vmatpush.bf16.msra.mxu1 %v7670_v29 }
 0x5cd   : > { %4801 = vmatpush.bf16.msrb.mxu2 %v7647_v47 }
 0x5cf   : > { %4853 = vmatpush.bf16.msra.mxu0 %v7661_v62 }
 0x5d0   : > { %4878 = vmatpush.bf16.msra.mxu1 %v7669_v43 }
 0x5d1   : > { %v7759_v5 = vpop.permute.xlu2 %7758  ;;  %4802 = vmatpush.bf16.msrb.mxu2 %v7646_v21  ;;  %v3021_v7 = vld [vmem:[#allocation3 + $0x1a8] sm:$0xff] }
 0x5d2   : > { %v7761_v57 = vunpack.i.h.bf16 %v7759_v5  ;;  %v7760_v19 = vunpack.i.l.bf16 %v7759_v5  ;;  %v3074_v5 = vpack.c.bf16 %v3021_v7, %v9284_v11 }
 0x5d4   : > { %2265 = vst.msk [vmem:[#allocation3 + $0x200] sm:$0xff] %vm2248_vm15, %v7761_v57  ;;  %v4263_v55 = vunpack.c.l.b16 %v3074_v5  ;;  %v4264_v11 = vunpack.c.h.b16 %v3074_v5 }
 0x5d5   : > { %2264 = vst.msk [vmem:[#allocation3 + $0x1e0] sm:$0xff] %vm2248_vm15, %v7760_v19 }
 0x5db   : > { %v9435_v37 = vld [vmem:[#allocation3 + $0x200] sm:$0xff] }
 0x5dc   : > { %v9437_v44 = vld [vmem:[#allocation3 + $0x1e0] sm:$0xff]  ;;  %v2467_v50 = vrot.slane %v9435_v37, 3  ;;  %v2343_v24 = vrot.slane %v9435_v37, 2  ;;  %v2631_v54 = vrot.slane %v9435_v37, 4  ;;  %v2918_v46 = vrot.slane %v9435_v37, 6 }
 0x5dd   : > { %v2753_v34 = vrot.slane %v9437_v44, 5  ;;  %v2465_v13 = vrot.slane %v9437_v44, 3  ;;  %v2629_v53 = vrot.slane %v9437_v44, 4  ;;  %v2341_v40 = vrot.slane %v9437_v44, 2 }
 0x5de   : > { %v2916_v9 = vrot.slane %v9437_v44, 6 }
 0x5df   : > { %v2754_v52 = vsel %vm2723_vm13, %v2751_v48, %v2753_v34  ;;  %v2468_v12 = vsel %vm2435_vm9, %v2465_v13, %v2467_v50  ;;  %v2466_v16 = vsel %vm2435_vm9, %v2463_v14, %v2465_v13  ;;  %v7645_v48 = vld [vmem:[%s10145_s7 + $0x380] sm:$0xff]  ;;  %v2630_v14 = vsel %vm2599_vm2, %v2627_v20, %v2629_v53 }
 0x5e0   : > { %2793 = vrot.lane.b32.xlu2 %v2754_v52, %s7821_s27  ;;  %2507 = vrot.lane.b32.xlu1 %v2468_v12, %s7821_s27  ;;  %v2790_v51 = vpop.permute.xlu0 %2789  ;;  %v2502_v56 = vpop.permute.xlu1 %2501  ;;  %v2344_v2 = vsel %vm2311_vm10, %v2341_v40, %v2343_v24  ;;  %v2342_v20 = vsel %vm2311_vm10, %v2339_v45, %v2341_v40  ;;  %2675 = vst.msk [vmem:[#allocation3 + $0x1d0] sm:$0xff] %vm1981_vm4, %v2630_v14  ;;  %v2755_v45 = vrot.slane %v9435_v37, 5 }
 0x5e1   : > { %2505 = vrot.lane.b32.xlu0 %v2466_v16, %s7821_s27  ;;  %2837 = vst.msk [vmem:[#allocation3 + $0x190] sm:$0xff] %vm2248_vm15, %v2790_v51  ;;  %4803 = vmatpush.bf16.msrb.mxu2 %v7645_v48  ;;  %v2632_v25 = vsel %vm2599_vm2, %v2629_v53, %v2631_v54  ;;  %v2917_v15 = vsel %vm621_vm0, %v2914_v4, %v2916_v9  ;;  %v3019_v53 = vld [vmem:[#allocation3 + $0x198] sm:$0xff] }
 0x5e2   : > { %2549 = vst.msk [vmem:[#allocation3 + $0x188] sm:$0xff] %vm2248_vm15, %v2502_v56  ;;  %v4165_v8 = vpop.f32.mrf.mxu0  ;;  %v4190_v3 = vpop.f32.mrf.mxu1  ;;  %v2919_v27 = vsel %vm621_vm0, %v2916_v9, %v2918_v46  ;;  %v2756_v4 = vsel %vm2723_vm13, %v2753_v34, %v2755_v45  ;;  %v3023_v16 = vld [vmem:[#allocation3 + $0x1b8] sm:$0xff] }
 0x5e3   : > { %2388 = vst.msk [vmem:[#allocation3 + $0x1e8] sm:$0xff] %vm1981_vm4, %v2344_v2 }
 0x5e4   : > { %2387 = vst.msk [vmem:[#allocation3 + $0x1c8] sm:$0xff] %vm1981_vm4, %v2342_v20 }
 0x5e5   : > { %2676 = vst.msk [vmem:[#allocation3 + $0x1f0] sm:$0xff] %vm1981_vm4, %v2632_v25 }
 0x5e6   : > { %2962 = vst.msk [vmem:[#allocation3 + $0x1d8] sm:$0xff] %vm1981_vm4, %v2917_v15 }
 0x5e7   : > { %2963 = vst.msk [vmem:[#allocation3 + $0x1f8] sm:$0xff] %vm1981_vm4, %v2919_v27 }
 0x5e8   : > { %7763 = vrot.lane.b32.xlu1 %v9069_v42, %s7821_s27  ;;  %v2792_v30 = vpop.permute.xlu1 %2791  ;;  %v3018_v10 = vld [vmem:[#allocation3 + $0x190] sm:$0xff] }
 0x5e9   : > { %2795 = vrot.lane.b32.xlu0 %v2756_v4, %s7821_s27  ;;  %2838 = vst.msk [vmem:[#allocation3 + $0x1b0] sm:$0xff] %vm2248_vm15, %v2792_v30  ;;  %v3017_v17 = vld [vmem:[#allocation3 + $0x188] sm:$0xff]  ;;  %v4115_v57 = vpop.f32.mrf.mxu2  ;;  %v4140_v19 = vpop.f32.mrf.mxu3  ;;  %v3073_v52 = vpack.c.bf16 %v3019_v53, %v3018_v10 }
 0x5ea   : > { %v3072_v58 = vpack.c.bf16 %v3017_v17, %v3016_v32  ;;  %v4141_v47 = vadd.f32 %v4140_v19, %v4115_v57  ;;  %v4167_v42 = vpop.f32.mrf.mxu0  ;;  %v4192_v60 = vpop.f32.mrf.mxu1 }
 0x5eb   : > { %v4261_v14 = vunpack.c.l.b16 %v3073_v52  ;;  %v4262_v35 = vunpack.c.h.b16 %v3073_v52  ;;  %v7680_v52 = vld [vmem:[%s10145_s7 + $0x498] sm:$0xff] }
 0x5ec   : > { %v4259_v49 = vunpack.c.l.b16 %v3072_v58  ;;  %v4260_v21 = vunpack.c.h.b16 %v3072_v58  ;;  %v4166_v33 = vadd.f32 %v4165_v8, %v4141_v47  ;;  %5147 = vmatpush.bf16.msra.mxu2 %v7680_v52 }
 0x5ed   : > { %v3027_v52 = vld [vmem:[#allocation3 + $0x1d8] sm:$0xff] }
 0x5ee   : > { %v9519_v34 = vpack.c.b16 %v4263_v55, %v4259_v49  ;;  %v9521_v13 = vpack.c.b16 %v4264_v11, %v4260_v21  ;;  %v4191_v40 = vadd.f32 %v4190_v3, %v4166_v33 }
 0x5f0   : > { %4465 = vmatmul.bf16.gmra.mxu2 %v9519_v34  ;;  %4490 = vmatmul.bf16.gmra.mxu3 %v9521_v13  ;;  %v3022_v12 = vld [vmem:[#allocation3 + $0x1b0] sm:$0xff]  ;;  %v9526_v51 = vadd.f32 %v4191_v40, %v9362_v63 }
 0x5f1   : > { %v3075_v9 = vpack.c.bf16 %v3023_v16, %v3022_v12  ;;  %v4117_v56 = vpop.f32.mrf.mxu2  ;;  %v4142_v48 = vpop.f32.mrf.mxu3  ;;  %v7688_v12 = vld [vmem:[%s10145_s7 + $0x4d8] sm:$0xff] }
 0x5f2   : > { %v4504_v39 = vpop.f32.mrf.mxu0  ;;  %v4529_v20 = vpop.f32.mrf.mxu1  ;;  %v7696_v16 = vld [vmem:[%s10145_s7 + $0x518] sm:$0xff]  ;;  %5172 = vmatpush.bf16.msra.mxu3 %v7688_v12  ;;  %v7678_v48 = vld [vmem:[%s10145_s7 + $0x488] sm:$0xff] }
 0x5f3   : > { %v4265_v18 = vunpack.c.l.b16 %v3075_v9  ;;  %v4266_v2 = vunpack.c.h.b16 %v3075_v9  ;;  %v7687_v9 = vld [vmem:[%s10145_s7 + $0x4d0] sm:$0xff]  ;;  %5197 = vmatpush.bf16.msrb.mxu0 %v7696_v16 }
 0x5f5   : > { %v9528_v8 = vpack.c.b16 %v4265_v18, %v4261_v14  ;;  %v9530_v3 = vpack.c.b16 %v4266_v2, %v4262_v35  ;;  %v7695_v14 = vld [vmem:[%s10145_s7 + $0x510] sm:$0xff]  ;;  %v7677_v18 = vld [vmem:[%s10145_s7 + $0x480] sm:$0xff]  ;;  %v7694_v2 = vld [vmem:[%s10145_s7 + $0x508] sm:$0xff] }
 0x5f6   : > { %5173 = vmatpush.bf16.msra.mxu3 %v7687_v9  ;;  %v7685_v35 = vld [vmem:[%s10145_s7 + $0x4c0] sm:$0xff] }
 0x5f7   : > { %4515 = vmatmul.bf16.gmra.mxu0 %v9528_v8  ;;  %6958 = vmatmul.msk.bf16.gmra.mxu1 %vm1981_vm4, %v9530_v3 }
 0x5f8   : > { %5198 = vmatpush.bf16.msrb.mxu0 %v7695_v14 }
 0x5f9   : > { %v4454_v22 = vpop.f32.mrf.mxu2 }
 0x5fa   : > { %v4479_v63 = vpop.f32.mrf.mxu3  ;;  %v4506_v29 = vpop.f32.mrf.mxu0 }
 0x5fb   : > { %v4480_v25 = vadd.f32 %v4479_v63, %v4454_v22  ;;  %v4531_v15 = vpop.f32.mrf.mxu1  ;;  %v7684_v22 = vld [vmem:[%s10145_s7 + $0x4b8] sm:$0xff]  ;;  %v7693_v29 = vld [vmem:[%s10145_s7 + $0x500] sm:$0xff] }
 0x5fc   : > { %v7700_v63 = vld [vmem:[%s10145_s7 + $0x538] sm:$0xff]  ;;  %5199 = vmatpush.bf16.msrb.mxu0 %v7694_v2  ;;  %v7675_v15 = vld [vmem:[%s10145_s7 + $0x470] sm:$0xff] }
 0x5fd   : > { %v4505_v7 = vadd.f32 %v4504_v39, %v4480_v25  ;;  %v7686_v39 = vld [vmem:[%s10145_s7 + $0x4c8] sm:$0xff]  ;;  %5226 = vmatpush.bf16.msrb.mxu1 %v7700_v63  ;;  %v7699_v25 = vld [vmem:[%s10145_s7 + $0x530] sm:$0xff] }
 0x5fe   : > { %5174 = vmatpush.bf16.msra.mxu3 %v7686_v39 }
 0x5ff   : > { %v4530_v27 = vadd.f32 %v4529_v20, %v4505_v7  ;;  %v7676_v20 = vld [vmem:[%s10145_s7 + $0x478] sm:$0xff]  ;;  %v7683_v7 = vld [vmem:[%s10145_s7 + $0x4b0] sm:$0xff] }
 0x600   : > { %4804 = vmatmul.bf16.vlgmr.msrb.gmra.mxu2 %v8803_v6  ;;  %4829 = vmatmul.bf16.vlgmr.msrb.gmra.mxu3 %v8805_v38 }
 0x601   : > { %v4456_v62 = vpop.f32.mrf.mxu2  ;;  %v9538_v43 = vadd.f32 %v4530_v27, %v9365_v31  ;;  %5200 = vmatpush.bf16.msrb.mxu0 %v7693_v29  ;;  %v7692_v27 = vld [vmem:[%s10145_s7 + $0x4f8] sm:$0xff]  ;;  %5227 = vmatpush.bf16.msrb.mxu1 %v7699_v25 }
 0x602   : > { %v4481_v4 = vpop.f32.mrf.mxu3  ;;  %v4508_v30 = vpop.f32.mrf.mxu0  ;;  %5175 = vmatpush.bf16.msra.mxu3 %v7685_v35 }
 0x603   : > { %v4533_v5 = vpop.f32.mrf.mxu1 }
 0x605   : > { %5201 = vmatpush.bf16.msrb.mxu0 %v7692_v27 }
 0x606   : > { %5176 = vmatpush.bf16.msra.mxu3 %v7684_v22 }
 0x607   : > { %4854 = vmatmul.bf16.vlgmr.msra.gmra.mxu0 %v8887_v0  ;;  %7127 = vmatmul.msk.bf16.vlgmr.msra.gmra.mxu1 %vm1981_vm4, %v8890_v23 }
 0x609   : > { %v4458_v32 = vpop.f32.mrf.mxu2 }
 0x60a   : > { %v4483_v17 = vpop.f32.mrf.mxu3  ;;  %v4510_v57 = vpop.f32.mrf.mxu0  ;;  %5177 = vmatpush.bf16.msra.mxu3 %v7683_v7 }
 0x60b   : > { %v4484_v19 = vadd.f32 %v4483_v17, %v4458_v32  ;;  %v4535_v58 = vpop.f32.mrf.mxu1  ;;  %v7682_v32 = vld [vmem:[%s10145_s7 + $0x4a8] sm:$0xff]  ;;  %v7691_v17 = vld [vmem:[%s10145_s7 + $0x4f0] sm:$0xff]  ;;  %v7673_v57 = vld [vmem:[%s10145_s7 + $0x460] sm:$0xff] }
 0x60c   : > { %5202 = vmatpush.bf16.msrb.mxu0 %v7691_v17  ;;  %v7690_v58 = vld [vmem:[%s10145_s7 + $0x4e8] sm:$0xff] }
 0x60d   : > { %v4509_v6 = vadd.f32 %v4508_v30, %v4484_v19  ;;  %v7698_v30 = vld [vmem:[%s10145_s7 + $0x528] sm:$0xff]  ;;  %v7681_v19 = vld [vmem:[%s10145_s7 + $0x4a0] sm:$0xff] }
 0x60e   : > { %5228 = vmatpush.bf16.msrb.mxu1 %v7698_v30  ;;  %5178 = vmatpush.bf16.msra.mxu3 %v7682_v32 }
 0x60f   : > { %v4534_v47 = vadd.f32 %v4533_v5, %v4509_v6  ;;  %v7674_v5 = vld [vmem:[%s10145_s7 + $0x468] sm:$0xff] }
 0x610   : > { %4808 = vmatmul.bf16.gmra.mxu2 %v9272_v61  ;;  %4833 = vmatmul.bf16.gmra.mxu3 %v9274_v1 }
 0x611   : > { %v4460_v38 = vpop.f32.mrf.mxu2  ;;  %v9546_v31 = vadd.f32 %v4534_v47, %v9367_v36  ;;  %5203 = vmatpush.bf16.msrb.mxu0 %v7690_v58 }
 0x612   : > { %v4485_v42 = vpop.f32.mrf.mxu3  ;;  %v4512_v0 = vpop.f32.mrf.mxu0  ;;  %v7697_v38 = vld [vmem:[%s10145_s7 + $0x520] sm:$0xff]  ;;  %5179 = vmatpush.bf16.msra.mxu3 %v7681_v19 }
 0x613   : > { %v4537_v60 = vpop.f32.mrf.mxu1  ;;  %5229 = vmatpush.bf16.msrb.mxu1 %v7697_v38 }
 0x617   : > { %4858 = vmatmul.bf16.gmra.mxu0 %v9268_v41  ;;  %7128 = vmatmul.msk.bf16.gmra.mxu1 %vm1981_vm4, %v9270_v26 }
 0x619   : > { %v4462_v23 = vpop.f32.mrf.mxu2 }
 0x61a   : > { %v4487_v49 = vpop.f32.mrf.mxu3  ;;  %v4514_v55 = vpop.f32.mrf.mxu0 }
 0x61b   : > { %v4488_v21 = vadd.f32 %v4487_v49, %v4462_v23  ;;  %v4539_v11 = vpop.f32.mrf.mxu1  ;;  %v3024_v23 = vld [vmem:[#allocation3 + $0x1c0] sm:$0xff] }
 0x61d   : > { %v4513_v10 = vadd.f32 %v4512_v0, %v4488_v21 }
 0x61f   : > { %v4538_v33 = vadd.f32 %v4537_v60, %v4513_v10 }
 0x620   : > { %4812 = vmatmul.bf16.gmra.mxu2 %v9519_v34  ;;  %4837 = vmatmul.bf16.gmra.mxu3 %v9521_v13 }
 0x621   : > { %v4464_v36 = vpop.f32.mrf.mxu2  ;;  %v9554_v53 = vadd.f32 %v4538_v33, %v9392_v28  ;;  %v7679_v28 = vld [vmem:[%s10145_s7 + $0x490] sm:$0xff] }
 0x622   : > { %v4489_v40 = vpop.f32.mrf.mxu3  ;;  %5148 = vmatpush.bf16.msra.mxu2 %v7679_v28  ;;  %v7689_v36 = vld [vmem:[%s10145_s7 + $0x4e0] sm:$0xff] }
 0x623   : > { %5204 = vmatpush.bf16.msrb.mxu0 %v7689_v36 }
 0x626   : > { %5149 = vmatpush.bf16.msra.mxu2 %v7678_v48 }
 0x627   : > { %4862 = vmatmul.bf16.gmra.mxu0 %v9528_v8  ;;  %7129 = vmatmul.msk.bf16.gmra.mxu1 %vm1981_vm4, %v9530_v3 }
 0x62a   : > { %5150 = vmatpush.bf16.msra.mxu2 %v7677_v18 }
 0x62e   : > { %5151 = vmatpush.bf16.msra.mxu2 %v7676_v20 }
 0x632   : > { %5152 = vmatpush.bf16.msra.mxu2 %v7675_v15 }
 0x636   : > { %5153 = vmatpush.bf16.msra.mxu2 %v7674_v5 }
 0x63a   : > { %v2794_v56 = vpop.permute.xlu2 %2793  ;;  %5154 = vmatpush.bf16.msra.mxu2 %v7673_v57  ;;  %v2125_v57 = vld [vmem:[#allocation3 + $0x280] sm:$0x1] }
 0x63b   : > { %2839 = vst.msk [vmem:[#allocation3 + $0x1d0] sm:$0xff] %vm2248_vm15, %v2794_v56  ;;  %v3031_v56 = vld [vmem:[#allocation3 + $0x1f8] sm:$0xff] }
 0x642   : > { %v3026_v33 = vld [vmem:[#allocation3 + $0x1d0] sm:$0xff] }
 0x643   : > { %v3077_v28 = vpack.c.bf16 %v3027_v52, %v3026_v33 }
 0x645   : > { %v4612_v14 = vunpack.c.l.b16 %v3077_v28  ;;  %v4613_v20 = vunpack.c.h.b16 %v3077_v28 }
 0x652   : > { %v2508_v62 = vpop.permute.xlu1 %2507 }
 0x653   : > { %2552 = vst.msk [vmem:[#allocation3 + $0x1e8] sm:$0xff] %vm2248_vm15, %v2508_v62  ;;  %v2506_v4 = vpop.permute.xlu0 %2505 }
 0x654   : > { %2551 = vst.msk [vmem:[#allocation3 + $0x1c8] sm:$0xff] %vm2248_vm15, %v2506_v4 }
 0x65a   : > { %v7764_v6 = vpop.permute.xlu1 %7763  ;;  %v3029_v47 = vld [vmem:[#allocation3 + $0x1e8] sm:$0xff] }
 0x65b   : > { %v7766_v42 = vunpack.i.h.bf16 %v7764_v6  ;;  %v7765_v0 = vunpack.i.l.bf16 %v7764_v6  ;;  %v2796_v60 = vpop.permute.xlu0 %2795  ;;  %v3025_v49 = vld [vmem:[#allocation3 + $0x1c8] sm:$0xff]  ;;  %v3078_v55 = vpack.c.bf16 %v3029_v47, %v9437_v44 }
 0x65c   : > { %2840 = vst.msk [vmem:[#allocation3 + $0x1f0] sm:$0xff] %vm2248_vm15, %v2796_v60  ;;  %v3076_v21 = vpack.c.bf16 %v3025_v49, %v3024_v23 }
 0x65d   : > { %2267 = vst.msk [vmem:[#allocation3 + $0x240] sm:$0xff] %vm2248_vm15, %v7766_v42  ;;  %v4614_v11 = vunpack.c.l.b16 %v3078_v55  ;;  %v4615_v10 = vunpack.c.h.b16 %v3078_v55 }
 0x65e   : > { %2266 = vst.msk [vmem:[#allocation3 + $0x220] sm:$0xff] %vm2248_vm15, %v7765_v0  ;;  %v4610_v40 = vunpack.c.l.b16 %v3076_v21  ;;  %v4611_v44 = vunpack.c.h.b16 %v3076_v21 }
 0x660   : > { %v9650_v12 = vpack.c.b16 %v4614_v11, %v4610_v40  ;;  %v9652_v16 = vpack.c.b16 %v4615_v10, %v4611_v44 }
 0x662   : > { %4816 = vmatmul.bf16.gmra.mxu2 %v9650_v12  ;;  %4841 = vmatmul.bf16.gmra.mxu3 %v9652_v16 }
 0x663   : > { %v3030_v9 = vld [vmem:[#allocation3 + $0x1f0] sm:$0xff] }
 0x664   : > { %v9656_v48 = vld [vmem:[#allocation3 + $0x240] sm:$0xff]  ;;  %v3079_v39 = vpack.c.bf16 %v3031_v56, %v3030_v9 }
 0x665   : > { %v2922_v18 = vrot.slane %v9656_v48, 6  ;;  %v9659_v35 = vld [vmem:[#allocation3 + $0x220] sm:$0xff]  ;;  %v2471_v2 = vrot.slane %v9656_v48, 3  ;;  %v2635_v22 = vrot.slane %v9656_v48, 4  ;;  %v2347_v4 = vrot.slane %v9656_v48, 2 }
 0x666   : > { %v2920_v63 = vrot.slane %v9659_v35, 6  ;;  %v2757_v29 = vrot.slane %v9659_v35, 5  ;;  %v2469_v25 = vrot.slane %v9659_v35, 3  ;;  %v4616_v15 = vunpack.c.l.b16 %v3079_v39 }
 0x667   : > { %v4617_v7 = vunpack.c.h.b16 %v3079_v39  ;;  %v2345_v27 = vrot.slane %v9659_v35, 2  ;;  %v2633_v62 = vrot.slane %v9659_v35, 4  ;;  %v2759_v38 = vrot.slane %v9656_v48, 5 }
 0x668   : > { %v2758_v30 = vsel %vm2723_vm13, %v2755_v45, %v2757_v29  ;;  %v2470_v5 = vsel %vm2435_vm9, %v2467_v50, %v2469_v25  ;;  %v2472_v32 = vsel %vm2435_vm9, %v2469_v25, %v2471_v2  ;;  %v9678_v17 = vpack.c.b16 %v4616_v15, %v4612_v14 }
 0x669   : > { %2797 = vrot.lane.b32.xlu1 %v2758_v30, %s7821_s27  ;;  %2509 = vrot.lane.b32.xlu2 %v2470_v5, %s7821_s27  ;;  %v9682_v19 = vpack.c.b16 %v4617_v7, %v4613_v20  ;;  %v2346_v45 = vsel %vm2311_vm10, %v2343_v24, %v2345_v27  ;;  %v2636_v50 = vsel %vm2599_vm2, %v2633_v62, %v2635_v22  ;;  %v2186_v24 = vrot.slane %v2125_v57, 1 }
 0x66a   : > { %2511 = vrot.lane.b32.xlu0 %v2472_v32, %s7821_s27  ;;  %4866 = vmatmul.bf16.gmra.mxu0 %v9678_v17  ;;  %2389 = vst.msk [vmem:[#allocation3 + $0x208] sm:$0xff] %vm1981_vm4, %v2346_v45  ;;  %v2634_v58 = vsel %vm2599_vm2, %v2631_v54, %v2633_v62  ;;  %v2348_v6 = vsel %vm2311_vm10, %v2345_v27, %v2347_v4 }
 0x66b   : > { %7130 = vmatmul.msk.bf16.gmra.mxu1 %vm1981_vm4, %v9682_v19  ;;  %2678 = vst.msk [vmem:[#allocation3 + $0x230] sm:$0xff] %vm1981_vm4, %v2636_v50  ;;  %v2921_v47 = vsel %vm621_vm0, %v2918_v46, %v2920_v63  ;;  %v2923_v54 = vsel %vm621_vm0, %v2920_v63, %v2922_v18  ;;  %v2187_v42 = vsel %vm942_vm7, %v8839_v59, %v2186_v24 }
 0x66c   : > { %2677 = vst.msk [vmem:[#allocation3 + $0x210] sm:$0xff] %vm1981_vm4, %v2634_v58  ;;  %v2760_v37 = vsel %vm2723_vm13, %v2757_v29, %v2759_v38 }
 0x66d   : > { %2390 = vst.msk [vmem:[#allocation3 + $0x228] sm:$0xff] %vm1981_vm4, %v2348_v6 }
 0x66e   : > { %2964 = vst.msk [vmem:[#allocation3 + $0x218] sm:$0xff] %vm1981_vm4, %v2921_v47 }
 0x66f   : > { %2965 = vst.msk [vmem:[#allocation3 + $0x238] sm:$0xff] %vm1981_vm4, %v2923_v54 }
 0x671   : > { %2799 = vrot.lane.b32.xlu2 %v2760_v37, %s7821_s27 }
 0x672   : > { %2226 = vrot.lane.b32.xlu0 %v2187_v42, %s7821_s27  ;;  %5155 = vmatmul.bf16.vlgmr.msra.gmra.mxu2 %v9272_v61 }
 0x673   : > { %5180 = vmatmul.bf16.vlgmr.msra.gmra.mxu3 %v9274_v1  ;;  %v4466_v46 = vpop.f32.mrf.mxu2  ;;  %v4491_v0 = vpop.f32.mrf.mxu3 }
 0x674   : > { %v4492_v60 = vadd.f32 %v4491_v0, %v4466_v46  ;;  %v4516_v23 = vpop.f32.mrf.mxu0  ;;  %v4541_v49 = vpop.f32.mrf.mxu1  ;;  %v7724_v46 = vld [vmem:[%s10145_s7 + $0x5f8] sm:$0xff] }
 0x675   : > { %5548 = vmatpush.bf16.msra.mxu0 %v7724_v46  ;;  %v7708_v0 = vld [vmem:[%s10145_s7 + $0x578] sm:$0xff] }
 0x676   : > { %v4517_v59 = vadd.f32 %v4516_v23, %v4492_v60  ;;  %v7716_v60 = vld [vmem:[%s10145_s7 + $0x5b8] sm:$0xff]  ;;  %5498 = vmatpush.bf16.msrb.mxu2 %v7708_v0  ;;  %v7707_v23 = vld [vmem:[%s10145_s7 + $0x570] sm:$0xff] }
 0x677   : > { %5523 = vmatpush.bf16.msrb.mxu3 %v7716_v60 }
 0x678   : > { %v4542_v55 = vadd.f32 %v4541_v49, %v4517_v59  ;;  %v7715_v49 = vld [vmem:[%s10145_s7 + $0x5b0] sm:$0xff]  ;;  %v7722_v59 = vld [vmem:[%s10145_s7 + $0x5e8] sm:$0xff] }
 0x67a   : > { %v9723_v21 = vadd.f32 %v4542_v55, %v9526_v51  ;;  %5205 = vmatmul.bf16.vlgmr.msrb.gmra.mxu0 %v9268_v41  ;;  %5499 = vmatpush.bf16.msrb.mxu2 %v7707_v23 }
 0x67b   : > { %7299 = vmatmul.msk.bf16.vlgmr.msrb.gmra.mxu1 %vm1981_vm4, %v9270_v26  ;;  %v4468_v11 = vpop.f32.mrf.mxu2  ;;  %v4493_v10 = vpop.f32.mrf.mxu3  ;;  %5524 = vmatpush.bf16.msrb.mxu3 %v7715_v49 }
 0x67c   : > { %v4518_v61 = vpop.f32.mrf.mxu0  ;;  %v4543_v33 = vpop.f32.mrf.mxu1  ;;  %v7706_v10 = vld [vmem:[%s10145_s7 + $0x568] sm:$0xff] }
 0x67d   : > { %v7714_v61 = vld [vmem:[%s10145_s7 + $0x5a8] sm:$0xff]  ;;  %v7721_v33 = vld [vmem:[%s10145_s7 + $0x5e0] sm:$0xff] }
 0x67e   : > { %5500 = vmatpush.bf16.msrb.mxu2 %v7706_v10 }
 0x67f   : > { %5525 = vmatpush.bf16.msrb.mxu3 %v7714_v61 }
 0x682   : > { %5159 = vmatmul.bf16.gmra.mxu2 %v9519_v34 }
 0x683   : > { %5184 = vmatmul.bf16.gmra.mxu3 %v9521_v13  ;;  %v4805_v1 = vpop.f32.mrf.mxu2  ;;  %v4830_v36 = vpop.f32.mrf.mxu3 }
 0x684   : > { %v4831_v40 = vadd.f32 %v4830_v36, %v4805_v1  ;;  %v4855_v44 = vpop.f32.mrf.mxu0  ;;  %v4880_v52 = vpop.f32.mrf.mxu1  ;;  %v7705_v1 = vld [vmem:[%s10145_s7 + $0x560] sm:$0xff] }
 0x685   : > { %v7713_v36 = vld [vmem:[%s10145_s7 + $0x5a0] sm:$0xff]  ;;  %5501 = vmatpush.bf16.msrb.mxu2 %v7705_v1 }
 0x686   : > { %v4856_v51 = vadd.f32 %v4855_v44, %v4831_v40  ;;  %v7720_v40 = vld [vmem:[%s10145_s7 + $0x5d8] sm:$0xff]  ;;  %5526 = vmatpush.bf16.msrb.mxu3 %v7713_v36 }
 0x687   : > { %v7728_v44 = vld [vmem:[%s10145_s7 + $0x618] sm:$0xff] }
 0x688   : > { %v4881_v28 = vadd.f32 %v4880_v52, %v4856_v51  ;;  %5577 = vmatpush.bf16.msra.mxu1 %v7728_v44  ;;  %v7727_v52 = vld [vmem:[%s10145_s7 + $0x610] sm:$0xff]  ;;  %v7704_v51 = vld [vmem:[%s10145_s7 + $0x558] sm:$0xff] }
 0x689   : > { %5502 = vmatpush.bf16.msrb.mxu2 %v7704_v51 }
 0x68a   : > { %v9731_v41 = vadd.f32 %v4881_v28, %v9538_v43  ;;  %5209 = vmatmul.bf16.gmra.mxu0 %v9528_v8  ;;  %v7712_v28 = vld [vmem:[%s10145_s7 + $0x598] sm:$0xff] }
 0x68b   : > { %7300 = vmatmul.msk.bf16.gmra.mxu1 %vm1981_vm4, %v9530_v3  ;;  %v4807_v26 = vpop.f32.mrf.mxu2  ;;  %v4832_v9 = vpop.f32.mrf.mxu3  ;;  %5527 = vmatpush.bf16.msrb.mxu3 %v7712_v28  ;;  %v2289_v28 = vld [vmem:[#allocation3 + $0x280] sm:$0x3] }
 0x68c   : > { %v4857_v56 = vpop.f32.mrf.mxu0  ;;  %v4882_v39 = vpop.f32.mrf.mxu1  ;;  %v7719_v26 = vld [vmem:[%s10145_s7 + $0x5d0] sm:$0xff]  ;;  %5578 = vmatpush.bf16.msra.mxu1 %v7727_v52  ;;  %v7726_v9 = vld [vmem:[%s10145_s7 + $0x608] sm:$0xff] }
 0x68d   : > { %v7703_v39 = vld [vmem:[%s10145_s7 + $0x550] sm:$0xff] }
 0x68e   : > { %5503 = vmatpush.bf16.msrb.mxu2 %v7703_v39  ;;  %v2577_v39 = vld [vmem:[#allocation3 + $0x280] sm:$0xf] }
 0x690   : > { %5579 = vmatpush.bf16.msra.mxu1 %v7726_v9 }
 0x692   : > { %5163 = vmatmul.bf16.gmra.mxu2 %v9650_v12 }
 0x693   : > { %5188 = vmatmul.bf16.gmra.mxu3 %v9652_v16  ;;  %v4809_v14 = vpop.f32.mrf.mxu2  ;;  %v4834_v20 = vpop.f32.mrf.mxu3 }
 0x694   : > { %v4835_v63 = vadd.f32 %v4834_v20, %v4809_v14  ;;  %v4859_v29 = vpop.f32.mrf.mxu0  ;;  %v4884_v25 = vpop.f32.mrf.mxu1  ;;  %v7711_v14 = vld [vmem:[%s10145_s7 + $0x590] sm:$0xff] }
 0x695   : > { %5528 = vmatpush.bf16.msrb.mxu3 %v7711_v14 }
 0x696   : > { %v4860_v43 = vadd.f32 %v4859_v29, %v4835_v63  ;;  %v7718_v63 = vld [vmem:[%s10145_s7 + $0x5c8] sm:$0xff] }
 0x698   : > { %v4885_v15 = vadd.f32 %v4884_v25, %v4860_v43  ;;  %v7725_v25 = vld [vmem:[%s10145_s7 + $0x600] sm:$0xff]  ;;  %v7702_v43 = vld [vmem:[%s10145_s7 + $0x548] sm:$0xff] }
 0x699   : > { %5580 = vmatpush.bf16.msra.mxu1 %v7725_v25  ;;  %5504 = vmatpush.bf16.msrb.mxu2 %v7702_v43 }
 0x69a   : > { %v9739_v7 = vadd.f32 %v4885_v15, %v9546_v31  ;;  %5213 = vmatmul.bf16.gmra.mxu0 %v9678_v17  ;;  %v7710_v15 = vld [vmem:[%s10145_s7 + $0x588] sm:$0xff] }
 0x69b   : > { %7301 = vmatmul.msk.bf16.gmra.mxu1 %vm1981_vm4, %v9682_v19  ;;  %v4811_v27 = vpop.f32.mrf.mxu2  ;;  %v4836_v62 = vpop.f32.mrf.mxu3  ;;  %5529 = vmatpush.bf16.msrb.mxu3 %v7710_v15 }
 0x69c   : > { %v4861_v30 = vpop.f32.mrf.mxu0  ;;  %v4886_v5 = vpop.f32.mrf.mxu1  ;;  %v3039_v62 = vld [vmem:[#allocation3 + $0x238] sm:$0xff] }
 0x69d   : > { %v7717_v30 = vld [vmem:[%s10145_s7 + $0x5c0] sm:$0xff] }
 0x6a3   : > { %v4813_v32 = vpop.f32.mrf.mxu2  ;;  %v4838_v57 = vpop.f32.mrf.mxu3 }
 0x6a4   : > { %v4839_v45 = vadd.f32 %v4838_v57, %v4813_v32  ;;  %v4863_v50 = vpop.f32.mrf.mxu0  ;;  %v4888_v58 = vpop.f32.mrf.mxu1  ;;  %v3032_v32 = vld [vmem:[#allocation3 + $0x200] sm:$0xff]  ;;  %v3035_v57 = vld [vmem:[#allocation3 + $0x218] sm:$0xff] }
 0x6a6   : > { %v4864_v6 = vadd.f32 %v4863_v50, %v4839_v45 }
 0x6a8   : > { %v4889_v24 = vadd.f32 %v4888_v58, %v4864_v6  ;;  %v7701_v58 = vld [vmem:[%s10145_s7 + $0x540] sm:$0xff] }
 0x6a9   : > { %v7709_v6 = vld [vmem:[%s10145_s7 + $0x580] sm:$0xff]  ;;  %5505 = vmatpush.bf16.msrb.mxu2 %v7701_v58 }
 0x6aa   : > { %v9745_v47 = vadd.f32 %v4889_v24, %v9554_v53  ;;  %v7723_v53 = vld [vmem:[%s10145_s7 + $0x5f0] sm:$0xff]  ;;  %5530 = vmatpush.bf16.msrb.mxu3 %v7709_v6 }
 0x6ab   : > { %v4815_v31 = vpop.f32.mrf.mxu2  ;;  %v4840_v54 = vpop.f32.mrf.mxu3  ;;  %5549 = vmatpush.bf16.msra.mxu0 %v7723_v53 }
 0x6ac   : > { %v4865_v42 = vpop.f32.mrf.mxu0  ;;  %v4890_v37 = vpop.f32.mrf.mxu1 }
 0x6af   : > { %5550 = vmatpush.bf16.msra.mxu0 %v7722_v59 }
 0x6b3   : > { %5551 = vmatpush.bf16.msra.mxu0 %v7721_v33  ;;  %v2865_v33 = vld [vmem:[#allocation3 + $0x280] sm:$0x3f] }
 0x6b4   : > { %v2926_v9 = vrot.slane %v2865_v33, 6 }
 0x6b7   : > { %5552 = vmatpush.bf16.msra.mxu0 %v7720_v40 }
 0x6bb   : > { %5553 = vmatpush.bf16.msra.mxu0 %v7719_v26 }
 0x6bf   : > { %5554 = vmatpush.bf16.msra.mxu0 %v7718_v63  ;;  %v2351_v63 = vrot.slane %v2289_v28, 2 }
 0x6c3   : > { %v2510_v55 = vpop.permute.xlu2 %2509  ;;  %5555 = vmatpush.bf16.msra.mxu0 %v7717_v30 }
 0x6c4   : > { %2553 = vst.msk [vmem:[#allocation3 + $0x208] sm:$0xff] %vm2248_vm15, %v2510_v55 }
 0x6cb   : > { %v2800_v11 = vpop.permute.xlu2 %2799  ;;  %v3033_v27 = vld [vmem:[#allocation3 + $0x208] sm:$0xff] }
 0x6cc   : > { %2842 = vst.msk [vmem:[#allocation3 + $0x230] sm:$0xff] %vm2248_vm15, %v2800_v11  ;;  %v3080_v45 = vpack.c.bf16 %v3033_v27, %v3032_v32 }
 0x6ce   : > { %v4961_v55 = vunpack.c.l.b16 %v3080_v45  ;;  %v4962_v10 = vunpack.c.h.b16 %v3080_v45 }
 0x6d3   : > { %v3038_v29 = vld [vmem:[#allocation3 + $0x230] sm:$0xff] }
 0x6d4   : > { %v3083_v5 = vpack.c.bf16 %v3039_v62, %v3038_v29 }
 0x6d6   : > { %v4967_v0 = vunpack.c.l.b16 %v3083_v5  ;;  %v4968_v49 = vunpack.c.h.b16 %v3083_v5  ;;  %v2639_v5 = vrot.slane %v2577_v39, 4 }
 0x6db   : > { %v2798_v56 = vpop.permute.xlu1 %2797 }
 0x6dc   : > { %2841 = vst.msk [vmem:[#allocation3 + $0x210] sm:$0xff] %vm2248_vm15, %v2798_v56  ;;  %v2512_v20 = vpop.permute.xlu0 %2511 }
 0x6dd   : > { %2554 = vst.msk [vmem:[#allocation3 + $0x228] sm:$0xff] %vm2248_vm15, %v2512_v20 }
 0x6e3   : > { %v3034_v50 = vld [vmem:[#allocation3 + $0x210] sm:$0xff] }
 0x6e4   : > { %v2227_v24 = vpop.permute.xlu0 %2226  ;;  %v3037_v31 = vld [vmem:[#allocation3 + $0x228] sm:$0xff]  ;;  %v3081_v54 = vpack.c.bf16 %v3035_v57, %v3034_v50 }
 0x6e5   : > { %2268 = vst.msk [vmem:[#allocation3 + $0x260] sm:$0xff] %vm2248_vm15, %v2227_v24  ;;  %v4817_v42 = vpop.f32.mrf.mxu2  ;;  %v4842_v37 = vpop.f32.mrf.mxu3  ;;  %v3082_v46 = vpack.c.bf16 %v3037_v31, %v9659_v35  ;;  %v2413_v35 = vld [vmem:[#allocation3 + $0x280] sm:$0x7] }
 0x6e6   : > { %v4843_v60 = vadd.f32 %v4842_v37, %v4817_v42  ;;  %v4963_v53 = vunpack.c.l.b16 %v3081_v54  ;;  %v4964_v23 = vunpack.c.h.b16 %v3081_v54  ;;  %v2475_v56 = vrot.slane %v2413_v35, 3 }
 0x6e7   : > { %v4867_v59 = vpop.f32.mrf.mxu0  ;;  %v4965_v11 = vunpack.c.l.b16 %v3082_v46  ;;  %v4966_v61 = vunpack.c.h.b16 %v3082_v46 }
 0x6e8   : > { %v4868_v1 = vadd.f32 %v4867_v59, %v4843_v60  ;;  %v4892_v36 = vpop.f32.mrf.mxu1  ;;  %v9837_v40 = vpack.c.b16 %v4967_v0, %v4963_v53  ;;  %v9839_v44 = vpack.c.b16 %v4968_v49, %v4964_v23 }
 0x6e9   : > { %v9841_v52 = vpack.c.b16 %v4965_v11, %v4961_v55  ;;  %v9843_v51 = vpack.c.b16 %v4966_v61, %v4962_v10 }
 0x6ea   : > { %v4893_v26 = vadd.f32 %v4892_v36, %v4868_v1  ;;  %5217 = vmatmul.bf16.gmra.mxu0 %v9837_v40  ;;  %7302 = vmatmul.msk.bf16.gmra.mxu1 %vm1981_vm4, %v9839_v44 }
 0x6eb   : > { %5167 = vmatmul.bf16.gmra.mxu2 %v9841_v52  ;;  %5192 = vmatmul.bf16.gmra.mxu3 %v9843_v51 }
 0x6ec   : > { %v9850_v14 = vld [vmem:[#allocation3 + $0x260] sm:$0xff]  ;;  %v9853_v20 = vadd.f32 %v4893_v26, %v9723_v21 }
 0x6ed   : > { %v2924_v29 = vrot.slane %v9850_v14, 6  ;;  %v4819_v25 = vpop.f32.mrf.mxu2  ;;  %v4844_v43 = vpop.f32.mrf.mxu3  ;;  %v2761_v15 = vrot.slane %v9850_v14, 5  ;;  %v2473_v27 = vrot.slane %v9850_v14, 3  ;;  %v2349_v62 = vrot.slane %v9850_v14, 2 }
 0x6ee   : > { %v2637_v30 = vrot.slane %v9850_v14, 4 }
 0x6ef   : > { %v2925_v32 = vsel %vm621_vm0, %v2922_v18, %v2924_v29  ;;  %v2927_v21 = vsel %vm621_vm0, %v2924_v29, %v2926_v9  ;;  %v4869_v57 = vpop.f32.mrf.mxu0  ;;  %v2762_v45 = vsel %vm2723_vm13, %v2759_v38, %v2761_v15  ;;  %v2476_v50 = vsel %vm2435_vm9, %v2473_v27, %v2475_v56  ;;  %v2701_v38 = vld [vmem:[#allocation3 + $0x280] sm:$0x1f] }
 0x6f0   : > { %2966 = vst.msk [vmem:[#allocation3 + $0x258] sm:$0xff] %vm1981_vm4, %v2925_v32  ;;  %v4894_v58 = vpop.f32.mrf.mxu1  ;;  %2801 = vrot.lane.b32.xlu0 %v2762_v45, %s7821_s27  ;;  %2515 = vrot.lane.b32.xlu2 %v2476_v50, %s7821_s27  ;;  %v2474_v18 = vsel %vm2435_vm9, %v2471_v2, %v2473_v27  ;;  %v2352_v6 = vsel %vm2311_vm10, %v2349_v62, %v2351_v63  ;;  %v2763_v2 = vrot.slane %v2701_v38, 5 }
 0x6f1   : > { %2967 = vst.msk [vmem:[#allocation3 + $0x278] sm:$0xff] %vm1981_vm4, %v2927_v21  ;;  %2513 = vrot.lane.b32.xlu1 %v2474_v18, %s7821_s27  ;;  %v2638_v24 = vsel %vm2599_vm2, %v2635_v22, %v2637_v30  ;;  %v2350_v31 = vsel %vm2311_vm10, %v2347_v4, %v2349_v62  ;;  %v2640_v54 = vsel %vm2599_vm2, %v2637_v30, %v2639_v5 }
 0x6f2   : > { %2392 = vst.msk [vmem:[#allocation3 + $0x268] sm:$0xff] %vm1981_vm4, %v2352_v6  ;;  %v2764_v60 = vsel %vm2723_vm13, %v2761_v15, %v2763_v2 }
 0x6f3   : > { %2679 = vst.msk [vmem:[#allocation3 + $0x250] sm:$0xff] %vm1981_vm4, %v2638_v24 }
 0x6f4   : > { %2391 = vst.msk [vmem:[#allocation3 + $0x248] sm:$0xff] %vm1981_vm4, %v2350_v31 }
 0x6f5   : > { %v5156_v42 = vpop.f32.mrf.mxu2  ;;  %2680 = vst.msk [vmem:[#allocation3 + $0x270] sm:$0xff] %vm1981_vm4, %v2640_v54 }
 0x6f6   : > { %v5181_v37 = vpop.f32.mrf.mxu3 }
 0x6f7   : > { %v5182_v46 = vadd.f32 %v5181_v37, %v5156_v42  ;;  %v5206_v0 = vpop.f32.mrf.mxu0 }
 0x6f8   : > { %v5231_v22 = vpop.f32.mrf.mxu1 }
 0x6f9   : > { %v5207_v53 = vadd.f32 %v5206_v0, %v5182_v46  ;;  %2803 = vrot.lane.b32.xlu1 %v2764_v60, %s7821_s27 }
 0x6fa   : > { %5556 = vmatmul.bf16.vlgmr.msra.gmra.mxu0 %v9528_v8  ;;  %7471 = vmatmul.msk.bf16.vlgmr.msra.gmra.mxu1 %vm1981_vm4, %v9530_v3 }
 0x6fb   : > { %v5232_v4 = vadd.f32 %v5231_v22, %v5207_v53  ;;  %5506 = vmatmul.bf16.vlgmr.msrb.gmra.mxu2 %v9519_v34  ;;  %5531 = vmatmul.bf16.vlgmr.msrb.gmra.mxu3 %v9521_v13 }
 0x6fd   : > { %v9896_v23 = vadd.f32 %v5232_v4, %v9731_v41  ;;  %v5158_v49 = vpop.f32.mrf.mxu2 }
 0x6fe   : > { %v5183_v59 = vpop.f32.mrf.mxu3 }
 0x6ff   : > { %v5208_v55 = vpop.f32.mrf.mxu0 }
 0x700   : > { %v5233_v11 = vpop.f32.mrf.mxu1 }
 0x705   : > { %v5160_v10 = vpop.f32.mrf.mxu2 }
 0x706   : > { %v5185_v61 = vpop.f32.mrf.mxu3 }
 0x707   : > { %v5186_v33 = vadd.f32 %v5185_v61, %v5160_v10  ;;  %v5210_v1 = vpop.f32.mrf.mxu0 }
 0x708   : > { %v5235_v8 = vpop.f32.mrf.mxu1 }
 0x709   : > { %v5211_v36 = vadd.f32 %v5210_v1, %v5186_v33 }
 0x70a   : > { %5560 = vmatmul.bf16.gmra.mxu0 %v9678_v17  ;;  %7472 = vmatmul.msk.bf16.gmra.mxu1 %vm1981_vm4, %v9682_v19 }
 0x70b   : > { %v5236_v34 = vadd.f32 %v5235_v8, %v5211_v36  ;;  %5510 = vmatmul.bf16.gmra.mxu2 %v9650_v12  ;;  %5535 = vmatmul.bf16.gmra.mxu3 %v9652_v16 }
 0x70d   : > { %v9904_v13 = vadd.f32 %v5236_v34, %v9739_v7  ;;  %v5162_v3 = vpop.f32.mrf.mxu2 }
 0x70e   : > { %v5187_v41 = vpop.f32.mrf.mxu3 }
 0x70f   : > { %v5212_v35 = vpop.f32.mrf.mxu0 }
 0x710   : > { %v5237_v28 = vpop.f32.mrf.mxu1 }
 0x715   : > { %v5164_v26 = vpop.f32.mrf.mxu2 }
 0x716   : > { %v5189_v9 = vpop.f32.mrf.mxu3 }
 0x717   : > { %v5190_v56 = vadd.f32 %v5189_v9, %v5164_v26  ;;  %v5214_v39 = vpop.f32.mrf.mxu0  ;;  %v5648_v26 = vld [vmem:[%s10146_s8 + $0x78] sm:$0xff] }
 0x718   : > { %v5239_v17 = vpop.f32.mrf.mxu1  ;;  %5649 = vmatpush.msra.mxu2 %v5648_v26 }
 0x719   : > { %v5215_v63 = vadd.f32 %v5214_v39, %v5190_v56 }
 0x71a   : > { %5564 = vmatmul.bf16.gmra.mxu0 %v9837_v40  ;;  %7473 = vmatmul.msk.bf16.gmra.mxu1 %vm1981_vm4, %v9839_v44 }
 0x71b   : > { %v5240_v12 = vadd.f32 %v5239_v17, %v5215_v63  ;;  %5514 = vmatmul.bf16.gmra.mxu2 %v9841_v52  ;;  %5539 = vmatmul.bf16.gmra.mxu3 %v9843_v51 }
 0x71d   : > { %v9912_v16 = vadd.f32 %v5240_v12, %v9745_v47  ;;  %v5166_v19 = vpop.f32.mrf.mxu2 }
 0x71e   : > { %v5191_v7 = vpop.f32.mrf.mxu3 }
 0x71f   : > { %v5216_v29 = vpop.f32.mrf.mxu0 }
 0x720   : > { %v5241_v25 = vpop.f32.mrf.mxu1 }
 0x74a   : > { %v2516_v43 = vpop.permute.xlu2 %2515 }
 0x74b   : > { %2556 = vst.msk [vmem:[#allocation3 + $0x268] sm:$0xff] %vm2248_vm15, %v2516_v43 }
 0x752   : > { %v3045_v27 = vld [vmem:[#allocation3 + $0x268] sm:$0xff] }
 0x753   : > { %v3086_v51 = vpack.c.bf16 %v3045_v27, %v9850_v14  ;;  %v3043_v14 = vld [vmem:[#allocation3 + $0x258] sm:$0xff] }
 0x755   : > { %v5316_v57 = vunpack.c.l.b16 %v3086_v51  ;;  %v5317_v50 = vunpack.c.h.b16 %v3086_v51 }
 0x762   : > { %v2802_v15 = vpop.permute.xlu0 %2801 }
 0x763   : > { %2843 = vst.msk [vmem:[#allocation3 + $0x250] sm:$0xff] %vm2248_vm15, %v2802_v15  ;;  %v2514_v40 = vpop.permute.xlu1 %2513 }
 0x764   : > { %2555 = vst.msk [vmem:[#allocation3 + $0x248] sm:$0xff] %vm2248_vm15, %v2514_v40 }
 0x767   : > { %v5218_v44 = vpop.f32.mrf.mxu0  ;;  %v5243_v52 = vpop.f32.mrf.mxu1 }
 0x76a   : > { %v3042_v38 = vld [vmem:[#allocation3 + $0x250] sm:$0xff] }
 0x76b   : > { %v2804_v47 = vpop.permute.xlu1 %2803  ;;  %v3041_v62 = vld [vmem:[#allocation3 + $0x248] sm:$0xff]  ;;  %v3085_v2 = vpack.c.bf16 %v3043_v14, %v3042_v38  ;;  %v7822_v38 = vmov 16.0  }
 0x76c   : > { %2844 = vst.msk [vmem:[#allocation3 + $0x270] sm:$0xff] %vm2248_vm15, %v2804_v47  ;;  %v3084_v30 = vpack.c.bf16 %v3041_v62, %v9656_v48  ;;  %v3047_v48 = vld [vmem:[#allocation3 + $0x278] sm:$0xff]  ;;  %7779 = vrcp.f32 %v7822_v38 }
 0x76d   : > { %v5314_v53 = vunpack.c.l.b16 %v3085_v2  ;;  %v5315_v49 = vunpack.c.h.b16 %v3085_v2 }
 0x76e   : > { %v5168_v5 = vpop.f32.mrf.mxu2  ;;  %v5193_v32 = vpop.f32.mrf.mxu3  ;;  %v5312_v21 = vunpack.c.l.b16 %v3084_v30  ;;  %v5313_v45 = vunpack.c.h.b16 %v3084_v30 }
 0x76f   : > { %v5194_v58 = vadd.f32 %v5193_v32, %v5168_v5  ;;  %v5220_v18 = vpop.f32.mrf.mxu0  ;;  %v5245_v6 = vpop.f32.mrf.mxu1 }
 0x770   : > { %v5320_v24 = vpack.c.b16 %v5316_v57, %v5312_v21  ;;  %v5321_v31 = vpack.c.b16 %v5317_v50, %v5313_v45  ;;  %v5646_v50 = vld [vmem:[%s10146_s8 + $0x68] sm:$0xff]  ;;  %v5643_v18 = vld [vmem:[%s10146_s8 + $0x50] sm:$0xff] }
 0x771   : > { %v5219_v54 = vadd.f32 %v5218_v44, %v5194_v58  ;;  %v5645_v58 = vld [vmem:[%s10146_s8 + $0x60] sm:$0xff]  ;;  %v5642_v6 = vld [vmem:[%s10146_s8 + $0x48] sm:$0xff] }
 0x772   : > { %5518 = vmatmul.bf16.gmra.mxu2 %v5320_v24  ;;  %5543 = vmatmul.bf16.gmra.mxu3 %v5321_v31 }
 0x773   : > { %v5244_v42 = vadd.f32 %v5243_v52, %v5219_v54  ;;  %v3046_v37 = vld [vmem:[#allocation3 + $0x270] sm:$0xff]  ;;  %v5641_v54 = vld [vmem:[%s10146_s8 + $0x40] sm:$0xff] }
 0x774   : > { %v3087_v46 = vpack.c.bf16 %v3047_v48, %v3046_v37  ;;  %v5640_v37 = vld [vmem:[%s10146_s8 + $0x38] sm:$0xff] }
 0x775   : > { %v9921_v0 = vadd.f32 %v5244_v42, %v9853_v20 }
 0x776   : > { %v5170_v22 = vpop.f32.mrf.mxu2  ;;  %v5195_v60 = vpop.f32.mrf.mxu3  ;;  %v5318_v4 = vunpack.c.l.b16 %v3087_v46  ;;  %v5319_v59 = vunpack.c.h.b16 %v3087_v46 }
 0x777   : > { %v5557_v55 = vpop.f32.mrf.mxu0  ;;  %v5582_v11 = vpop.f32.mrf.mxu1  ;;  %v5639_v22 = vld [vmem:[%s10146_s8 + $0x30] sm:$0xff] }
 0x778   : > { %v5322_v10 = vpack.c.b16 %v5318_v4, %v5314_v53  ;;  %v5323_v61 = vpack.c.b16 %v5319_v59, %v5315_v49  ;;  %v7780_v46 = vpop.eup %7779  ;;  %v5638_v53 = vld [vmem:[%s10146_s8 + $0x28] sm:$0xff] }
 0x779   : > { %v5618_v49 = vmul.f32 16.0, %v7780_v46  ;;  %vm5622_vm0 = vweird.f32 %v7780_v46 }
 0x77a   : > { %5568 = vmatmul.bf16.gmra.mxu0 %v5322_v10  ;;  %7474 = vmatmul.msk.bf16.gmra.mxu1 %vm1981_vm4, %v5323_v61 }
 0x77e   : > { %v5507_v33 = vpop.f32.mrf.mxu2  ;;  %v5532_v1 = vpop.f32.mrf.mxu3 }
 0x77f   : > { %v5533_v8 = vadd.f32 %v5532_v1, %v5507_v33  ;;  %v5559_v36 = vpop.f32.mrf.mxu0  ;;  %v5584_v34 = vpop.f32.mrf.mxu1  ;;  %v5636_v1 = vld [vmem:[%s10146_s8 + $0x18] sm:$0xff] }
 0x781   : > { %v5558_v20 = vadd.f32 %v5557_v55, %v5533_v8 }
 0x783   : > { %v5583_v3 = vadd.f32 %v5582_v11, %v5558_v20  ;;  %v5637_v11 = vld [vmem:[%s10146_s8 + $0x20] sm:$0xff]  ;;  %v5635_v20 = vld [vmem:[%s10146_s8 + $0x10] sm:$0xff] }
 0x785   : > { %v5598_v41 = vadd.f32 %v5583_v3, %v9896_v23 }
 0x786   : > { %v5509_v35 = vpop.f32.mrf.mxu2  ;;  %v5534_v28 = vpop.f32.mrf.mxu3 }
 0x787   : > { %v5561_v9 = vpop.f32.mrf.mxu0  ;;  %v5586_v56 = vpop.f32.mrf.mxu1  ;;  %v5634_v35 = vld [vmem:[%s10146_s8 + $0x8] sm:$0xff] }
 0x78e   : > { %v5511_v39 = vpop.f32.mrf.mxu2  ;;  %v5536_v17 = vpop.f32.mrf.mxu3 }
 0x78f   : > { %v5537_v63 = vadd.f32 %v5536_v17, %v5511_v39  ;;  %v5563_v12 = vpop.f32.mrf.mxu0  ;;  %v5588_v19 = vpop.f32.mrf.mxu1 }
 0x791   : > { %v5562_v7 = vadd.f32 %v5561_v9, %v5537_v63 }
 0x793   : > { %v5587_v29 = vadd.f32 %v5586_v56, %v5562_v7  ;;  %v5633_v56 = vld [vmem:[%s10146_s8] sm:$0xff] }
 0x795   : > { %v5599_v25 = vadd.f32 %v5587_v29, %v9904_v13  ;;  %v5647_v13 = vld [vmem:[%s10146_s8 + $0x70] sm:$0xff] }
 0x796   : > { %v5513_v43 = vpop.f32.mrf.mxu2  ;;  %v5538_v23 = vpop.f32.mrf.mxu3  ;;  %5650 = vmatpush.msra.mxu2 %v5647_v13 }
 0x797   : > { %v5603_v15 = vrot.slane %v5599_v25, 4  ;;  %v5565_v40 = vpop.f32.mrf.mxu0  ;;  %v5590_v44 = vpop.f32.mrf.mxu1 }
 0x798   : > { %5651 = vmatpush.msra.mxu2 %v5646_v50 }
 0x799   : > { %v9930_v52 = vsel %vm2599_vm2, %v5598_v41, %v5603_v15 }
 0x79a   : > { %5652 = vmatpush.msra.mxu2 %v5645_v58 }
 0x79e   : > { %v5515_v27 = vpop.f32.mrf.mxu2  ;;  %v5540_v51 = vpop.f32.mrf.mxu3 }
 0x79f   : > { %v5541_v47 = vadd.f32 %v5540_v51, %v5515_v27  ;;  %v5567_v62 = vpop.f32.mrf.mxu0  ;;  %v5592_v30 = vpop.f32.mrf.mxu1 }
 0x7a1   : > { %v5566_v5 = vadd.f32 %v5565_v40, %v5541_v47 }
 0x7a3   : > { %v5591_v32 = vadd.f32 %v5590_v44, %v5566_v5 }
 0x7a5   : > { %v5600_v21 = vadd.f32 %v5591_v32, %v9912_v16  ;;  %v5644_v16 = vld [vmem:[%s10146_s8 + $0x58] sm:$0xff] }
 0x7a6   : > { %v5517_v57 = vpop.f32.mrf.mxu2  ;;  %v5542_v45 = vpop.f32.mrf.mxu3  ;;  %5653 = vmatpush.msra.mxu2 %v5644_v16 }
 0x7a8   : > { %5654 = vmatpush.msra.mxu2 %v5643_v18 }
 0x7aa   : > { %5655 = vmatpush.msra.mxu2 %v5642_v6 }
 0x7ac   : > { %5656 = vmatpush.msra.mxu2 %v5641_v54 }
 0x7ae   : > { %5657 = vmatpush.msra.mxu2 %v5640_v37 }
 0x7b0   : > { %5658 = vmatpush.msra.mxu2 %v5639_v22 }
 0x7b2   : > { %5659 = vmatpush.msra.mxu2 %v5638_v53 }
 0x7b4   : > { %5660 = vmatpush.msra.mxu2 %v5637_v11 }
 0x7b6   : > { %5661 = vmatpush.msra.mxu2 %v5636_v1 }
 0x7b8   : > { %5662 = vmatpush.msra.mxu2 %v5635_v20 }
 0x7ba   : > { %5663 = vmatpush.msra.mxu2 %v5634_v35 }
 0x7bc   : > { %5664 = vmatpush.msra.mxu2 %v5633_v56 }
 0x7f5   : > { %v5519_v24 = vpop.f32.mrf.mxu2  ;;  %v5544_v31 = vpop.f32.mrf.mxu3 }
 0x7f6   : > { %v5545_v14 = vadd.f32 %v5544_v31, %v5519_v24 }
 0x7f7   : > { %v5569_v2 = vpop.f32.mrf.mxu0  ;;  %v5594_v42 = vpop.f32.mrf.mxu1 }
 0x7f8   : > { %v5570_v48 = vadd.f32 %v5569_v2, %v5545_v14 }
 0x7fa   : > { %v5595_v60 = vadd.f32 %v5594_v42, %v5570_v48 }
 0x7fc   : > { %v5601_v4 = vadd.f32 %v5595_v60, %v9921_v0  ;;  %v5619_v0 = vsub.f32 1.0, %v5618_v49 }
 0x7fd   : > { %v5521_v59 = vpop.f32.mrf.mxu2  ;;  %v5546_v55 = vpop.f32.mrf.mxu3 }
 0x7fe   : > { %v5606_v10 = vrot.slane %v5601_v4, 4  ;;  %v5620_v28 = vmul.f32 %v7780_v46, %v5619_v0 }
 0x7ff   : > { %v5571_v61 = vpop.f32.mrf.mxu0  ;;  %v5596_v33 = vpop.f32.mrf.mxu1 }
 0x800   : > { %v5609_v8 = vsel %vm2599_vm2, %v5600_v21, %v5606_v10  ;;  %v5621_v63 = vadd.f32 %v7780_v46, %v5620_v28  ;;  %v5691_v21 = vlaneseq }
 0x801   : > { %v5610_v36 = vadd.f32 %v5609_v8, %v9930_v52  ;;  %v5625_v34 = vmax.f32 %v9930_v52, %v5609_v8 }
 0x802   : > { %v5623_v25 = vsel %vm5622_vm0, %v7780_v46, %v5621_v63  ;;  %v9982_v58 = vand.u32 127, %v5691_v21  ;;  %v7488_v63 = vld [vmem:[%s10147_s9 + $0x28] sm:$0xff] }
 0x803   : > { %v5611_v3 = vrot.slane %v5610_v36, 4  ;;  %v5626_v41 = vrot.slane %v5625_v34, 4 }
 0x804   : > { %vm5694_vm9 = vcmp.lt.s32.totalorder %v9982_v58, 32  ;;  %vm5787_vm1 = vcmp.ge.s32.totalorder %v9982_v58, 32  ;;  %vm5788_vm10 = vcmp.lt.s32.totalorder %v9982_v58, 64  ;;  %vm5883_vm12 = vcmp.ge.s32.totalorder %v9982_v58, 64 }
 0x805   : > { %v5612_v26 = vadd.f32 %v5611_v3, %v5610_v36  ;;  %v5627_v9 = vmax.f32 %v5625_v34, %v5626_v41  ;;  %vm10004_vm13 = vmand %vm5787_vm1, %vm5788_vm10  ;;  %v5711_v3 = vld [vmem:[%s10147_s9 + $0x8] sm:$0xff] }
 0x807   : > { %v5613_v39 = vrot.slane %v5612_v26, 2  ;;  %v5628_v17 = vrot.slane %v5627_v9, 2 }
 0x809   : > { %v5614_v12 = vadd.f32 %v5613_v39, %v5612_v26  ;;  %v5629_v19 = vmax.f32 %v5627_v9, %v5628_v17  ;;  %v7487_v9 = vld [vmem:[%s10147_s9 + $0x20] sm:$0xff]  ;;  %v7480_v17 = vld [vmem:[%s10147_s9 + $0x10] sm:$0xff] }
 0x80b   : > { %v5615_v7 = vrot.slane %v5614_v12, 1  ;;  %v5630_v29 = vrot.slane %v5629_v19, 1 }
 0x80d   : > { %v5616_v43 = vadd.f32 %v5615_v7, %v5614_v12  ;;  %v5631_v15 = vmax.f32 %v5629_v19, %v5630_v29  ;;  %v7481_v12 = vld [vmem:[%s10147_s9 + $0x18] sm:$0xff]  ;;  %v7774_v7 = vld [vmem:[%s10148_s10] ss:$0 sm:$0xff] }
 0x80f   : > { %v5624_v23 = vmul.f32 %v5623_v25, %v5616_v43 }
 0x811   : > { %v5632_v40 = vadd.f32 %v5631_v15, %v5624_v23  ;;  %v7776_v23 = vld [vmem:[%s10148_s10 + $0x2] ss:$0 sm:$0xff] }
 0x813   : > { %5665 = vmatmul.f32.vlgmr.msra.gmra.mxu2 %v5632_v40  ;;  %v7823_v40 = vmov 0  }
 0x814   : > { %7769 = vset.pattern.permute.xlu0 %v7823_v40  ;;  %7767 = vset.pattern.permute.xlu1 %v7823_v40 }
 0x815   : > { %7768 = vset.pattern.permute.xlu2 %v7823_v40 }
 0x896   : > { %v5666_v44 = vpop.f32.mrf.mxu2 }
 0x897   : > { %v7475_v27 = vmul.f32 -1.442695, %v5666_v44 }
 0x899   : > { %7781 = vpow2.f32 %v7475_v27 }
 0x89f   : > { %v7782_v51 = vpop.eup %7781 }
 0x8a0   : > { %v5672_v47 = vadd.f32 1.0, %v7782_v51 }
 0x8a2   : > { %7783 = vrcp.f32 %v5672_v47  ;;  %v5684_v32 = vand.u32 2147483648, %v5672_v47  ;;  %v5682_v45 = vand.u32 2147483647, %v5672_v47  ;;  %vm5678_vm11 = vweird.f32 %v5672_v47 }
 0x8a4   : > { %v5685_v50 = vor.u32 1.1754944e-38, %v5684_v32  ;;  %vm5683_vm6 = vcmp.eq.f32.partialorder %v5682_v45, 8.507059e+37 }
 0x8a8   : > { %v7784_v62 = vpop.eup %7783 }
 0x8a9   : > { %v5674_v30 = vmul.f32 %v7784_v62, %v5672_v47  ;;  %vm5679_vm4 = vweird.f32 %v7784_v62 }
 0x8aa   : > { %vm5680_vm15 = vmor %vm5678_vm11, %vm5679_vm4 }
 0x8ab   : > { %v5675_v5 = vsub.f32 1.0, %v5674_v30 }
 0x8ad   : > { %v5676_v57 = vmul.f32 %v7784_v62, %v5675_v5 }
 0x8af   : > { %v5677_v13 = vadd.f32 %v7784_v62, %v5676_v57 }
 0x8b1   : > { %v5681_v16 = vsel %vm5680_vm15, %v7784_v62, %v5677_v13  ;;  %v7775_v62 = vld [vmem:[%s10148_s10 + $0x1] ss:$0 sm:$0xff] }
 0x8b2   : > { %v5686_v18 = vsel %vm5683_vm6, %v5685_v50, %v5681_v16 }
 0x8b3   : > { %v5688_v6 = vperm.slane %v5686_v18, 0 }
 0x8b5   : > { %v9986_v38 = vmul.f32 %v5688_v6, %v9930_v52  ;;  %v9988_v24 = vmul.f32 %v5688_v6, %v5609_v8  ;;  %v5710_v8 = vld [vmem:[%s10147_s9] sm:$0xff] }
 0x8b7   : > { %v5705_v31 = vsel %vm5694_vm9, %v9988_v24, -3e+38  ;;  %v5697_v54 = vsel %vm5694_vm9, %v9988_v24, 0.0  ;;  %v5704_v14 = vsel %vm5694_vm9, %v9986_v38, -3e+38  ;;  %v5696_v42 = vsel %vm5694_vm9, %v9986_v38, 0.0 }
 0x8b8   : > { %5708 = vmax.xlane.f32.xlu2 %v5705_v31  ;;  %5700 = vadd.xlane.f32.xlu0 %v5697_v54  ;;  %v5895_v2 = vsel %vm5883_vm12, %v9988_v24, -3e+38  ;;  %v5791_v37 = vsel %vm10004_vm13, %v9988_v24, 0.0  ;;  %v5887_v48 = vsel %vm5883_vm12, %v9988_v24, 0.0  ;;  %v5799_v46 = vsel %vm10004_vm13, %v9988_v24, -3e+38 }
 0x8b9   : > { %5706 = vmax.xlane.f32.xlu1 %v5704_v14  ;;  %v5894_v22 = vsel %vm5883_vm12, %v9986_v38, -3e+38  ;;  %v5886_v60 = vsel %vm5883_vm12, %v9986_v38, 0.0  ;;  %v5798_v53 = vsel %vm10004_vm13, %v9986_v38, -3e+38  ;;  %v5790_v4 = vsel %vm10004_vm13, %v9986_v38, 0.0 }
 0x8c0   : > { %5898 = vmax.xlane.f32.xlu0 %v5895_v2  ;;  %5698 = vadd.xlane.f32.xlu2 %v5696_v42 }
 0x8c1   : > { %5794 = vadd.xlane.f32.xlu1 %v5791_v37 }
 0x8c8   : > { %5890 = vadd.xlane.f32.xlu0 %v5887_v48  ;;  %5802 = vmax.xlane.f32.xlu2 %v5799_v46 }
 0x8c9   : > { %5896 = vmax.xlane.f32.xlu1 %v5894_v22 }
 0x8d0   : > { %5888 = vadd.xlane.f32.xlu0 %v5886_v60  ;;  %5800 = vmax.xlane.f32.xlu2 %v5798_v53 }
 0x8d8   : > { %5792 = vadd.xlane.f32.xlu2 %v5790_v4 }
 0x92b   : > { %v5709_v49 = vpop.xlane.xlu2 %5708  ;;  %v5701_v59 = vpop.xlane.xlu0 %5700 }
 0x92c   : > { %v5707_v55 = vpop.xlane.xlu1 %5706  ;;  %5734 = vmatpush.msra.mxu3 %v5709_v49  ;;  %v5703_v11 = vmul.f32 0.03125, %v5701_v59 }
 0x92e   : > { %5735 = vmatpush.msra.mxu3 %v5707_v55 }
 0x930   : > { %5736 = vmatpush.msra.mxu3 %v5703_v11 }
 0x933   : > { %v5899_v10 = vpop.xlane.xlu0 %5898  ;;  %v5699_v61 = vpop.xlane.xlu2 %5698 }
 0x934   : > { %v5795_v33 = vpop.xlane.xlu1 %5794  ;;  %v5702_v1 = vmul.f32 0.03125, %v5699_v61 }
 0x935   : > { %v5797_v28 = vmul.f32 0.03125, %v5795_v33 }
 0x936   : > { %5737 = vmatpush.msra.mxu3 %v5702_v1 }
 0x937   : > { %7476 = vmatmul.msk.f32.vlgmr.msra.gmra.mxu3 %vm1062_vm8, %v5710_v8 }
 0x938   : > { %5926 = vmatpush.msrb.mxu3 %v5899_v10 }
 0x93b   : > { %v5891_v0 = vpop.xlane.xlu0 %5890  ;;  %v5803_v36 = vpop.xlane.xlu2 %5802 }
 0x93c   : > { %v5893_v34 = vmul.f32 0.015625, %v5891_v0  ;;  %v5897_v20 = vpop.xlane.xlu1 %5896  ;;  %5830 = vmatpush.msrb.mxu2 %v5803_v36 }
 0x93d   : > { %5927 = vmatpush.msrb.mxu3 %v5897_v20 }
 0x93f   : > { %5928 = vmatpush.msrb.mxu3 %v5893_v34 }
 0x940   : > { %7477 = vmatmul.msk.f32.gmra.mxu3 %vm1062_vm8, %v5711_v3 }
 0x943   : > { %v5889_v41 = vpop.xlane.xlu0 %5888  ;;  %v5801_v35 = vpop.xlane.xlu2 %5800 }
 0x944   : > { %v5892_v26 = vmul.f32 0.015625, %v5889_v41  ;;  %5831 = vmatpush.msrb.mxu2 %v5801_v35 }
 0x946   : > { %5832 = vmatpush.msrb.mxu2 %v5797_v28  ;;  %5929 = vmatpush.msrb.mxu3 %v5892_v26 }
 0x948   : > { %7490 = vmatmul.msk.f32.vlgmr.msrb.gmra.mxu3 %vm1062_vm8, %v7487_v9 }
 0x94b   : > { %v5793_v56 = vpop.xlane.xlu2 %5792 }
 0x94c   : > { %v5796_v39 = vmul.f32 0.03125, %v5793_v56 }
 0x94e   : > { %5833 = vmatpush.msrb.mxu2 %v5796_v39 }
 0x94f   : > { %7483 = vmatmul.msk.f32.vlgmr.msrb.gmra.mxu2 %vm1062_vm8, %v7480_v17 }
 0x950   : > { %7491 = vmatmul.msk.f32.gmra.mxu3 %vm1062_vm8, %v7488_v63 }
 0x957   : > { %7484 = vmatmul.msk.f32.gmra.mxu2 %vm1062_vm8, %v7481_v12 }
 0x9ba   : > { %v5739_v19 = vpop.f32.mrf.mxu3 }
 0x9bb   : > { %v5740_v25 = vadd.f32 %v7774_v7, %v5739_v19 }
 0x9bd   : > { %v7478_v15 = vmul.f32 -1.442695, %v5740_v25 }
 0x9bf   : > { %7785 = vpow2.f32 %v7478_v15 }
 0x9c3   : > { %v5742_v29 = vpop.f32.mrf.mxu3 }
 0x9c4   : > { %v5743_v43 = vadd.f32 %v7774_v7, %v5742_v29 }
 0x9c5   : > { %v7786_v5 = vpop.eup %7785 }
 0x9c6   : > { %v7479_v44 = vmul.f32 -1.442695, %v5743_v43  ;;  %v10060_v16 = vadd.f32 1.0, %v7786_v5 }
 0x9c8   : > { %7787 = vpow2.f32 %v7479_v44 }
 0x9cb   : > { %v5931_v27 = vpop.f32.mrf.mxu3 }
 0x9cc   : > { %v5932_v51 = vadd.f32 %v7776_v23, %v5931_v27 }
 0x9ce   : > { %v7492_v47 = vmul.f32 -1.442695, %v5932_v51  ;;  %v7788_v45 = vpop.eup %7787 }
 0x9cf   : > { %v10062_v31 = vadd.f32 1.0, %v7788_v45 }
 0x9d0   : > { %7789 = vpow2.f32 %v7492_v47 }
 0x9d2   : > { %v5835_v30 = vpop.f32.mrf.mxu2 }
 0x9d3   : > { %v5836_v32 = vadd.f32 %v7775_v62, %v5835_v30  ;;  %v5934_v21 = vpop.f32.mrf.mxu3 }
 0x9d4   : > { %v5935_v57 = vadd.f32 %v7776_v23, %v5934_v21 }
 0x9d5   : > { %v7485_v13 = vmul.f32 -1.442695, %v5836_v32 }
 0x9d6   : > { %v7790_v50 = vpop.eup %7789  ;;  %v7493_v18 = vmul.f32 -1.442695, %v5935_v57 }
 0x9d7   : > { %7791 = vpow2.f32 %v7485_v13  ;;  %v5943_v6 = vadd.f32 1.0, %v7790_v50 }
 0x9d8   : > { %7793 = vpow2.f32 %v7493_v18 }
 0x9d9   : > { %7795 = vrcp.f32 %v5943_v6  ;;  %v5956_v49 = vand.u32 2147483648, %v5943_v6  ;;  %vm5950_vm8 = vweird.f32 %v5943_v6  ;;  %v5954_v11 = vand.u32 2147483647, %v5943_v6 }
 0x9da   : > { %7797 = vrcp.f32 %v10060_v16  ;;  %v5838_v54 = vpop.f32.mrf.mxu2 }
 0x9db   : > { %v5839_v14 = vadd.f32 %v7775_v62, %v5838_v54  ;;  %7799 = vrcp.f32 %v10062_v31  ;;  %v5957_v36 = vor.u32 1.1754944e-38, %v5956_v49  ;;  %vm5955_vm3 = vcmp.eq.f32.partialorder %v5954_v11, 8.507059e+37 }
 0x9dd   : > { %v7792_v52 = vpop.eup %7791  ;;  %v7486_v2 = vmul.f32 -1.442695, %v5839_v14  ;;  %v5764_v14 = vand.u32 2147483648, %v10060_v16 }
 0x9de   : > { %v7794_v42 = vpop.eup %7793  ;;  %v5847_v37 = vadd.f32 1.0, %v7792_v52  ;;  %v5779_v52 = vand.u32 2147483648, %v10062_v31 }
 0x9df   : > { %v7796_v48 = vpop.eup %7795  ;;  %7801 = vpow2.f32 %v7486_v2  ;;  %v10066_v46 = vadd.f32 1.0, %v7794_v42 }
 0x9e0   : > { %v10068_v22 = vpop.eup %7797  ;;  %7803 = vrcp.f32 %v5847_v37  ;;  %v5946_v60 = vmul.f32 %v7796_v48, %v5943_v6  ;;  %vm5951_vm14 = vweird.f32 %v7796_v48  ;;  %v5858_v26 = vand.u32 2147483647, %v5847_v37 }
 0x9e1   : > { %7805 = vrcp.f32 %v10066_v46  ;;  %v10071_v4 = vpop.eup %7799  ;;  %v5754_v59 = vmul.f32 %v10068_v22, %v10060_v16  ;;  %vm5952_vm5 = vmor %vm5950_vm8, %vm5951_vm14  ;;  %v5860_v9 = vand.u32 2147483648, %v5847_v37  ;;  %vm5854_vm11 = vweird.f32 %v5847_v37 }
 0x9e2   : > { %v5947_v53 = vsub.f32 1.0, %v5946_v60  ;;  %v5769_v8 = vmul.f32 %v10071_v4, %v10062_v31  ;;  %vm5965_vm15 = vweird.f32 %v10066_v46  ;;  %v5969_v43 = vand.u32 2147483647, %v10066_v46 }
 0x9e3   : > { %v5755_v3 = vsub.f32 1.0, %v5754_v59  ;;  %v5861_v25 = vor.u32 1.1754944e-38, %v5860_v9  ;;  %v5971_v23 = vand.u32 2147483648, %v10066_v46  ;;  %vm5859_vm12 = vcmp.eq.f32.partialorder %v5858_v26, 8.507059e+37 }
 0x9e4   : > { %v5948_v55 = vmul.f32 %v7796_v48, %v5947_v53  ;;  %v5770_v56 = vsub.f32 1.0, %v5769_v8  ;;  %v5780_v11 = vor.u32 1.1754944e-38, %v5779_v52 }
 0x9e5   : > { %v7802_v10 = vpop.eup %7801  ;;  %v5756_v12 = vmul.f32 %v10068_v22, %v5755_v3  ;;  %v5972_v21 = vor.u32 1.1754944e-38, %v5971_v23 }
 0x9e6   : > { %v7804_v61 = vpop.eup %7803  ;;  %v5848_v33 = vadd.f32 1.0, %v7802_v10  ;;  %v5949_v1 = vadd.f32 %v7796_v48, %v5948_v55  ;;  %v5771_v15 = vmul.f32 %v10071_v4, %v5770_v56  ;;  %v5765_v55 = vor.u32 1.1754944e-38, %v5764_v14 }
 0x9e7   : > { %v7806_v0 = vpop.eup %7805  ;;  %v5850_v34 = vmul.f32 %v7804_v61, %v5847_v37  ;;  %vm5855_vm4 = vweird.f32 %v7804_v61  ;;  %v5757_v18 = vadd.f32 %v10068_v22, %v5756_v12  ;;  %v5762_v37 = vand.u32 2147483647, %v10060_v16 }
 0x9e8   : > { %7807 = vrcp.f32 %v5848_v33  ;;  %v5953_v20 = vsel %vm5952_vm5, %v7796_v48, %v5949_v1  ;;  %v5961_v28 = vmul.f32 %v7806_v0, %v10066_v46  ;;  %vm5966_vm6 = vweird.f32 %v7806_v0  ;;  %vm5856_vm1 = vmor %vm5854_vm11, %vm5855_vm4 }
 0x9e9   : > { %v5958_v41 = vsel %vm5955_vm3, %v5957_v36, %v5953_v20  ;;  %v5851_v35 = vsub.f32 1.0, %v5850_v34  ;;  %vm5869_vm13 = vweird.f32 %v5848_v33  ;;  %v5873_v47 = vand.u32 2147483647, %v5848_v33  ;;  %vm5967_vm8 = vmor %vm5965_vm15, %vm5966_vm6  ;;  %v7777_v20 = vld [vmem:[%s10149_s11] ss:$0 sm:$0xff] }
 0x9ea   : > { %vm5975_vm0 = vcmp.ge.f32.partialorder %v5958_v41, 0.2  ;;  %v5962_v63 = vsub.f32 1.0, %v5961_v28  ;;  %v5875_v62 = vand.u32 2147483648, %v5848_v33  ;;  %vm5970_vm3 = vcmp.eq.f32.partialorder %v5969_v43, 8.507059e+37 }
 0x9eb   : > { %v5977_v39 = vsel %vm5975_vm0, %v5958_v41, 0.0  ;;  %v5852_v17 = vmul.f32 %v7804_v61, %v5851_v35  ;;  %vm5758_vm0 = vweird.f32 %v10060_v16  ;;  %vm5759_vm4 = vweird.f32 %v10068_v22  ;;  %v7778_v41 = vld [vmem:[%s10150_s12] ss:$0 sm:$0xff] }
 0x9ec   : > { %5991 = vperm.xlu0 %7769, %v5977_v39   ;;  %v5963_v7 = vmul.f32 %v7806_v0, %v5962_v63  ;;  %v5876_v13 = vor.u32 1.1754944e-38, %v5875_v62  ;;  %vm5773_vm15 = vweird.f32 %v10062_v31  ;;  %vm5874_vm6 = vcmp.eq.f32.partialorder %v5873_v47, 8.507059e+37 }
 0x9ed   : > { %v5853_v19 = vadd.f32 %v7804_v61, %v5852_v17  ;;  %v5772_v54 = vadd.f32 %v10071_v4, %v5771_v15  ;;  %v5777_v48 = vand.u32 2147483647, %v10062_v31 }
 0x9ee   : > { %v7808_v29 = vpop.eup %7807  ;;  %v5964_v27 = vadd.f32 %v7806_v0, %v5963_v7 }
 0x9ef   : > { %v5857_v40 = vsel %vm5856_vm1, %v7804_v61, %v5853_v19  ;;  %v5865_v44 = vmul.f32 %v7808_v29, %v5848_v33  ;;  %vm5870_vm5 = vweird.f32 %v7808_v29  ;;  %vm5774_vm1 = vweird.f32 %v10071_v4 }
 0x9f0   : > { %v5862_v51 = vsel %vm5859_vm12, %v5861_v25, %v5857_v40  ;;  %v5968_v5 = vsel %vm5967_vm8, %v7806_v0, %v5964_v27  ;;  %vm10089_vm11 = vmor %vm5869_vm13, %vm5870_vm5  ;;  %vm5763_vm5 = vcmp.eq.f32.partialorder %v5762_v37, 8.507059e+37 }
 0x9f1   : > { %vm5879_vm14 = vcmp.ge.f32.partialorder %v5862_v51, 0.2  ;;  %v5866_v30 = vsub.f32 1.0, %v5865_v44  ;;  %v5973_v50 = vsel %vm5970_vm3, %v5972_v21, %v5968_v5  ;;  %vm10103_vm13 = vmor %vm5758_vm0, %vm5759_vm4  ;;  %vm5778_vm3 = vcmp.eq.f32.partialorder %v5777_v48, 8.507059e+37 }
 0x9f2   : > { %v5881_v32 = vsel %vm5879_vm14, %v5862_v51, 0.0  ;;  %vm5976_vm12 = vcmp.ge.f32.partialorder %v5973_v50, 0.2  ;;  %vm5775_vm8 = vmor %vm5773_vm15, %vm5774_vm1  ;;  %v5761_v60 = vsel %vm10103_vm13, %v10068_v22, %v5757_v18 }
 0x9f3   : > { %5981 = vperm.xlu1 %7767, %v5881_v32   ;;  %v5867_v57 = vmul.f32 %v7808_v29, %v5866_v30  ;;  %v5776_v53 = vsel %vm5775_vm8, %v10071_v4, %v5772_v54  ;;  %v5978_v59 = vsel %vm5976_vm12, %v5973_v50, 0.0  ;;  %v5766_v16 = vsel %vm5763_vm5, %v5765_v55, %v5761_v60 }
 0x9f4   : > { %v5781_v10 = vsel %vm5778_vm3, %v5780_v11, %v5776_v53  ;;  %vm5783_vm0 = vcmp.ge.f32.partialorder %v5766_v16, 0.2 }
 0x9f5   : > { %v5868_v6 = vadd.f32 %v7808_v29, %v5867_v57  ;;  %vm5784_vm4 = vcmp.ge.f32.partialorder %v5781_v10, 0.2  ;;  %v5785_v31 = vsel %vm5783_vm0, %v5766_v16, 0.0 }
 0x9f6   : > { %v5786_v61 = vsel %vm5784_vm4, %v5781_v10, 0.0 }
 0x9f7   : > { %v5872_v2 = vsel %vm10089_vm11, %v7808_v29, %v5868_v6 }
 0x9f8   : > { %v5877_v46 = vsel %vm5874_vm6, %v5876_v13, %v5872_v2 }
 0x9f9   : > { %vm5880_vm14 = vcmp.ge.f32.partialorder %v5877_v46, 0.2 }
 0x9fa   : > { %v5882_v49 = vsel %vm5880_vm14, %v5877_v46, 0.0 }
 0x9fb   : > { %5986 = vperm.xlu2 %7768, %v5882_v49   ;;  %5996 = vperm.xlu1 %7767, %v5978_v59  }
 0xa03   : > { %6003 = vperm.xlu2 %7768, %v5785_v31   ;;  %6008 = vperm.xlu1 %7767, %v5786_v61  }
 0xa55   : > { %v5987_v33 = vpop.permute.xlu2 %5986 }
 0xa5d   : > { %v6004_v8 = vpop.permute.xlu2 %6003 }
 0xa5e   : > { %v5992_v1 = vpop.permute.xlu0 %5991 }
 0xa65   : > { %v5982_v22 = vpop.permute.xlu1 %5981 }
 0xa66   : > { %v5999_v4 = vsel %vm5788_vm10, %v5982_v22, %v5992_v1 }
 0xa67   : > { %v6011_v0 = vsel %vm5694_vm9, %v6004_v8, %v5999_v4 }
 0xa68   : > { %v6013_v36 = vmul.f32 %v6011_v0, %v9986_v38 }
 0xa6a   : > { %v6019_v3 = vmul.f32 %v7777_v20, %v6013_v36 }
 0xa6c   : > { %v6025_v28 = vadd.f32 %v7778_v41, %v6019_v3 }
 0xa6d   : > { %v5997_v34 = vpop.permute.xlu1 %5996 }
 0xa6e   : > { %v6000_v35 = vsel %vm5788_vm10, %v5987_v33, %v5997_v34  ;;  %v6029_v56 = vmul.f32 0.01, %v6025_v28  ;;  %vm6027_vm11 = vcmp.ge.f32.partialorder %v6025_v28, 0.0 }
 0xa70   : > { %v6031_v63 = vsel %vm6027_vm11, %v6025_v28, %v6029_v56 }
 0xa71   : > { %v6035_v7 = vrot.slane %v6031_v63, 4 }
 0xa75   : > { %v6009_v26 = vpop.permute.xlu1 %6008 }
 0xa76   : > { %v6012_v9 = vsel %vm5694_vm9, %v6009_v26, %v6000_v35 }
 0xa77   : > { %v6014_v38 = vmul.f32 %v6012_v9, %v9988_v24 }
 0xa79   : > { %v6020_v39 = vmul.f32 %v7777_v20, %v6014_v38 }
 0xa7b   : > { %v6026_v17 = vadd.f32 %v7778_v41, %v6020_v39 }
 0xa7d   : > { %vm6028_vm15 = vcmp.ge.f32.partialorder %v6026_v17, 0.0  ;;  %v6030_v12 = vmul.f32 0.01, %v6026_v17 }
 0xa7f   : > { %v6032_v19 = vsel %vm6028_vm15, %v6026_v17, %v6030_v12 }
 0xa80   : > { %v6036_v29 = vrot.slane %v6032_v19, 4 }
 0xa82   : > { %v6037_v25 = vsel %vm2599_vm2, %v6035_v7, %v6036_v29  ;;  %v6041_v43 = vmax.f32 %v6032_v19, %v6036_v29 }
 0xa83   : > { %v6040_v23 = vmax.f32 %v6031_v63, %v6037_v25 }
 0xa84   : > { %v6045_v15 = vrot.slane %v6041_v43, 1 }
 0xa85   : > { %v6044_v58 = vrot.slane %v6040_v23, 1 }
 0xa86   : > { %v6050_v40 = vmax.f32 %v6041_v43, %v6045_v15 }
 0xa87   : > { %v6046_v24 = vsel %vm942_vm7, %v6044_v58, %v6045_v15 }
 0xa88   : > { %v6049_v44 = vmax.f32 %v6040_v23, %v6046_v24  ;;  %6052 = vst [vmem:[#allocation6 + $0x8] sm:$0x7] %v6050_v40 }
 0xa8a   : > { %6051 = vst [vmem:[#allocation6] sm:$0xff] %v6049_v44 }
 0xa8f   : > { %v6056_v27 = vld [vmem:[#allocation6 + $0x8] ss:$2 sm:$0x3] }
 0xa90   : > { %6057 = vst [vmem:[%s438_s21 + $0x2] sm:$0x3] %v6056_v27 }
 0xa91   : > { %v6053_v51 = vld [vmem:[#allocation6] ss:$2 sm:$0x3] }
 0xa92   : > { %6054 = vst [vmem:[%s438_s21] sm:$0x3] %v6053_v51 }
 0xa93 PF: > { %s23_s25 = sadd.s32 1, %s7817_s25  }
 0xa94   : > { %p20_p4 = scmp.ge.s32.totalorder %s23_s25, 4  }
 0xa96   :  { %22 = sbr.rel (!%p20_p4) target bundleno = 1 (0x1), region = 125 }

// kernel: pycnn_forward.3
= control target key start
LH: loop header
LB: loop body
LE: loop exit
PB: predicated region body
PF: predicated region fallthrough
CT: control target
= control target key end

     0   :  { %s7882_s25 = smov 0   ;;  %s10122_s0 = inlined_call_operand.vmem [shape: bf16[2,256,18], index: 0, kind: input, shape index: {}]   ;;  %s10123_s1 = inlined_call_operand.vmem [shape: bf16[18,32], index: 1, kind: input, shape index: {}]   ;;  %s10124_s2 = inlined_call_operand.vmem [shape: f32[1,32], index: 2, kind: input, shape index: {}]   ;;  %s10125_s3 = inlined_call_operand.vmem [shape: f32[1,32], index: 3, kind: input, shape index: {}]   ;;  %s10126_s4 = inlined_call_operand.vmem [shape: bf16[3,96,64], index: 4, kind: input, shape index: {}]   ;;  %s10127_s5 = inlined_call_operand.vmem [shape: f32[1,64], index: 5, kind: input, shape index: {}]   ;;  %s10128_s6 = inlined_call_operand.vmem [shape: f32[1,64], index: 6, kind: input, shape index: {}]   ;;  %s10129_s7 = inlined_call_operand.vmem [shape: bf16[7,448,128], index: 7, kind: input, shape index: {}]   ;;  %s10130_s8 = inlined_call_operand.vmem [shape: f32[128,128], index: 8, kind: input, shape index: {}]   ;;  %s10131_s9 = inlined_call_operand.vmem [shape: f32[3,16,32], index: 9, kind: input, shape index: {}]   ;;  %s10132_s10 = inlined_call_operand.vmem [shape: f32[3,1,1], index: 10, kind: input, shape index: {}]   ;;  %s10133_s11 = inlined_call_operand.vmem [shape: f32[1,128], index: 11, kind: input, shape index: {}]   ;;  %s10134_s12 = inlined_call_operand.vmem [shape: f32[1,128], index: 12, kind: input, shape index: {}]   ;;  %s10135_s13 = inlined_call_operand.vmem [shape: f32[2,4,128], index: 13, kind: output, shape index: {}]  }
   0x1 LB: > { %s6104_s26 = sadd.s32 4294967295, %s7805_s25   ;;  %p6108_p0 = scmp.ge.s32.totalorder %s7805_s25, 1  ;;  %s7805_s25 = sphi %s7882_s25, %s23_s25  }
   0x2   : > { %p387_p1 = scmp.lt.s32.totalorder %s7805_s25, 3 }
   0x4   : > { %p388_p2 = pnand %p6108_p0, %p387_p1 }
   0x5   : > { %p430_p3 = scmp.lt.s32.totalorder (!%p388_p2), %s6104_s26, 1  ;;  %s7808_s20 = smov (!%p388_p2), 32  }
   0x6   : > { %391 = sbr.rel (%p388_p2) target bundleno = 2703 (0xa8f), region = 72  ;;  %s7809_s23 = smov (!%p388_p2), 64  }
   0xb   : > { %v474_v0 = vld [vmem:[%s10123_s1 + $0x8] sm:$0x1]  ;;  %vm613_vm0 = vcmask 1040384   ;;  %s10143_s26 = smov (!%p430_p3, %s6104_s26), 1  ;;  %v7502_v4 = vld [vmem:[%s10123_s1] sm:$0xff]  ;;  %vm564_vm1 = vcmask 146432  }
   0xc   : > { %v560_v1 = vunpack.c.l.b16 %v474_v0  ;;  %s7485_s29 = sshll.u32 %s10143_s26, 7  ;;  %vm1086_vm2 = vcmask 785408   ;;  %v7807_v15 = vmov 0.0   ;;  %v7937_v17 = vld [vmem:[%s10124_s2] ss:$0 sm:$0xff]  ;;  %vm934_vm7 = vcmask 1046528  }
   0xd   : > { %s7902_s17 = scalar_lea.vmem %s10122_s0, %s7485_s29  ;;  %1087 = vst.msk [vmem:[#allocation2] sm:$0xff] %vm1086_vm2, %v7807_v15  ;;  %v7953_v22 = vld [vmem:[%s10125_s3] ss:$0 sm:$0xff]  ;;  %vm1054_vm8 = vcmask 261120  }
   0xe   : > { %v562_v2 = vpack.c.b16 %v560_v1, %v560_v1  ;;  %v7486_v5 = vld [vmem:[%s7902_s17] sm:$0xff]  ;;  %v7487_v6 = vld [vmem:[%s7902_s17 + $0x8] sm:$0xff]  ;;  %v7488_v7 = vld [vmem:[%s7902_s17 + $0x10] sm:$0xff]  ;;  %1088 = vst.msk [vmem:[#allocation2 + $0x8] sm:$0xff] %vm1086_vm2, %v7807_v15 }
   0xf   : > { %v7489_v8 = vld [vmem:[%s7902_s17 + $0x18] sm:$0xff]  ;;  %v7490_v9 = vld [vmem:[%s7902_s17 + $0x20] sm:$0xff]  ;;  %v7491_v10 = vld [vmem:[%s7902_s17 + $0x28] sm:$0xff]  ;;  %1089 = vst.msk [vmem:[#allocation2 + $0x10] sm:$0xff] %vm1086_vm2, %v7807_v15 }
  0x10   : > { %v615_v3 = vsel %vm613_vm0, %v562_v2, 0  ;;  %v7492_v11 = vld [vmem:[%s7902_s17 + $0x30] sm:$0xff]  ;;  %v7493_v12 = vld [vmem:[%s7902_s17 + $0x38] sm:$0xff]  ;;  %v7494_v13 = vld [vmem:[%s7902_s17 + $0x40] sm:$0xff]  ;;  %1090 = vst.msk [vmem:[#allocation2 + $0x18] sm:$0xff] %vm1086_vm2, %v7807_v15 }
  0x11   : > { %623 = vmatpush.bf16.msra.mxu0 %v615_v3  ;;  %1091 = vst.msk [vmem:[#allocation2 + $0x20] sm:$0xff] %vm1086_vm2, %v7807_v15  ;;  %v7495_v18 = vld [vmem:[%s7902_s17 + $0x48] sm:$0xff]  ;;  %v7496_v40 = vld [vmem:[%s7902_s17 + $0x50] sm:$0xff]  ;;  %v7497_v60 = vld [vmem:[%s7902_s17 + $0x58] sm:$0xff] }
  0x12   : > { %1092 = vst.msk [vmem:[#allocation2 + $0x28] sm:$0xff] %vm1086_vm2, %v7807_v15 }
  0x13   : > { %1093 = vst.msk [vmem:[#allocation2 + $0x30] sm:$0xff] %vm1086_vm2, %v7807_v15 }
  0x14   : > { %1094 = vst.msk [vmem:[#allocation2 + $0x38] sm:$0xff] %vm1086_vm2, %v7807_v15 }
  0x15   : > { %624 = vmatpush.bf16.msra.mxu0 %v7502_v4  ;;  %v1131_v19 = vld [vmem:[#allocation2 + $0x1] sm:$0xff]  ;;  %1095 = vst.msk [vmem:[#allocation2 + $0x40] sm:$0xff] %vm1086_vm2, %v7807_v15 }
  0x16   : > { %1171 = vrot.lane.b32.xlu0 %v1131_v19, %s7808_s20  ;;  %1096 = vst.msk [vmem:[#allocation2 + $0x48] sm:$0xff] %vm1086_vm2, %v7807_v15  ;;  %v1132_v62 = vld [vmem:[#allocation2 + $0x9] sm:$0xff] }
  0x17   : > { %1097 = vst.msk [vmem:[#allocation2 + $0x50] sm:$0xff] %vm1086_vm2, %v7807_v15 }
  0x18   : > { %6180 = vmatmul.msk.bf16.vlgmr.msra.gmra.mxu0 %vm564_vm1, %v7486_v5  ;;  %1098 = vst.msk [vmem:[#allocation2 + $0x58] sm:$0xff] %vm1086_vm2, %v7807_v15  ;;  %v1134_v63 = vld [vmem:[#allocation2 + $0x19] sm:$0xff] }
  0x19   : > { %1099 = vst.msk [vmem:[#allocation2 + $0x60] sm:$0xff] %vm1086_vm2, %v7807_v15 }
  0x1a   : > { %1100 = vst.msk [vmem:[#allocation2 + $0x68] sm:$0xff] %vm1086_vm2, %v7807_v15 }
  0x1b   : > { %1101 = vst.msk [vmem:[#allocation2 + $0x70] sm:$0xff] %vm1086_vm2, %v7807_v15 }
  0x1c   : > { %1102 = vst.msk [vmem:[#allocation2 + $0x78] sm:$0xff] %vm1086_vm2, %v7807_v15 }
  0x1d   : > { %1103 = vst.msk [vmem:[#allocation2 + $0x80] sm:$0xff] %vm1086_vm2, %v7807_v15 }
  0x1e   : > { %1104 = vst.msk [vmem:[#allocation2 + $0x88] sm:$0xff] %vm1086_vm2, %v7807_v15  ;;  %1173 = vrot.lane.b32.xlu0 %v1132_v62, %s7808_s20 }
  0x1f   : > { %1105 = vst.msk [vmem:[#allocation2 + $0x90] sm:$0xff] %vm1086_vm2, %v7807_v15 }
  0x20   : > { %1106 = vst.msk [vmem:[#allocation2 + $0x98] sm:$0xff] %vm1086_vm2, %v7807_v15 }
  0x21   : > { %1107 = vst.msk [vmem:[#allocation2 + $0xa0] sm:$0xff] %vm1086_vm2, %v7807_v15 }
  0x22   : > { %1989 = vst [vmem:[#allocation3] sm:$0xff] %v7807_v15 }
  0x23   : > { %1990 = vst [vmem:[#allocation3 + $0x8] sm:$0xff] %v7807_v15 }
  0x24   : > { %1991 = vst [vmem:[#allocation3 + $0x10] sm:$0xff] %v7807_v15 }
  0x25   : > { %1993 = vst [vmem:[#allocation3 + $0x20] sm:$0xff] %v7807_v15 }
  0x26   : > { %1994 = vst [vmem:[#allocation3 + $0x28] sm:$0xff] %v7807_v15  ;;  %1177 = vrot.lane.b32.xlu0 %v1134_v63, %s7808_s20 }
  0x27   : > { %1995 = vst [vmem:[#allocation3 + $0x30] sm:$0xff] %v7807_v15 }
  0x28   : > { %6181 = vmatmul.msk.bf16.gmra.mxu0 %vm564_vm1, %v7487_v6  ;;  %1997 = vst [vmem:[#allocation3 + $0x40] sm:$0xff] %v7807_v15 }
  0x29   : > { %1998 = vst [vmem:[#allocation3 + $0x48] sm:$0xff] %v7807_v15 }
  0x2a   : > { %1999 = vst [vmem:[#allocation3 + $0x50] sm:$0xff] %v7807_v15 }
  0x2b   : > { %2001 = vst [vmem:[#allocation3 + $0x60] sm:$0xff] %v7807_v15 }
  0x2c   : > { %2002 = vst [vmem:[#allocation3 + $0x68] sm:$0xff] %v7807_v15 }
  0x2d   : > { %2003 = vst [vmem:[#allocation3 + $0x70] sm:$0xff] %v7807_v15 }
  0x2e   : > { %2005 = vst [vmem:[#allocation3 + $0x80] sm:$0xff] %v7807_v15 }
  0x2f   : > { %2006 = vst [vmem:[#allocation3 + $0x88] sm:$0xff] %v7807_v15 }
  0x30   : > { %2007 = vst [vmem:[#allocation3 + $0x90] sm:$0xff] %v7807_v15 }
  0x31   : > { %2009 = vst [vmem:[#allocation3 + $0xa0] sm:$0xff] %v7807_v15 }
  0x32   : > { %2010 = vst [vmem:[#allocation3 + $0xa8] sm:$0xff] %v7807_v15 }
  0x33   : > { %2011 = vst [vmem:[#allocation3 + $0xb0] sm:$0xff] %v7807_v15 }
  0x34   : > { %2013 = vst [vmem:[#allocation3 + $0xc0] sm:$0xff] %v7807_v15 }
  0x35   : > { %2014 = vst [vmem:[#allocation3 + $0xc8] sm:$0xff] %v7807_v15 }
  0x36   : > { %2015 = vst [vmem:[#allocation3 + $0xd0] sm:$0xff] %v7807_v15 }
  0x37   : > { %2017 = vst [vmem:[#allocation3 + $0xe0] sm:$0xff] %v7807_v15 }
  0x38   : > { %6182 = vmatmul.msk.bf16.gmra.mxu0 %vm564_vm1, %v7488_v7  ;;  %2018 = vst [vmem:[#allocation3 + $0xe8] sm:$0xff] %v7807_v15  ;;  %v7498_v7 = vld [vmem:[%s7902_s17 + $0x60] sm:$0xff] }
  0x39   : > { %2019 = vst [vmem:[#allocation3 + $0xf0] sm:$0xff] %v7807_v15 }
  0x3a   : > { %2021 = vst [vmem:[#allocation3 + $0x100] sm:$0xff] %v7807_v15 }
  0x3b   : > { %2022 = vst [vmem:[#allocation3 + $0x108] sm:$0xff] %v7807_v15 }
  0x3c   : > { %2023 = vst [vmem:[#allocation3 + $0x110] sm:$0xff] %v7807_v15 }
  0x3d   : > { %2025 = vst [vmem:[#allocation3 + $0x120] sm:$0xff] %v7807_v15 }
  0x3e   : > { %2026 = vst [vmem:[#allocation3 + $0x128] sm:$0xff] %v7807_v15 }
  0x3f   : > { %2027 = vst [vmem:[#allocation3 + $0x130] sm:$0xff] %v7807_v15 }
  0x40   : > { %2029 = vst [vmem:[#allocation3 + $0x140] sm:$0xff] %v7807_v15 }
  0x41   : > { %2030 = vst [vmem:[#allocation3 + $0x148] sm:$0xff] %v7807_v15 }
  0x42   : > { %2031 = vst [vmem:[#allocation3 + $0x150] sm:$0xff] %v7807_v15 }
  0x43   : > { %2033 = vst [vmem:[#allocation3 + $0x160] sm:$0xff] %v7807_v15 }
  0x44   : > { %2034 = vst [vmem:[#allocation3 + $0x168] sm:$0xff] %v7807_v15 }
  0x45   : > { %2035 = vst [vmem:[#allocation3 + $0x170] sm:$0xff] %v7807_v15 }
  0x46   : > { %2037 = vst [vmem:[#allocation3 + $0x180] sm:$0xff] %v7807_v15 }
  0x47   : > { %2038 = vst [vmem:[#allocation3 + $0x188] sm:$0xff] %v7807_v15 }
  0x48   : > { %6183 = vmatmul.msk.bf16.gmra.mxu0 %vm564_vm1, %v7489_v8  ;;  %2039 = vst [vmem:[#allocation3 + $0x190] sm:$0xff] %v7807_v15 }
  0x49   : > { %2041 = vst [vmem:[#allocation3 + $0x1a0] sm:$0xff] %v7807_v15 }
  0x4a   : > { %2042 = vst [vmem:[#allocation3 + $0x1a8] sm:$0xff] %v7807_v15 }
  0x4b   : > { %2043 = vst [vmem:[#allocation3 + $0x1b0] sm:$0xff] %v7807_v15 }
  0x4c   : > { %2045 = vst [vmem:[#allocation3 + $0x1c0] sm:$0xff] %v7807_v15 }
  0x4d   : > { %2046 = vst [vmem:[#allocation3 + $0x1c8] sm:$0xff] %v7807_v15 }
  0x4e   : > { %2047 = vst [vmem:[#allocation3 + $0x1d0] sm:$0xff] %v7807_v15 }
  0x4f   : > { %2049 = vst [vmem:[#allocation3 + $0x1e0] sm:$0xff] %v7807_v15 }
  0x50   : > { %2050 = vst [vmem:[#allocation3 + $0x1e8] sm:$0xff] %v7807_v15 }
  0x51   : > { %2051 = vst [vmem:[#allocation3 + $0x1f0] sm:$0xff] %v7807_v15 }
  0x52   : > { %2053 = vst [vmem:[#allocation3 + $0x200] sm:$0xff] %v7807_v15 }
  0x53   : > { %2054 = vst [vmem:[#allocation3 + $0x208] sm:$0xff] %v7807_v15 }
  0x54   : > { %2055 = vst [vmem:[#allocation3 + $0x210] sm:$0xff] %v7807_v15 }
  0x55   : > { %2057 = vst [vmem:[#allocation3 + $0x220] sm:$0xff] %v7807_v15 }
  0x56   : > { %2058 = vst [vmem:[#allocation3 + $0x228] sm:$0xff] %v7807_v15 }
  0x57   : > { %2059 = vst [vmem:[#allocation3 + $0x230] sm:$0xff] %v7807_v15 }
  0x58   : > { %6184 = vmatmul.msk.bf16.gmra.mxu0 %vm564_vm1, %v7490_v9  ;;  %2061 = vst [vmem:[#allocation3 + $0x240] sm:$0xff] %v7807_v15 }
  0x59   : > { %2062 = vst [vmem:[#allocation3 + $0x248] sm:$0xff] %v7807_v15 }
  0x5a   : > { %2063 = vst [vmem:[#allocation3 + $0x250] sm:$0xff] %v7807_v15 }
  0x5b   : > { %2065 = vst [vmem:[#allocation3 + $0x260] sm:$0xff] %v7807_v15 }
  0x5c   : > { %2066 = vst [vmem:[#allocation3 + $0x268] sm:$0xff] %v7807_v15 }
  0x5d   : > { %2067 = vst [vmem:[#allocation3 + $0x270] sm:$0xff] %v7807_v15 }
  0x5e   : > { %2069 = vst [vmem:[#allocation3 + $0x280] sm:$0xff] %v7807_v15 }
  0x68   : > { %6185 = vmatmul.msk.bf16.gmra.mxu0 %vm564_vm1, %v7491_v10 }
  0x78   : > { %6186 = vmatmul.msk.bf16.gmra.mxu0 %vm564_vm1, %v7492_v11 }
  0x88   : > { %6187 = vmatmul.msk.bf16.gmra.mxu0 %vm564_vm1, %v7493_v12 }
  0x95   : > { %v626_v14 = vpop.f32.mrf.mxu0 }
  0x96   : > { %v710_v21 = vmul.f32 %v7937_v17, %v626_v14 }
  0x98   : > { %6188 = vmatmul.msk.bf16.gmra.mxu0 %vm564_vm1, %v7494_v13  ;;  %v746_v26 = vadd.f32 %v7953_v22, %v710_v21 }
  0x9a   : > { %v810_v30 = vmul.f32 0.01, %v746_v26  ;;  %vm778_vm4 = vcmp.ge.f32.partialorder %v746_v26, 0.0 }
  0x9c   : > { %v842_v35 = vsel %vm778_vm4, %v746_v26, %v810_v30 }
  0x9d   : > { %v628_v16 = vpop.f32.mrf.mxu0 }
  0x9e   : > { %v711_v24 = vmul.f32 %v7937_v17, %v628_v16 }
  0xa0   : > { %v747_v27 = vadd.f32 %v7953_v22, %v711_v24 }
  0xa2   : > { %v811_v32 = vmul.f32 0.01, %v747_v27  ;;  %vm779_vm5 = vcmp.ge.f32.partialorder %v747_v27, 0.0 }
  0xa4   : > { %v843_v38 = vsel %vm779_vm5, %v747_v27, %v811_v32 }
  0xa5   : > { %v631_v20 = vpop.f32.mrf.mxu0 }
  0xa6   : > { %v712_v23 = vmul.f32 %v7937_v17, %v631_v20 }
  0xa8   : > { %v748_v25 = vadd.f32 %v7953_v22, %v712_v23  ;;  %6189 = vmatmul.msk.bf16.gmra.mxu0 %vm564_vm1, %v7495_v18 }
  0xaa   : > { %v812_v28 = vmul.f32 0.01, %v748_v25  ;;  %vm780_vm3 = vcmp.ge.f32.partialorder %v748_v25, 0.0 }
  0xac   : > { %v844_v33 = vsel %vm780_vm3, %v748_v25, %v812_v28  ;;  %v7499_v28 = vld [vmem:[%s7902_s17 + $0x68] sm:$0xff] }
  0xad   : > { %v633_v29 = vpop.f32.mrf.mxu0  ;;  %v874_v37 = vmax.f32 %v842_v35, %v844_v33 }
  0xae   : > { %v713_v31 = vmul.f32 %v7937_v17, %v633_v29 }
  0xaf   : > { %v935_v44 = vrot.slane %v874_v37, 1 }
  0xb0   : > { %v749_v34 = vadd.f32 %v7953_v22, %v713_v31 }
  0xb2   : > { %vm781_vm6 = vcmp.ge.f32.partialorder %v749_v34, 0.0  ;;  %v813_v36 = vmul.f32 0.01, %v749_v34 }
  0xb4   : > { %v845_v39 = vsel %vm781_vm6, %v749_v34, %v813_v36 }
  0xb5   : > { %v875_v41 = vmax.f32 %v843_v38, %v845_v39  ;;  %v636_v42 = vpop.f32.mrf.mxu0 }
  0xb6   : > { %v714_v43 = vmul.f32 %v7937_v17, %v636_v42 }
  0xb7   : > { %v936_v45 = vrot.slane %v875_v41, 1 }
  0xb8   : > { %v750_v46 = vadd.f32 %v7953_v22, %v714_v43  ;;  %6190 = vmatmul.msk.bf16.gmra.mxu0 %vm564_vm1, %v7496_v40 }
  0xb9   : > { %v937_v47 = vsel %vm934_vm7, %v935_v44, %v936_v45 }
  0xba   : > { %v1024_v48 = vmax.f32 %v874_v37, %v937_v47  ;;  %vm782_vm9 = vcmp.ge.f32.partialorder %v750_v46, 0.0  ;;  %v814_v49 = vmul.f32 0.01, %v750_v46 }
  0xbc   : > { %1055 = vst.msk [vmem:[#allocation4] sm:$0xff] %vm1054_vm8, %v1024_v48  ;;  %v8002_v50 = vsel %vm782_vm9, %v750_v46, %v814_v49  ;;  %v1136_v48 = vld [vmem:[#allocation2 + $0x29] sm:$0xff] }
  0xbd   : > { %v876_v51 = vmax.f32 %v844_v33, %v8002_v50  ;;  %v638_v52 = vpop.f32.mrf.mxu0  ;;  %1181 = vrot.lane.b32.xlu2 %v1136_v48, %s7808_s20 }
  0xbe   : > { %v715_v53 = vmul.f32 %v7937_v17, %v638_v52 }
  0xbf   : > { %v938_v54 = vrot.slane %v876_v51, 1 }
  0xc0   : > { %v751_v55 = vadd.f32 %v7953_v22, %v715_v53 }
  0xc1   : > { %v939_v56 = vsel %vm934_vm7, %v936_v45, %v938_v54  ;;  %v7500_v45 = vld [vmem:[%s7902_s17 + $0x70] sm:$0xff] }
  0xc2   : > { %v1025_v57 = vmax.f32 %v875_v41, %v939_v56  ;;  %vm783_vm10 = vcmp.ge.f32.partialorder %v751_v55, 0.0  ;;  %v815_v58 = vmul.f32 0.01, %v751_v55 }
  0xc4   : > { %1056 = vst.msk [vmem:[#allocation4 + $0x8] sm:$0xff] %vm1054_vm8, %v1025_v57  ;;  %v847_v59 = vsel %vm783_vm10, %v751_v55, %v815_v58  ;;  %vm1231_vm10 = vcmask 523520  }
  0xc5   : > { %v641_v61 = vpop.f32.mrf.mxu0 }
  0xc6   : > { %v716_v1 = vmul.f32 %v7937_v17, %v641_v61 }
  0xc8   : > { %6191 = vmatmul.msk.bf16.gmra.mxu0 %vm564_vm1, %v7497_v60  ;;  %v752_v3 = vadd.f32 %v7953_v22, %v716_v1 }
  0xca   : > { %v816_v5 = vmul.f32 0.01, %v752_v3  ;;  %vm784_vm11 = vcmp.ge.f32.partialorder %v752_v3, 0.0 }
  0xcb   : > { %v1108_v36 = vld [vmem:[#allocation4] ss:$2 sm:$0xff] }
  0xcc   : > { %v848_v11 = vsel %vm784_vm11, %v752_v3, %v816_v5  ;;  %1109 = vst.msk [vmem:[#allocation2 + $0x11] sm:$0xff] %vm1054_vm8, %v1108_v36  ;;  %v7501_v5 = vld [vmem:[%s7902_s17 + $0x78] sm:$0xff]  ;;  %s6111_s17 = sshll.u32 %s10143_s26, 2 }
  0xcd   : > { %v643_v0 = vpop.f32.mrf.mxu0  ;;  %v878_v14 = vmax.f32 %v8002_v50, %v848_v11  ;;  %s438_s19 = scalar_lea.vmem %s10135_s13, %s6111_s17 }
  0xce   : > { %v717_v2 = vmul.f32 %v7937_v17, %v643_v0 }
  0xcf   : > { %v942_v23 = vrot.slane %v878_v14, 1 }
  0xd0   : > { %v753_v4 = vadd.f32 %v7953_v22, %v717_v2 }
  0xd2   : > { %v817_v8 = vmul.f32 0.01, %v753_v4  ;;  %vm785_vm12 = vcmp.ge.f32.partialorder %v753_v4, 0.0 }
  0xd3   : > { %v1133_v46 = vld [vmem:[#allocation2 + $0x11] sm:$0xff] }
  0xd4   : > { %v849_v12 = vsel %vm785_vm12, %v753_v4, %v817_v8  ;;  %1175 = vrot.lane.b32.xlu1 %v1133_v46, %s7808_s20  ;;  %v1138_v4 = vld [vmem:[#allocation2 + $0x39] sm:$0xff] }
  0xd5   : > { %v646_v6 = vpop.f32.mrf.mxu0  ;;  %v879_v18 = vmax.f32 %v847_v59, %v849_v12 }
  0xd6   : > { %v718_v9 = vmul.f32 %v7937_v17, %v646_v6 }
  0xd7   : > { %v944_v25 = vrot.slane %v879_v18, 1 }
  0xd8   : > { %6192 = vmatmul.msk.bf16.gmra.mxu0 %vm564_vm1, %v7498_v7  ;;  %v754_v10 = vadd.f32 %v7953_v22, %v718_v9  ;;  %v1140_v7 = vld [vmem:[#allocation2 + $0x49] sm:$0xff] }
  0xd9   : > { %v945_v30 = vsel %vm934_vm7, %v942_v23, %v944_v25  ;;  %1189 = vrot.lane.b32.xlu0 %v1140_v7, %s7808_s20 }
  0xda   : > { %vm786_vm13 = vcmp.ge.f32.partialorder %v754_v10, 0.0  ;;  %v818_v13 = vmul.f32 0.01, %v754_v10  ;;  %v1028_v34 = vmax.f32 %v878_v14, %v945_v30 }
  0xdc   : > { %v850_v16 = vsel %vm786_vm13, %v754_v10, %v818_v13  ;;  %1059 = vst.msk [vmem:[#allocation4 + $0x20] sm:$0xff] %vm1054_vm8, %v1028_v34 }
  0xdd   : > { %v648_v19 = vpop.f32.mrf.mxu0  ;;  %v880_v21 = vmax.f32 %v848_v11, %v850_v16 }
  0xde   : > { %v719_v20 = vmul.f32 %v7937_v17, %v648_v19 }
  0xdf   : > { %v946_v27 = vrot.slane %v880_v21, 1 }
  0xe0   : > { %v755_v24 = vadd.f32 %v7953_v22, %v719_v20 }
  0xe1   : > { %v947_v33 = vsel %vm934_vm7, %v944_v25, %v946_v27 }
  0xe2   : > { %vm787_vm14 = vcmp.ge.f32.partialorder %v755_v24, 0.0  ;;  %v819_v26 = vmul.f32 0.01, %v755_v24  ;;  %v1029_v37 = vmax.f32 %v879_v18, %v947_v33 }
  0xe4   : > { %v851_v29 = vsel %vm787_vm14, %v755_v24, %v819_v26  ;;  %1060 = vst.msk [vmem:[#allocation4 + $0x28] sm:$0xff] %vm1054_vm8, %v1029_v37 }
  0xe5   : > { %v651_v31 = vpop.f32.mrf.mxu0 }
  0xe6   : > { %v720_v32 = vmul.f32 %v7937_v17, %v651_v31 }
  0xe8   : > { %6193 = vmatmul.msk.bf16.gmra.mxu0 %vm564_vm1, %v7499_v28  ;;  %v756_v35 = vadd.f32 %v7953_v22, %v720_v32 }
  0xea   : > { %vm788_vm15 = vcmp.ge.f32.partialorder %v756_v35, 0.0  ;;  %v820_v38 = vmul.f32 0.01, %v756_v35 }
  0xeb   : > { %v1111_v50 = vld [vmem:[#allocation4 + $0x20] ss:$2 sm:$0xff] }
  0xec   : > { %v852_v39 = vsel %vm788_vm15, %v756_v35, %v820_v38  ;;  %1112 = vst.msk [vmem:[#allocation2 + $0x21] sm:$0xff] %vm1054_vm8, %v1111_v50 }
  0xed   : > { %v882_v40 = vmax.f32 %v850_v16, %v852_v39  ;;  %v653_v41 = vpop.f32.mrf.mxu0 }
  0xee   : > { %v721_v42 = vmul.f32 %v7937_v17, %v653_v41 }
  0xef   : > { %v950_v15 = vrot.slane %v882_v40, 1 }
  0xf0   : > { %v757_v43 = vadd.f32 %v7953_v22, %v721_v42 }
  0xf2   : > { %vm789_vm0 = vcmp.ge.f32.partialorder %v757_v43, 0.0  ;;  %v821_v44 = vmul.f32 0.01, %v757_v43 }
  0xf3   : > { %v1135_v59 = vld [vmem:[#allocation2 + $0x21] sm:$0xff] }
  0xf4   : > { %v853_v47 = vsel %vm789_vm0, %v757_v43, %v821_v44  ;;  %1179 = vrot.lane.b32.xlu1 %v1135_v59, %s7808_s20 }
  0xf5   : > { %v883_v49 = vmax.f32 %v851_v29, %v853_v47  ;;  %v656_v51 = vpop.f32.mrf.mxu0 }
  0xf6   : > { %v722_v52 = vmul.f32 %v7937_v17, %v656_v51 }
  0xf7   : > { %v952_v53 = vrot.slane %v883_v49, 1 }
  0xf8   : > { %6194 = vmatmul.msk.bf16.gmra.mxu0 %vm564_vm1, %v7500_v45  ;;  %v758_v54 = vadd.f32 %v7953_v22, %v722_v52 }
  0xf9   : > { %v953_v55 = vsel %vm934_vm7, %v950_v15, %v952_v53  ;;  %v1172_v15 = vpop.permute.xlu0 %1171 }
  0xfa   : > { %v1032_v56 = vmax.f32 %v882_v40, %v953_v55  ;;  %vm790_vm3 = vcmp.ge.f32.partialorder %v758_v54, 0.0  ;;  %v822_v57 = vmul.f32 0.01, %v758_v54  ;;  %1232 = vst.msk [vmem:[#allocation2] sm:$0xff] %vm1231_vm10, %v1172_v15 }
  0xfc   : > { %1063 = vst.msk [vmem:[#allocation4 + $0x40] sm:$0xff] %vm1054_vm8, %v1032_v56  ;;  %v854_v58 = vsel %vm790_vm3, %v758_v54, %v822_v57  ;;  %1185 = vrot.lane.b32.xlu1 %v1138_v4, %s7808_s20 }
  0xfd   : > { %v884_v60 = vmax.f32 %v852_v39, %v854_v58  ;;  %v658_v61 = vpop.f32.mrf.mxu0 }
  0xfe   : > { %v723_v62 = vmul.f32 %v7937_v17, %v658_v61 }
  0xff   : > { %v954_v63 = vrot.slane %v884_v60, 1 }
 0x100   : > { %v759_v0 = vadd.f32 %v7953_v22, %v723_v62 }
 0x101   : > { %v955_v1 = vsel %vm934_vm7, %v952_v53, %v954_v63  ;;  %v1174_v59 = vpop.permute.xlu0 %1173 }
 0x102   : > { %v1033_v2 = vmax.f32 %v883_v49, %v955_v1  ;;  %vm791_vm4 = vcmp.ge.f32.partialorder %v759_v0, 0.0  ;;  %v823_v3 = vmul.f32 0.01, %v759_v0  ;;  %1233 = vst.msk [vmem:[#allocation2 + $0x8] sm:$0xff] %vm1231_vm10, %v1174_v59 }
 0x104   : > { %1064 = vst.msk [vmem:[#allocation4 + $0x48] sm:$0xff] %vm1054_vm8, %v1033_v2  ;;  %v855_v6 = vsel %vm791_vm4, %v759_v0, %v823_v3 }
 0x105   : > { %v661_v8 = vpop.f32.mrf.mxu0 }
 0x106   : > { %v724_v9 = vmul.f32 %v7937_v17, %v661_v8 }
 0x108   : > { %6195 = vmatmul.msk.bf16.gmra.mxu0 %vm564_vm1, %v7501_v5  ;;  %v760_v10 = vadd.f32 %v7953_v22, %v724_v9 }
 0x109   : > { %v1178_v5 = vpop.permute.xlu0 %1177 }
 0x10a   : > { %vm792_vm5 = vcmp.ge.f32.partialorder %v760_v10, 0.0  ;;  %v824_v11 = vmul.f32 0.01, %v760_v10  ;;  %1235 = vst.msk [vmem:[#allocation2 + $0x18] sm:$0xff] %vm1231_vm10, %v1178_v5 }
 0x10b   : > { %v1114_v12 = vld [vmem:[#allocation4 + $0x40] ss:$2 sm:$0xff] }
 0x10c   : > { %v856_v13 = vsel %vm792_vm5, %v760_v10, %v824_v11  ;;  %1115 = vst.msk [vmem:[#allocation2 + $0x31] sm:$0xff] %vm1054_vm8, %v1114_v12 }
 0x10d   : > { %v886_v14 = vmax.f32 %v854_v58, %v856_v13  ;;  %v663_v16 = vpop.f32.mrf.mxu0 }
 0x10e   : > { %v725_v18 = vmul.f32 %v7937_v17, %v663_v16  ;;  %v1142_v16 = vld [vmem:[#allocation2 + $0x59] sm:$0xff] }
 0x10f   : > { %v958_v19 = vrot.slane %v886_v14, 1  ;;  %1193 = vrot.lane.b32.xlu0 %v1142_v16, %s7808_s20 }
 0x110   : > { %v761_v20 = vadd.f32 %v7953_v22, %v725_v18 }
 0x112   : > { %vm793_vm6 = vcmp.ge.f32.partialorder %v761_v20, 0.0  ;;  %v825_v21 = vmul.f32 0.01, %v761_v20 }
 0x113   : > { %v1137_v24 = vld [vmem:[#allocation2 + $0x31] sm:$0xff] }
 0x114   : > { %v857_v23 = vsel %vm793_vm6, %v761_v20, %v825_v21  ;;  %1183 = vrot.lane.b32.xlu2 %v1137_v24, %s7808_s20 }
 0x115   : > { %v887_v25 = vmax.f32 %v855_v6, %v857_v23  ;;  %v666_v26 = vpop.f32.mrf.mxu0 }
 0x116   : > { %v726_v27 = vmul.f32 %v7937_v17, %v666_v26 }
 0x117   : > { %v960_v28 = vrot.slane %v887_v25, 1 }
 0x118   : > { %v762_v29 = vadd.f32 %v7953_v22, %v726_v27 }
 0x119   : > { %v961_v30 = vsel %vm934_vm7, %v958_v19, %v960_v28 }
 0x11a   : > { %v1036_v31 = vmax.f32 %v886_v14, %v961_v30  ;;  %vm794_vm1 = vcmp.ge.f32.partialorder %v762_v29, 0.0  ;;  %v826_v32 = vmul.f32 0.01, %v762_v29 }
 0x11c   : > { %1067 = vst.msk [vmem:[#allocation4 + $0x60] sm:$0xff] %vm1054_vm8, %v1036_v31  ;;  %v858_v33 = vsel %vm794_vm1, %v762_v29, %v826_v32  ;;  %v1182_v31 = vpop.permute.xlu2 %1181  ;;  %v1252_v32 = vld [vmem:[#allocation2 + $0x2] sm:$0xff] }
 0x11d   : > { %v888_v34 = vmax.f32 %v856_v13, %v858_v33  ;;  %v668_v35 = vpop.f32.mrf.mxu0  ;;  %1237 = vst.msk [vmem:[#allocation2 + $0x28] sm:$0xff] %vm1231_vm10, %v1182_v31 }
 0x11e   : > { %v727_v36 = vmul.f32 %v7937_v17, %v668_v35 }
 0x11f   : > { %v962_v37 = vrot.slane %v888_v34, 1 }
 0x120   : > { %v763_v38 = vadd.f32 %v7953_v22, %v727_v36 }
 0x121   : > { %v963_v39 = vsel %vm934_vm7, %v960_v28, %v962_v37 }
 0x122   : > { %v1037_v40 = vmax.f32 %v887_v25, %v963_v39  ;;  %vm795_vm9 = vcmp.ge.f32.partialorder %v763_v38, 0.0  ;;  %v827_v41 = vmul.f32 0.01, %v763_v38 }
 0x124   : > { %1068 = vst.msk [vmem:[#allocation4 + $0x68] sm:$0xff] %vm1054_vm8, %v1037_v40  ;;  %v859_v42 = vsel %vm795_vm9, %v763_v38, %v827_v41 }
 0x125   : > { %v671_v43 = vpop.f32.mrf.mxu0 }
 0x126   : > { %v728_v44 = vmul.f32 %v7937_v17, %v671_v43 }
 0x128   : > { %v764_v45 = vadd.f32 %v7953_v22, %v728_v44 }
 0x12a   : > { %vm796_vm11 = vcmp.ge.f32.partialorder %v764_v45, 0.0  ;;  %v828_v46 = vmul.f32 0.01, %v764_v45 }
 0x12b   : > { %v1117_v47 = vld [vmem:[#allocation4 + $0x60] ss:$2 sm:$0xff] }
 0x12c   : > { %v860_v48 = vsel %vm796_vm11, %v764_v45, %v828_v46  ;;  %1118 = vst.msk [vmem:[#allocation2 + $0x41] sm:$0xff] %vm1054_vm8, %v1117_v47 }
 0x12d   : > { %v890_v49 = vmax.f32 %v858_v33, %v860_v48  ;;  %v673_v50 = vpop.f32.mrf.mxu0 }
 0x12e   : > { %v729_v51 = vmul.f32 %v7937_v17, %v673_v50 }
 0x12f   : > { %v966_v52 = vrot.slane %v890_v49, 1 }
 0x130   : > { %v765_v53 = vadd.f32 %v7953_v22, %v729_v51 }
 0x132   : > { %vm797_vm12 = vcmp.ge.f32.partialorder %v765_v53, 0.0  ;;  %v829_v54 = vmul.f32 0.01, %v765_v53 }
 0x133   : > { %v1139_v56 = vld [vmem:[#allocation2 + $0x41] sm:$0xff] }
 0x134   : > { %v861_v55 = vsel %vm797_vm12, %v765_v53, %v829_v54  ;;  %1187 = vrot.lane.b32.xlu2 %v1139_v56, %s7808_s20 }
 0x135   : > { %v891_v57 = vmax.f32 %v859_v42, %v861_v55  ;;  %v676_v58 = vpop.f32.mrf.mxu0 }
 0x136   : > { %v730_v60 = vmul.f32 %v7937_v17, %v676_v58 }
 0x137   : > { %v968_v61 = vrot.slane %v891_v57, 1 }
 0x138   : > { %v766_v62 = vadd.f32 %v7953_v22, %v730_v60 }
 0x139   : > { %v969_v63 = vsel %vm934_vm7, %v966_v52, %v968_v61 }
 0x13a   : > { %v1040_v0 = vmax.f32 %v890_v49, %v969_v63  ;;  %vm798_vm13 = vcmp.ge.f32.partialorder %v766_v62, 0.0  ;;  %v830_v1 = vmul.f32 0.01, %v766_v62 }
 0x13c   : > { %1071 = vst.msk [vmem:[#allocation4 + $0x80] sm:$0xff] %vm1054_vm8, %v1040_v0  ;;  %v862_v2 = vsel %vm798_vm13, %v766_v62, %v830_v1  ;;  %1292 = vrot.lane.b32.xlu2 %v1252_v32, %s7809_s23  ;;  %vm1084_vm13 = vcmask 260096  }
 0x13d   : > { %v892_v3 = vmax.f32 %v860_v48, %v862_v2  ;;  %v678_v4 = vpop.f32.mrf.mxu0 }
 0x13e   : > { %v731_v6 = vmul.f32 %v7937_v17, %v678_v4 }
 0x13f   : > { %v970_v7 = vrot.slane %v892_v3, 1 }
 0x140   : > { %v767_v8 = vadd.f32 %v7953_v22, %v731_v6 }
 0x141   : > { %v971_v9 = vsel %vm934_vm7, %v968_v61, %v970_v7 }
 0x142   : > { %v1041_v10 = vmax.f32 %v891_v57, %v971_v9  ;;  %vm799_vm14 = vcmp.ge.f32.partialorder %v767_v8, 0.0  ;;  %v831_v11 = vmul.f32 0.01, %v767_v8 }
 0x144   : > { %1072 = vst.msk [vmem:[#allocation4 + $0x88] sm:$0xff] %vm1054_vm8, %v1041_v10  ;;  %v863_v12 = vsel %vm799_vm14, %v767_v8, %v831_v11  ;;  %vm1352_vm14 = vcmask 785920  }
 0x145   : > { %v681_v13 = vpop.f32.mrf.mxu0 }
 0x146   : > { %v732_v14 = vmul.f32 %v7937_v17, %v681_v13  ;;  %v1176_v52 = vpop.permute.xlu1 %1175 }
 0x147   : > { %1234 = vst.msk [vmem:[#allocation2 + $0x10] sm:$0xff] %vm1231_vm10, %v1176_v52 }
 0x148   : > { %v768_v18 = vadd.f32 %v7953_v22, %v732_v14 }
 0x14a   : > { %vm800_vm15 = vcmp.ge.f32.partialorder %v768_v18, 0.0  ;;  %v832_v19 = vmul.f32 0.01, %v768_v18 }
 0x14b   : > { %v1120_v21 = vld [vmem:[#allocation4 + $0x80] ss:$2 sm:$0xff] }
 0x14c   : > { %v864_v20 = vsel %vm800_vm15, %v768_v18, %v832_v19  ;;  %1121 = vst.msk [vmem:[#allocation2 + $0x51] sm:$0xff] %vm1054_vm8, %v1120_v21  ;;  %v1190_v18 = vpop.permute.xlu0 %1189  ;;  %v1144_v21 = vld [vmem:[#allocation2 + $0x69] sm:$0xff]  ;;  %vm1973_vm15 = vcmask 523264  }
 0x14d   : > { %v894_v23 = vmax.f32 %v862_v2, %v864_v20  ;;  %v683_v24 = vpop.f32.mrf.mxu0  ;;  %1241 = vst.msk [vmem:[#allocation2 + $0x48] sm:$0xff] %vm1231_vm10, %v1190_v18  ;;  %v7515_v18 = vld [vmem:[%s10126_s4 + $0x60] sm:$0xff] }
 0x14e   : > { %v733_v25 = vmul.f32 %v7937_v17, %v683_v24  ;;  %v1253_v60 = vld [vmem:[#allocation2 + $0xa] sm:$0xff] }
 0x14f   : > { %v974_v26 = vrot.slane %v894_v23, 1  ;;  %1294 = vrot.lane.b32.xlu0 %v1253_v60, %s7809_s23  ;;  %v7505_v60 = vld [vmem:[%s10126_s4 + $0x10] sm:$0xff] }
 0x150   : > { %v769_v27 = vadd.f32 %v7953_v22, %v733_v25  ;;  %v1254_v25 = vld [vmem:[#allocation2 + $0x12] sm:$0xff] }
 0x152   : > { %vm801_vm0 = vcmp.ge.f32.partialorder %v769_v27, 0.0  ;;  %v833_v28 = vmul.f32 0.01, %v769_v27 }
 0x153   : > { %v1141_v30 = vld [vmem:[#allocation2 + $0x51] sm:$0xff] }
 0x154   : > { %v865_v29 = vsel %vm801_vm0, %v769_v27, %v833_v28  ;;  %1191 = vrot.lane.b32.xlu1 %v1141_v30, %s7808_s20 }
 0x155   : > { %v895_v33 = vmax.f32 %v863_v12, %v865_v29  ;;  %v686_v34 = vpop.f32.mrf.mxu0 }
 0x156   : > { %v734_v35 = vmul.f32 %v7937_v17, %v686_v34 }
 0x157   : > { %v976_v36 = vrot.slane %v895_v33, 1 }
 0x158   : > { %v770_v37 = vadd.f32 %v7953_v22, %v734_v35 }
 0x159   : > { %v977_v38 = vsel %vm934_vm7, %v974_v26, %v976_v36 }
 0x15a   : > { %v1044_v39 = vmax.f32 %v894_v23, %v977_v38  ;;  %vm802_vm3 = vcmp.ge.f32.partialorder %v770_v37, 0.0  ;;  %v834_v40 = vmul.f32 0.01, %v770_v37 }
 0x15c   : > { %1075 = vst.msk [vmem:[#allocation4 + $0xa0] sm:$0xff] %vm1054_vm8, %v1044_v39  ;;  %v866_v41 = vsel %vm802_vm3, %v770_v37, %v834_v40  ;;  %v7508_v39 = vld [vmem:[%s10126_s4 + $0x28] sm:$0xff] }
 0x15d   : > { %v896_v42 = vmax.f32 %v864_v20, %v866_v41  ;;  %v688_v15 = vpop.f32.mrf.mxu0  ;;  %1633 = vmatpush.bf16.msra.mxu2 %v7508_v39 }
 0x15e   : > { %v735_v43 = vmul.f32 %v7937_v17, %v688_v15 }
 0x15f   : > { %v978_v44 = vrot.slane %v896_v42, 1 }
 0x160   : > { %v771_v45 = vadd.f32 %v7953_v22, %v735_v43 }
 0x161   : > { %v979_v46 = vsel %vm934_vm7, %v976_v36, %v978_v44 }
 0x162   : > { %v1045_v47 = vmax.f32 %v895_v33, %v979_v46  ;;  %vm803_vm4 = vcmp.ge.f32.partialorder %v771_v45, 0.0  ;;  %v835_v48 = vmul.f32 0.01, %v771_v45 }
 0x164   : > { %1076 = vst.msk [vmem:[#allocation4 + $0xa8] sm:$0xff] %vm1054_vm8, %v1045_v47  ;;  %v867_v49 = vsel %vm803_vm4, %v771_v45, %v835_v48 }
 0x165   : > { %v691_v50 = vpop.f32.mrf.mxu0 }
 0x166   : > { %v736_v51 = vmul.f32 %v7937_v17, %v691_v50  ;;  %v1180_v63 = vpop.permute.xlu1 %1179 }
 0x167   : > { %1236 = vst.msk [vmem:[#allocation2 + $0x20] sm:$0xff] %vm1231_vm10, %v1180_v63  ;;  %v7503_v63 = vld [vmem:[%s10126_s4] sm:$0xff] }
 0x168   : > { %v772_v53 = vadd.f32 %v7953_v22, %v736_v51 }
 0x16a   : > { %vm804_vm5 = vcmp.ge.f32.partialorder %v772_v53, 0.0  ;;  %v836_v54 = vmul.f32 0.01, %v772_v53 }
 0x16b   : > { %v1123_v55 = vld [vmem:[#allocation4 + $0xa0] ss:$2 sm:$0xff] }
 0x16c   : > { %v868_v56 = vsel %vm804_vm5, %v772_v53, %v836_v54  ;;  %1124 = vst.msk [vmem:[#allocation2 + $0x61] sm:$0xff] %vm1054_vm8, %v1123_v55  ;;  %v1146_v53 = vld [vmem:[#allocation2 + $0x79] sm:$0xff] }
 0x16d   : > { %v898_v57 = vmax.f32 %v866_v41, %v868_v56  ;;  %v693_v58 = vpop.f32.mrf.mxu0  ;;  %v7506_v54 = vld [vmem:[%s10126_s4 + $0x18] sm:$0xff] }
 0x16e   : > { %v737_v59 = vmul.f32 %v7937_v17, %v693_v58  ;;  %v1184_v62 = vpop.permute.xlu2 %1183  ;;  %v1186_v8 = vpop.permute.xlu1 %1185  ;;  %v1255_v9 = vld [vmem:[#allocation2 + $0x1a] sm:$0xff]  ;;  %v1256_v10 = vld [vmem:[#allocation2 + $0x22] sm:$0xff] }
 0x16f   : > { %v982_v61 = vrot.slane %v898_v57, 1  ;;  %1238 = vst.msk [vmem:[#allocation2 + $0x30] sm:$0xff] %vm1231_vm10, %v1184_v62  ;;  %1298 = vrot.lane.b32.xlu0 %v1255_v9, %s7809_s23  ;;  %1300 = vrot.lane.b32.xlu1 %v1256_v10, %s7809_s23  ;;  %v7511_v10 = vld [vmem:[%s10126_s4 + $0x40] sm:$0xff] }
 0x170   : > { %v773_v0 = vadd.f32 %v7953_v22, %v737_v59  ;;  %1239 = vst.msk [vmem:[#allocation2 + $0x38] sm:$0xff] %vm1231_vm10, %v1186_v8  ;;  %v7518_v8 = vld [vmem:[%s10126_s4 + $0x78] sm:$0xff] }
 0x172   : > { %vm805_vm6 = vcmp.ge.f32.partialorder %v773_v0, 0.0  ;;  %v837_v1 = vmul.f32 0.01, %v773_v0 }
 0x173   : > { %v1143_v26 = vld [vmem:[#allocation2 + $0x61] sm:$0xff] }
 0x174   : > { %v869_v2 = vsel %vm805_vm6, %v773_v0, %v837_v1  ;;  %v7514_v1 = vld [vmem:[%s10126_s4 + $0x58] sm:$0xff] }
 0x175   : > { %v899_v3 = vmax.f32 %v867_v49, %v869_v2  ;;  %v696_v4 = vpop.f32.mrf.mxu0  ;;  %v7520_v2 = vld [vmem:[%s10126_s4 + $0x88] sm:$0xff]  ;;  %1540 = vmatpush.bf16.msra.mxu1 %v7514_v1 }
 0x176   : > { %v738_v5 = vmul.f32 %v7937_v17, %v696_v4  ;;  %v1257_v7 = vld [vmem:[#allocation2 + $0x2a] sm:$0xff]  ;;  %1739 = vmatpush.bf16.msra.mxu3 %v7520_v2 }
 0x177   : > { %v984_v6 = vrot.slane %v899_v3, 1  ;;  %1302 = vrot.lane.b32.xlu2 %v1257_v7, %s7809_s23  ;;  %1197 = vrot.lane.b32.xlu0 %v1144_v21, %s7808_s20  ;;  %v1258_v34 = vld [vmem:[#allocation2 + $0x32] sm:$0xff]  ;;  %v7512_v7 = vld [vmem:[%s10126_s4 + $0x48] sm:$0xff] }
 0x178   : > { %v774_v11 = vadd.f32 %v7953_v22, %v738_v5  ;;  %1195 = vrot.lane.b32.xlu1 %v1143_v26, %s7808_s20  ;;  %v7513_v4 = vld [vmem:[%s10126_s4 + $0x50] sm:$0xff]  ;;  %v7519_v5 = vld [vmem:[%s10126_s4 + $0x80] sm:$0xff] }
 0x179   : > { %v985_v12 = vsel %vm934_vm7, %v982_v61, %v984_v6  ;;  %v7504_v61 = vld [vmem:[%s10126_s4 + $0x8] sm:$0xff]  ;;  %1541 = vmatpush.bf16.msra.mxu1 %v7513_v4 }
 0x17a   : > { %v1048_v13 = vmax.f32 %v898_v57, %v985_v12  ;;  %vm806_vm1 = vcmp.ge.f32.partialorder %v774_v11, 0.0  ;;  %v838_v14 = vmul.f32 0.01, %v774_v11  ;;  %1740 = vmatpush.bf16.msra.mxu3 %v7519_v5  ;;  %v7510_v12 = vld [vmem:[%s10126_s4 + $0x38] sm:$0xff] }
 0x17c   : > { %1079 = vst.msk [vmem:[#allocation4 + $0xc0] sm:$0xff] %vm1054_vm8, %v1048_v13  ;;  %v870_v16 = vsel %vm806_vm1, %v774_v11, %v838_v14  ;;  %v7517_v11 = vld [vmem:[%s10126_s4 + $0x70] sm:$0xff]  ;;  %v7516_v13 = vld [vmem:[%s10126_s4 + $0x68] sm:$0xff] }
 0x17d   : > { %v900_v19 = vmax.f32 %v868_v56, %v870_v16  ;;  %v698_v20 = vpop.f32.mrf.mxu0  ;;  %1542 = vmatpush.bf16.msra.mxu1 %v7512_v7 }
 0x17e   : > { %v739_v23 = vmul.f32 %v7937_v17, %v698_v20  ;;  %1741 = vmatpush.bf16.msra.mxu3 %v7518_v8 }
 0x17f   : > { %v986_v24 = vrot.slane %v900_v19, 1  ;;  %1296 = vrot.lane.b32.xlu2 %v1254_v25, %s7809_s23 }
 0x180   : > { %v775_v27 = vadd.f32 %v7953_v22, %v739_v23  ;;  %1304 = vrot.lane.b32.xlu1 %v1258_v34, %s7809_s23 }
 0x181   : > { %v987_v28 = vsel %vm934_vm7, %v984_v6, %v986_v24  ;;  %v1194_v58 = vpop.permute.xlu0 %1193  ;;  %1543 = vmatpush.bf16.msra.mxu1 %v7511_v10 }
 0x182   : > { %v1049_v29 = vmax.f32 %v899_v3, %v987_v28  ;;  %vm807_vm9 = vcmp.ge.f32.partialorder %v775_v27, 0.0  ;;  %v839_v30 = vmul.f32 0.01, %v775_v27  ;;  %1243 = vst.msk [vmem:[#allocation2 + $0x58] sm:$0xff] %vm1231_vm10, %v1194_v58  ;;  %1742 = vmatpush.bf16.msra.mxu3 %v7517_v11  ;;  %v1148_v58 = vld [vmem:[#allocation2 + $0x89] sm:$0xff] }
 0x184   : > { %1080 = vst.msk [vmem:[#allocation4 + $0xc8] sm:$0xff] %vm1054_vm8, %v1049_v29  ;;  %v871_v31 = vsel %vm807_vm9, %v775_v27, %v839_v30 }
 0x185   : > { %v701_v32 = vpop.f32.mrf.mxu0  ;;  %1544 = vmatpush.bf16.msra.mxu1 %v7510_v12 }
 0x186   : > { %v740_v33 = vmul.f32 %v7937_v17, %v701_v32  ;;  %1743 = vmatpush.bf16.msra.mxu3 %v7516_v13 }
 0x188   : > { %v776_v35 = vadd.f32 %v7953_v22, %v740_v33 }
 0x18a   : > { %vm808_vm11 = vcmp.ge.f32.partialorder %v776_v35, 0.0  ;;  %v840_v36 = vmul.f32 0.01, %v776_v35  ;;  %1744 = vmatpush.bf16.msra.mxu3 %v7515_v18 }
 0x18b   : > { %v1126_v37 = vld [vmem:[#allocation4 + $0xc0] ss:$2 sm:$0xff] }
 0x18c   : > { %v872_v38 = vsel %vm808_vm11, %v776_v35, %v840_v36  ;;  %1127 = vst.msk [vmem:[#allocation2 + $0x71] sm:$0xff] %vm1054_vm8, %v1126_v37 }
 0x18d   : > { %v902_v40 = vmax.f32 %v870_v16, %v872_v38  ;;  %v703_v41 = vpop.f32.mrf.mxu0  ;;  %v7509_v16 = vld [vmem:[%s10126_s4 + $0x30] sm:$0xff] }
 0x18e   : > { %v741_v42 = vmul.f32 %v7937_v17, %v703_v41  ;;  %v1188_v43 = vpop.permute.xlu2 %1187  ;;  %1545 = vmatpush.bf16.msra.mxu1 %v7509_v16 }
 0x18f   : > { %v990_v15 = vrot.slane %v902_v40, 1  ;;  %1240 = vst.msk [vmem:[#allocation2 + $0x40] sm:$0xff] %vm1231_vm10, %v1188_v43 }
 0x190   : > { %v777_v44 = vadd.f32 %v7953_v22, %v741_v42  ;;  %v7507_v22 = vld [vmem:[%s10126_s4 + $0x20] sm:$0xff] }
 0x191   : > { %1634 = vmatpush.bf16.msra.mxu2 %v7507_v22 }
 0x192   : > { %vm809_vm12 = vcmp.ge.f32.partialorder %v777_v44, 0.0  ;;  %v841_v45 = vmul.f32 0.01, %v777_v44 }
 0x193   : > { %v1145_v47 = vld [vmem:[#allocation2 + $0x71] sm:$0xff] }
 0x194   : > { %v873_v46 = vsel %vm809_vm12, %v777_v44, %v841_v45  ;;  %1199 = vrot.lane.b32.xlu1 %v1145_v47, %s7808_s20  ;;  %vm2240_vm12 = vcmask 1048064  }
 0x195   : > { %v903_v48 = vmax.f32 %v871_v31, %v873_v46  ;;  %1635 = vmatpush.bf16.msra.mxu2 %v7506_v54 }
 0x196   : > { %v1259_v50 = vld [vmem:[#allocation2 + $0x3a] sm:$0xff]  ;;  %v1260_v55 = vld [vmem:[#allocation2 + $0x42] sm:$0xff]  ;;  %v1293_v59 = vpop.permute.xlu2 %1292 }
 0x197   : > { %v992_v49 = vrot.slane %v903_v48, 1  ;;  %1306 = vrot.lane.b32.xlu2 %v1259_v50, %s7809_s23  ;;  %1353 = vst.msk [vmem:[#allocation2] sm:$0xff] %vm1352_vm14, %v1293_v59 }
 0x199   : > { %v993_v17 = vsel %vm934_vm7, %v990_v15, %v992_v49  ;;  %v1053_v51 = vmax.f32 %v903_v48, %v992_v49  ;;  %1636 = vmatpush.bf16.msra.mxu2 %v7505_v60 }
 0x19a   : > { %v1052_v52 = vmax.f32 %v902_v40, %v993_v17 }
 0x19b   : > { %1085 = vst.msk [vmem:[#allocation4 + $0xe8] sm:$0x7f] %vm1084_vm13, %v1053_v51 }
 0x19c   : > { %1083 = vst.msk [vmem:[#allocation4 + $0xe0] sm:$0xff] %vm1054_vm8, %v1052_v52  ;;  %1201 = vrot.lane.b32.xlu1 %v1146_v53, %s7808_s20 }
 0x19d   : > { %1637 = vmatpush.bf16.msra.mxu2 %v7504_v61  ;;  %v1149_v61 = vld [vmem:[#allocation2 + $0x91] sm:$0xff] }
 0x19e   : > { %v1373_v19 = vld [vmem:[#allocation2] sm:$0xff] }
 0x19f   : > { %1308 = vrot.lane.b32.xlu2 %v1260_v55, %s7809_s23  ;;  %v1393_v20 = vpack.c.bf16 %v1373_v19, %v1373_v19 }
 0x1a1   : > { %1638 = vmatpush.bf16.msra.mxu2 %v7503_v63  ;;  %v1589_v24 = vunpack.c.l.b16 %v1393_v20 }
 0x1a3   : > { %v1129_v56 = vld [vmem:[#allocation4 + $0xe0] ss:$2 sm:$0xff] }
 0x1a4   : > { %1130 = vst.msk [vmem:[#allocation2 + $0x81] sm:$0xff] %vm1054_vm8, %v1129_v56 }
 0x1ab   : > { %v1147_v57 = vld [vmem:[#allocation2 + $0x81] sm:$0xff] }
 0x1ac   : > { %1203 = vrot.lane.b32.xlu2 %v1147_v57, %s7808_s20 }
 0x1c1   : > { %v1295_v14 = vpop.permute.xlu0 %1294 }
 0x1c2   : > { %1354 = vst.msk [vmem:[#allocation2 + $0x8] sm:$0xff] %vm1352_vm14, %v1295_v14 }
 0x1c6   : > { %v1192_v62 = vpop.permute.xlu1 %1191 }
 0x1c7   : > { %1242 = vst.msk [vmem:[#allocation2 + $0x50] sm:$0xff] %vm1231_vm10, %v1192_v62  ;;  %v1150_v62 = vld [vmem:[#allocation2 + $0x99] sm:$0xff] }
 0x1c9   : > { %v1374_v21 = vld [vmem:[#allocation2 + $0x8] sm:$0xff] }
 0x1ca   : > { %v1394_v23 = vpack.c.bf16 %v1374_v21, %v1374_v21 }
 0x1cc   : > { %v1590_v27 = vunpack.c.l.b16 %v1394_v23 }
 0x1ce   : > { %v1261_v0 = vld [vmem:[#allocation2 + $0x4a] sm:$0xff]  ;;  %v1262_v6 = vld [vmem:[#allocation2 + $0x52] sm:$0xff]  ;;  %v1591_v28 = vpack.c.b16 %v1590_v27, %v1589_v24 }
 0x1cf   : > { %1310 = vrot.lane.b32.xlu0 %v1261_v0, %s7809_s23 }
 0x1d0   : > { %6264 = vmatmul.msk.bf16.vlgmr.msra.gmra.mxu2 %vm1086_vm2, %v1591_v28 }
 0x1d1   : > { %v1303_v3 = vpop.permute.xlu2 %1302 }
 0x1d2   : > { %1358 = vst.msk [vmem:[#allocation2 + $0x28] sm:$0xff] %vm1352_vm14, %v1303_v3 }
 0x1d7   : > { %1312 = vrot.lane.b32.xlu0 %v1262_v6, %s7809_s23 }
 0x1d9   : > { %v1297_v9 = vpop.permute.xlu2 %1296  ;;  %v1378_v30 = vld [vmem:[#allocation2 + $0x28] sm:$0xff] }
 0x1da   : > { %1355 = vst.msk [vmem:[#allocation2 + $0x10] sm:$0xff] %vm1352_vm14, %v1297_v9  ;;  %v1398_v36 = vpack.c.bf16 %v1378_v30, %v1378_v30 }
 0x1dc   : > { %v1457_v15 = vunpack.c.l.b16 %v1398_v36 }
 0x1e1   : > { %v1299_v25 = vpop.permute.xlu0 %1298  ;;  %v1301_v26 = vpop.permute.xlu1 %1300  ;;  %v1375_v29 = vld [vmem:[#allocation2 + $0x10] sm:$0xff] }
 0x1e2   : > { %1356 = vst.msk [vmem:[#allocation2 + $0x18] sm:$0xff] %vm1352_vm14, %v1299_v25  ;;  %v1395_v31 = vpack.c.bf16 %v1375_v29, %v1375_v29  ;;  %v8292_v29 = vld [vmem:[#allocation3] sm:$0xff] }
 0x1e3   : > { %1357 = vst.msk [vmem:[#allocation2 + $0x20] sm:$0xff] %vm1352_vm14, %v1301_v26 }
 0x1e4   : > { %v1454_v40 = vunpack.c.l.b16 %v1395_v31  ;;  %1992 = vst.msk [vmem:[#allocation3 + $0x18] sm:$0xff] %vm1973_vm15, %v8292_v29 }
 0x1e5   : > { %1996 = vst.msk [vmem:[#allocation3 + $0x38] sm:$0xff] %vm1973_vm15, %v8292_v29 }
 0x1e6   : > { %2000 = vst.msk [vmem:[#allocation3 + $0x58] sm:$0xff] %vm1973_vm15, %v8292_v29 }
 0x1e7   : > { %2004 = vst.msk [vmem:[#allocation3 + $0x78] sm:$0xff] %vm1973_vm15, %v8292_v29 }
 0x1e8   : > { %2008 = vst.msk [vmem:[#allocation3 + $0x98] sm:$0xff] %vm1973_vm15, %v8292_v29 }
 0x1e9   : > { %v1198_v33 = vpop.permute.xlu0 %1197  ;;  %v1376_v35 = vld [vmem:[#allocation2 + $0x18] sm:$0xff]  ;;  %2012 = vst.msk [vmem:[#allocation3 + $0xb8] sm:$0xff] %vm1973_vm15, %v8292_v29 }
 0x1ea   : > { %v1196_v34 = vpop.permute.xlu1 %1195  ;;  %1245 = vst.msk [vmem:[#allocation2 + $0x68] sm:$0xff] %vm1231_vm10, %v1198_v33  ;;  %v1396_v37 = vpack.c.bf16 %v1376_v35, %v1376_v35  ;;  %v1377_v38 = vld [vmem:[#allocation2 + $0x20] sm:$0xff] }
 0x1eb   : > { %1244 = vst.msk [vmem:[#allocation2 + $0x60] sm:$0xff] %vm1231_vm10, %v1196_v34  ;;  %v1397_v39 = vpack.c.bf16 %v1377_v38, %v1377_v38 }
 0x1ec   : > { %v1455_v41 = vunpack.c.l.b16 %v1396_v37  ;;  %2016 = vst.msk [vmem:[#allocation3 + $0xd8] sm:$0xff] %vm1973_vm15, %v8292_v29 }
 0x1ed   : > { %v1456_v42 = vunpack.c.l.b16 %v1397_v39  ;;  %2020 = vst.msk [vmem:[#allocation3 + $0xf8] sm:$0xff] %vm1973_vm15, %v8292_v29 }
 0x1ee   : > { %v1470_v43 = vpack.c.b16 %v1455_v41, %v1454_v40  ;;  %v8309_v40 = vld [vmem:[%s10127_s5] ss:$0 sm:$0xff]  ;;  %2024 = vst.msk [vmem:[#allocation3 + $0x118] sm:$0xff] %vm1973_vm15, %v8292_v29 }
 0x1ef   : > { %v1471_v44 = vpack.c.b16 %v1457_v15, %v1456_v42  ;;  %2028 = vst.msk [vmem:[#allocation3 + $0x138] sm:$0xff] %vm1973_vm15, %v8292_v29 }
 0x1f0   : > { %6232 = vmatmul.msk.bf16.vlgmr.msra.gmra.mxu1 %vm1086_vm2, %v1470_v43  ;;  %6265 = vmatmul.msk.bf16.gmra.mxu2 %vm1086_vm2, %v1470_v43  ;;  %2032 = vst.msk [vmem:[#allocation3 + $0x158] sm:$0xff] %vm1973_vm15, %v8292_v29 }
 0x1f1   : > { %v1307_v32 = vpop.permute.xlu2 %1306  ;;  %6308 = vmatmul.msk.bf16.vlgmr.msra.gmra.mxu3 %vm1086_vm2, %v1471_v44  ;;  %2036 = vst.msk [vmem:[#allocation3 + $0x178] sm:$0xff] %vm1973_vm15, %v8292_v29 }
 0x1f2   : > { %1360 = vst.msk [vmem:[#allocation2 + $0x38] sm:$0xff] %vm1352_vm14, %v1307_v32  ;;  %v1305_v46 = vpop.permute.xlu1 %1304  ;;  %v1263_v47 = vld [vmem:[#allocation2 + $0x5a] sm:$0xff]  ;;  %v1264_v48 = vld [vmem:[#allocation2 + $0x62] sm:$0xff] }
 0x1f3   : > { %1359 = vst.msk [vmem:[#allocation2 + $0x30] sm:$0xff] %vm1352_vm14, %v1305_v46  ;;  %1314 = vrot.lane.b32.xlu1 %v1263_v47, %s7809_s23  ;;  %1316 = vrot.lane.b32.xlu2 %v1264_v48, %s7809_s23  ;;  %v8323_v48 = vld [vmem:[%s10128_s6] ss:$0 sm:$0xff] }
 0x1f4   : > { %2040 = vst.msk [vmem:[#allocation3 + $0x198] sm:$0xff] %vm1973_vm15, %v8292_v29 }
 0x1f5   : > { %2044 = vst.msk [vmem:[#allocation3 + $0x1b8] sm:$0xff] %vm1973_vm15, %v8292_v29 }
 0x1f6   : > { %2048 = vst.msk [vmem:[#allocation3 + $0x1d8] sm:$0xff] %vm1973_vm15, %v8292_v29 }
 0x1f7   : > { %2052 = vst.msk [vmem:[#allocation3 + $0x1f8] sm:$0xff] %vm1973_vm15, %v8292_v29 }
 0x1f8   : > { %2056 = vst.msk [vmem:[#allocation3 + $0x218] sm:$0xff] %vm1973_vm15, %v8292_v29 }
 0x1f9   : > { %v1309_v45 = vpop.permute.xlu2 %1308  ;;  %v1380_v49 = vld [vmem:[#allocation2 + $0x38] sm:$0xff]  ;;  %2060 = vst.msk [vmem:[#allocation3 + $0x238] sm:$0xff] %vm1973_vm15, %v8292_v29 }
 0x1fa   : > { %1361 = vst.msk [vmem:[#allocation2 + $0x40] sm:$0xff] %vm1352_vm14, %v1309_v45  ;;  %v1400_v50 = vpack.c.bf16 %v1380_v49, %v1380_v49  ;;  %v1379_v17 = vld [vmem:[#allocation2 + $0x30] sm:$0xff] }
 0x1fb   : > { %v1399_v51 = vpack.c.bf16 %v1379_v17, %v1379_v17  ;;  %2064 = vst.msk [vmem:[#allocation3 + $0x258] sm:$0xff] %vm1973_vm15, %v8292_v29 }
 0x1fc   : > { %v1459_v52 = vunpack.c.l.b16 %v1400_v50  ;;  %2068 = vst.msk [vmem:[#allocation3 + $0x278] sm:$0xff] %vm1973_vm15, %v8292_v29 }
 0x1fd   : > { %v1458_v53 = vunpack.c.l.b16 %v1399_v51 }
 0x1ff   : > { %v1472_v55 = vpack.c.b16 %v1459_v52, %v1458_v53 }
 0x200   : > { %6233 = vmatmul.msk.bf16.gmra.mxu1 %vm1086_vm2, %v1471_v44  ;;  %6266 = vmatmul.msk.bf16.gmra.mxu2 %vm1086_vm2, %v1471_v44 }
 0x201   : > { %6309 = vmatmul.msk.bf16.gmra.mxu3 %vm1086_vm2, %v1472_v55  ;;  %v1381_v0 = vld [vmem:[#allocation2 + $0x40] sm:$0xff] }
 0x202   : > { %v1401_v1 = vpack.c.bf16 %v1381_v0, %v1381_v0 }
 0x204   : > { %v1460_v5 = vunpack.c.l.b16 %v1401_v1 }
 0x206   : > { %v1204_v22 = vpop.permute.xlu2 %1203  ;;  %v1200_v54 = vpop.permute.xlu1 %1199 }
 0x207   : > { %1248 = vst.msk [vmem:[#allocation2 + $0x80] sm:$0xff] %vm1231_vm10, %v1204_v22 }
 0x208   : > { %1246 = vst.msk [vmem:[#allocation2 + $0x70] sm:$0xff] %vm1231_vm10, %v1200_v54 }
 0x20e   : > { %v1202_v56 = vpop.permute.xlu1 %1201 }
 0x20f   : > { %v1265_v57 = vld [vmem:[#allocation2 + $0x6a] sm:$0xff]  ;;  %1247 = vst.msk [vmem:[#allocation2 + $0x78] sm:$0xff] %vm1231_vm10, %v1202_v56 }
 0x210   : > { %1318 = vrot.lane.b32.xlu0 %v1265_v57, %s7809_s23  ;;  %6234 = vmatmul.msk.bf16.gmra.mxu1 %vm1086_vm2, %v1472_v55 }
 0x211   : > { %6267 = vmatmul.msk.bf16.gmra.mxu2 %vm1086_vm2, %v1472_v55 }
 0x216   : > { %v1266_v59 = vld [vmem:[#allocation2 + $0x72] sm:$0xff]  ;;  %v1267_v60 = vld [vmem:[#allocation2 + $0x7a] sm:$0xff] }
 0x217   : > { %1320 = vrot.lane.b32.xlu1 %v1266_v59, %s7809_s23  ;;  %1322 = vrot.lane.b32.xlu2 %v1267_v60, %s7809_s23 }
 0x218   : > { %1205 = vrot.lane.b32.xlu0 %v1148_v58, %s7808_s20 }
 0x21f   : > { %1207 = vrot.lane.b32.xlu1 %v1149_v61, %s7808_s20  ;;  %1209 = vrot.lane.b32.xlu2 %v1150_v62, %s7808_s20 }
 0x241   : > { %v1311_v63 = vpop.permute.xlu0 %1310 }
 0x242   : > { %1362 = vst.msk [vmem:[#allocation2 + $0x48] sm:$0xff] %vm1352_vm14, %v1311_v63 }
 0x249   : > { %v1313_v2 = vpop.permute.xlu0 %1312  ;;  %v1382_v3 = vld [vmem:[#allocation2 + $0x48] sm:$0xff] }
 0x24a   : > { %1363 = vst.msk [vmem:[#allocation2 + $0x50] sm:$0xff] %vm1352_vm14, %v1313_v2  ;;  %v1402_v4 = vpack.c.bf16 %v1382_v3, %v1382_v3 }
 0x24c   : > { %v1461_v6 = vunpack.c.l.b16 %v1402_v4 }
 0x24d   : > { %v1317_v8 = vpop.permute.xlu2 %1316 }
 0x24e   : > { %v1473_v7 = vpack.c.b16 %v1461_v6, %v1460_v5  ;;  %1365 = vst.msk [vmem:[#allocation2 + $0x60] sm:$0xff] %vm1352_vm14, %v1317_v8 }
 0x250   : > { %6235 = vmatmul.msk.bf16.gmra.mxu1 %vm1086_vm2, %v1473_v7  ;;  %6268 = vmatmul.msk.bf16.gmra.mxu2 %vm1086_vm2, %v1473_v7 }
 0x251   : > { %6310 = vmatmul.msk.bf16.gmra.mxu3 %vm1086_vm2, %v1473_v7  ;;  %v1383_v11 = vld [vmem:[#allocation2 + $0x50] sm:$0xff] }
 0x252   : > { %v1403_v12 = vpack.c.bf16 %v1383_v11, %v1383_v11 }
 0x253   : > { %v1640_v13 = vpop.f32.mrf.mxu2 }
 0x254   : > { %v1462_v19 = vunpack.c.l.b16 %v1403_v12 }
 0x255   : > { %v1385_v27 = vld [vmem:[#allocation2 + $0x60] sm:$0xff] }
 0x256   : > { %v1405_v31 = vpack.c.bf16 %v1385_v27, %v1385_v27 }
 0x258   : > { %v1464_v38 = vunpack.c.l.b16 %v1405_v31 }
 0x25b   : > { %v1642_v25 = vpop.f32.mrf.mxu2 }
 0x265   : > { %v1315_v9 = vpop.permute.xlu1 %1314 }
 0x266   : > { %1364 = vst.msk [vmem:[#allocation2 + $0x58] sm:$0xff] %vm1352_vm14, %v1315_v9 }
 0x26d   : > { %v1547_v14 = vpop.f32.mrf.mxu1  ;;  %v1384_v16 = vld [vmem:[#allocation2 + $0x58] sm:$0xff] }
 0x26e   : > { %v1404_v18 = vpack.c.bf16 %v1384_v16, %v1384_v16  ;;  %v1641_v36 = vadd.f32 %v1640_v13, %v1547_v14 }
 0x270   : > { %v1463_v20 = vunpack.c.l.b16 %v1404_v18 }
 0x271   : > { %v1323_v10 = vpop.permute.xlu2 %1322 }
 0x272   : > { %1368 = vst.msk [vmem:[#allocation2 + $0x78] sm:$0xff] %vm1352_vm14, %v1323_v10  ;;  %v1474_v21 = vpack.c.b16 %v1463_v20, %v1462_v19  ;;  %v8364_v19 = vrot.slane %v8292_v29, 1 }
 0x273   : > { %v1645_v32 = vpop.f32.mrf.mxu2 }
 0x274   : > { %6236 = vmatmul.msk.bf16.gmra.mxu1 %vm1086_vm2, %v1474_v21  ;;  %6269 = vmatmul.msk.bf16.gmra.mxu2 %vm1086_vm2, %v1474_v21  ;;  %v1746_v23 = vpop.f32.mrf.mxu3 }
 0x275   : > { %6311 = vmatmul.msk.bf16.gmra.mxu3 %vm1086_vm2, %v1474_v21  ;;  %v1549_v24 = vpop.f32.mrf.mxu1  ;;  %v1786_v39 = vadd.f32 %v1746_v23, %v1641_v36 }
 0x276   : > { %v1643_v41 = vadd.f32 %v1642_v25, %v1549_v24 }
 0x277   : > { %v1806_v47 = vmul.f32 %v8309_v40, %v1786_v39 }
 0x279   : > { %v1826_v54 = vadd.f32 %v8323_v48, %v1806_v47  ;;  %v1388_v57 = vld [vmem:[#allocation2 + $0x78] sm:$0xff]  ;;  %v1210_v6 = vpop.permute.xlu2 %1209 }
 0x27a   : > { %v1408_v0 = vpack.c.bf16 %v1388_v57, %v1388_v57  ;;  %1251 = vst.msk [vmem:[#allocation2 + $0x98] sm:$0xff] %vm1231_vm10, %v1210_v6 }
 0x27b   : > { %v1647_v53 = vpop.f32.mrf.mxu2  ;;  %v1858_v62 = vmul.f32 0.01, %v1826_v54  ;;  %vm1842_vm3 = vcmp.ge.f32.partialorder %v1826_v54, 0.0 }
 0x27c   : > { %v1748_v28 = vpop.f32.mrf.mxu3  ;;  %v1467_v9 = vunpack.c.l.b16 %v1408_v0 }
 0x27d   : > { %v1552_v30 = vpop.f32.mrf.mxu1  ;;  %v1787_v44 = vadd.f32 %v1748_v28, %v1643_v41  ;;  %v1874_v7 = vsel %vm1842_vm3, %v1826_v54, %v1858_v62 }
 0x27e   : > { %v1646_v42 = vadd.f32 %v1645_v32, %v1552_v30 }
 0x27f   : > { %v1807_v51 = vmul.f32 %v8309_v40, %v1787_v44 }
 0x281   : > { %v1827_v58 = vadd.f32 %v8323_v48, %v1807_v51  ;;  %v1271_v24 = vld [vmem:[#allocation2 + $0x9a] sm:$0xff] }
 0x282   : > { %v1319_v26 = vpop.permute.xlu0 %1318 }
 0x283   : > { %1366 = vst.msk [vmem:[#allocation2 + $0x68] sm:$0xff] %vm1352_vm14, %v1319_v26  ;;  %v1859_v2 = vmul.f32 0.01, %v1827_v58  ;;  %vm1843_vm4 = vcmp.ge.f32.partialorder %v1827_v58, 0.0  ;;  %v7730_v26 = vpack.i.bf16 %v8364_v19, %v8364_v19 }
 0x284   : > { %v1751_v43 = vpop.f32.mrf.mxu3 }
 0x285   : > { %v1788_v45 = vadd.f32 %v1751_v43, %v1646_v42  ;;  %v1554_v50 = vpop.f32.mrf.mxu1  ;;  %v1875_v11 = vsel %vm1843_vm4, %v1827_v58, %v1859_v2  ;;  %vm2427_vm4 = vcmask 1044480  }
 0x286   : > { %v1648_v55 = vadd.f32 %v1647_v53, %v1554_v50 }
 0x287   : > { %v1808_v49 = vmul.f32 %v8309_v40, %v1788_v45 }
 0x289   : > { %v1321_v34 = vpop.permute.xlu1 %1320  ;;  %v1828_v52 = vadd.f32 %v8323_v48, %v1808_v49 }
 0x28a   : > { %v1206_v33 = vpop.permute.xlu0 %1205  ;;  %v1386_v35 = vld [vmem:[#allocation2 + $0x68] sm:$0xff]  ;;  %1367 = vst.msk [vmem:[#allocation2 + $0x70] sm:$0xff] %vm1352_vm14, %v1321_v34  ;;  %v1650_v34 = vpop.f32.mrf.mxu2 }
 0x28b   : > { %1249 = vst.msk [vmem:[#allocation2 + $0x88] sm:$0xff] %vm1231_vm10, %v1206_v33  ;;  %v1406_v37 = vpack.c.bf16 %v1386_v35, %v1386_v35  ;;  %v1860_v59 = vmul.f32 0.01, %v1828_v52  ;;  %vm1844_vm0 = vcmp.ge.f32.partialorder %v1828_v52, 0.0 }
 0x28c   : > { %v1753_v56 = vpop.f32.mrf.mxu3 }
 0x28d   : > { %v1465_v15 = vunpack.c.l.b16 %v1406_v37  ;;  %v1789_v60 = vadd.f32 %v1753_v56, %v1648_v55  ;;  %v1876_v3 = vsel %vm1844_vm0, %v1828_v52, %v1860_v59  ;;  %v1557_v33 = vpop.f32.mrf.mxu1  ;;  %vm2879_vm0 = vcmask 1041408  }
 0x28e   : > { %v1890_v10 = vmax.f32 %v1874_v7, %v1876_v3  ;;  %v1651_v35 = vadd.f32 %v1650_v34, %v1557_v33 }
 0x28f   : > { %v1475_v46 = vpack.c.b16 %v1465_v15, %v1464_v38  ;;  %v1809_v63 = vmul.f32 %v8309_v40, %v1789_v60 }
 0x290   : > { %v1918_v16 = vrot.slane %v1890_v10, 1 }
 0x291   : > { %6237 = vmatmul.msk.bf16.gmra.mxu1 %vm1086_vm2, %v1475_v46  ;;  %6270 = vmatmul.msk.bf16.gmra.mxu2 %vm1086_vm2, %v1475_v46  ;;  %v1387_v22 = vld [vmem:[#allocation2 + $0x70] sm:$0xff]  ;;  %v1208_v1 = vpop.permute.xlu1 %1207  ;;  %v1829_v4 = vadd.f32 %v8323_v48, %v1809_v63 }
 0x292   : > { %6312 = vmatmul.msk.bf16.gmra.mxu3 %vm1086_vm2, %v1475_v46  ;;  %v1268_v17 = vld [vmem:[#allocation2 + $0x82] sm:$0xff]  ;;  %v1407_v61 = vpack.c.bf16 %v1387_v22, %v1387_v22  ;;  %1250 = vst.msk [vmem:[#allocation2 + $0x90] sm:$0xff] %vm1231_vm10, %v1208_v1  ;;  %vm2077_vm10 = vcmask 522243   ;;  %v1652_v42 = vpop.f32.mrf.mxu2 }
 0x293   : > { %1324 = vrot.lane.b32.xlu0 %v1268_v17, %s7809_s23  ;;  %vm1845_vm5 = vcmp.ge.f32.partialorder %v1829_v4, 0.0  ;;  %v1861_v8 = vmul.f32 0.01, %v1829_v4 }
 0x294   : > { %v1466_v5 = vunpack.c.l.b16 %v1407_v61 }
 0x295   : > { %v1877_v12 = vsel %vm1845_vm5, %v1829_v4, %v1861_v8  ;;  %v1559_v39 = vpop.f32.mrf.mxu1 }
 0x296   : > { %v1476_v13 = vpack.c.b16 %v1467_v9, %v1466_v5  ;;  %v1891_v14 = vmax.f32 %v1875_v11, %v1877_v12  ;;  %v1653_v15 = vadd.f32 %v1652_v42, %v1559_v39 }
 0x298   : > { %v1919_v18 = vrot.slane %v1891_v14, 1 }
 0x299   : > { %v1269_v21 = vld [vmem:[#allocation2 + $0x8a] sm:$0xff]  ;;  %v1270_v25 = vld [vmem:[#allocation2 + $0x92] sm:$0xff] }
 0x29a   : > { %v1920_v20 = vsel %vm934_vm7, %v1918_v16, %v1919_v18  ;;  %1326 = vrot.lane.b32.xlu1 %v1269_v21, %s7809_s23  ;;  %1328 = vrot.lane.b32.xlu2 %v1270_v25, %s7809_s23  ;;  %v1655_v52 = vpop.f32.mrf.mxu2 }
 0x29b   : > { %v1959_v23 = vmax.f32 %v1890_v10, %v1920_v20  ;;  %1330 = vrot.lane.b32.xlu0 %v1271_v24, %s7809_s23 }
 0x29d   : > { %1974 = vst.msk [vmem:[#allocation5] sm:$0xff] %vm1973_vm15, %v1959_v23 }
 0x2a1   : > { %6238 = vmatmul.msk.bf16.gmra.mxu1 %vm1086_vm2, %v1476_v13  ;;  %6271 = vmatmul.msk.bf16.gmra.mxu2 %vm1086_vm2, %v1476_v13 }
 0x2a2   : > { %6313 = vmatmul.msk.bf16.gmra.mxu3 %vm1086_vm2, %v1476_v13  ;;  %7731 = vrot.lane.b32.xlu1 %v7730_v26, %s7809_s23  ;;  %v1657_v58 = vpop.f32.mrf.mxu2 }
 0x2a3   : > { %2188 = vrot.lane.b32.xlu2 %v8364_v19, %s7809_s23 }
 0x2a4   : > { %v2073_v27 = vld [vmem:[#allocation5] ss:$2 sm:$0xf] }
 0x2a5   : > { %v2075_v28 = vrot.slane %v2073_v27, 5 }
 0x2a7   : > { %2078 = vst.msk [vmem:[#allocation3 + $0xc0] sm:$0x78] %vm2077_vm10, %v2075_v28 }
 0x2ae   : > { %v2103_v29 = vld [vmem:[#allocation3 + $0xc0] sm:$0xff] }
 0x2af   : > { %v2150_v30 = vrot.slane %v2103_v29, 1 }
 0x2b1   : > { %v2153_v31 = vsel %vm934_vm7, %v2150_v30, %v8364_v19  ;;  %v2151_v32 = vsel %vm934_vm7, %v8364_v19, %v2150_v30 }
 0x2b2   : > { %2192 = vrot.lane.b32.xlu1 %v2153_v31, %s7809_s23  ;;  %2190 = vrot.lane.b32.xlu0 %v2151_v32, %s7809_s23 }
 0x2cd   : > { %v1562_v51 = vpop.f32.mrf.mxu1 }
 0x2ce   : > { %v1656_v53 = vadd.f32 %v1655_v52, %v1562_v51 }
 0x2d3   : > { %v1660_v4 = vpop.f32.mrf.mxu2 }
 0x2d4   : > { %v1756_v36 = vpop.f32.mrf.mxu3 }
 0x2d5   : > { %v1790_v37 = vadd.f32 %v1756_v36, %v1651_v35  ;;  %v1564_v55 = vpop.f32.mrf.mxu1 }
 0x2d6   : > { %v1658_v60 = vadd.f32 %v1657_v58, %v1564_v55 }
 0x2d7   : > { %v1810_v38 = vmul.f32 %v8309_v40, %v1790_v37 }
 0x2d9   : > { %v1830_v41 = vadd.f32 %v8323_v48, %v1810_v38 }
 0x2db   : > { %vm1846_vm6 = vcmp.ge.f32.partialorder %v1830_v41, 0.0  ;;  %v1862_v43 = vmul.f32 0.01, %v1830_v41  ;;  %v1662_v21 = vpop.f32.mrf.mxu2 }
 0x2dc   : > { %v1758_v44 = vpop.f32.mrf.mxu3 }
 0x2dd   : > { %v1878_v45 = vsel %vm1846_vm6, %v1830_v41, %v1862_v43  ;;  %v1791_v46 = vadd.f32 %v1758_v44, %v1653_v15  ;;  %vm2303_vm6 = vcmask 1045504  }
 0x2df   : > { %v1811_v47 = vmul.f32 %v8309_v40, %v1791_v46 }
 0x2e1   : > { %v1831_v49 = vadd.f32 %v8323_v48, %v1811_v47 }
 0x2e3   : > { %vm1847_vm1 = vcmp.ge.f32.partialorder %v1831_v49, 0.0  ;;  %v1863_v50 = vmul.f32 0.01, %v1831_v49 }
 0x2e5   : > { %v1879_v17 = vsel %vm1847_vm1, %v1831_v49, %v1863_v50 }
 0x2f1   : > { %v1567_v1 = vpop.f32.mrf.mxu1 }
 0x2f2   : > { %v1661_v10 = vadd.f32 %v1660_v4, %v1567_v1 }
 0x2f4   : > { %v1329_v6 = vpop.permute.xlu2 %1328 }
 0x2f5   : > { %1371 = vst.msk [vmem:[#allocation2 + $0x90] sm:$0xff] %vm1352_vm14, %v1329_v6 }
 0x2f7   : > { %v1665_v38 = vpop.f32.mrf.mxu2 }
 0x2f8   : > { %v1761_v22 = vpop.f32.mrf.mxu3 }
 0x2f9   : > { %v1792_v54 = vadd.f32 %v1761_v22, %v1656_v53  ;;  %v1569_v13 = vpop.f32.mrf.mxu1 }
 0x2fa   : > { %v1663_v29 = vadd.f32 %v1662_v21, %v1569_v13 }
 0x2fb   : > { %v1812_v56 = vmul.f32 %v8309_v40, %v1792_v54 }
 0x2fc   : > { %v1391_v54 = vld [vmem:[#allocation2 + $0x90] sm:$0xff] }
 0x2fd   : > { %v1832_v59 = vadd.f32 %v8323_v48, %v1812_v56  ;;  %v2189_v18 = vpop.permute.xlu2 %2188 }
 0x2fe   : > { %2245 = vst.msk [vmem:[#allocation3 + $0x80] sm:$0xff] %vm2240_vm12, %v2189_v18 }
 0x2ff   : > { %vm1848_vm9 = vcmp.ge.f32.partialorder %v1832_v59, 0.0  ;;  %v1864_v61 = vmul.f32 0.01, %v1832_v59 }
 0x300   : > { %v1763_v62 = vpop.f32.mrf.mxu3 }
 0x301   : > { %v1880_v63 = vsel %vm1848_vm9, %v1832_v59, %v1864_v61  ;;  %v1793_v0 = vadd.f32 %v1763_v62, %v1658_v60  ;;  %v1667_v60 = vpop.f32.mrf.mxu2  ;;  %vm2715_vm9 = vcmask 1042432  }
 0x302   : > { %v1894_v2 = vmax.f32 %v1878_v45, %v1880_v63  ;;  %v1411_v63 = vpack.c.bf16 %v1391_v54, %v1391_v54 }
 0x303   : > { %v1813_v3 = vmul.f32 %v8309_v40, %v1793_v0 }
 0x304   : > { %v1925_v5 = vrot.slane %v1894_v2, 1 }
 0x305   : > { %v1325_v57 = vpop.permute.xlu0 %1324  ;;  %v1833_v7 = vadd.f32 %v8323_v48, %v1813_v3  ;;  %v8407_v22 = vld [vmem:[#allocation3 + $0x80] sm:$0xff] }
 0x306   : > { %1369 = vst.msk [vmem:[#allocation2 + $0x80] sm:$0xff] %vm1352_vm14, %v1325_v57  ;;  %v2887_v59 = vrot.slane %v8407_v22, 6 }
 0x307   : > { %vm1849_vm11 = vcmp.ge.f32.partialorder %v1833_v7, 0.0  ;;  %v1865_v8 = vmul.f32 0.01, %v1833_v7 }
 0x309   : > { %v1881_v9 = vsel %vm1849_vm11, %v1833_v7, %v1865_v8 }
 0x30a   : > { %v1895_v11 = vmax.f32 %v1879_v17, %v1881_v9 }
 0x30c   : > { %v1927_v14 = vrot.slane %v1895_v11, 1  ;;  %v1327_v20 = vpop.permute.xlu1 %1326 }
 0x30d   : > { %1370 = vst.msk [vmem:[#allocation2 + $0x88] sm:$0xff] %vm1352_vm14, %v1327_v20  ;;  %v1331_v25 = vpop.permute.xlu0 %1330  ;;  %v1389_v28 = vld [vmem:[#allocation2 + $0x80] sm:$0xff] }
 0x30e   : > { %v1928_v23 = vsel %vm934_vm7, %v1925_v5, %v1927_v14  ;;  %1372 = vst.msk [vmem:[#allocation2 + $0x98] sm:$0xff] %vm1352_vm14, %v1331_v25  ;;  %v1572_v32 = vpop.f32.mrf.mxu1  ;;  %v1409_v35 = vpack.c.bf16 %v1389_v28, %v1389_v28 }
 0x30f   : > { %v1963_v26 = vmax.f32 %v1894_v2, %v1928_v23  ;;  %v1666_v47 = vadd.f32 %v1665_v38, %v1572_v32 }
 0x310   : > { %v1468_v44 = vunpack.c.l.b16 %v1409_v35 }
 0x311   : > { %1978 = vst.msk [vmem:[#allocation5 + $0x20] sm:$0xff] %vm1973_vm15, %v1963_v26 }
 0x314   : > { %v7732_v36 = vpop.permute.xlu1 %7731  ;;  %v1390_v37 = vld [vmem:[#allocation2 + $0x88] sm:$0xff] }
 0x315   : > { %v1766_v12 = vpop.f32.mrf.mxu3  ;;  %v7734_v41 = vunpack.i.h.bf16 %v7732_v36  ;;  %v7733_v42 = vunpack.i.l.bf16 %v7732_v36  ;;  %v1410_v15 = vpack.c.bf16 %v1390_v37, %v1390_v37  ;;  %v1392_v55 = vld [vmem:[#allocation2 + $0x98] sm:$0xff]  ;;  %v2311_v37 = vrot.slane %v8407_v22, 2 }
 0x316   : > { %v1794_v16 = vadd.f32 %v1766_v12, %v1661_v10  ;;  %v1574_v56 = vpop.f32.mrf.mxu1  ;;  %v1412_v0 = vpack.c.bf16 %v1392_v55, %v1392_v55  ;;  %v1695_v12 = vunpack.c.l.b16 %v1411_v63 }
 0x317   : > { %2244 = vst.msk [vmem:[#allocation3 + $0x60] sm:$0xff] %vm2240_vm12, %v7734_v41  ;;  %v1469_v45 = vunpack.c.l.b16 %v1410_v15  ;;  %v1668_v1 = vadd.f32 %v1667_v60, %v1574_v56  ;;  %v2435_v60 = vrot.slane %v8407_v22, 3 }
 0x318   : > { %v1814_v24 = vmul.f32 %v8309_v40, %v1794_v16  ;;  %v2080_v46 = vld [vmem:[#allocation5 + $0x20] ss:$2 sm:$0xf]  ;;  %2243 = vst.msk [vmem:[#allocation3 + $0x40] sm:$0xff] %vm2240_vm12, %v7733_v42  ;;  %v1696_v13 = vunpack.c.l.b16 %v1412_v0 }
 0x319   : > { %v2082_v49 = vrot.slane %v2080_v46, 5  ;;  %v1477_v17 = vpack.c.b16 %v1469_v45, %v1468_v44 }
 0x31a   : > { %v1834_v27 = vadd.f32 %v8323_v48, %v1814_v24  ;;  %v1697_v26 = vpack.c.b16 %v1696_v13, %v1695_v12 }
 0x31b   : > { %2084 = vst.msk [vmem:[#allocation3 + $0x100] sm:$0x78] %vm2077_vm10, %v2082_v49  ;;  %6239 = vmatmul.msk.bf16.gmra.mxu1 %vm1086_vm2, %v1477_v17  ;;  %6314 = vmatmul.msk.bf16.gmra.mxu3 %vm1086_vm2, %v1477_v17 }
 0x31c   : > { %vm1850_vm13 = vcmp.ge.f32.partialorder %v1834_v27, 0.0  ;;  %v1866_v30 = vmul.f32 0.01, %v1834_v27 }
 0x31d   : > { %v1768_v31 = vpop.f32.mrf.mxu3 }
 0x31e   : > { %v1882_v33 = vsel %vm1850_vm13, %v1834_v27, %v1866_v30  ;;  %v1795_v34 = vadd.f32 %v1768_v31, %v1663_v29  ;;  %v8410_v58 = vld [vmem:[#allocation3 + $0x60] sm:$0xff] }
 0x31f   : > { %v2885_v61 = vrot.slane %v8410_v58, 6  ;;  %v8419_v7 = vld [vmem:[#allocation3 + $0x40] sm:$0xff]  ;;  %v2433_v24 = vrot.slane %v8410_v58, 3 }
 0x320   : > { %v1815_v39 = vmul.f32 %v8309_v40, %v1795_v34  ;;  %v2431_v23 = vrot.slane %v8419_v7, 3 }
 0x321   : > { %v2888_v3 = vsel %vm2879_vm0, %v2885_v61, %v2887_v59 }
 0x322   : > { %v1835_v43 = vadd.f32 %v8323_v48, %v1815_v39  ;;  %v2105_v4 = vld [vmem:[#allocation3 + $0x100] sm:$0xff]  ;;  %2944 = vst.msk [vmem:[#allocation3 + $0x78] sm:$0xff] %vm1973_vm15, %v2888_v3  ;;  %v2434_v28 = vsel %vm2427_vm4, %v2431_v23, %v2433_v24  ;;  %v2599_v39 = vrot.slane %v8407_v22, 4 }
 0x323   : > { %v2154_v5 = vrot.slane %v2105_v4, 1 }
 0x324   : > { %vm1851_vm14 = vcmp.ge.f32.partialorder %v1835_v43, 0.0  ;;  %v1867_v50 = vmul.f32 0.01, %v1835_v43  ;;  %v2193_v9 = vpop.permute.xlu1 %2192  ;;  %v2191_v10 = vpop.permute.xlu0 %2190 }
 0x325   : > { %v1771_v51 = vpop.f32.mrf.mxu3  ;;  %2247 = vst.msk [vmem:[#allocation3 + $0xc0] sm:$0xff] %vm2240_vm12, %v2193_v9  ;;  %v2155_v16 = vsel %vm934_vm7, %v8364_v19, %v2154_v5  ;;  %v2157_v18 = vsel %vm934_vm7, %v2154_v5, %v8364_v19 }
 0x326   : > { %v1883_v52 = vsel %vm1851_vm14, %v1835_v43, %v1867_v50  ;;  %v1796_v53 = vadd.f32 %v1771_v51, %v1666_v47  ;;  %2246 = vst.msk [vmem:[#allocation3 + $0xa0] sm:$0xff] %vm2240_vm12, %v2191_v10  ;;  %2194 = vrot.lane.b32.xlu2 %v2155_v16, %s7809_s23  ;;  %2196 = vrot.lane.b32.xlu0 %v2157_v18, %s7809_s23  ;;  %v1577_v16 = vpop.f32.mrf.mxu1 }
 0x328   : > { %v1816_v57 = vmul.f32 %v8309_v40, %v1796_v53 }
 0x32a   : > { %v1836_v62 = vadd.f32 %v8323_v48, %v1816_v57 }
 0x32b   : > { %6315 = vmatmul.msk.bf16.gmra.mxu3 %vm1086_vm2, %v1697_v26  ;;  %vm2591_vm2 = vcmask 1043456  }
 0x32c   : > { %vm1852_vm3 = vcmp.ge.f32.partialorder %v1836_v62, 0.0  ;;  %v1868_v2 = vmul.f32 0.01, %v1836_v62  ;;  %v8436_v29 = vld [vmem:[#allocation3 + $0xc0] sm:$0xff] }
 0x32d   : > { %v1773_v6 = vpop.f32.mrf.mxu3  ;;  %v2891_v31 = vrot.slane %v8436_v29, 6  ;;  %v8440_v32 = vld [vmem:[#allocation3 + $0xa0] sm:$0xff]  ;;  %v2315_v34 = vrot.slane %v8436_v29, 2  ;;  %v2603_v43 = vrot.slane %v8436_v29, 4  ;;  %v2439_v46 = vrot.slane %v8436_v29, 3 }
 0x32e   : > { %v1884_v8 = vsel %vm1852_vm3, %v1836_v62, %v1868_v2  ;;  %v1797_v11 = vadd.f32 %v1773_v6, %v1668_v1  ;;  %v2889_v35 = vrot.slane %v8440_v32, 6  ;;  %2473 = vrot.lane.b32.xlu0 %v2434_v28, %s7809_s23  ;;  %v2313_v36 = vrot.slane %v8440_v32, 2  ;;  %v1579_v28 = vpop.f32.mrf.mxu1 }
 0x32f   : > { %v1898_v14 = vmax.f32 %v1882_v33, %v1884_v8  ;;  %v2601_v41 = vrot.slane %v8440_v32, 4  ;;  %v2437_v45 = vrot.slane %v8440_v32, 3  ;;  %v2436_v62 = vsel %vm2427_vm4, %v2433_v24, %v2435_v60 }
 0x330   : > { %v1817_v20 = vmul.f32 %v8309_v40, %v1797_v11  ;;  %v2890_v42 = vsel %vm2879_vm0, %v2887_v59, %v2889_v35  ;;  %v2892_v15 = vsel %vm2879_vm0, %v2889_v35, %v2891_v31  ;;  %v2316_v47 = vsel %vm2303_vm6, %v2313_v36, %v2315_v34 }
 0x331   : > { %v1933_v21 = vrot.slane %v1898_v14, 1  ;;  %2945 = vst.msk [vmem:[#allocation3 + $0x98] sm:$0xff] %vm1973_vm15, %v2890_v42  ;;  %v2314_v50 = vsel %vm2303_vm6, %v2311_v37, %v2313_v36  ;;  %v2602_v17 = vsel %vm2591_vm2, %v2599_v39, %v2601_v41  ;;  %v2604_v51 = vsel %vm2591_vm2, %v2601_v41, %v2603_v43 }
 0x332   : > { %v1837_v25 = vadd.f32 %v8323_v48, %v1817_v20  ;;  %2946 = vst.msk [vmem:[#allocation3 + $0xb8] sm:$0xff] %vm1973_vm15, %v2892_v15  ;;  %v2438_v63 = vsel %vm2427_vm4, %v2435_v60, %v2437_v45  ;;  %v2307_v1 = vrot.slane %v8419_v7, 2  ;;  %v2309_v2 = vrot.slane %v8410_v58, 2 }
 0x333   : > { %2370 = vst.msk [vmem:[#allocation3 + $0xa8] sm:$0xff] %vm1973_vm15, %v2316_v47 }
 0x334   : > { %vm1853_vm5 = vcmp.ge.f32.partialorder %v1837_v25, 0.0  ;;  %v1869_v27 = vmul.f32 0.01, %v1837_v25  ;;  %2369 = vst.msk [vmem:[#allocation3 + $0x88] sm:$0xff] %vm1973_vm15, %v2314_v50  ;;  %v2310_v3 = vsel %vm2303_vm6, %v2307_v1, %v2309_v2  ;;  %v2312_v60 = vsel %vm2303_vm6, %v2309_v2, %v2311_v37  ;;  %v7562_v37 = vld [vmem:[%s10129_s7 + $0x148] sm:$0xff] }
 0x335   : > { %2657 = vst.msk [vmem:[#allocation3 + $0x90] sm:$0xff] %vm1973_vm15, %v2602_v17 }
 0x336   : > { %v1885_v30 = vsel %vm1853_vm5, %v1837_v25, %v1869_v27  ;;  %2658 = vst.msk [vmem:[#allocation3 + $0xb0] sm:$0xff] %vm1973_vm15, %v2604_v51 }
 0x337   : > { %v1899_v33 = vmax.f32 %v1883_v52, %v1885_v30  ;;  %v2440_v52 = vsel %vm2427_vm4, %v2437_v45, %v2439_v46  ;;  %2367 = vst.msk [vmem:[#allocation3 + $0x48] sm:$0xff] %vm1973_vm15, %v2310_v3  ;;  %v2721_v45 = vrot.slane %v8410_v58, 5 }
 0x338   : > { %2479 = vrot.lane.b32.xlu0 %v2440_v52, %s7809_s23  ;;  %v7556_v52 = vld [vmem:[%s10129_s7 + $0x118] sm:$0xff]  ;;  %2368 = vst.msk [vmem:[#allocation3 + $0x68] sm:$0xff] %vm1973_vm15, %v2312_v60 }
 0x339   : > { %v1935_v38 = vrot.slane %v1899_v33, 1  ;;  %3450 = vmatpush.bf16.msrb.mxu1 %v7556_v52  ;;  %v7551_v52 = vld [vmem:[%s10129_s7 + $0xf0] sm:$0xff] }
 0x33b   : > { %v1936_v44 = vsel %vm934_vm7, %v1933_v21, %v1935_v38 }
 0x33c   : > { %v1967_v49 = vmax.f32 %v1898_v14, %v1936_v44  ;;  %v1670_v14 = vpop.f32.mrf.mxu2  ;;  %v2719_v44 = vrot.slane %v8419_v7, 5 }
 0x33d   : > { %v1671_v20 = vadd.f32 %v1670_v14, %v1577_v16  ;;  %v7553_v14 = vld [vmem:[%s10129_s7 + $0x100] sm:$0xff] }
 0x33e   : > { %1982 = vst.msk [vmem:[#allocation5 + $0x40] sm:$0xff] %vm1973_vm15, %v1967_v49  ;;  %v7561_v16 = vld [vmem:[%s10129_s7 + $0x140] sm:$0xff] }
 0x344   : > { %v1672_v27 = vpop.f32.mrf.mxu2 }
 0x345   : > { %v2086_v53 = vld [vmem:[#allocation5 + $0x40] ss:$2 sm:$0xf] }
 0x346   : > { %v2088_v54 = vrot.slane %v2086_v53, 5  ;;  %v7564_v53 = vld [vmem:[%s10129_s7 + $0x158] sm:$0xff] }
 0x347   : > { %3475 = vmatpush.bf16.msrb.mxu2 %v7564_v53  ;;  %v7559_v53 = vld [vmem:[%s10129_s7 + $0x130] sm:$0xff] }
 0x348   : > { %2090 = vst.msk [vmem:[#allocation3 + $0x140] sm:$0x78] %vm2077_vm10, %v2088_v54 }
 0x34f   : > { %v2107_v55 = vld [vmem:[#allocation3 + $0x140] sm:$0xff] }
 0x350   : > { %v2158_v56 = vrot.slane %v2107_v55, 1  ;;  %v2722_v55 = vsel %vm2715_vm9, %v2719_v44, %v2721_v45 }
 0x352   : > { %v2161_v57 = vsel %vm934_vm7, %v2158_v56, %v8364_v19  ;;  %v2159_v59 = vsel %vm934_vm7, %v8364_v19, %v2158_v56 }
 0x353   : > { %2200 = vrot.lane.b32.xlu2 %v2161_v57, %s7809_s23  ;;  %2198 = vrot.lane.b32.xlu1 %v2159_v59, %s7809_s23  ;;  %v7555_v57 = vld [vmem:[%s10129_s7 + $0x110] sm:$0xff] }
 0x354   : > { %v7563_v59 = vld [vmem:[%s10129_s7 + $0x150] sm:$0xff]  ;;  %3451 = vmatpush.bf16.msrb.mxu1 %v7555_v57  ;;  %v7558_v57 = vld [vmem:[%s10129_s7 + $0x128] sm:$0xff] }
 0x355   : > { %3476 = vmatpush.bf16.msrb.mxu2 %v7563_v59 }
 0x359   : > { %3477 = vmatpush.bf16.msrb.mxu2 %v7562_v37  ;;  %v7557_v37 = vld [vmem:[%s10129_s7 + $0x120] sm:$0xff] }
 0x35b   : > { %2475 = vrot.lane.b32.xlu1 %v2436_v62, %s7809_s23  ;;  %2477 = vrot.lane.b32.xlu2 %v2438_v63, %s7809_s23  ;;  %v1675_v62 = vpop.f32.mrf.mxu2 }
 0x35d   : > { %3478 = vmatpush.bf16.msrb.mxu2 %v7561_v16 }
 0x380   : > { %v2195_v0 = vpop.permute.xlu2 %2194 }
 0x381   : > { %2248 = vst.msk [vmem:[#allocation3 + $0xe0] sm:$0xff] %vm2240_vm12, %v2195_v0 }
 0x388   : > { %v8493_v4 = vld [vmem:[#allocation3 + $0xe0] sm:$0xff] }
 0x389   : > { %v2893_v5 = vrot.slane %v8493_v4, 6  ;;  %v2441_v6 = vrot.slane %v8493_v4, 3  ;;  %v2317_v8 = vrot.slane %v8493_v4, 2  ;;  %v2605_v9 = vrot.slane %v8493_v4, 4 }
 0x38b   : > { %v2894_v10 = vsel %vm2879_vm0, %v2891_v31, %v2893_v5  ;;  %v2442_v11 = vsel %vm2427_vm4, %v2439_v46, %v2441_v6  ;;  %v2318_v12 = vsel %vm2303_vm6, %v2315_v34, %v2317_v8  ;;  %v2606_v13 = vsel %vm2591_vm2, %v2603_v43, %v2605_v9 }
 0x38c   : > { %2947 = vst.msk [vmem:[#allocation3 + $0xd8] sm:$0xff] %vm1973_vm15, %v2894_v10  ;;  %2481 = vrot.lane.b32.xlu1 %v2442_v11, %s7809_s23  ;;  %v1673_v46 = vadd.f32 %v1672_v27, %v1579_v28  ;;  %v2597_v27 = vrot.slane %v8410_v58, 4 }
 0x38d   : > { %2371 = vst.msk [vmem:[#allocation3 + $0xc8] sm:$0xff] %vm1973_vm15, %v2318_v12  ;;  %v2883_v12 = vrot.slane %v8419_v7, 6 }
 0x38e   : > { %2659 = vst.msk [vmem:[#allocation3 + $0xd0] sm:$0xff] %vm1973_vm15, %v2606_v13 }
 0x38f   : > { %v2886_v28 = vsel %vm2879_vm0, %v2883_v12, %v2885_v61 }
 0x390   : > { %2943 = vst.msk [vmem:[#allocation3 + $0x58] sm:$0xff] %vm1973_vm15, %v2886_v28 }
 0x398   : > { %v2197_v18 = vpop.permute.xlu0 %2196  ;;  %v1582_v54 = vpop.f32.mrf.mxu1 }
 0x399   : > { %2249 = vst.msk [vmem:[#allocation3 + $0x100] sm:$0xff] %vm2240_vm12, %v2197_v18  ;;  %v1676_v3 = vadd.f32 %v1675_v62, %v1582_v54  ;;  %v2097_v62 = vld [vmem:[#allocation3] sm:$0xfe] }
 0x39e   : > { %v1776_v21 = vpop.f32.mrf.mxu3 }
 0x39f   : > { %v1798_v26 = vadd.f32 %v1776_v21, %v1671_v20 }
 0x3a0   : > { %v8508_v24 = vld [vmem:[#allocation3 + $0x100] sm:$0xff]  ;;  %v2474_v25 = vpop.permute.xlu0 %2473  ;;  %v1584_v18 = vpop.f32.mrf.mxu1 }
 0x3a1   : > { %v2895_v30 = vrot.slane %v8508_v24, 6  ;;  %2531 = vst.msk [vmem:[#allocation3 + $0x48] sm:$0xff] %vm2240_vm12, %v2474_v25  ;;  %v2443_v31 = vrot.slane %v8508_v24, 3  ;;  %v2319_v33 = vrot.slane %v8508_v24, 2  ;;  %v1818_v34 = vmul.f32 %v8309_v40, %v1798_v26  ;;  %v1677_v26 = vpop.f32.mrf.mxu2 }
 0x3a2   : > { %v2607_v35 = vrot.slane %v8508_v24, 4  ;;  %v2595_v25 = vrot.slane %v8419_v7, 4 }
 0x3a3   : > { %v2896_v36 = vsel %vm2879_vm0, %v2893_v5, %v2895_v30  ;;  %v2444_v38 = vsel %vm2427_vm4, %v2441_v6, %v2443_v31  ;;  %v2320_v42 = vsel %vm2303_vm6, %v2317_v8, %v2319_v33  ;;  %v1838_v15 = vadd.f32 %v8323_v48, %v1818_v34  ;;  %v7554_v6 = vld [vmem:[%s10129_s7 + $0x108] sm:$0xff] }
 0x3a4   : > { %2948 = vst.msk [vmem:[#allocation3 + $0xf8] sm:$0xff] %vm1973_vm15, %v2896_v36  ;;  %2483 = vrot.lane.b32.xlu2 %v2444_v38, %s7809_s23  ;;  %v2608_v43 = vsel %vm2591_vm2, %v2605_v9, %v2607_v35  ;;  %v2723_v8 = vrot.slane %v8407_v22, 5  ;;  %v2725_v9 = vrot.slane %v8440_v32, 5  ;;  %3452 = vmatpush.bf16.msrb.mxu1 %v7554_v6  ;;  %v1678_v34 = vadd.f32 %v1677_v26, %v1584_v18  ;;  %v7552_v38 = vld [vmem:[%s10129_s7 + $0xf8] sm:$0xff] }
 0x3a5   : > { %vm1854_vm1 = vcmp.ge.f32.partialorder %v1838_v15, 0.0  ;;  %v1870_v47 = vmul.f32 0.01, %v1838_v15  ;;  %2372 = vst.msk [vmem:[#allocation3 + $0xe8] sm:$0xff] %vm1973_vm15, %v2320_v42  ;;  %v2598_v61 = vsel %vm2591_vm2, %v2595_v25, %v2597_v27 }
 0x3a6   : > { %v1778_v49 = vpop.f32.mrf.mxu3  ;;  %2660 = vst.msk [vmem:[#allocation3 + $0xf0] sm:$0xff] %vm1973_vm15, %v2608_v43  ;;  %v2726_v20 = vsel %vm2715_vm9, %v2723_v8, %v2725_v9  ;;  %v2600_v43 = vsel %vm2591_vm2, %v2597_v27, %v2599_v39 }
 0x3a7   : > { %v1886_v50 = vsel %vm1854_vm1, %v1838_v15, %v1870_v47  ;;  %v1799_v51 = vadd.f32 %v1778_v49, %v1673_v46  ;;  %v2731_v15 = vrot.slane %v8508_v24, 5  ;;  %2655 = vst.msk [vmem:[#allocation3 + $0x50] sm:$0xff] %vm1973_vm15, %v2598_v61 }
 0x3a8   : > { %3453 = vmatpush.bf16.msrb.mxu1 %v7553_v14  ;;  %2656 = vst.msk [vmem:[#allocation3 + $0x70] sm:$0xff] %vm1973_vm15, %v2600_v43 }
 0x3a9   : > { %v1819_v56 = vmul.f32 %v8309_v40, %v1799_v51 }
 0x3aa   : > { %v2480_v17 = vpop.permute.xlu0 %2479 }
 0x3ab   : > { %2534 = vst.msk [vmem:[#allocation3 + $0xa8] sm:$0xff] %vm2240_vm12, %v2480_v17  ;;  %v1839_v0 = vadd.f32 %v8323_v48, %v1819_v56  ;;  %v2729_v17 = vrot.slane %v8493_v4, 5  ;;  %v7550_v56 = vld [vmem:[%s10129_s7 + $0xe8] sm:$0xff] }
 0x3ac   : > { %2761 = vrot.lane.b32.xlu2 %v2722_v55, %s7809_s23  ;;  %3454 = vmatpush.bf16.msrb.mxu1 %v7552_v38 }
 0x3ad   : > { %v2201_v41 = vpop.permute.xlu2 %2200  ;;  %vm1855_vm11 = vcmp.ge.f32.partialorder %v1839_v0, 0.0  ;;  %v1871_v5 = vmul.f32 0.01, %v1839_v0 }
 0x3ae   : > { %2251 = vst.msk [vmem:[#allocation3 + $0x140] sm:$0xff] %vm2240_vm12, %v2201_v41  ;;  %v1781_v2 = vpop.f32.mrf.mxu3  ;;  %v7560_v41 = vld [vmem:[%s10129_s7 + $0x138] sm:$0xff] }
 0x3af   : > { %v1887_v10 = vsel %vm1855_vm11, %v1839_v0, %v1871_v5  ;;  %v1800_v11 = vadd.f32 %v1781_v2, %v1676_v3  ;;  %3479 = vmatpush.bf16.msrb.mxu2 %v7560_v41 }
 0x3b0   : > { %3455 = vmatpush.bf16.msrb.mxu1 %v7551_v52 }
 0x3b1   : > { %v1820_v13 = vmul.f32 %v8309_v40, %v1800_v11  ;;  %v2139_v11 = vrot.slane %v2097_v62, 1 }
 0x3b3   : > { %v1840_v21 = vadd.f32 %v8323_v48, %v1820_v13  ;;  %3480 = vmatpush.bf16.msrb.mxu2 %v7559_v53 }
 0x3b4   : > { %2765 = vrot.lane.b32.xlu2 %v2726_v20, %s7809_s23  ;;  %3456 = vmatpush.bf16.msrb.mxu1 %v7550_v56 }
 0x3b5   : > { %v2478_v63 = vpop.permute.xlu2 %2477  ;;  %vm1856_vm13 = vcmp.ge.f32.partialorder %v1840_v21, 0.0  ;;  %v1872_v36 = vmul.f32 0.01, %v1840_v21  ;;  %v8632_v59 = vld [vmem:[#allocation3 + $0x140] sm:$0xff] }
 0x3b6   : > { %2533 = vst.msk [vmem:[#allocation3 + $0x88] sm:$0xff] %vm2240_vm12, %v2478_v63  ;;  %v1783_v42 = vpop.f32.mrf.mxu3  ;;  %v7549_v63 = vld [vmem:[%s10129_s7 + $0xe0] sm:$0xff]  ;;  %v2447_v6 = vrot.slane %v8632_v59, 3  ;;  %v2899_v14 = vrot.slane %v8632_v59, 6  ;;  %v2323_v18 = vrot.slane %v8632_v59, 2  ;;  %v2611_v41 = vrot.slane %v8632_v59, 4 }
 0x3b7   : > { %v1888_v46 = vsel %vm1856_vm13, %v1840_v21, %v1872_v36  ;;  %v1801_v47 = vadd.f32 %v1783_v42, %v1678_v34  ;;  %3481 = vmatpush.bf16.msrb.mxu2 %v7558_v57  ;;  %v2970_v36 = vld [vmem:[#allocation3 + $0x48] sm:$0xff]  ;;  %v2735_v62 = vrot.slane %v8632_v59, 5  ;;  %v7598_v59 = vld [vmem:[%s10129_s7 + $0x268] sm:$0xff] }
 0x3b8   : > { %v1902_v49 = vmax.f32 %v1886_v50, %v1888_v46  ;;  %v2732_v50 = vsel %vm2715_vm9, %v2729_v17, %v2731_v15  ;;  %3457 = vmatpush.bf16.msrb.mxu1 %v7549_v63  ;;  %v3045_v42 = vpack.c.bf16 %v2970_v36, %v8419_v7 }
 0x3b9   : > { %v1821_v51 = vmul.f32 %v8309_v40, %v1801_v47 }
 0x3ba   : > { %v1941_v39 = vrot.slane %v1902_v49, 1  ;;  %v3211_v52 = vunpack.c.h.b16 %v3045_v42 }
 0x3bb   : > { %v1841_v54 = vadd.f32 %v8323_v48, %v1821_v51  ;;  %3482 = vmatpush.bf16.msrb.mxu2 %v7557_v37 }
 0x3bc   : > { %2771 = vrot.lane.b32.xlu2 %v2732_v50, %s7809_s23 }
 0x3bd   : > { %vm1857_vm14 = vcmp.ge.f32.partialorder %v1841_v54, 0.0  ;;  %v1873_v55 = vmul.f32 0.01, %v1841_v54  ;;  %v2978_v56 = vld [vmem:[#allocation3 + $0x88] sm:$0xff] }
 0x3be   : > { %v3049_v57 = vpack.c.bf16 %v2978_v56, %v8407_v22 }
 0x3bf   : > { %v1889_v60 = vsel %vm1857_vm14, %v1841_v54, %v1873_v55  ;;  %v2727_v55 = vrot.slane %v8436_v29, 5 }
 0x3c0   : > { %v1903_v48 = vmax.f32 %v1887_v10, %v1889_v60  ;;  %v3218_v63 = vunpack.c.l.b16 %v3049_v57 }
 0x3c2   : > { %v1943_v0 = vrot.slane %v1903_v48, 1 }
 0x3c4   : > { %v1944_v16 = vsel %vm934_vm7, %v1941_v39, %v1943_v0  ;;  %v3219_v0 = vunpack.c.h.b16 %v3049_v57 }
 0x3c5   : > { %v2199_v40 = vpop.permute.xlu1 %2198  ;;  %v1971_v20 = vmax.f32 %v1902_v49, %v1944_v16 }
 0x3c6   : > { %2250 = vst.msk [vmem:[#allocation3 + $0x120] sm:$0xff] %vm2240_vm12, %v2199_v40 }
 0x3c7   : > { %1986 = vst.msk [vmem:[#allocation5 + $0x60] sm:$0xff] %vm1973_vm15, %v1971_v20 }
 0x3cd   : > { %v8637_v3 = vld [vmem:[#allocation3 + $0x120] sm:$0xff]  ;;  %v2476_v5 = vpop.permute.xlu1 %2475 }
 0x3ce   : > { %v2897_v2 = vrot.slane %v8637_v3, 6  ;;  %2532 = vst.msk [vmem:[#allocation3 + $0x68] sm:$0xff] %vm2240_vm12, %v2476_v5  ;;  %v2445_v10 = vrot.slane %v8637_v3, 3  ;;  %v2321_v13 = vrot.slane %v8637_v3, 2  ;;  %v2609_v27 = vrot.slane %v8637_v3, 4 }
 0x3cf   : > { %v2092_v39 = vld [vmem:[#allocation5 + $0x60] ss:$2 sm:$0xf]  ;;  %v2733_v60 = vrot.slane %v8637_v3, 5 }
 0x3d0   : > { %v2898_v21 = vsel %vm2879_vm0, %v2895_v30, %v2897_v2  ;;  %v2448_v26 = vsel %vm2427_vm4, %v2445_v10, %v2447_v6  ;;  %v2900_v28 = vsel %vm2879_vm0, %v2897_v2, %v2899_v14  ;;  %v2446_v34 = vsel %vm2427_vm4, %v2443_v31, %v2445_v10  ;;  %v7572_v2 = vld [vmem:[%s10129_s7 + $0x198] sm:$0xff]  ;;  %v7571_v10 = vld [vmem:[%s10129_s7 + $0x190] sm:$0xff] }
 0x3d1   : > { %2487 = vrot.lane.b32.xlu1 %v2448_v26, %s7809_s23  ;;  %2485 = vrot.lane.b32.xlu0 %v2446_v34, %s7809_s23  ;;  %v2141_v30 = vsel %vm934_vm7, %v2139_v11, %v8364_v19  ;;  %v2324_v38 = vsel %vm2303_vm6, %v2321_v13, %v2323_v18  ;;  %2949 = vst.msk [vmem:[#allocation3 + $0x118] sm:$0xff] %vm1973_vm15, %v2898_v21  ;;  %v2094_v54 = vrot.slane %v2092_v39, 5 }
 0x3d2   : > { %v2322_v31 = vsel %vm2303_vm6, %v2319_v33, %v2321_v13  ;;  %2950 = vst.msk [vmem:[#allocation3 + $0x138] sm:$0xff] %vm1973_vm15, %v2900_v28  ;;  %v2612_v61 = vsel %vm2591_vm2, %v2609_v27, %v2611_v41  ;;  %v7735_v43 = vpack.i.bf16 %v8364_v19, %v2141_v30  ;;  %v2610_v47 = vsel %vm2591_vm2, %v2607_v35, %v2609_v27 }
 0x3d3   : > { %2374 = vst.msk [vmem:[#allocation3 + $0x128] sm:$0xff] %vm1973_vm15, %v2324_v38  ;;  %v3210_v33 = vunpack.c.l.b16 %v3045_v42  ;;  %v2724_v35 = vsel %vm2715_vm9, %v2721_v45, %v2723_v8  ;;  %v2728_v45 = vsel %vm2715_vm9, %v2725_v9, %v2727_v55  ;;  %v2982_v8 = vld [vmem:[#allocation3 + $0xa8] sm:$0xff]  ;;  %v2734_v22 = vsel %vm2715_vm9, %v2731_v15, %v2733_v60  ;;  %3500 = vmatpush.bf16.msrb.mxu3 %v7572_v2  ;;  %v7570_v15 = vld [vmem:[%s10129_s7 + $0x188] sm:$0xff] }
 0x3d4   : > { %2373 = vst.msk [vmem:[#allocation3 + $0x108] sm:$0xff] %vm1973_vm15, %v2322_v31  ;;  %v3051_v48 = vpack.c.bf16 %v2982_v8, %v8440_v32 }
 0x3d5   : > { %v2974_v46 = vld [vmem:[#allocation3 + $0x68] sm:$0xff]  ;;  %2662 = vst.msk [vmem:[#allocation3 + $0x130] sm:$0xff] %vm1973_vm15, %v2612_v61 }
 0x3d6   : > { %v3047_v49 = vpack.c.bf16 %v2974_v46, %v8410_v58  ;;  %2661 = vst.msk [vmem:[#allocation3 + $0x110] sm:$0xff] %vm1973_vm15, %v2610_v47  ;;  %v2730_v58 = vsel %vm2715_vm9, %v2727_v55, %v2729_v17  ;;  %v2736_v17 = vsel %vm2715_vm9, %v2733_v60, %v2735_v62  ;;  %v3222_v5 = vunpack.c.l.b16 %v3051_v48  ;;  %v7576_v46 = vld [vmem:[%s10129_s7 + $0x1b8] sm:$0xff]  ;;  %v7566_v47 = vld [vmem:[%s10129_s7 + $0x168] sm:$0xff] }
 0x3d7   : > { %2096 = vst.msk [vmem:[#allocation3 + $0x180] sm:$0x78] %vm2077_vm10, %v2094_v54  ;;  %v3223_v37 = vunpack.c.h.b16 %v3051_v48  ;;  %3501 = vmatpush.bf16.msrb.mxu3 %v7571_v10  ;;  %3529 = vmatpush.bf16.msra.mxu1 %v7576_v46 }
 0x3d8   : > { %v3214_v51 = vunpack.c.l.b16 %v3047_v49  ;;  %v3215_v53 = vunpack.c.h.b16 %v3047_v49  ;;  %v8725_v9 = vpack.c.b16 %v3222_v5, %v3218_v63  ;;  %v7575_v49 = vld [vmem:[%s10129_s7 + $0x1b0] sm:$0xff] }
 0x3d9   : > { %7736 = vrot.lane.b32.xlu1 %v7735_v43, %s7809_s23  ;;  %2763 = vrot.lane.b32.xlu0 %v2724_v35, %s7809_s23  ;;  %v8727_v32 = vpack.c.b16 %v3223_v37, %v3219_v0  ;;  %v7567_v43 = vld [vmem:[%s10129_s7 + $0x170] sm:$0xff]  ;;  %v7573_v35 = vld [vmem:[%s10129_s7 + $0x1a0] sm:$0xff] }
 0x3da   : > { %v8697_v50 = vpack.c.b16 %v3214_v51, %v3210_v33  ;;  %v8699_v40 = vpack.c.b16 %v3215_v53, %v3211_v52  ;;  %v7565_v33 = vld [vmem:[%s10129_s7 + $0x160] sm:$0xff]  ;;  %v7574_v51 = vld [vmem:[%s10129_s7 + $0x1a8] sm:$0xff] }
 0x3db   : > { %3502 = vmatpush.bf16.msrb.mxu3 %v7570_v15  ;;  %3530 = vmatpush.bf16.msra.mxu1 %v7575_v49  ;;  %v2976_v15 = vld [vmem:[#allocation3 + $0x78] sm:$0xff] }
 0x3dc   : > { %3458 = vmatmul.bf16.vlgmr.msrb.gmra.mxu1 %v8697_v50  ;;  %3483 = vmatmul.bf16.vlgmr.msrb.gmra.mxu2 %v8699_v40 }
 0x3df   : > { %3531 = vmatpush.bf16.msra.mxu1 %v7574_v51 }
 0x3e1   : > { %2769 = vrot.lane.b32.xlu1 %v2730_v58, %s7809_s23  ;;  %2767 = vrot.lane.b32.xlu0 %v2728_v45, %s7809_s23 }
 0x3e3   : > { %3532 = vmatpush.bf16.msra.mxu1 %v7573_v35 }
 0x3e9   : > { %2775 = vrot.lane.b32.xlu1 %v2736_v17, %s7809_s23  ;;  %2773 = vrot.lane.b32.xlu0 %v2734_v22, %s7809_s23  ;;  %v2972_v22 = vld [vmem:[#allocation3 + $0x58] sm:$0xff] }
 0x3ec   : > { %3462 = vmatmul.bf16.gmra.mxu1 %v8725_v9  ;;  %3487 = vmatmul.bf16.gmra.mxu2 %v8727_v32 }
 0x3fe   : > { %v2482_v11 = vpop.permute.xlu1 %2481  ;;  %v2484_v13 = vpop.permute.xlu2 %2483 }
 0x3ff   : > { %2535 = vst.msk [vmem:[#allocation3 + $0xc8] sm:$0xff] %vm2240_vm12, %v2482_v11 }
 0x400   : > { %2536 = vst.msk [vmem:[#allocation3 + $0xe8] sm:$0xff] %vm2240_vm12, %v2484_v13 }
 0x406   : > { %v2762_v16 = vpop.permute.xlu2 %2761  ;;  %v2986_v20 = vld [vmem:[#allocation3 + $0xc8] sm:$0xff] }
 0x407   : > { %2819 = vst.msk [vmem:[#allocation3 + $0x50] sm:$0xff] %vm2240_vm12, %v2762_v16  ;;  %v2990_v21 = vld [vmem:[#allocation3 + $0xe8] sm:$0xff]  ;;  %v3053_v26 = vpack.c.bf16 %v2986_v20, %v8436_v29  ;;  %v7569_v29 = vld [vmem:[%s10129_s7 + $0x180] sm:$0xff] }
 0x408   : > { %v3055_v27 = vpack.c.bf16 %v2990_v21, %v8493_v4  ;;  %3503 = vmatpush.bf16.msrb.mxu3 %v7569_v29  ;;  %v7568_v4 = vld [vmem:[%s10129_s7 + $0x178] sm:$0xff] }
 0x409   : > { %v3226_v28 = vunpack.c.l.b16 %v3053_v26  ;;  %v3227_v34 = vunpack.c.h.b16 %v3053_v26 }
 0x40a   : > { %v3230_v36 = vunpack.c.l.b16 %v3055_v27  ;;  %v3231_v30 = vunpack.c.h.b16 %v3055_v27 }
 0x40c   : > { %v8745_v38 = vpack.c.b16 %v3230_v36, %v3226_v28  ;;  %v8747_v31 = vpack.c.b16 %v3231_v30, %v3227_v34  ;;  %3504 = vmatpush.bf16.msrb.mxu3 %v7568_v4 }
 0x40e   : > { %3466 = vmatmul.bf16.gmra.mxu1 %v8745_v38  ;;  %3491 = vmatmul.bf16.gmra.mxu2 %v8747_v31  ;;  %v2766_v42 = vpop.permute.xlu2 %2765  ;;  %v2971_v17 = vld [vmem:[#allocation3 + $0x50] sm:$0xff] }
 0x40f   : > { %2821 = vst.msk [vmem:[#allocation3 + $0x90] sm:$0xff] %vm2240_vm12, %v2766_v42  ;;  %v8791_v2 = vpack.c.bf16 %v2972_v22, %v2971_v17 }
 0x410   : > { %3505 = vmatpush.bf16.msrb.mxu3 %v7567_v43 }
 0x411   : > { %v3212_v27 = vunpack.c.l.b16 %v8791_v2  ;;  %v3213_v17 = vunpack.c.h.b16 %v8791_v2 }
 0x414   : > { %3506 = vmatpush.bf16.msrb.mxu3 %v7566_v47 }
 0x416   : > { %v2772_v61 = vpop.permute.xlu2 %2771 }
 0x417   : > { %2824 = vst.msk [vmem:[#allocation3 + $0xf0] sm:$0xff] %vm2240_vm12, %v2772_v61 }
 0x418   : > { %3507 = vmatpush.bf16.msrb.mxu3 %v7565_v33 }
 0x443   : > { %v2488_v52 = vpop.permute.xlu1 %2487  ;;  %v2486_v53 = vpop.permute.xlu0 %2485 }
 0x444   : > { %2538 = vst.msk [vmem:[#allocation3 + $0x128] sm:$0xff] %vm2240_vm12, %v2488_v52  ;;  %v2109_v52 = vld [vmem:[#allocation3 + $0x180] sm:$0xff] }
 0x445   : > { %2537 = vst.msk [vmem:[#allocation3 + $0x108] sm:$0xff] %vm2240_vm12, %v2486_v53 }
 0x44b   : > { %v7737_v39 = vpop.permute.xlu1 %7736  ;;  %v2998_v54 = vld [vmem:[#allocation3 + $0x128] sm:$0xff]  ;;  %v2764_v58 = vpop.permute.xlu0 %2763 }
 0x44c   : > { %v7739_v55 = vunpack.i.h.bf16 %v7737_v39  ;;  %v7738_v56 = vunpack.i.l.bf16 %v7737_v39  ;;  %v2994_v45 = vld [vmem:[#allocation3 + $0x108] sm:$0xff]  ;;  %v3059_v8 = vpack.c.bf16 %v2998_v54, %v8637_v3  ;;  %2820 = vst.msk [vmem:[#allocation3 + $0x70] sm:$0xff] %vm2240_vm12, %v2764_v58 }
 0x44d   : > { %v3057_v57 = vpack.c.bf16 %v2994_v45, %v8508_v24 }
 0x44e   : > { %2242 = vst.msk [vmem:[#allocation3 + $0x20] sm:$0xff] %vm2240_vm12, %v7739_v55  ;;  %v3238_v60 = vunpack.c.l.b16 %v3059_v8  ;;  %v3239_v48 = vunpack.c.h.b16 %v3059_v8 }
 0x44f   : > { %2241 = vst.msk [vmem:[#allocation3] sm:$0xff] %vm2240_vm12, %v7738_v56  ;;  %v3234_v63 = vunpack.c.l.b16 %v3057_v57  ;;  %v3235_v0 = vunpack.c.h.b16 %v3057_v57  ;;  %v7798_v56 = vld [vmem:[#allocation3 + $0x8] sm:$0xff]  ;;  %v2162_v57 = vrot.slane %v2109_v52, 1 }
 0x450   : > { %v8823_v58 = vrot.slane %v7798_v56, 1  ;;  %v3000_v56 = vld [vmem:[#allocation3 + $0x138] sm:$0xff] }
 0x451   : > { %v8787_v5 = vpack.c.b16 %v3238_v60, %v3234_v63  ;;  %v8789_v37 = vpack.c.b16 %v3239_v48, %v3235_v0 }
 0x453   : > { %3470 = vmatmul.bf16.gmra.mxu1 %v8787_v5  ;;  %3495 = vmatmul.bf16.gmra.mxu2 %v8789_v37  ;;  %v2770_v24 = vpop.permute.xlu1 %2769  ;;  %v2768_v3 = vpop.permute.xlu0 %2767  ;;  %v2975_v10 = vld [vmem:[#allocation3 + $0x70] sm:$0xff] }
 0x454   : > { %2823 = vst.msk [vmem:[#allocation3 + $0xd0] sm:$0xff] %vm2240_vm12, %v2770_v24  ;;  %v3048_v13 = vpack.c.bf16 %v2976_v15, %v2975_v10  ;;  %v2984_v10 = vld [vmem:[#allocation3 + $0xb8] sm:$0xff] }
 0x455   : > { %v8796_v11 = vld [vmem:[#allocation3 + $0x20] sm:$0xff]  ;;  %2822 = vst.msk [vmem:[#allocation3 + $0xb0] sm:$0xff] %vm2240_vm12, %v2768_v3  ;;  %v2979_v3 = vld [vmem:[#allocation3 + $0x90] sm:$0xff] }
 0x456   : > { %v2881_v16 = vrot.slane %v8796_v11, 6  ;;  %v2837_v20 = vld [vmem:[#allocation3] sm:$0xc0]  ;;  %v2717_v26 = vrot.slane %v8796_v11, 5  ;;  %v2429_v36 = vrot.slane %v8796_v11, 3  ;;  %v3216_v42 = vunpack.c.l.b16 %v3048_v13 }
 0x457   : > { %v2673_v21 = vld [vmem:[#allocation3] sm:$0xe0]  ;;  %v2880_v28 = vrot.slane %v2837_v20, 6  ;;  %v2305_v35 = vrot.slane %v8796_v11, 2  ;;  %v2593_v39 = vrot.slane %v8796_v11, 4  ;;  %v3217_v8 = vunpack.c.h.b16 %v3048_v13  ;;  %v2980_v20 = vld [vmem:[#allocation3 + $0x98] sm:$0xff] }
 0x458   : > { %v2716_v34 = vrot.slane %v2673_v21, 5  ;;  %v2385_v30 = vld [vmem:[#allocation3] sm:$0xf8]  ;;  %v2884_v61 = vsel %vm2879_vm0, %v2881_v16, %v2883_v12  ;;  %v2432_v49 = vsel %vm2427_vm4, %v2429_v36, %v2431_v23  ;;  %v8812_v51 = vpack.c.b16 %v3216_v42, %v3212_v27 }
 0x459   : > { %v2428_v29 = vrot.slane %v2385_v30, 3  ;;  %v2261_v4 = vld [vmem:[#allocation3] sm:$0xfc]  ;;  %v2882_v46 = vsel %vm2879_vm0, %v2880_v28, %v2881_v16  ;;  %2942 = vst.msk [vmem:[#allocation3 + $0x38] sm:$0xff] %vm1973_vm15, %v2884_v61  ;;  %v3459_v33 = vpop.f32.mrf.mxu1  ;;  %2471 = vrot.lane.b32.xlu0 %v2432_v49, %s7809_s23  ;;  %v2596_v60 = vsel %vm2591_vm2, %v2593_v39, %v2595_v25  ;;  %v2308_v0 = vsel %vm2303_vm6, %v2305_v35, %v2307_v1  ;;  %v2988_v61 = vld [vmem:[#allocation3 + $0xd8] sm:$0xff] }
 0x45a   : > { %v2549_v43 = vld [vmem:[#allocation3] sm:$0xf0]  ;;  %v2718_v47 = vsel %vm2715_vm9, %v2716_v34, %v2717_v26  ;;  %2941 = vst.msk [vmem:[#allocation3 + $0x18] sm:$0xff] %vm1973_vm15, %v2882_v46  ;;  %v2304_v53 = vrot.slane %v2261_v4, 2  ;;  %3508 = vmatmul.bf16.vlgmr.msrb.gmra.mxu3 %v8812_v51  ;;  %v8840_v25 = vpack.c.b16 %v3217_v8, %v3213_v17  ;;  %v2165_v13 = vsel %vm934_vm7, %v2162_v57, %v8823_v58 }
 0x45b   : > { %2757 = vrot.lane.b32.xlu1 %v2718_v47, %s7809_s23  ;;  %v2430_v12 = vsel %vm2427_vm4, %v2428_v29, %v2429_v36  ;;  %v2776_v23 = vpop.permute.xlu1 %2775  ;;  %v2592_v54 = vrot.slane %v2549_v43, 4  ;;  %v2774_v55 = vpop.permute.xlu0 %2773  ;;  %2654 = vst.msk [vmem:[#allocation3 + $0x30] sm:$0xff] %vm1973_vm15, %v2596_v60  ;;  %v2163_v1 = vsel %vm934_vm7, %v8364_v19, %v2162_v57  ;;  %v2720_v2 = vsel %vm2715_vm9, %v2717_v26, %v2719_v44  ;;  %v2987_v44 = vld [vmem:[#allocation3 + $0xd0] sm:$0xff]  ;;  %v2992_v47 = vld [vmem:[#allocation3 + $0xf8] sm:$0xff] }
 0x45c   : > { %2469 = vrot.lane.b32.xlu2 %v2430_v12, %s7809_s23  ;;  %2826 = vst.msk [vmem:[#allocation3 + $0x130] sm:$0xff] %vm2240_vm12, %v2776_v23  ;;  %v2306_v45 = vsel %vm2303_vm6, %v2304_v53, %v2305_v35  ;;  %v2983_v63 = vld [vmem:[#allocation3 + $0xb0] sm:$0xff]  ;;  %v3050_v21 = vpack.c.bf16 %v2980_v20, %v2979_v3  ;;  %v3054_v46 = vpack.c.bf16 %v2988_v61, %v2987_v44  ;;  %v7527_v20 = vld [vmem:[%s10129_s7 + $0x30] sm:$0xff]  ;;  %v7525_v44 = vld [vmem:[%s10129_s7 + $0x20] sm:$0xff] }
 0x45d   : > { %2825 = vst.msk [vmem:[#allocation3 + $0x110] sm:$0xff] %vm2240_vm12, %v2774_v55  ;;  %v2594_v48 = vsel %vm2591_vm2, %v2592_v54, %v2593_v39  ;;  %v3052_v16 = vpack.c.bf16 %v2984_v10, %v2983_v63  ;;  %v2991_v29 = vld [vmem:[#allocation3 + $0xf0] sm:$0xff]  ;;  %v2996_v55 = vld [vmem:[#allocation3 + $0x118] sm:$0xff] }
 0x45e   : > { %2365 = vst.msk [vmem:[#allocation3 + $0x8] sm:$0xff] %vm1973_vm15, %v2306_v45  ;;  %v3220_v28 = vunpack.c.l.b16 %v3050_v21  ;;  %v3221_v30 = vunpack.c.h.b16 %v3050_v21  ;;  %v3056_v49 = vpack.c.bf16 %v2992_v47, %v2991_v29  ;;  %v3229_v35 = vunpack.c.h.b16 %v3054_v46  ;;  %v7528_v10 = vld [vmem:[%s10129_s7 + $0x38] sm:$0xff]  ;;  %v7535_v21 = vld [vmem:[%s10129_s7 + $0x70] sm:$0xff] }
 0x45f   : > { %v3484_v22 = vpop.f32.mrf.mxu2  ;;  %2653 = vst.msk [vmem:[#allocation3 + $0x10] sm:$0xff] %vm1973_vm15, %v2594_v48  ;;  %v3224_v27 = vunpack.c.l.b16 %v3052_v16  ;;  %v3225_v7 = vunpack.c.h.b16 %v3052_v16  ;;  %3740 = vmatpush.bf16.msra.mxu2 %v7528_v10  ;;  %v7524_v61 = vld [vmem:[%s10129_s7 + $0x18] sm:$0xff]  ;;  %v7523_v47 = vld [vmem:[%s10129_s7 + $0x10] sm:$0xff] }
 0x460   : > { %v8837_v24 = vadd.f32 %v3484_v22, %v3459_v33  ;;  %2366 = vst.msk [vmem:[#allocation3 + $0x28] sm:$0xff] %vm1973_vm15, %v2308_v0  ;;  %v3228_v33 = vunpack.c.l.b16 %v3054_v46  ;;  %v3232_v52 = vunpack.c.l.b16 %v3056_v49  ;;  %v3233_v54 = vunpack.c.h.b16 %v3056_v49  ;;  %v7532_v29 = vld [vmem:[%s10129_s7 + $0x58] sm:$0xff]  ;;  %v7531_v49 = vld [vmem:[%s10129_s7 + $0x50] sm:$0xff] }
 0x461   : > { %v3461_v15 = vpop.f32.mrf.mxu1  ;;  %2202 = vrot.lane.b32.xlu0 %v2163_v1, %s7809_s23  ;;  %v8855_v36 = vpack.c.b16 %v3224_v27, %v3220_v28  ;;  %v8860_v43 = vpack.c.b16 %v3225_v7, %v3221_v30  ;;  %v7543_v27 = vld [vmem:[%s10129_s7 + $0xb0] sm:$0xff]  ;;  %v7534_v28 = vld [vmem:[%s10129_s7 + $0x68] sm:$0xff]  ;;  %v7541_v30 = vld [vmem:[%s10129_s7 + $0xa0] sm:$0xff] }
 0x462   : > { %v8864_v53 = vpack.c.b16 %v3232_v52, %v3228_v33  ;;  %v8867_v45 = vpack.c.b16 %v3233_v54, %v3229_v35  ;;  %v7536_v15 = vld [vmem:[%s10129_s7 + $0x78] sm:$0xff]  ;;  %v7539_v33 = vld [vmem:[%s10129_s7 + $0x90] sm:$0xff]  ;;  %v7522_v52 = vld [vmem:[%s10129_s7 + $0x8] sm:$0xff] }
 0x463   : > { %2204 = vrot.lane.b32.xlu1 %v2165_v13, %s7809_s23  ;;  %6484 = vmatmul.msk.bf16.vlgmr.msra.gmra.mxu1 %vm1973_vm15, %v8840_v25  ;;  %v2999_v39 = vld [vmem:[#allocation3 + $0x130] sm:$0xff]  ;;  %v7530_v35 = vld [vmem:[%s10129_s7 + $0x48] sm:$0xff] }
 0x464   : > { %2759 = vrot.lane.b32.xlu2 %v2720_v2, %s7809_s23  ;;  %v2995_v23 = vld [vmem:[#allocation3 + $0x110] sm:$0xff]  ;;  %v3060_v57 = vpack.c.bf16 %v3000_v56, %v2999_v39  ;;  %3765 = vmatpush.bf16.msra.mxu3 %v7536_v15  ;;  %v7546_v39 = vld [vmem:[%s10129_s7 + $0xc8] sm:$0xff]  ;;  %v7521_v56 = vld [vmem:[%s10129_s7] sm:$0xff] }
 0x465   : > { %v3058_v8 = vpack.c.bf16 %v2996_v55, %v2995_v23  ;;  %v7544_v13 = vld [vmem:[%s10129_s7 + $0xb8] sm:$0xff]  ;;  %3741 = vmatpush.bf16.msra.mxu2 %v7527_v20  ;;  %v7538_v23 = vld [vmem:[%s10129_s7 + $0x88] sm:$0xff]  ;;  %v2968_v15 = vld [vmem:[#allocation3 + $0x38] sm:$0xff] }
 0x466   : > { %v3240_v48 = vunpack.c.l.b16 %v3060_v57  ;;  %v3241_v17 = vunpack.c.h.b16 %v3060_v57  ;;  %3790 = vmatpush.bf16.msrb.mxu0 %v7544_v13  ;;  %v7548_v46 = vld [vmem:[%s10129_s7 + $0xd8] sm:$0xff]  ;;  %v7537_v57 = vld [vmem:[%s10129_s7 + $0x80] sm:$0xff] }
 0x467   : > { %v3486_v19 = vpop.f32.mrf.mxu2  ;;  %v3236_v60 = vunpack.c.l.b16 %v3058_v8  ;;  %v3237_v0 = vunpack.c.h.b16 %v3058_v8  ;;  %3819 = vmatpush.bf16.msrb.mxu1 %v7548_v46  ;;  %v7529_v8 = vld [vmem:[%s10129_s7 + $0x40] sm:$0xff] }
 0x468   : > { %3766 = vmatpush.bf16.msra.mxu3 %v7535_v21  ;;  %v7526_v19 = vld [vmem:[%s10129_s7 + $0x28] sm:$0xff] }
 0x469   : > { %v3463_v34 = vpop.f32.mrf.mxu1  ;;  %v8871_v63 = vpack.c.b16 %v3240_v48, %v3236_v60  ;;  %v8874_v22 = vpack.c.b16 %v3241_v17, %v3237_v0  ;;  %3742 = vmatpush.bf16.msra.mxu2 %v7526_v19  ;;  %v7545_v60 = vld [vmem:[%s10129_s7 + $0xc0] sm:$0xff] }
 0x46a   : > { %3512 = vmatmul.bf16.gmra.mxu3 %v8855_v36  ;;  %3791 = vmatpush.bf16.msrb.mxu0 %v7543_v27  ;;  %v2964_v19 = vld [vmem:[#allocation3 + $0x18] sm:$0xff] }
 0x46c   : > { %3767 = vmatpush.bf16.msra.mxu3 %v7534_v28 }
 0x46d   : > { %3743 = vmatpush.bf16.msra.mxu2 %v7525_v44 }
 0x46f   : > { %v3488_v26 = vpop.f32.mrf.mxu2 }
 0x470   : > { %v8858_v42 = vadd.f32 %v3488_v26, %v3463_v34  ;;  %v7542_v34 = vld [vmem:[%s10129_s7 + $0xa8] sm:$0xff]  ;;  %v7533_v26 = vld [vmem:[%s10129_s7 + $0x60] sm:$0xff] }
 0x471   : > { %v3465_v4 = vpop.f32.mrf.mxu1  ;;  %3792 = vmatpush.bf16.msrb.mxu0 %v7542_v34  ;;  %3768 = vmatpush.bf16.msra.mxu3 %v7533_v26 }
 0x472   : > { %v7540_v4 = vld [vmem:[%s10129_s7 + $0x98] sm:$0xff]  ;;  %3744 = vmatpush.bf16.msra.mxu2 %v7524_v61 }
 0x473   : > { %6485 = vmatmul.msk.bf16.gmra.mxu1 %vm1973_vm15, %v8860_v43 }
 0x475   : > { %3793 = vmatpush.bf16.msrb.mxu0 %v7541_v30  ;;  %3769 = vmatpush.bf16.msra.mxu3 %v7532_v29 }
 0x476   : > { %3745 = vmatpush.bf16.msra.mxu2 %v7523_v47 }
 0x477   : > { %v3490_v12 = vpop.f32.mrf.mxu2 }
 0x478   : > { %v7547_v12 = vld [vmem:[%s10129_s7 + $0xd0] sm:$0xff] }
 0x479   : > { %3794 = vmatpush.bf16.msrb.mxu0 %v7540_v4  ;;  %3770 = vmatpush.bf16.msra.mxu3 %v7531_v49 }
 0x47a   : > { %3516 = vmatmul.bf16.gmra.mxu3 %v8864_v53  ;;  %3820 = vmatpush.bf16.msrb.mxu1 %v7547_v12 }
 0x47b   : > { %3746 = vmatpush.bf16.msra.mxu2 %v7522_v52 }
 0x47d   : > { %3795 = vmatpush.bf16.msrb.mxu0 %v7539_v33  ;;  %3771 = vmatpush.bf16.msra.mxu3 %v7530_v35 }
 0x47e   : > { %3821 = vmatpush.bf16.msrb.mxu1 %v7546_v39 }
 0x47f   : > { %3747 = vmatpush.bf16.msra.mxu2 %v7521_v56 }
 0x481   : > { %3796 = vmatpush.bf16.msrb.mxu0 %v7538_v23  ;;  %3772 = vmatpush.bf16.msra.mxu3 %v7529_v8 }
 0x482   : > { %3822 = vmatpush.bf16.msrb.mxu1 %v7545_v60  ;;  %v7600_v60 = vld [vmem:[%s10129_s7 + $0x278] sm:$0xff] }
 0x483   : > { %6486 = vmatmul.msk.bf16.gmra.mxu1 %vm1973_vm15, %v8867_v45 }
 0x485   : > { %3797 = vmatpush.bf16.msrb.mxu0 %v7537_v57 }
 0x489   : > { %4137 = vmatpush.bf16.msra.mxu0 %v7600_v60  ;;  %v7579_v60 = vld [vmem:[%s10129_s7 + $0x1d0] sm:$0xff] }
 0x48a   : > { %3520 = vmatmul.bf16.gmra.mxu3 %v8871_v63 }
 0x48b   : > { %v3467_v3 = vpop.f32.mrf.mxu1 }
 0x491   : > { %v3492_v1 = vpop.f32.mrf.mxu2 }
 0x492   : > { %v8887_v16 = vadd.f32 %v3492_v1, %v3467_v3  ;;  %v2961_v1 = vld [vmem:[#allocation3] sm:$0xff] }
 0x493   : > { %6487 = vmatmul.msk.bf16.gmra.mxu1 %vm1973_vm15, %v8874_v22  ;;  %v3469_v2 = vpop.f32.mrf.mxu1 }
 0x499   : > { %v3494_v7 = vpop.f32.mrf.mxu2 }
 0x4b6   : > { %v2470_v54 = vpop.permute.xlu2 %2469 }
 0x4b7   : > { %2529 = vst.msk [vmem:[#allocation3 + $0x8] sm:$0xff] %vm2240_vm12, %v2470_v54 }
 0x4be   : > { %v2760_v55 = vpop.permute.xlu2 %2759  ;;  %v2962_v10 = vld [vmem:[#allocation3 + $0x8] sm:$0xff] }
 0x4bf   : > { %2818 = vst.msk [vmem:[#allocation3 + $0x30] sm:$0xff] %vm2240_vm12, %v2760_v55  ;;  %v3041_v21 = vpack.c.bf16 %v2962_v10, %v2961_v1  ;;  %v7592_v55 = vld [vmem:[%s10129_s7 + $0x238] sm:$0xff] }
 0x4c0   : > { %4112 = vmatpush.bf16.msrb.mxu3 %v7592_v55 }
 0x4c1   : > { %v3554_v47 = vunpack.c.l.b16 %v3041_v21  ;;  %v3555_v33 = vunpack.c.h.b16 %v3041_v21 }
 0x4c6   : > { %v2967_v17 = vld [vmem:[#allocation3 + $0x30] sm:$0xff] }
 0x4c7   : > { %v3044_v13 = vpack.c.bf16 %v2968_v15, %v2967_v17 }
 0x4c9   : > { %v3560_v26 = vunpack.c.l.b16 %v3044_v13  ;;  %v3561_v4 = vunpack.c.h.b16 %v3044_v13 }
 0x4cb   : > { %v2472_v0 = vpop.permute.xlu0 %2471 }
 0x4cc   : > { %2530 = vst.msk [vmem:[#allocation3 + $0x28] sm:$0xff] %vm2240_vm12, %v2472_v0 }
 0x4cd   : > { %v2758_v48 = vpop.permute.xlu1 %2757 }
 0x4ce   : > { %2817 = vst.msk [vmem:[#allocation3 + $0x10] sm:$0xff] %vm2240_vm12, %v2758_v48 }
 0x4d0   : > { %v3471_v3 = vpop.f32.mrf.mxu1 }
 0x4d3   : > { %v2203_v20 = vpop.permute.xlu0 %2202  ;;  %v2966_v28 = vld [vmem:[#allocation3 + $0x28] sm:$0xff] }
 0x4d4   : > { %2252 = vst.msk [vmem:[#allocation3 + $0x160] sm:$0xff] %vm2240_vm12, %v2203_v20  ;;  %v3043_v44 = vpack.c.bf16 %v2966_v28, %v8796_v11  ;;  %v7584_v11 = vld [vmem:[%s10129_s7 + $0x1f8] sm:$0xff] }
 0x4d5   : > { %v2205_v2 = vpop.permute.xlu1 %2204  ;;  %v2963_v27 = vld [vmem:[#allocation3 + $0x10] sm:$0xff]  ;;  %4087 = vmatpush.bf16.msrb.mxu2 %v7584_v11 }
 0x4d6   : > { %2253 = vst.msk [vmem:[#allocation3 + $0x180] sm:$0xff] %vm2240_vm12, %v2205_v2  ;;  %v3042_v34 = vpack.c.bf16 %v2964_v19, %v2963_v27  ;;  %v3496_v7 = vpop.f32.mrf.mxu2  ;;  %v3558_v49 = vunpack.c.l.b16 %v3043_v44  ;;  %v3559_v12 = vunpack.c.h.b16 %v3043_v44  ;;  %v7599_v44 = vld [vmem:[%s10129_s7 + $0x270] sm:$0xff] }
 0x4d7   : > { %v8971_v30 = vadd.f32 %v3496_v7, %v3471_v3  ;;  %v7591_v7 = vld [vmem:[%s10129_s7 + $0x230] sm:$0xff]  ;;  %4138 = vmatpush.bf16.msra.mxu0 %v7599_v44 }
 0x4d8   : > { %v3556_v61 = vunpack.c.l.b16 %v3042_v34  ;;  %v3557_v29 = vunpack.c.h.b16 %v3042_v34  ;;  %v3473_v46 = vpop.f32.mrf.mxu1  ;;  %v3562_v23 = vpack.c.b16 %v3558_v49, %v3554_v47  ;;  %v3563_v39 = vpack.c.b16 %v3559_v12, %v3555_v33  ;;  %4113 = vmatpush.bf16.msrb.mxu3 %v7591_v7  ;;  %v7581_v12 = vld [vmem:[%s10129_s7 + $0x1e0] sm:$0xff] }
 0x4da   : > { %v3564_v52 = vpack.c.b16 %v3560_v26, %v3556_v61  ;;  %v3565_v35 = vpack.c.b16 %v3561_v4, %v3557_v29  ;;  %3748 = vmatmul.bf16.vlgmr.msra.gmra.mxu2 %v3562_v23  ;;  %3773 = vmatmul.bf16.vlgmr.msra.gmra.mxu3 %v3563_v39  ;;  %v7582_v29 = vld [vmem:[%s10129_s7 + $0x1e8] sm:$0xff]  ;;  %v7580_v23 = vld [vmem:[%s10129_s7 + $0x1d8] sm:$0xff] }
 0x4db   : > { %v8983_v8 = vld [vmem:[#allocation3 + $0x160] sm:$0xff]  ;;  %4139 = vmatpush.bf16.msra.mxu0 %v7598_v59  ;;  %v7588_v39 = vld [vmem:[%s10129_s7 + $0x218] sm:$0xff] }
 0x4dc   : > { %3798 = vmatmul.bf16.vlgmr.msrb.gmra.mxu0 %v3564_v52  ;;  %6600 = vmatmul.msk.bf16.vlgmr.msrb.gmra.mxu1 %vm1973_vm15, %v3565_v35  ;;  %v2901_v0 = vrot.slane %v8983_v8, 6  ;;  %v2737_v10 = vrot.slane %v8983_v8, 5  ;;  %v2449_v15 = vrot.slane %v8983_v8, 3  ;;  %v2325_v13 = vrot.slane %v8983_v8, 2  ;;  %v7590_v4 = vld [vmem:[%s10129_s7 + $0x228] sm:$0xff]  ;;  %v7589_v52 = vld [vmem:[%s10129_s7 + $0x220] sm:$0xff] }
 0x4dd   : > { %v8974_v54 = vld [vmem:[#allocation3 + $0x180] sm:$0xff]  ;;  %v3509_v3 = vpop.f32.mrf.mxu3  ;;  %v2613_v2 = vrot.slane %v8983_v8, 4  ;;  %4114 = vmatpush.bf16.msrb.mxu3 %v7590_v4  ;;  %v7597_v35 = vld [vmem:[%s10129_s7 + $0x260] sm:$0xff]  ;;  %v7612_v59 = vld [vmem:[%s10129_s7 + $0x2d8] sm:$0xff] }
 0x4de   : > { %v2903_v56 = vrot.slane %v8974_v54, 6  ;;  %v2451_v57 = vrot.slane %v8974_v54, 3  ;;  %v2615_v48 = vrot.slane %v8974_v54, 4  ;;  %v3498_v17 = vpop.f32.mrf.mxu2  ;;  %v3510_v1 = vadd.f32 %v3509_v3, %v8837_v24  ;;  %v7602_v3 = vld [vmem:[%s10129_s7 + $0x288] sm:$0xff] }
 0x4df   : > { %v2327_v20 = vrot.slane %v8974_v54, 2  ;;  %v2902_v21 = vsel %vm2879_vm0, %v2899_v14, %v2901_v0  ;;  %v2738_v28 = vsel %vm2715_vm9, %v2735_v62, %v2737_v10  ;;  %v2450_v14 = vsel %vm2427_vm4, %v2447_v6, %v2449_v15  ;;  %v7583_v62 = vld [vmem:[%s10129_s7 + $0x1f0] sm:$0xff]  ;;  %4140 = vmatpush.bf16.msra.mxu0 %v7597_v35  ;;  %v7609_v35 = vld [vmem:[%s10129_s7 + $0x2c0] sm:$0xff] }
 0x4e0   : > { %v2904_v27 = vsel %vm2879_vm0, %v2901_v0, %v2903_v56  ;;  %v3534_v19 = vpop.f32.mrf.mxu1  ;;  %v2452_v24 = vsel %vm2427_vm4, %v2449_v15, %v2451_v57  ;;  %2951 = vst.msk [vmem:[#allocation3 + $0x158] sm:$0xff] %vm1973_vm15, %v2902_v21  ;;  %2777 = vrot.lane.b32.xlu1 %v2738_v28, %s7809_s23  ;;  %2489 = vrot.lane.b32.xlu2 %v2450_v14, %s7809_s23  ;;  %v2739_v46 = vrot.slane %v8974_v54, 5  ;;  %v7587_v0 = vld [vmem:[%s10129_s7 + $0x210] sm:$0xff]  ;;  %v7586_v15 = vld [vmem:[%s10129_s7 + $0x208] sm:$0xff] }
 0x4e1   : > { %v9010_v34 = vadd.f32 %v3534_v19, %v3510_v1  ;;  %2491 = vrot.lane.b32.xlu0 %v2452_v24, %s7809_s23  ;;  %2952 = vst.msk [vmem:[#allocation3 + $0x178] sm:$0xff] %vm1973_vm15, %v2904_v27  ;;  %v2326_v6 = vsel %vm2303_vm6, %v2323_v18, %v2325_v13  ;;  %v2616_v26 = vsel %vm2591_vm2, %v2613_v2, %v2615_v48  ;;  %v7595_v17 = vld [vmem:[%s10129_s7 + $0x250] sm:$0xff]  ;;  %v7594_v1 = vld [vmem:[%s10129_s7 + $0x248] sm:$0xff]  ;;  %v7577_v21 = vld [vmem:[%s10129_s7 + $0x1c0] sm:$0xff] }
 0x4e2   : > { %v2614_v61 = vsel %vm2591_vm2, %v2611_v41, %v2613_v2  ;;  %4088 = vmatpush.bf16.msrb.mxu2 %v7583_v62  ;;  %2375 = vst.msk [vmem:[#allocation3 + $0x148] sm:$0xff] %vm1973_vm15, %v2326_v6  ;;  %v2328_v18 = vsel %vm2303_vm6, %v2325_v13, %v2327_v20  ;;  %v9053_v41 = vpack.i.bf16 %v8823_v58, %v8823_v58  ;;  %v7585_v27 = vld [vmem:[%s10129_s7 + $0x200] sm:$0xff] }
 0x4e3   : > { %2664 = vst.msk [vmem:[#allocation3 + $0x170] sm:$0xff] %vm1973_vm15, %v2616_v26  ;;  %v2740_v33 = vsel %vm2715_vm9, %v2737_v10, %v2739_v46  ;;  %4115 = vmatpush.bf16.msrb.mxu3 %v7589_v52  ;;  %v7578_v10 = vld [vmem:[%s10129_s7 + $0x1c8] sm:$0xff]  ;;  %v7593_v19 = vld [vmem:[%s10129_s7 + $0x240] sm:$0xff] }
 0x4e4   : > { %2663 = vst.msk [vmem:[#allocation3 + $0x150] sm:$0xff] %vm1973_vm15, %v2614_v61  ;;  %v7601_v28 = vld [vmem:[%s10129_s7 + $0x280] sm:$0xff] }
 0x4e5   : > { %v3511_v47 = vpop.f32.mrf.mxu3  ;;  %2376 = vst.msk [vmem:[#allocation3 + $0x168] sm:$0xff] %vm1973_vm15, %v2328_v18 }
 0x4e6   : > { %4089 = vmatpush.bf16.msrb.mxu2 %v7582_v29  ;;  %v7628_v47 = vld [vmem:[%s10129_s7 + $0x358] sm:$0xff] }
 0x4e7   : > { %4116 = vmatpush.bf16.msrb.mxu3 %v7588_v39  ;;  %v7625_v39 = vld [vmem:[%s10129_s7 + $0x340] sm:$0xff] }
 0x4e8   : > { %v3536_v49 = vpop.f32.mrf.mxu1  ;;  %2779 = vrot.lane.b32.xlu2 %v2740_v33, %s7809_s23  ;;  %v7626_v33 = vld [vmem:[%s10129_s7 + $0x348] sm:$0xff] }
 0x4e9   : > { %7741 = vrot.lane.b32.xlu0 %v9053_v41, %s7809_s23  ;;  %v7618_v49 = vld [vmem:[%s10129_s7 + $0x308] sm:$0xff] }
 0x4ea   : > { %3752 = vmatmul.bf16.gmra.mxu2 %v8697_v50  ;;  %3777 = vmatmul.bf16.gmra.mxu3 %v8699_v40  ;;  %v7596_v50 = vld [vmem:[%s10129_s7 + $0x258] sm:$0xff] }
 0x4eb   : > { %4090 = vmatpush.bf16.msrb.mxu2 %v7581_v12  ;;  %4141 = vmatpush.bf16.msra.mxu0 %v7596_v50  ;;  %v7632_v50 = vld [vmem:[%s10129_s7 + $0x378] sm:$0xff] }
 0x4ec   : > { %3802 = vmatmul.bf16.gmra.mxu0 %v8812_v51  ;;  %6601 = vmatmul.msk.bf16.gmra.mxu1 %vm1973_vm15, %v8840_v25  ;;  %v7604_v51 = vld [vmem:[%s10129_s7 + $0x298] sm:$0xff] }
 0x4ed   : > { %v3513_v11 = vpop.f32.mrf.mxu3  ;;  %4166 = vmatpush.bf16.msra.mxu1 %v7604_v51  ;;  %4117 = vmatpush.bf16.msrb.mxu3 %v7587_v0  ;;  %v7608_v51 = vld [vmem:[%s10129_s7 + $0x2b8] sm:$0xff]  ;;  %v7615_v0 = vld [vmem:[%s10129_s7 + $0x2f0] sm:$0xff] }
 0x4ee   : > { %v3514_v40 = vadd.f32 %v3513_v11, %v8858_v42  ;;  %v7603_v42 = vld [vmem:[%s10129_s7 + $0x290] sm:$0xff]  ;;  %v7616_v11 = vld [vmem:[%s10129_s7 + $0x2f8] sm:$0xff] }
 0x4ef   : > { %4091 = vmatpush.bf16.msrb.mxu2 %v7580_v23  ;;  %4142 = vmatpush.bf16.msra.mxu0 %v7595_v17  ;;  %v7617_v23 = vld [vmem:[%s10129_s7 + $0x300] sm:$0xff]  ;;  %v7623_v17 = vld [vmem:[%s10129_s7 + $0x330] sm:$0xff] }
 0x4f0   : > { %v3538_v25 = vpop.f32.mrf.mxu1 }
 0x4f1   : > { %v9091_v55 = vadd.f32 %v3538_v25, %v3514_v40  ;;  %4167 = vmatpush.bf16.msra.mxu1 %v7603_v42  ;;  %4118 = vmatpush.bf16.msrb.mxu3 %v7586_v15  ;;  %v7624_v40 = vld [vmem:[%s10129_s7 + $0x338] sm:$0xff]  ;;  %v7631_v25 = vld [vmem:[%s10129_s7 + $0x370] sm:$0xff]  ;;  %v7606_v15 = vld [vmem:[%s10129_s7 + $0x2a8] sm:$0xff] }
 0x4f3   : > { %4092 = vmatpush.bf16.msrb.mxu2 %v7579_v60  ;;  %4143 = vmatpush.bf16.msra.mxu0 %v7594_v1  ;;  %v7607_v60 = vld [vmem:[%s10129_s7 + $0x2b0] sm:$0xff]  ;;  %v7622_v1 = vld [vmem:[%s10129_s7 + $0x328] sm:$0xff] }
 0x4f5   : > { %v3515_v13 = vpop.f32.mrf.mxu3  ;;  %4168 = vmatpush.bf16.msra.mxu1 %v7602_v3  ;;  %4119 = vmatpush.bf16.msrb.mxu3 %v7585_v27 }
 0x4f6   : > { %v7614_v13 = vld [vmem:[%s10129_s7 + $0x2e8] sm:$0xff] }
 0x4f7   : > { %4093 = vmatpush.bf16.msrb.mxu2 %v7578_v10  ;;  %4144 = vmatpush.bf16.msra.mxu0 %v7593_v19  ;;  %v7630_v10 = vld [vmem:[%s10129_s7 + $0x368] sm:$0xff] }
 0x4f8   : > { %v3540_v2 = vpop.f32.mrf.mxu1 }
 0x4f9   : > { %4169 = vmatpush.bf16.msra.mxu1 %v7601_v28 }
 0x4fa   : > { %3756 = vmatmul.bf16.gmra.mxu2 %v8725_v9  ;;  %3781 = vmatmul.bf16.gmra.mxu3 %v8727_v32 }
 0x4fb   : > { %4094 = vmatpush.bf16.msrb.mxu2 %v7577_v21  ;;  %4488 = vmatpush.bf16.msrb.mxu0 %v7628_v47  ;;  %v7629_v21 = vld [vmem:[%s10129_s7 + $0x360] sm:$0xff] }
 0x4fc   : > { %3806 = vmatmul.bf16.gmra.mxu0 %v8855_v36  ;;  %6602 = vmatmul.msk.bf16.gmra.mxu1 %vm1973_vm15, %v8860_v43 }
 0x4fd   : > { %v3517_v24 = vpop.f32.mrf.mxu3  ;;  %4517 = vmatpush.bf16.msrb.mxu1 %v7632_v50 }
 0x4fe   : > { %v3518_v14 = vadd.f32 %v3517_v24, %v8887_v16  ;;  %v3008_v24 = vld [vmem:[#allocation3 + $0x178] sm:$0xff] }
 0x4ff   : > { %4438 = vmatpush.bf16.msra.mxu2 %v7612_v59 }
 0x500   : > { %v3542_v62 = vpop.f32.mrf.mxu1 }
 0x501   : > { %v9135_v7 = vadd.f32 %v3542_v62, %v3518_v14  ;;  %4518 = vmatpush.bf16.msrb.mxu1 %v7631_v25  ;;  %v7605_v14 = vld [vmem:[%s10129_s7 + $0x2a0] sm:$0xff] }
 0x502   : > { %v7613_v62 = vld [vmem:[%s10129_s7 + $0x2e0] sm:$0xff] }
 0x505   : > { %v3519_v44 = vpop.f32.mrf.mxu3  ;;  %4519 = vmatpush.bf16.msrb.mxu1 %v7630_v10 }
 0x506   : > { %v3001_v44 = vld [vmem:[#allocation3 + $0x140] sm:$0xff] }
 0x508   : > { %v3544_v6 = vpop.f32.mrf.mxu1 }
 0x509   : > { %4520 = vmatpush.bf16.msrb.mxu1 %v7629_v21 }
 0x50a   : > { %3760 = vmatmul.bf16.gmra.mxu2 %v8745_v38  ;;  %3785 = vmatmul.bf16.gmra.mxu3 %v8747_v31 }
 0x50c   : > { %3810 = vmatmul.bf16.gmra.mxu0 %v8864_v53  ;;  %6603 = vmatmul.msk.bf16.gmra.mxu1 %vm1973_vm15, %v8867_v45 }
 0x50d   : > { %v3521_v26 = vpop.f32.mrf.mxu3 }
 0x50e   : > { %v3522_v61 = vadd.f32 %v3521_v26, %v8971_v30  ;;  %v7620_v30 = vld [vmem:[%s10129_s7 + $0x318] sm:$0xff]  ;;  %v7621_v26 = vld [vmem:[%s10129_s7 + $0x320] sm:$0xff] }
 0x50f   : > { %4463 = vmatpush.bf16.msra.mxu3 %v7620_v30 }
 0x510   : > { %v3546_v29 = vpop.f32.mrf.mxu1 }
 0x511   : > { %v9143_v4 = vadd.f32 %v3546_v29, %v3522_v61 }
 0x515   : > { %v3523_v16 = vpop.f32.mrf.mxu3 }
 0x518   : > { %v3548_v18 = vpop.f32.mrf.mxu1 }
 0x519   : > { %v3004_v18 = vld [vmem:[#allocation3 + $0x158] sm:$0xff] }
 0x51a   : > { %4095 = vmatmul.bf16.vlgmr.msrb.gmra.mxu2 %v8725_v9  ;;  %4120 = vmatmul.bf16.vlgmr.msrb.gmra.mxu3 %v8727_v32  ;;  %v7611_v9 = vld [vmem:[%s10129_s7 + $0x2d0] sm:$0xff] }
 0x51b   : > { %v7619_v32 = vld [vmem:[%s10129_s7 + $0x310] sm:$0xff]  ;;  %4439 = vmatpush.bf16.msra.mxu2 %v7611_v9 }
 0x51c   : > { %4145 = vmatmul.bf16.vlgmr.msra.gmra.mxu0 %v8855_v36  ;;  %6772 = vmatmul.msk.bf16.vlgmr.msra.gmra.mxu1 %vm1973_vm15, %v8860_v43  ;;  %v7627_v36 = vld [vmem:[%s10129_s7 + $0x350] sm:$0xff]  ;;  %v7610_v43 = vld [vmem:[%s10129_s7 + $0x2c8] sm:$0xff] }
 0x51d   : > { %4464 = vmatpush.bf16.msra.mxu3 %v7619_v32  ;;  %4489 = vmatpush.bf16.msrb.mxu0 %v7627_v36 }
 0x51f   : > { %4440 = vmatpush.bf16.msra.mxu2 %v7610_v43 }
 0x521   : > { %4465 = vmatpush.bf16.msra.mxu3 %v7618_v49  ;;  %4490 = vmatpush.bf16.msrb.mxu0 %v7626_v33 }
 0x523   : > { %4441 = vmatpush.bf16.msra.mxu2 %v7609_v35 }
 0x525   : > { %4466 = vmatpush.bf16.msra.mxu3 %v7617_v23  ;;  %4491 = vmatpush.bf16.msrb.mxu0 %v7625_v39 }
 0x527   : > { %4442 = vmatpush.bf16.msra.mxu2 %v7608_v51 }
 0x529   : > { %4467 = vmatpush.bf16.msra.mxu3 %v7616_v11  ;;  %4492 = vmatpush.bf16.msrb.mxu0 %v7624_v40 }
 0x52a   : > { %4099 = vmatmul.bf16.gmra.mxu2 %v8745_v38  ;;  %4124 = vmatmul.bf16.gmra.mxu3 %v8747_v31 }
 0x52b   : > { %4443 = vmatpush.bf16.msra.mxu2 %v7607_v60 }
 0x52c   : > { %4149 = vmatmul.bf16.gmra.mxu0 %v8864_v53  ;;  %6773 = vmatmul.msk.bf16.gmra.mxu1 %vm1973_vm15, %v8867_v45 }
 0x52d   : > { %4468 = vmatpush.bf16.msra.mxu3 %v7615_v0  ;;  %4493 = vmatpush.bf16.msrb.mxu0 %v7623_v17 }
 0x52f   : > { %4444 = vmatpush.bf16.msra.mxu2 %v7606_v15 }
 0x531   : > { %4469 = vmatpush.bf16.msra.mxu3 %v7614_v13  ;;  %4494 = vmatpush.bf16.msrb.mxu0 %v7622_v1 }
 0x533   : > { %4445 = vmatpush.bf16.msra.mxu2 %v7605_v14 }
 0x535   : > { %4470 = vmatpush.bf16.msra.mxu3 %v7613_v62  ;;  %4495 = vmatpush.bf16.msrb.mxu0 %v7621_v26 }
 0x53a   : > { %v2490_v12 = vpop.permute.xlu2 %2489  ;;  %4103 = vmatmul.bf16.gmra.mxu2 %v8787_v5  ;;  %4128 = vmatmul.bf16.gmra.mxu3 %v8789_v37 }
 0x53b   : > { %2539 = vst.msk [vmem:[#allocation3 + $0x148] sm:$0xff] %vm2240_vm12, %v2490_v12 }
 0x53c   : > { %4153 = vmatmul.bf16.gmra.mxu0 %v8871_v63  ;;  %6774 = vmatmul.msk.bf16.gmra.mxu1 %vm1973_vm15, %v8874_v22 }
 0x542   : > { %v2780_v52 = vpop.permute.xlu2 %2779  ;;  %v3002_v28 = vld [vmem:[#allocation3 + $0x148] sm:$0xff] }
 0x543   : > { %2828 = vst.msk [vmem:[#allocation3 + $0x170] sm:$0xff] %vm2240_vm12, %v2780_v52  ;;  %v3061_v29 = vpack.c.bf16 %v3002_v28, %v3001_v44 }
 0x545   : > { %v3901_v35 = vunpack.c.l.b16 %v3061_v29  ;;  %v3902_v39 = vunpack.c.h.b16 %v3061_v29 }
 0x54a   : > { %v3007_v2 = vld [vmem:[#allocation3 + $0x170] sm:$0xff] }
 0x54b   : > { %v3064_v6 = vpack.c.bf16 %v3008_v24, %v3007_v2 }
 0x54d   : > { %v3907_v43 = vunpack.c.l.b16 %v3064_v6  ;;  %v3908_v33 = vunpack.c.h.b16 %v3064_v6 }
 0x552   : > { %v2778_v42 = vpop.permute.xlu1 %2777 }
 0x553   : > { %v2492_v3 = vpop.permute.xlu0 %2491  ;;  %2827 = vst.msk [vmem:[#allocation3 + $0x150] sm:$0xff] %vm2240_vm12, %v2778_v42 }
 0x554   : > { %2540 = vst.msk [vmem:[#allocation3 + $0x168] sm:$0xff] %vm2240_vm12, %v2492_v3 }
 0x559   : > { %v3799_v27 = vpop.f32.mrf.mxu0  ;;  %v3824_v19 = vpop.f32.mrf.mxu1 }
 0x55a   : > { %v3003_v16 = vld [vmem:[#allocation3 + $0x150] sm:$0xff] }
 0x55b   : > { %v7742_v61 = vpop.permute.xlu0 %7741  ;;  %v3006_v47 = vld [vmem:[#allocation3 + $0x168] sm:$0xff]  ;;  %v3062_v9 = vpack.c.bf16 %v3004_v18, %v3003_v16 }
 0x55c   : > { %v7744_v59 = vunpack.i.h.bf16 %v7742_v61  ;;  %v7743_v30 = vunpack.i.l.bf16 %v7742_v61  ;;  %v3063_v32 = vpack.c.bf16 %v3006_v47, %v8983_v8 }
 0x55d   : > { %v3903_v36 = vunpack.c.l.b16 %v3062_v9  ;;  %v3904_v49 = vunpack.c.h.b16 %v3062_v9  ;;  %v3749_v12 = vpop.f32.mrf.mxu2  ;;  %v3774_v52 = vpop.f32.mrf.mxu3 }
 0x55e   : > { %2255 = vst.msk [vmem:[#allocation3 + $0x1c0] sm:$0xff] %vm2240_vm12, %v7744_v59  ;;  %v3905_v23 = vunpack.c.l.b16 %v3063_v32  ;;  %v3906_v51 = vunpack.c.h.b16 %v3063_v32  ;;  %v3750_v11 = vadd.f32 %v3749_v12, %v9010_v34  ;;  %v2171_v59 = vsel %vm934_vm7, %v8823_v58, %v8823_v58 }
 0x55f   : > { %2254 = vst.msk [vmem:[#allocation3 + $0x1a0] sm:$0xff] %vm2240_vm12, %v7743_v30  ;;  %v9252_v40 = vpack.c.b16 %v3907_v43, %v3903_v36  ;;  %v9254_v25 = vpack.c.b16 %v3908_v33, %v3904_v49 }
 0x560   : > { %v9256_v60 = vpack.c.b16 %v3905_v23, %v3901_v35  ;;  %v9258_v0 = vpack.c.b16 %v3906_v51, %v3902_v39  ;;  %v3775_v17 = vadd.f32 %v3774_v52, %v3750_v11 }
 0x561   : > { %v3801_v8 = vpop.f32.mrf.mxu0  ;;  %v3826_v50 = vpop.f32.mrf.mxu1  ;;  %4157 = vmatmul.bf16.gmra.mxu0 %v9252_v40  ;;  %6775 = vmatmul.msk.bf16.gmra.mxu1 %vm1973_vm15, %v9254_v25 }
 0x562   : > { %4107 = vmatmul.bf16.gmra.mxu2 %v9256_v60  ;;  %4132 = vmatmul.bf16.gmra.mxu3 %v9258_v0  ;;  %v3800_v34 = vadd.f32 %v3799_v27, %v3775_v17 }
 0x564   : > { %v9270_v15 = vadd.f32 %v3824_v19, %v3800_v34 }
 0x565   : > { %v9265_v42 = vld [vmem:[#allocation3 + $0x1c0] sm:$0xff]  ;;  %v3751_v2 = vpop.f32.mrf.mxu2  ;;  %v3776_v21 = vpop.f32.mrf.mxu3 }
 0x566   : > { %v2907_v3 = vrot.slane %v9265_v42, 6  ;;  %v9268_v10 = vld [vmem:[#allocation3 + $0x1a0] sm:$0xff]  ;;  %v2455_v13 = vrot.slane %v9265_v42, 3  ;;  %v2331_v44 = vrot.slane %v9265_v42, 2  ;;  %v2619_v19 = vrot.slane %v9265_v42, 4 }
 0x567   : > { %v2905_v1 = vrot.slane %v9268_v10, 6  ;;  %v2741_v28 = vrot.slane %v9268_v10, 5  ;;  %v2453_v24 = vrot.slane %v9268_v10, 3  ;;  %v2329_v27 = vrot.slane %v9268_v10, 2 }
 0x568   : > { %v2617_v6 = vrot.slane %v9268_v10, 4  ;;  %v2743_v47 = vrot.slane %v9265_v42, 5  ;;  %v7657_v42 = vld [vmem:[%s10129_s7 + $0x440] sm:$0xff] }
 0x569   : > { %v3803_v14 = vpop.f32.mrf.mxu0  ;;  %v3828_v62 = vpop.f32.mrf.mxu1  ;;  %v2906_v26 = vsel %vm2879_vm0, %v2903_v56, %v2905_v1  ;;  %v2908_v61 = vsel %vm2879_vm0, %v2905_v1, %v2907_v3  ;;  %v2742_v29 = vsel %vm2715_vm9, %v2739_v46, %v2741_v28  ;;  %v2454_v16 = vsel %vm2427_vm4, %v2451_v57, %v2453_v24 }
 0x56a   : > { %2953 = vst.msk [vmem:[#allocation3 + $0x198] sm:$0xff] %vm1973_vm15, %v2906_v26  ;;  %2781 = vrot.lane.b32.xlu0 %v2742_v29, %s7809_s23  ;;  %2493 = vrot.lane.b32.xlu1 %v2454_v16, %s7809_s23  ;;  %v2456_v56 = vsel %vm2427_vm4, %v2453_v24, %v2455_v13  ;;  %v2332_v18 = vsel %vm2303_vm6, %v2329_v27, %v2331_v44 }
 0x56b   : > { %2954 = vst.msk [vmem:[#allocation3 + $0x1b8] sm:$0xff] %vm1973_vm15, %v2908_v61  ;;  %2495 = vrot.lane.b32.xlu2 %v2456_v56, %s7809_s23  ;;  %v2618_v57 = vsel %vm2591_vm2, %v2615_v48, %v2617_v6  ;;  %v2330_v46 = vsel %vm2303_vm6, %v2327_v20, %v2329_v27  ;;  %v2620_v30 = vsel %vm2591_vm2, %v2617_v6, %v2619_v19 }
 0x56c   : > { %2378 = vst.msk [vmem:[#allocation3 + $0x1a8] sm:$0xff] %vm1973_vm15, %v2332_v18  ;;  %v7745_v20 = vpack.i.bf16 %v8823_v58, %v2171_v59  ;;  %v2744_v43 = vsel %vm2715_vm9, %v2741_v28, %v2743_v47 }
 0x56d   : > { %2665 = vst.msk [vmem:[#allocation3 + $0x190] sm:$0xff] %vm1973_vm15, %v2618_v57  ;;  %v3753_v48 = vpop.f32.mrf.mxu2  ;;  %v3778_v54 = vpop.f32.mrf.mxu3 }
 0x56e   : > { %2377 = vst.msk [vmem:[#allocation3 + $0x188] sm:$0xff] %vm1973_vm15, %v2330_v46  ;;  %v3754_v9 = vadd.f32 %v3753_v48, %v9091_v55 }
 0x56f   : > { %2666 = vst.msk [vmem:[#allocation3 + $0x1b0] sm:$0xff] %vm1973_vm15, %v2620_v30 }
 0x570   : > { %v3779_v49 = vadd.f32 %v3778_v54, %v3754_v9 }
 0x571   : > { %v3805_v32 = vpop.f32.mrf.mxu0  ;;  %v3830_v36 = vpop.f32.mrf.mxu1  ;;  %4496 = vmatmul.bf16.vlgmr.msrb.gmra.mxu0 %v8864_v53  ;;  %6944 = vmatmul.msk.bf16.vlgmr.msrb.gmra.mxu1 %vm1973_vm15, %v8867_v45 }
 0x572   : > { %2783 = vrot.lane.b32.xlu1 %v2744_v43, %s7809_s23  ;;  %4446 = vmatmul.bf16.vlgmr.msra.gmra.mxu2 %v8745_v38  ;;  %v3804_v33 = vadd.f32 %v3803_v14, %v3779_v49 }
 0x573   : > { %7746 = vrot.lane.b32.xlu2 %v7745_v20, %s7809_s23  ;;  %4471 = vmatmul.bf16.vlgmr.msra.gmra.mxu3 %v8747_v31 }
 0x574   : > { %v3829_v55 = vadd.f32 %v3828_v62, %v3804_v33 }
 0x575   : > { %v3755_v12 = vpop.f32.mrf.mxu2  ;;  %v3780_v52 = vpop.f32.mrf.mxu3 }
 0x579   : > { %v3807_v35 = vpop.f32.mrf.mxu0  ;;  %v3832_v23 = vpop.f32.mrf.mxu1 }
 0x57d   : > { %v3757_v39 = vpop.f32.mrf.mxu2  ;;  %v3782_v51 = vpop.f32.mrf.mxu3 }
 0x57e   : > { %v3758_v11 = vadd.f32 %v3757_v39, %v9135_v7 }
 0x580   : > { %v3783_v50 = vadd.f32 %v3782_v51, %v3758_v11 }
 0x581   : > { %v3809_v53 = vpop.f32.mrf.mxu0  ;;  %v3834_v8 = vpop.f32.mrf.mxu1  ;;  %4500 = vmatmul.bf16.gmra.mxu0 %v8871_v63  ;;  %6945 = vmatmul.msk.bf16.gmra.mxu1 %vm1973_vm15, %v8874_v22 }
 0x582   : > { %4450 = vmatmul.bf16.gmra.mxu2 %v8787_v5  ;;  %v3808_v38 = vadd.f32 %v3807_v35, %v3783_v50  ;;  %v7648_v53 = vld [vmem:[%s10129_s7 + $0x3f8] sm:$0xff] }
 0x583   : > { %4475 = vmatmul.bf16.gmra.mxu3 %v8789_v37 }
 0x584   : > { %v9338_v31 = vadd.f32 %v3832_v23, %v3808_v38  ;;  %4814 = vmatpush.bf16.msrb.mxu3 %v7648_v53  ;;  %v7647_v38 = vld [vmem:[%s10129_s7 + $0x3f0] sm:$0xff] }
 0x585   : > { %v3759_v45 = vpop.f32.mrf.mxu2  ;;  %v3784_v17 = vpop.f32.mrf.mxu3 }
 0x588   : > { %4815 = vmatpush.bf16.msrb.mxu3 %v7647_v38  ;;  %v7641_v38 = vld [vmem:[%s10129_s7 + $0x3c0] sm:$0xff] }
 0x589   : > { %v3811_v34 = vpop.f32.mrf.mxu0  ;;  %v3836_v1 = vpop.f32.mrf.mxu1 }
 0x58d   : > { %v3761_v7 = vpop.f32.mrf.mxu2  ;;  %v3786_v2 = vpop.f32.mrf.mxu3 }
 0x58e   : > { %v3762_v21 = vadd.f32 %v3761_v7, %v9143_v4 }
 0x590   : > { %v3787_v27 = vadd.f32 %v3786_v2, %v3762_v21  ;;  %v7638_v21 = vld [vmem:[%s10129_s7 + $0x3a8] sm:$0xff] }
 0x591   : > { %v3813_v28 = vpop.f32.mrf.mxu0  ;;  %v3838_v24 = vpop.f32.mrf.mxu1  ;;  %4504 = vmatmul.bf16.gmra.mxu0 %v9252_v40  ;;  %6946 = vmatmul.msk.bf16.gmra.mxu1 %vm1973_vm15, %v9254_v25 }
 0x592   : > { %4454 = vmatmul.bf16.gmra.mxu2 %v9256_v60  ;;  %v3812_v14 = vadd.f32 %v3811_v34, %v3787_v27  ;;  %v7646_v28 = vld [vmem:[%s10129_s7 + $0x3e8] sm:$0xff]  ;;  %v7656_v24 = vld [vmem:[%s10129_s7 + $0x438] sm:$0xff] }
 0x593   : > { %4479 = vmatmul.bf16.gmra.mxu3 %v9258_v0  ;;  %4839 = vmatpush.bf16.msra.mxu0 %v7656_v24 }
 0x594   : > { %v9346_v62 = vadd.f32 %v3836_v1, %v3812_v14  ;;  %4816 = vmatpush.bf16.msrb.mxu3 %v7646_v28  ;;  %v7658_v28 = vld [vmem:[%s10129_s7 + $0x448] sm:$0xff] }
 0x595   : > { %v3763_v6 = vpop.f32.mrf.mxu2  ;;  %v3788_v26 = vpop.f32.mrf.mxu3 }
 0x596   : > { %v7637_v26 = vld [vmem:[%s10129_s7 + $0x3a0] sm:$0xff] }
 0x599   : > { %v4146_v61 = vpop.f32.mrf.mxu0  ;;  %v4171_v29 = vpop.f32.mrf.mxu1 }
 0x59d   : > { %v4096_v4 = vpop.f32.mrf.mxu2  ;;  %v4121_v16 = vpop.f32.mrf.mxu3 }
 0x59e   : > { %v4122_v56 = vadd.f32 %v4121_v16, %v4096_v4  ;;  %v7644_v16 = vld [vmem:[%s10129_s7 + $0x3d8] sm:$0xff] }
 0x5a0   : > { %v4147_v46 = vadd.f32 %v4146_v61, %v4122_v56  ;;  %v7645_v61 = vld [vmem:[%s10129_s7 + $0x3e0] sm:$0xff] }
 0x5a1   : > { %v4148_v18 = vpop.f32.mrf.mxu0  ;;  %v4173_v57 = vpop.f32.mrf.mxu1  ;;  %4817 = vmatpush.bf16.msrb.mxu3 %v7645_v61  ;;  %v7649_v61 = vld [vmem:[%s10129_s7 + $0x400] sm:$0xff] }
 0x5a2   : > { %v4172_v59 = vadd.f32 %v4171_v29, %v4147_v46  ;;  %v7655_v29 = vld [vmem:[%s10129_s7 + $0x430] sm:$0xff]  ;;  %v7654_v57 = vld [vmem:[%s10129_s7 + $0x428] sm:$0xff] }
 0x5a3   : > { %4840 = vmatpush.bf16.msra.mxu0 %v7655_v29  ;;  %v7635_v46 = vld [vmem:[%s10129_s7 + $0x390] sm:$0xff] }
 0x5a4   : > { %v9349_v30 = vadd.f32 %v4172_v59, %v9270_v15  ;;  %v7640_v15 = vld [vmem:[%s10129_s7 + $0x3b8] sm:$0xff]  ;;  %v7643_v59 = vld [vmem:[%s10129_s7 + $0x3d0] sm:$0xff] }
 0x5a5   : > { %v4098_v48 = vpop.f32.mrf.mxu2  ;;  %v4123_v54 = vpop.f32.mrf.mxu3  ;;  %4789 = vmatpush.bf16.msrb.mxu2 %v7640_v15  ;;  %4818 = vmatpush.bf16.msrb.mxu3 %v7644_v16 }
 0x5a6   : > { %v7653_v48 = vld [vmem:[%s10129_s7 + $0x420] sm:$0xff]  ;;  %v7660_v54 = vld [vmem:[%s10129_s7 + $0x458] sm:$0xff] }
 0x5a7   : > { %4841 = vmatpush.bf16.msra.mxu0 %v7654_v57  ;;  %4868 = vmatpush.bf16.msra.mxu1 %v7660_v54 }
 0x5a9   : > { %v4150_v20 = vpop.f32.mrf.mxu0  ;;  %v4175_v9 = vpop.f32.mrf.mxu1  ;;  %4819 = vmatpush.bf16.msrb.mxu3 %v7643_v59 }
 0x5ab   : > { %4842 = vmatpush.bf16.msra.mxu0 %v7653_v48 }
 0x5ad   : > { %v4100_v32 = vpop.f32.mrf.mxu2  ;;  %v4125_v36 = vpop.f32.mrf.mxu3 }
 0x5ae   : > { %v4126_v43 = vadd.f32 %v4125_v36, %v4100_v32  ;;  %v7652_v32 = vld [vmem:[%s10129_s7 + $0x418] sm:$0xff] }
 0x5af   : > { %4843 = vmatpush.bf16.msra.mxu0 %v7652_v32 }
 0x5b0   : > { %v4151_v12 = vadd.f32 %v4150_v20, %v4126_v43  ;;  %v7634_v20 = vld [vmem:[%s10129_s7 + $0x388] sm:$0xff] }
 0x5b1   : > { %v4152_v49 = vpop.f32.mrf.mxu0  ;;  %v4177_v33 = vpop.f32.mrf.mxu1 }
 0x5b2   : > { %v4176_v52 = vadd.f32 %v4175_v9, %v4151_v12  ;;  %v7642_v9 = vld [vmem:[%s10129_s7 + $0x3c8] sm:$0xff] }
 0x5b3   : > { %4820 = vmatpush.bf16.msrb.mxu3 %v7642_v9 }
 0x5b4   : > { %v9351_v35 = vadd.f32 %v4176_v52, %v3829_v55  ;;  %v7639_v55 = vld [vmem:[%s10129_s7 + $0x3b0] sm:$0xff] }
 0x5b5   : > { %v4102_v23 = vpop.f32.mrf.mxu2  ;;  %v4127_v39 = vpop.f32.mrf.mxu3  ;;  %4790 = vmatpush.bf16.msrb.mxu2 %v7639_v55 }
 0x5b7   : > { %4821 = vmatpush.bf16.msrb.mxu3 %v7641_v38 }
 0x5b9   : > { %v4154_v51 = vpop.f32.mrf.mxu0  ;;  %v4179_v11 = vpop.f32.mrf.mxu1  ;;  %4791 = vmatpush.bf16.msrb.mxu2 %v7638_v21  ;;  %v7650_v21 = vld [vmem:[%s10129_s7 + $0x408] sm:$0xff] }
 0x5bd   : > { %v4104_v8 = vpop.f32.mrf.mxu2  ;;  %v4129_v50 = vpop.f32.mrf.mxu3  ;;  %4792 = vmatpush.bf16.msrb.mxu2 %v7637_v26 }
 0x5be   : > { %v4130_v45 = vadd.f32 %v4129_v50, %v4104_v8 }
 0x5c0   : > { %v4155_v1 = vadd.f32 %v4154_v51, %v4130_v45 }
 0x5c1   : > { %v4156_v17 = vpop.f32.mrf.mxu0  ;;  %v4181_v34 = vpop.f32.mrf.mxu1 }
 0x5c2   : > { %v4180_v7 = vadd.f32 %v4179_v11, %v4155_v1  ;;  %v7651_v17 = vld [vmem:[%s10129_s7 + $0x410] sm:$0xff] }
 0x5c3   : > { %v7659_v34 = vld [vmem:[%s10129_s7 + $0x450] sm:$0xff]  ;;  %4844 = vmatpush.bf16.msra.mxu0 %v7651_v17 }
 0x5c4   : > { %v9376_v27 = vadd.f32 %v4180_v7, %v9338_v31  ;;  %v7636_v31 = vld [vmem:[%s10129_s7 + $0x398] sm:$0xff]  ;;  %4869 = vmatpush.bf16.msra.mxu1 %v7659_v34 }
 0x5c5   : > { %v2496_v2 = vpop.permute.xlu2 %2495  ;;  %v4106_v14 = vpop.f32.mrf.mxu2  ;;  %4793 = vmatpush.bf16.msrb.mxu2 %v7636_v31  ;;  %v3009_v31 = vld [vmem:[#allocation3 + $0x180] sm:$0xff] }
 0x5c6   : > { %2542 = vst.msk [vmem:[#allocation3 + $0x1a8] sm:$0xff] %vm2240_vm12, %v2496_v2  ;;  %v4131_v6 = vpop.f32.mrf.mxu3 }
 0x5c7   : > { %4845 = vmatpush.bf16.msra.mxu0 %v7650_v21 }
 0x5c8   : > { %4870 = vmatpush.bf16.msra.mxu1 %v7658_v28 }
 0x5c9   : > { %4794 = vmatpush.bf16.msrb.mxu2 %v7635_v46 }
 0x5cb   : > { %4846 = vmatpush.bf16.msra.mxu0 %v7649_v61 }
 0x5cc   : > { %4871 = vmatpush.bf16.msra.mxu1 %v7657_v42 }
 0x5cd   : > { %v7747_v4 = vpop.permute.xlu2 %7746  ;;  %4795 = vmatpush.bf16.msrb.mxu2 %v7634_v20  ;;  %v3014_v6 = vld [vmem:[#allocation3 + $0x1a8] sm:$0xff] }
 0x5ce   : > { %v7749_v56 = vunpack.i.h.bf16 %v7747_v4  ;;  %v7748_v18 = vunpack.i.l.bf16 %v7747_v4  ;;  %v3067_v4 = vpack.c.bf16 %v3014_v6, %v9268_v10 }
 0x5d0   : > { %2257 = vst.msk [vmem:[#allocation3 + $0x200] sm:$0xff] %vm2240_vm12, %v7749_v56  ;;  %v4256_v54 = vunpack.c.l.b16 %v3067_v4  ;;  %v4257_v10 = vunpack.c.h.b16 %v3067_v4 }
 0x5d1   : > { %2256 = vst.msk [vmem:[#allocation3 + $0x1e0] sm:$0xff] %vm2240_vm12, %v7748_v18 }
 0x5d7   : > { %v9419_v36 = vld [vmem:[#allocation3 + $0x200] sm:$0xff] }
 0x5d8   : > { %v9421_v43 = vld [vmem:[#allocation3 + $0x1e0] sm:$0xff]  ;;  %v2459_v49 = vrot.slane %v9419_v36, 3  ;;  %v2335_v23 = vrot.slane %v9419_v36, 2  ;;  %v2623_v53 = vrot.slane %v9419_v36, 4  ;;  %v2911_v45 = vrot.slane %v9419_v36, 6 }
 0x5d9   : > { %v2745_v33 = vrot.slane %v9421_v43, 5  ;;  %v2457_v12 = vrot.slane %v9421_v43, 3  ;;  %v2621_v52 = vrot.slane %v9421_v43, 4  ;;  %v2333_v39 = vrot.slane %v9421_v43, 2 }
 0x5da   : > { %v2909_v8 = vrot.slane %v9421_v43, 6 }
 0x5db   : > { %v2746_v51 = vsel %vm2715_vm9, %v2743_v47, %v2745_v33  ;;  %v2460_v11 = vsel %vm2427_vm4, %v2457_v12, %v2459_v49  ;;  %v2458_v15 = vsel %vm2427_vm4, %v2455_v13, %v2457_v12  ;;  %v7633_v47 = vld [vmem:[%s10129_s7 + $0x380] sm:$0xff]  ;;  %v2622_v13 = vsel %vm2591_vm2, %v2619_v19, %v2621_v52 }
 0x5dc   : > { %2785 = vrot.lane.b32.xlu2 %v2746_v51, %s7809_s23  ;;  %2499 = vrot.lane.b32.xlu1 %v2460_v11, %s7809_s23  ;;  %v2782_v50 = vpop.permute.xlu0 %2781  ;;  %v2494_v55 = vpop.permute.xlu1 %2493  ;;  %v2336_v1 = vsel %vm2303_vm6, %v2333_v39, %v2335_v23  ;;  %v2334_v19 = vsel %vm2303_vm6, %v2331_v44, %v2333_v39  ;;  %2667 = vst.msk [vmem:[#allocation3 + $0x1d0] sm:$0xff] %vm1973_vm15, %v2622_v13  ;;  %v2747_v44 = vrot.slane %v9419_v36, 5 }
 0x5dd   : > { %2497 = vrot.lane.b32.xlu0 %v2458_v15, %s7809_s23  ;;  %2829 = vst.msk [vmem:[#allocation3 + $0x190] sm:$0xff] %vm2240_vm12, %v2782_v50  ;;  %4796 = vmatpush.bf16.msrb.mxu2 %v7633_v47  ;;  %v2624_v24 = vsel %vm2591_vm2, %v2621_v52, %v2623_v53  ;;  %v2910_v14 = vsel %vm2879_vm0, %v2907_v3, %v2909_v8  ;;  %v3012_v52 = vld [vmem:[#allocation3 + $0x198] sm:$0xff] }
 0x5de   : > { %2541 = vst.msk [vmem:[#allocation3 + $0x188] sm:$0xff] %vm2240_vm12, %v2494_v55  ;;  %v4158_v7 = vpop.f32.mrf.mxu0  ;;  %v4183_v2 = vpop.f32.mrf.mxu1  ;;  %v2912_v26 = vsel %vm2879_vm0, %v2909_v8, %v2911_v45  ;;  %v2748_v3 = vsel %vm2715_vm9, %v2745_v33, %v2747_v44  ;;  %v3016_v15 = vld [vmem:[#allocation3 + $0x1b8] sm:$0xff] }
 0x5df   : > { %2380 = vst.msk [vmem:[#allocation3 + $0x1e8] sm:$0xff] %vm1973_vm15, %v2336_v1 }
 0x5e0   : > { %2379 = vst.msk [vmem:[#allocation3 + $0x1c8] sm:$0xff] %vm1973_vm15, %v2334_v19 }
 0x5e1   : > { %2668 = vst.msk [vmem:[#allocation3 + $0x1f0] sm:$0xff] %vm1973_vm15, %v2624_v24 }
 0x5e2   : > { %2955 = vst.msk [vmem:[#allocation3 + $0x1d8] sm:$0xff] %vm1973_vm15, %v2910_v14 }
 0x5e3   : > { %2956 = vst.msk [vmem:[#allocation3 + $0x1f8] sm:$0xff] %vm1973_vm15, %v2912_v26 }
 0x5e4   : > { %7751 = vrot.lane.b32.xlu1 %v9053_v41, %s7809_s23  ;;  %v2784_v29 = vpop.permute.xlu1 %2783  ;;  %v3011_v9 = vld [vmem:[#allocation3 + $0x190] sm:$0xff] }
 0x5e5   : > { %2787 = vrot.lane.b32.xlu0 %v2748_v3, %s7809_s23  ;;  %2830 = vst.msk [vmem:[#allocation3 + $0x1b0] sm:$0xff] %vm2240_vm12, %v2784_v29  ;;  %v3010_v16 = vld [vmem:[#allocation3 + $0x188] sm:$0xff]  ;;  %v4108_v56 = vpop.f32.mrf.mxu2  ;;  %v4133_v18 = vpop.f32.mrf.mxu3  ;;  %v3066_v51 = vpack.c.bf16 %v3012_v52, %v3011_v9 }
 0x5e6   : > { %v3065_v57 = vpack.c.bf16 %v3010_v16, %v3009_v31  ;;  %v4134_v46 = vadd.f32 %v4133_v18, %v4108_v56  ;;  %v4160_v41 = vpop.f32.mrf.mxu0  ;;  %v4185_v59 = vpop.f32.mrf.mxu1 }
 0x5e7   : > { %v4254_v13 = vunpack.c.l.b16 %v3066_v51  ;;  %v4255_v34 = vunpack.c.h.b16 %v3066_v51  ;;  %v7668_v51 = vld [vmem:[%s10129_s7 + $0x498] sm:$0xff] }
 0x5e8   : > { %v4252_v48 = vunpack.c.l.b16 %v3065_v57  ;;  %v4253_v20 = vunpack.c.h.b16 %v3065_v57  ;;  %v4159_v32 = vadd.f32 %v4158_v7, %v4134_v46  ;;  %5140 = vmatpush.bf16.msra.mxu2 %v7668_v51 }
 0x5e9   : > { %v3020_v51 = vld [vmem:[#allocation3 + $0x1d8] sm:$0xff] }
 0x5ea   : > { %v9503_v33 = vpack.c.b16 %v4256_v54, %v4252_v48  ;;  %v9505_v12 = vpack.c.b16 %v4257_v10, %v4253_v20  ;;  %v4184_v39 = vadd.f32 %v4183_v2, %v4159_v32 }
 0x5ec   : > { %4458 = vmatmul.bf16.gmra.mxu2 %v9503_v33  ;;  %4483 = vmatmul.bf16.gmra.mxu3 %v9505_v12  ;;  %v3015_v11 = vld [vmem:[#allocation3 + $0x1b0] sm:$0xff]  ;;  %v9510_v50 = vadd.f32 %v4184_v39, %v9346_v62 }
 0x5ed   : > { %v3068_v8 = vpack.c.bf16 %v3016_v15, %v3015_v11  ;;  %v4110_v55 = vpop.f32.mrf.mxu2  ;;  %v4135_v47 = vpop.f32.mrf.mxu3  ;;  %v7676_v11 = vld [vmem:[%s10129_s7 + $0x4d8] sm:$0xff] }
 0x5ee   : > { %v4497_v38 = vpop.f32.mrf.mxu0  ;;  %v4522_v19 = vpop.f32.mrf.mxu1  ;;  %v7684_v15 = vld [vmem:[%s10129_s7 + $0x518] sm:$0xff]  ;;  %5165 = vmatpush.bf16.msra.mxu3 %v7676_v11  ;;  %v7666_v47 = vld [vmem:[%s10129_s7 + $0x488] sm:$0xff] }
 0x5ef   : > { %v4258_v17 = vunpack.c.l.b16 %v3068_v8  ;;  %v4259_v1 = vunpack.c.h.b16 %v3068_v8  ;;  %v7675_v8 = vld [vmem:[%s10129_s7 + $0x4d0] sm:$0xff]  ;;  %5190 = vmatpush.bf16.msrb.mxu0 %v7684_v15 }
 0x5f1   : > { %v9512_v7 = vpack.c.b16 %v4258_v17, %v4254_v13  ;;  %v9514_v2 = vpack.c.b16 %v4259_v1, %v4255_v34  ;;  %v7683_v13 = vld [vmem:[%s10129_s7 + $0x510] sm:$0xff]  ;;  %v7665_v17 = vld [vmem:[%s10129_s7 + $0x480] sm:$0xff]  ;;  %v7682_v1 = vld [vmem:[%s10129_s7 + $0x508] sm:$0xff] }
 0x5f2   : > { %5166 = vmatpush.bf16.msra.mxu3 %v7675_v8  ;;  %v7673_v34 = vld [vmem:[%s10129_s7 + $0x4c0] sm:$0xff] }
 0x5f3   : > { %4508 = vmatmul.bf16.gmra.mxu0 %v9512_v7  ;;  %6947 = vmatmul.msk.bf16.gmra.mxu1 %vm1973_vm15, %v9514_v2 }
 0x5f4   : > { %5191 = vmatpush.bf16.msrb.mxu0 %v7683_v13 }
 0x5f5   : > { %v4447_v21 = vpop.f32.mrf.mxu2 }
 0x5f6   : > { %v4472_v62 = vpop.f32.mrf.mxu3  ;;  %v4499_v28 = vpop.f32.mrf.mxu0 }
 0x5f7   : > { %v4473_v24 = vadd.f32 %v4472_v62, %v4447_v21  ;;  %v4524_v14 = vpop.f32.mrf.mxu1  ;;  %v7672_v21 = vld [vmem:[%s10129_s7 + $0x4b8] sm:$0xff]  ;;  %v7681_v28 = vld [vmem:[%s10129_s7 + $0x500] sm:$0xff] }
 0x5f8   : > { %v7688_v62 = vld [vmem:[%s10129_s7 + $0x538] sm:$0xff]  ;;  %5192 = vmatpush.bf16.msrb.mxu0 %v7682_v1  ;;  %v7663_v14 = vld [vmem:[%s10129_s7 + $0x470] sm:$0xff] }
 0x5f9   : > { %v4498_v6 = vadd.f32 %v4497_v38, %v4473_v24  ;;  %v7674_v38 = vld [vmem:[%s10129_s7 + $0x4c8] sm:$0xff]  ;;  %5219 = vmatpush.bf16.msrb.mxu1 %v7688_v62  ;;  %v7687_v24 = vld [vmem:[%s10129_s7 + $0x530] sm:$0xff] }
 0x5fa   : > { %5167 = vmatpush.bf16.msra.mxu3 %v7674_v38 }
 0x5fb   : > { %v4523_v26 = vadd.f32 %v4522_v19, %v4498_v6  ;;  %v7664_v19 = vld [vmem:[%s10129_s7 + $0x478] sm:$0xff]  ;;  %v7671_v6 = vld [vmem:[%s10129_s7 + $0x4b0] sm:$0xff] }
 0x5fc   : > { %4797 = vmatmul.bf16.vlgmr.msrb.gmra.mxu2 %v8787_v5  ;;  %4822 = vmatmul.bf16.vlgmr.msrb.gmra.mxu3 %v8789_v37 }
 0x5fd   : > { %v4449_v61 = vpop.f32.mrf.mxu2  ;;  %v9522_v42 = vadd.f32 %v4523_v26, %v9349_v30  ;;  %5193 = vmatpush.bf16.msrb.mxu0 %v7681_v28  ;;  %v7680_v26 = vld [vmem:[%s10129_s7 + $0x4f8] sm:$0xff]  ;;  %5220 = vmatpush.bf16.msrb.mxu1 %v7687_v24 }
 0x5fe   : > { %v4474_v3 = vpop.f32.mrf.mxu3  ;;  %v4501_v29 = vpop.f32.mrf.mxu0  ;;  %5168 = vmatpush.bf16.msra.mxu3 %v7673_v34 }
 0x5ff   : > { %v4526_v4 = vpop.f32.mrf.mxu1 }
 0x601   : > { %5194 = vmatpush.bf16.msrb.mxu0 %v7680_v26 }
 0x602   : > { %5169 = vmatpush.bf16.msra.mxu3 %v7672_v21 }
 0x603   : > { %4847 = vmatmul.bf16.vlgmr.msra.gmra.mxu0 %v8871_v63  ;;  %7116 = vmatmul.msk.bf16.vlgmr.msra.gmra.mxu1 %vm1973_vm15, %v8874_v22 }
 0x605   : > { %v4451_v31 = vpop.f32.mrf.mxu2 }
 0x606   : > { %v4476_v16 = vpop.f32.mrf.mxu3  ;;  %v4503_v56 = vpop.f32.mrf.mxu0  ;;  %5170 = vmatpush.bf16.msra.mxu3 %v7671_v6 }
 0x607   : > { %v4477_v18 = vadd.f32 %v4476_v16, %v4451_v31  ;;  %v4528_v57 = vpop.f32.mrf.mxu1  ;;  %v7670_v31 = vld [vmem:[%s10129_s7 + $0x4a8] sm:$0xff]  ;;  %v7679_v16 = vld [vmem:[%s10129_s7 + $0x4f0] sm:$0xff]  ;;  %v7661_v56 = vld [vmem:[%s10129_s7 + $0x460] sm:$0xff] }
 0x608   : > { %5195 = vmatpush.bf16.msrb.mxu0 %v7679_v16  ;;  %v7678_v57 = vld [vmem:[%s10129_s7 + $0x4e8] sm:$0xff] }
 0x609   : > { %v4502_v5 = vadd.f32 %v4501_v29, %v4477_v18  ;;  %v7686_v29 = vld [vmem:[%s10129_s7 + $0x528] sm:$0xff]  ;;  %v7669_v18 = vld [vmem:[%s10129_s7 + $0x4a0] sm:$0xff] }
 0x60a   : > { %5221 = vmatpush.bf16.msrb.mxu1 %v7686_v29  ;;  %5171 = vmatpush.bf16.msra.mxu3 %v7670_v31 }
 0x60b   : > { %v4527_v46 = vadd.f32 %v4526_v4, %v4502_v5  ;;  %v7662_v4 = vld [vmem:[%s10129_s7 + $0x468] sm:$0xff] }
 0x60c   : > { %4801 = vmatmul.bf16.gmra.mxu2 %v9256_v60  ;;  %4826 = vmatmul.bf16.gmra.mxu3 %v9258_v0 }
 0x60d   : > { %v4453_v37 = vpop.f32.mrf.mxu2  ;;  %v9530_v30 = vadd.f32 %v4527_v46, %v9351_v35  ;;  %5196 = vmatpush.bf16.msrb.mxu0 %v7678_v57 }
 0x60e   : > { %v4478_v41 = vpop.f32.mrf.mxu3  ;;  %v4505_v63 = vpop.f32.mrf.mxu0  ;;  %v7685_v37 = vld [vmem:[%s10129_s7 + $0x520] sm:$0xff]  ;;  %5172 = vmatpush.bf16.msra.mxu3 %v7669_v18 }
 0x60f   : > { %v4530_v59 = vpop.f32.mrf.mxu1  ;;  %5222 = vmatpush.bf16.msrb.mxu1 %v7685_v37 }
 0x613   : > { %4851 = vmatmul.bf16.gmra.mxu0 %v9252_v40  ;;  %7117 = vmatmul.msk.bf16.gmra.mxu1 %vm1973_vm15, %v9254_v25 }
 0x615   : > { %v4455_v22 = vpop.f32.mrf.mxu2 }
 0x616   : > { %v4480_v48 = vpop.f32.mrf.mxu3  ;;  %v4507_v54 = vpop.f32.mrf.mxu0 }
 0x617   : > { %v4481_v20 = vadd.f32 %v4480_v48, %v4455_v22  ;;  %v4532_v10 = vpop.f32.mrf.mxu1  ;;  %v3017_v22 = vld [vmem:[#allocation3 + $0x1c0] sm:$0xff] }
 0x619   : > { %v4506_v9 = vadd.f32 %v4505_v63, %v4481_v20 }
 0x61b   : > { %v4531_v32 = vadd.f32 %v4530_v59, %v4506_v9 }
 0x61c   : > { %4805 = vmatmul.bf16.gmra.mxu2 %v9503_v33  ;;  %4830 = vmatmul.bf16.gmra.mxu3 %v9505_v12 }
 0x61d   : > { %v4457_v35 = vpop.f32.mrf.mxu2  ;;  %v9538_v52 = vadd.f32 %v4531_v32, %v9376_v27  ;;  %v7667_v27 = vld [vmem:[%s10129_s7 + $0x490] sm:$0xff] }
 0x61e   : > { %v4482_v39 = vpop.f32.mrf.mxu3  ;;  %5141 = vmatpush.bf16.msra.mxu2 %v7667_v27  ;;  %v7677_v35 = vld [vmem:[%s10129_s7 + $0x4e0] sm:$0xff] }
 0x61f   : > { %5197 = vmatpush.bf16.msrb.mxu0 %v7677_v35 }
 0x622   : > { %5142 = vmatpush.bf16.msra.mxu2 %v7666_v47 }
 0x623   : > { %4855 = vmatmul.bf16.gmra.mxu0 %v9512_v7  ;;  %7118 = vmatmul.msk.bf16.gmra.mxu1 %vm1973_vm15, %v9514_v2 }
 0x626   : > { %5143 = vmatpush.bf16.msra.mxu2 %v7665_v17 }
 0x62a   : > { %5144 = vmatpush.bf16.msra.mxu2 %v7664_v19 }
 0x62e   : > { %5145 = vmatpush.bf16.msra.mxu2 %v7663_v14 }
 0x632   : > { %5146 = vmatpush.bf16.msra.mxu2 %v7662_v4 }
 0x636   : > { %v2786_v55 = vpop.permute.xlu2 %2785  ;;  %5147 = vmatpush.bf16.msra.mxu2 %v7661_v56  ;;  %v2117_v56 = vld [vmem:[#allocation3 + $0x280] sm:$0x1] }
 0x637   : > { %2831 = vst.msk [vmem:[#allocation3 + $0x1d0] sm:$0xff] %vm2240_vm12, %v2786_v55  ;;  %v3024_v55 = vld [vmem:[#allocation3 + $0x1f8] sm:$0xff] }
 0x63e   : > { %v3019_v32 = vld [vmem:[#allocation3 + $0x1d0] sm:$0xff] }
 0x63f   : > { %v3070_v27 = vpack.c.bf16 %v3020_v51, %v3019_v32 }
 0x641   : > { %v4605_v13 = vunpack.c.l.b16 %v3070_v27  ;;  %v4606_v19 = vunpack.c.h.b16 %v3070_v27 }
 0x64e   : > { %v2500_v61 = vpop.permute.xlu1 %2499 }
 0x64f   : > { %2544 = vst.msk [vmem:[#allocation3 + $0x1e8] sm:$0xff] %vm2240_vm12, %v2500_v61  ;;  %v2498_v3 = vpop.permute.xlu0 %2497 }
 0x650   : > { %2543 = vst.msk [vmem:[#allocation3 + $0x1c8] sm:$0xff] %vm2240_vm12, %v2498_v3 }
 0x656   : > { %v7752_v5 = vpop.permute.xlu1 %7751  ;;  %v3022_v46 = vld [vmem:[#allocation3 + $0x1e8] sm:$0xff] }
 0x657   : > { %v7754_v41 = vunpack.i.h.bf16 %v7752_v5  ;;  %v7753_v63 = vunpack.i.l.bf16 %v7752_v5  ;;  %v2788_v59 = vpop.permute.xlu0 %2787  ;;  %v3018_v48 = vld [vmem:[#allocation3 + $0x1c8] sm:$0xff]  ;;  %v3071_v54 = vpack.c.bf16 %v3022_v46, %v9421_v43 }
 0x658   : > { %2832 = vst.msk [vmem:[#allocation3 + $0x1f0] sm:$0xff] %vm2240_vm12, %v2788_v59  ;;  %v3069_v20 = vpack.c.bf16 %v3018_v48, %v3017_v22 }
 0x659   : > { %2259 = vst.msk [vmem:[#allocation3 + $0x240] sm:$0xff] %vm2240_vm12, %v7754_v41  ;;  %v4607_v10 = vunpack.c.l.b16 %v3071_v54  ;;  %v4608_v9 = vunpack.c.h.b16 %v3071_v54 }
 0x65a   : > { %2258 = vst.msk [vmem:[#allocation3 + $0x220] sm:$0xff] %vm2240_vm12, %v7753_v63  ;;  %v4603_v39 = vunpack.c.l.b16 %v3069_v20  ;;  %v4604_v43 = vunpack.c.h.b16 %v3069_v20 }
 0x65c   : > { %v9634_v11 = vpack.c.b16 %v4607_v10, %v4603_v39  ;;  %v9636_v15 = vpack.c.b16 %v4608_v9, %v4604_v43 }
 0x65e   : > { %4809 = vmatmul.bf16.gmra.mxu2 %v9634_v11  ;;  %4834 = vmatmul.bf16.gmra.mxu3 %v9636_v15 }
 0x65f   : > { %v3023_v8 = vld [vmem:[#allocation3 + $0x1f0] sm:$0xff] }
 0x660   : > { %v9640_v47 = vld [vmem:[#allocation3 + $0x240] sm:$0xff]  ;;  %v3072_v38 = vpack.c.bf16 %v3024_v55, %v3023_v8 }
 0x661   : > { %v2915_v17 = vrot.slane %v9640_v47, 6  ;;  %v9643_v34 = vld [vmem:[#allocation3 + $0x220] sm:$0xff]  ;;  %v2463_v1 = vrot.slane %v9640_v47, 3  ;;  %v2627_v21 = vrot.slane %v9640_v47, 4  ;;  %v2339_v3 = vrot.slane %v9640_v47, 2 }
 0x662   : > { %v2913_v62 = vrot.slane %v9643_v34, 6  ;;  %v2749_v28 = vrot.slane %v9643_v34, 5  ;;  %v2461_v24 = vrot.slane %v9643_v34, 3  ;;  %v4609_v14 = vunpack.c.l.b16 %v3072_v38 }
 0x663   : > { %v4610_v6 = vunpack.c.h.b16 %v3072_v38  ;;  %v2337_v26 = vrot.slane %v9643_v34, 2  ;;  %v2625_v61 = vrot.slane %v9643_v34, 4  ;;  %v2751_v37 = vrot.slane %v9640_v47, 5 }
 0x664   : > { %v2750_v29 = vsel %vm2715_vm9, %v2747_v44, %v2749_v28  ;;  %v2462_v4 = vsel %vm2427_vm4, %v2459_v49, %v2461_v24  ;;  %v2464_v31 = vsel %vm2427_vm4, %v2461_v24, %v2463_v1  ;;  %v9662_v16 = vpack.c.b16 %v4609_v14, %v4605_v13 }
 0x665   : > { %2789 = vrot.lane.b32.xlu1 %v2750_v29, %s7809_s23  ;;  %2501 = vrot.lane.b32.xlu2 %v2462_v4, %s7809_s23  ;;  %v9666_v18 = vpack.c.b16 %v4610_v6, %v4606_v19  ;;  %v2338_v44 = vsel %vm2303_vm6, %v2335_v23, %v2337_v26  ;;  %v2628_v49 = vsel %vm2591_vm2, %v2625_v61, %v2627_v21  ;;  %v2178_v23 = vrot.slane %v2117_v56, 1 }
 0x666   : > { %2503 = vrot.lane.b32.xlu0 %v2464_v31, %s7809_s23  ;;  %4859 = vmatmul.bf16.gmra.mxu0 %v9662_v16  ;;  %2381 = vst.msk [vmem:[#allocation3 + $0x208] sm:$0xff] %vm1973_vm15, %v2338_v44  ;;  %v2626_v57 = vsel %vm2591_vm2, %v2623_v53, %v2625_v61  ;;  %v2340_v5 = vsel %vm2303_vm6, %v2337_v26, %v2339_v3 }
 0x667   : > { %7119 = vmatmul.msk.bf16.gmra.mxu1 %vm1973_vm15, %v9666_v18  ;;  %2670 = vst.msk [vmem:[#allocation3 + $0x230] sm:$0xff] %vm1973_vm15, %v2628_v49  ;;  %v2914_v46 = vsel %vm2879_vm0, %v2911_v45, %v2913_v62  ;;  %v2916_v53 = vsel %vm2879_vm0, %v2913_v62, %v2915_v17  ;;  %v2179_v41 = vsel %vm934_vm7, %v8823_v58, %v2178_v23 }
 0x668   : > { %2669 = vst.msk [vmem:[#allocation3 + $0x210] sm:$0xff] %vm1973_vm15, %v2626_v57  ;;  %v2752_v36 = vsel %vm2715_vm9, %v2749_v28, %v2751_v37 }
 0x669   : > { %2382 = vst.msk [vmem:[#allocation3 + $0x228] sm:$0xff] %vm1973_vm15, %v2340_v5 }
 0x66a   : > { %2957 = vst.msk [vmem:[#allocation3 + $0x218] sm:$0xff] %vm1973_vm15, %v2914_v46 }
 0x66b   : > { %2958 = vst.msk [vmem:[#allocation3 + $0x238] sm:$0xff] %vm1973_vm15, %v2916_v53 }
 0x66d   : > { %2791 = vrot.lane.b32.xlu2 %v2752_v36, %s7809_s23 }
 0x66e   : > { %2218 = vrot.lane.b32.xlu0 %v2179_v41, %s7809_s23  ;;  %5148 = vmatmul.bf16.vlgmr.msra.gmra.mxu2 %v9256_v60 }
 0x66f   : > { %5173 = vmatmul.bf16.vlgmr.msra.gmra.mxu3 %v9258_v0  ;;  %v4459_v45 = vpop.f32.mrf.mxu2  ;;  %v4484_v63 = vpop.f32.mrf.mxu3 }
 0x670   : > { %v4485_v59 = vadd.f32 %v4484_v63, %v4459_v45  ;;  %v4509_v22 = vpop.f32.mrf.mxu0  ;;  %v4534_v48 = vpop.f32.mrf.mxu1  ;;  %v7712_v45 = vld [vmem:[%s10129_s7 + $0x5f8] sm:$0xff] }
 0x671   : > { %5541 = vmatpush.bf16.msra.mxu0 %v7712_v45  ;;  %v7696_v63 = vld [vmem:[%s10129_s7 + $0x578] sm:$0xff] }
 0x672   : > { %v4510_v58 = vadd.f32 %v4509_v22, %v4485_v59  ;;  %v7704_v59 = vld [vmem:[%s10129_s7 + $0x5b8] sm:$0xff]  ;;  %5491 = vmatpush.bf16.msrb.mxu2 %v7696_v63  ;;  %v7695_v22 = vld [vmem:[%s10129_s7 + $0x570] sm:$0xff] }
 0x673   : > { %5516 = vmatpush.bf16.msrb.mxu3 %v7704_v59 }
 0x674   : > { %v4535_v54 = vadd.f32 %v4534_v48, %v4510_v58  ;;  %v7703_v48 = vld [vmem:[%s10129_s7 + $0x5b0] sm:$0xff]  ;;  %v7710_v58 = vld [vmem:[%s10129_s7 + $0x5e8] sm:$0xff] }
 0x676   : > { %v9707_v20 = vadd.f32 %v4535_v54, %v9510_v50  ;;  %5198 = vmatmul.bf16.vlgmr.msrb.gmra.mxu0 %v9252_v40  ;;  %5492 = vmatpush.bf16.msrb.mxu2 %v7695_v22 }
 0x677   : > { %7288 = vmatmul.msk.bf16.vlgmr.msrb.gmra.mxu1 %vm1973_vm15, %v9254_v25  ;;  %v4461_v10 = vpop.f32.mrf.mxu2  ;;  %v4486_v9 = vpop.f32.mrf.mxu3  ;;  %5517 = vmatpush.bf16.msrb.mxu3 %v7703_v48 }
 0x678   : > { %v4511_v60 = vpop.f32.mrf.mxu0  ;;  %v4536_v32 = vpop.f32.mrf.mxu1  ;;  %v7694_v9 = vld [vmem:[%s10129_s7 + $0x568] sm:$0xff] }
 0x679   : > { %v7702_v60 = vld [vmem:[%s10129_s7 + $0x5a8] sm:$0xff]  ;;  %v7709_v32 = vld [vmem:[%s10129_s7 + $0x5e0] sm:$0xff] }
 0x67a   : > { %5493 = vmatpush.bf16.msrb.mxu2 %v7694_v9 }
 0x67b   : > { %5518 = vmatpush.bf16.msrb.mxu3 %v7702_v60 }
 0x67e   : > { %5152 = vmatmul.bf16.gmra.mxu2 %v9503_v33 }
 0x67f   : > { %5177 = vmatmul.bf16.gmra.mxu3 %v9505_v12  ;;  %v4798_v0 = vpop.f32.mrf.mxu2  ;;  %v4823_v35 = vpop.f32.mrf.mxu3 }
 0x680   : > { %v4824_v39 = vadd.f32 %v4823_v35, %v4798_v0  ;;  %v4848_v43 = vpop.f32.mrf.mxu0  ;;  %v4873_v51 = vpop.f32.mrf.mxu1  ;;  %v7693_v0 = vld [vmem:[%s10129_s7 + $0x560] sm:$0xff] }
 0x681   : > { %v7701_v35 = vld [vmem:[%s10129_s7 + $0x5a0] sm:$0xff]  ;;  %5494 = vmatpush.bf16.msrb.mxu2 %v7693_v0 }
 0x682   : > { %v4849_v50 = vadd.f32 %v4848_v43, %v4824_v39  ;;  %v7708_v39 = vld [vmem:[%s10129_s7 + $0x5d8] sm:$0xff]  ;;  %5519 = vmatpush.bf16.msrb.mxu3 %v7701_v35 }
 0x683   : > { %v7716_v43 = vld [vmem:[%s10129_s7 + $0x618] sm:$0xff] }
 0x684   : > { %v4874_v27 = vadd.f32 %v4873_v51, %v4849_v50  ;;  %5570 = vmatpush.bf16.msra.mxu1 %v7716_v43  ;;  %v7715_v51 = vld [vmem:[%s10129_s7 + $0x610] sm:$0xff]  ;;  %v7692_v50 = vld [vmem:[%s10129_s7 + $0x558] sm:$0xff] }
 0x685   : > { %5495 = vmatpush.bf16.msrb.mxu2 %v7692_v50 }
 0x686   : > { %v9715_v40 = vadd.f32 %v4874_v27, %v9522_v42  ;;  %5202 = vmatmul.bf16.gmra.mxu0 %v9512_v7  ;;  %v7700_v27 = vld [vmem:[%s10129_s7 + $0x598] sm:$0xff] }
 0x687   : > { %7289 = vmatmul.msk.bf16.gmra.mxu1 %vm1973_vm15, %v9514_v2  ;;  %v4800_v25 = vpop.f32.mrf.mxu2  ;;  %v4825_v8 = vpop.f32.mrf.mxu3  ;;  %5520 = vmatpush.bf16.msrb.mxu3 %v7700_v27  ;;  %v2281_v27 = vld [vmem:[#allocation3 + $0x280] sm:$0x3] }
 0x688   : > { %v4850_v55 = vpop.f32.mrf.mxu0  ;;  %v4875_v38 = vpop.f32.mrf.mxu1  ;;  %v7707_v25 = vld [vmem:[%s10129_s7 + $0x5d0] sm:$0xff]  ;;  %5571 = vmatpush.bf16.msra.mxu1 %v7715_v51  ;;  %v7714_v8 = vld [vmem:[%s10129_s7 + $0x608] sm:$0xff] }
 0x689   : > { %v7691_v38 = vld [vmem:[%s10129_s7 + $0x550] sm:$0xff] }
 0x68a   : > { %5496 = vmatpush.bf16.msrb.mxu2 %v7691_v38  ;;  %v2569_v38 = vld [vmem:[#allocation3 + $0x280] sm:$0xf] }
 0x68c   : > { %5572 = vmatpush.bf16.msra.mxu1 %v7714_v8 }
 0x68e   : > { %5156 = vmatmul.bf16.gmra.mxu2 %v9634_v11 }
 0x68f   : > { %5181 = vmatmul.bf16.gmra.mxu3 %v9636_v15  ;;  %v4802_v13 = vpop.f32.mrf.mxu2  ;;  %v4827_v19 = vpop.f32.mrf.mxu3 }
 0x690   : > { %v4828_v62 = vadd.f32 %v4827_v19, %v4802_v13  ;;  %v4852_v28 = vpop.f32.mrf.mxu0  ;;  %v4877_v24 = vpop.f32.mrf.mxu1  ;;  %v7699_v13 = vld [vmem:[%s10129_s7 + $0x590] sm:$0xff] }
 0x691   : > { %5521 = vmatpush.bf16.msrb.mxu3 %v7699_v13 }
 0x692   : > { %v4853_v42 = vadd.f32 %v4852_v28, %v4828_v62  ;;  %v7706_v62 = vld [vmem:[%s10129_s7 + $0x5c8] sm:$0xff] }
 0x694   : > { %v4878_v14 = vadd.f32 %v4877_v24, %v4853_v42  ;;  %v7713_v24 = vld [vmem:[%s10129_s7 + $0x600] sm:$0xff]  ;;  %v7690_v42 = vld [vmem:[%s10129_s7 + $0x548] sm:$0xff] }
 0x695   : > { %5573 = vmatpush.bf16.msra.mxu1 %v7713_v24  ;;  %5497 = vmatpush.bf16.msrb.mxu2 %v7690_v42 }
 0x696   : > { %v9723_v6 = vadd.f32 %v4878_v14, %v9530_v30  ;;  %5206 = vmatmul.bf16.gmra.mxu0 %v9662_v16  ;;  %v7698_v14 = vld [vmem:[%s10129_s7 + $0x588] sm:$0xff] }
 0x697   : > { %7290 = vmatmul.msk.bf16.gmra.mxu1 %vm1973_vm15, %v9666_v18  ;;  %v4804_v26 = vpop.f32.mrf.mxu2  ;;  %v4829_v61 = vpop.f32.mrf.mxu3  ;;  %5522 = vmatpush.bf16.msrb.mxu3 %v7698_v14 }
 0x698   : > { %v4854_v29 = vpop.f32.mrf.mxu0  ;;  %v4879_v4 = vpop.f32.mrf.mxu1  ;;  %v3032_v61 = vld [vmem:[#allocation3 + $0x238] sm:$0xff] }
 0x699   : > { %v7705_v29 = vld [vmem:[%s10129_s7 + $0x5c0] sm:$0xff] }
 0x69f   : > { %v4806_v31 = vpop.f32.mrf.mxu2  ;;  %v4831_v56 = vpop.f32.mrf.mxu3 }
 0x6a0   : > { %v4832_v44 = vadd.f32 %v4831_v56, %v4806_v31  ;;  %v4856_v49 = vpop.f32.mrf.mxu0  ;;  %v4881_v57 = vpop.f32.mrf.mxu1  ;;  %v3025_v31 = vld [vmem:[#allocation3 + $0x200] sm:$0xff]  ;;  %v3028_v56 = vld [vmem:[#allocation3 + $0x218] sm:$0xff] }
 0x6a2   : > { %v4857_v5 = vadd.f32 %v4856_v49, %v4832_v44 }
 0x6a4   : > { %v4882_v23 = vadd.f32 %v4881_v57, %v4857_v5  ;;  %v7689_v57 = vld [vmem:[%s10129_s7 + $0x540] sm:$0xff] }
 0x6a5   : > { %v7697_v5 = vld [vmem:[%s10129_s7 + $0x580] sm:$0xff]  ;;  %5498 = vmatpush.bf16.msrb.mxu2 %v7689_v57 }
 0x6a6   : > { %v9729_v46 = vadd.f32 %v4882_v23, %v9538_v52  ;;  %v7711_v52 = vld [vmem:[%s10129_s7 + $0x5f0] sm:$0xff]  ;;  %5523 = vmatpush.bf16.msrb.mxu3 %v7697_v5 }
 0x6a7   : > { %v4808_v30 = vpop.f32.mrf.mxu2  ;;  %v4833_v53 = vpop.f32.mrf.mxu3  ;;  %5542 = vmatpush.bf16.msra.mxu0 %v7711_v52 }
 0x6a8   : > { %v4858_v41 = vpop.f32.mrf.mxu0  ;;  %v4883_v36 = vpop.f32.mrf.mxu1 }
 0x6ab   : > { %5543 = vmatpush.bf16.msra.mxu0 %v7710_v58 }
 0x6af   : > { %5544 = vmatpush.bf16.msra.mxu0 %v7709_v32  ;;  %v2857_v32 = vld [vmem:[#allocation3 + $0x280] sm:$0x3f] }
 0x6b0   : > { %v2919_v8 = vrot.slane %v2857_v32, 6 }
 0x6b3   : > { %5545 = vmatpush.bf16.msra.mxu0 %v7708_v39 }
 0x6b7   : > { %5546 = vmatpush.bf16.msra.mxu0 %v7707_v25 }
 0x6bb   : > { %5547 = vmatpush.bf16.msra.mxu0 %v7706_v62  ;;  %v2343_v62 = vrot.slane %v2281_v27, 2 }
 0x6bf   : > { %v2502_v54 = vpop.permute.xlu2 %2501  ;;  %5548 = vmatpush.bf16.msra.mxu0 %v7705_v29 }
 0x6c0   : > { %2545 = vst.msk [vmem:[#allocation3 + $0x208] sm:$0xff] %vm2240_vm12, %v2502_v54 }
 0x6c7   : > { %v2792_v10 = vpop.permute.xlu2 %2791  ;;  %v3026_v26 = vld [vmem:[#allocation3 + $0x208] sm:$0xff] }
 0x6c8   : > { %2834 = vst.msk [vmem:[#allocation3 + $0x230] sm:$0xff] %vm2240_vm12, %v2792_v10  ;;  %v3073_v44 = vpack.c.bf16 %v3026_v26, %v3025_v31 }
 0x6ca   : > { %v4954_v54 = vunpack.c.l.b16 %v3073_v44  ;;  %v4955_v9 = vunpack.c.h.b16 %v3073_v44 }
 0x6cf   : > { %v3031_v28 = vld [vmem:[#allocation3 + $0x230] sm:$0xff] }
 0x6d0   : > { %v3076_v4 = vpack.c.bf16 %v3032_v61, %v3031_v28 }
 0x6d2   : > { %v4960_v63 = vunpack.c.l.b16 %v3076_v4  ;;  %v4961_v48 = vunpack.c.h.b16 %v3076_v4  ;;  %v2631_v4 = vrot.slane %v2569_v38, 4 }
 0x6d7   : > { %v2790_v55 = vpop.permute.xlu1 %2789 }
 0x6d8   : > { %2833 = vst.msk [vmem:[#allocation3 + $0x210] sm:$0xff] %vm2240_vm12, %v2790_v55  ;;  %v2504_v19 = vpop.permute.xlu0 %2503 }
 0x6d9   : > { %2546 = vst.msk [vmem:[#allocation3 + $0x228] sm:$0xff] %vm2240_vm12, %v2504_v19 }
 0x6df   : > { %v3027_v49 = vld [vmem:[#allocation3 + $0x210] sm:$0xff] }
 0x6e0   : > { %v2219_v23 = vpop.permute.xlu0 %2218  ;;  %v3030_v30 = vld [vmem:[#allocation3 + $0x228] sm:$0xff]  ;;  %v3074_v53 = vpack.c.bf16 %v3028_v56, %v3027_v49 }
 0x6e1   : > { %2260 = vst.msk [vmem:[#allocation3 + $0x260] sm:$0xff] %vm2240_vm12, %v2219_v23  ;;  %v4810_v41 = vpop.f32.mrf.mxu2  ;;  %v4835_v36 = vpop.f32.mrf.mxu3  ;;  %v3075_v45 = vpack.c.bf16 %v3030_v30, %v9643_v34  ;;  %v2405_v34 = vld [vmem:[#allocation3 + $0x280] sm:$0x7] }
 0x6e2   : > { %v4836_v59 = vadd.f32 %v4835_v36, %v4810_v41  ;;  %v4956_v52 = vunpack.c.l.b16 %v3074_v53  ;;  %v4957_v22 = vunpack.c.h.b16 %v3074_v53  ;;  %v2467_v55 = vrot.slane %v2405_v34, 3 }
 0x6e3   : > { %v4860_v58 = vpop.f32.mrf.mxu0  ;;  %v4958_v10 = vunpack.c.l.b16 %v3075_v45  ;;  %v4959_v60 = vunpack.c.h.b16 %v3075_v45 }
 0x6e4   : > { %v4861_v0 = vadd.f32 %v4860_v58, %v4836_v59  ;;  %v4885_v35 = vpop.f32.mrf.mxu1  ;;  %v9821_v39 = vpack.c.b16 %v4960_v63, %v4956_v52  ;;  %v9823_v43 = vpack.c.b16 %v4961_v48, %v4957_v22 }
 0x6e5   : > { %v9825_v51 = vpack.c.b16 %v4958_v10, %v4954_v54  ;;  %v9827_v50 = vpack.c.b16 %v4959_v60, %v4955_v9 }
 0x6e6   : > { %v4886_v25 = vadd.f32 %v4885_v35, %v4861_v0  ;;  %5210 = vmatmul.bf16.gmra.mxu0 %v9821_v39  ;;  %7291 = vmatmul.msk.bf16.gmra.mxu1 %vm1973_vm15, %v9823_v43 }
 0x6e7   : > { %5160 = vmatmul.bf16.gmra.mxu2 %v9825_v51  ;;  %5185 = vmatmul.bf16.gmra.mxu3 %v9827_v50 }
 0x6e8   : > { %v9834_v13 = vld [vmem:[#allocation3 + $0x260] sm:$0xff]  ;;  %v9837_v19 = vadd.f32 %v4886_v25, %v9707_v20 }
 0x6e9   : > { %v2917_v28 = vrot.slane %v9834_v13, 6  ;;  %v4812_v24 = vpop.f32.mrf.mxu2  ;;  %v4837_v42 = vpop.f32.mrf.mxu3  ;;  %v2753_v14 = vrot.slane %v9834_v13, 5  ;;  %v2465_v26 = vrot.slane %v9834_v13, 3  ;;  %v2341_v61 = vrot.slane %v9834_v13, 2 }
 0x6ea   : > { %v2629_v29 = vrot.slane %v9834_v13, 4 }
 0x6eb   : > { %v2918_v31 = vsel %vm2879_vm0, %v2915_v17, %v2917_v28  ;;  %v2920_v20 = vsel %vm2879_vm0, %v2917_v28, %v2919_v8  ;;  %v4862_v56 = vpop.f32.mrf.mxu0  ;;  %v2754_v44 = vsel %vm2715_vm9, %v2751_v37, %v2753_v14  ;;  %v2468_v49 = vsel %vm2427_vm4, %v2465_v26, %v2467_v55  ;;  %v2693_v37 = vld [vmem:[#allocation3 + $0x280] sm:$0x1f] }
 0x6ec   : > { %2959 = vst.msk [vmem:[#allocation3 + $0x258] sm:$0xff] %vm1973_vm15, %v2918_v31  ;;  %v4887_v57 = vpop.f32.mrf.mxu1  ;;  %2793 = vrot.lane.b32.xlu0 %v2754_v44, %s7809_s23  ;;  %2507 = vrot.lane.b32.xlu2 %v2468_v49, %s7809_s23  ;;  %v2466_v17 = vsel %vm2427_vm4, %v2463_v1, %v2465_v26  ;;  %v2344_v5 = vsel %vm2303_vm6, %v2341_v61, %v2343_v62  ;;  %v2755_v1 = vrot.slane %v2693_v37, 5 }
 0x6ed   : > { %2960 = vst.msk [vmem:[#allocation3 + $0x278] sm:$0xff] %vm1973_vm15, %v2920_v20  ;;  %2505 = vrot.lane.b32.xlu1 %v2466_v17, %s7809_s23  ;;  %v2630_v23 = vsel %vm2591_vm2, %v2627_v21, %v2629_v29  ;;  %v2342_v30 = vsel %vm2303_vm6, %v2339_v3, %v2341_v61  ;;  %v2632_v53 = vsel %vm2591_vm2, %v2629_v29, %v2631_v4 }
 0x6ee   : > { %2384 = vst.msk [vmem:[#allocation3 + $0x268] sm:$0xff] %vm1973_vm15, %v2344_v5  ;;  %v2756_v59 = vsel %vm2715_vm9, %v2753_v14, %v2755_v1 }
 0x6ef   : > { %2671 = vst.msk [vmem:[#allocation3 + $0x250] sm:$0xff] %vm1973_vm15, %v2630_v23 }
 0x6f0   : > { %2383 = vst.msk [vmem:[#allocation3 + $0x248] sm:$0xff] %vm1973_vm15, %v2342_v30 }
 0x6f1   : > { %v5149_v41 = vpop.f32.mrf.mxu2  ;;  %2672 = vst.msk [vmem:[#allocation3 + $0x270] sm:$0xff] %vm1973_vm15, %v2632_v53 }
 0x6f2   : > { %v5174_v36 = vpop.f32.mrf.mxu3 }
 0x6f3   : > { %v5175_v45 = vadd.f32 %v5174_v36, %v5149_v41  ;;  %v5199_v63 = vpop.f32.mrf.mxu0 }
 0x6f4   : > { %v5224_v21 = vpop.f32.mrf.mxu1 }
 0x6f5   : > { %v5200_v52 = vadd.f32 %v5199_v63, %v5175_v45  ;;  %2795 = vrot.lane.b32.xlu1 %v2756_v59, %s7809_s23 }
 0x6f6   : > { %5549 = vmatmul.bf16.vlgmr.msra.gmra.mxu0 %v9512_v7  ;;  %7460 = vmatmul.msk.bf16.vlgmr.msra.gmra.mxu1 %vm1973_vm15, %v9514_v2 }
 0x6f7   : > { %v5225_v3 = vadd.f32 %v5224_v21, %v5200_v52  ;;  %5499 = vmatmul.bf16.vlgmr.msrb.gmra.mxu2 %v9503_v33  ;;  %5524 = vmatmul.bf16.vlgmr.msrb.gmra.mxu3 %v9505_v12 }
 0x6f9   : > { %v9880_v22 = vadd.f32 %v5225_v3, %v9715_v40  ;;  %v5151_v48 = vpop.f32.mrf.mxu2 }
 0x6fa   : > { %v5176_v58 = vpop.f32.mrf.mxu3 }
 0x6fb   : > { %v5201_v54 = vpop.f32.mrf.mxu0 }
 0x6fc   : > { %v5226_v10 = vpop.f32.mrf.mxu1 }
 0x701   : > { %v5153_v9 = vpop.f32.mrf.mxu2 }
 0x702   : > { %v5178_v60 = vpop.f32.mrf.mxu3 }
 0x703   : > { %v5179_v32 = vadd.f32 %v5178_v60, %v5153_v9  ;;  %v5203_v0 = vpop.f32.mrf.mxu0 }
 0x704   : > { %v5228_v7 = vpop.f32.mrf.mxu1 }
 0x705   : > { %v5204_v35 = vadd.f32 %v5203_v0, %v5179_v32 }
 0x706   : > { %5553 = vmatmul.bf16.gmra.mxu0 %v9662_v16  ;;  %7461 = vmatmul.msk.bf16.gmra.mxu1 %vm1973_vm15, %v9666_v18 }
 0x707   : > { %v5229_v33 = vadd.f32 %v5228_v7, %v5204_v35  ;;  %5503 = vmatmul.bf16.gmra.mxu2 %v9634_v11  ;;  %5528 = vmatmul.bf16.gmra.mxu3 %v9636_v15 }
 0x709   : > { %v9888_v12 = vadd.f32 %v5229_v33, %v9723_v6  ;;  %v5155_v2 = vpop.f32.mrf.mxu2 }
 0x70a   : > { %v5180_v40 = vpop.f32.mrf.mxu3 }
 0x70b   : > { %v5205_v34 = vpop.f32.mrf.mxu0 }
 0x70c   : > { %v5230_v27 = vpop.f32.mrf.mxu1 }
 0x711   : > { %v5157_v25 = vpop.f32.mrf.mxu2 }
 0x712   : > { %v5182_v8 = vpop.f32.mrf.mxu3 }
 0x713   : > { %v5183_v55 = vadd.f32 %v5182_v8, %v5157_v25  ;;  %v5207_v38 = vpop.f32.mrf.mxu0  ;;  %v5641_v25 = vld [vmem:[%s10130_s8 + $0x78] sm:$0xff] }
 0x714   : > { %v5232_v16 = vpop.f32.mrf.mxu1  ;;  %5642 = vmatpush.msra.mxu2 %v5641_v25 }
 0x715   : > { %v5208_v62 = vadd.f32 %v5207_v38, %v5183_v55 }
 0x716   : > { %5557 = vmatmul.bf16.gmra.mxu0 %v9821_v39  ;;  %7462 = vmatmul.msk.bf16.gmra.mxu1 %vm1973_vm15, %v9823_v43 }
 0x717   : > { %v5233_v11 = vadd.f32 %v5232_v16, %v5208_v62  ;;  %5507 = vmatmul.bf16.gmra.mxu2 %v9825_v51  ;;  %5532 = vmatmul.bf16.gmra.mxu3 %v9827_v50 }
 0x719   : > { %v9896_v15 = vadd.f32 %v5233_v11, %v9729_v46  ;;  %v5159_v18 = vpop.f32.mrf.mxu2 }
 0x71a   : > { %v5184_v6 = vpop.f32.mrf.mxu3 }
 0x71b   : > { %v5209_v28 = vpop.f32.mrf.mxu0 }
 0x71c   : > { %v5234_v24 = vpop.f32.mrf.mxu1 }
 0x746   : > { %v2508_v42 = vpop.permute.xlu2 %2507 }
 0x747   : > { %2548 = vst.msk [vmem:[#allocation3 + $0x268] sm:$0xff] %vm2240_vm12, %v2508_v42 }
 0x74e   : > { %v3038_v26 = vld [vmem:[#allocation3 + $0x268] sm:$0xff] }
 0x74f   : > { %v3079_v50 = vpack.c.bf16 %v3038_v26, %v9834_v13  ;;  %v3036_v13 = vld [vmem:[#allocation3 + $0x258] sm:$0xff] }
 0x751   : > { %v5309_v56 = vunpack.c.l.b16 %v3079_v50  ;;  %v5310_v49 = vunpack.c.h.b16 %v3079_v50 }
 0x75e   : > { %v2794_v14 = vpop.permute.xlu0 %2793 }
 0x75f   : > { %2835 = vst.msk [vmem:[#allocation3 + $0x250] sm:$0xff] %vm2240_vm12, %v2794_v14  ;;  %v2506_v39 = vpop.permute.xlu1 %2505 }
 0x760   : > { %2547 = vst.msk [vmem:[#allocation3 + $0x248] sm:$0xff] %vm2240_vm12, %v2506_v39 }
 0x763   : > { %v5211_v43 = vpop.f32.mrf.mxu0  ;;  %v5236_v51 = vpop.f32.mrf.mxu1 }
 0x766   : > { %v3035_v37 = vld [vmem:[#allocation3 + $0x250] sm:$0xff] }
 0x767   : > { %v2796_v46 = vpop.permute.xlu1 %2795  ;;  %v3034_v61 = vld [vmem:[#allocation3 + $0x248] sm:$0xff]  ;;  %v3078_v1 = vpack.c.bf16 %v3036_v13, %v3035_v37  ;;  %v7810_v37 = vmov 16.0  }
 0x768   : > { %2836 = vst.msk [vmem:[#allocation3 + $0x270] sm:$0xff] %vm2240_vm12, %v2796_v46  ;;  %v3077_v29 = vpack.c.bf16 %v3034_v61, %v9640_v47  ;;  %v3040_v47 = vld [vmem:[#allocation3 + $0x278] sm:$0xff]  ;;  %7767 = vrcp.f32 %v7810_v37 }
 0x769   : > { %v5307_v52 = vunpack.c.l.b16 %v3078_v1  ;;  %v5308_v48 = vunpack.c.h.b16 %v3078_v1 }
 0x76a   : > { %v5161_v4 = vpop.f32.mrf.mxu2  ;;  %v5186_v31 = vpop.f32.mrf.mxu3  ;;  %v5305_v20 = vunpack.c.l.b16 %v3077_v29  ;;  %v5306_v44 = vunpack.c.h.b16 %v3077_v29 }
 0x76b   : > { %v5187_v57 = vadd.f32 %v5186_v31, %v5161_v4  ;;  %v5213_v17 = vpop.f32.mrf.mxu0  ;;  %v5238_v5 = vpop.f32.mrf.mxu1 }
 0x76c   : > { %v5313_v23 = vpack.c.b16 %v5309_v56, %v5305_v20  ;;  %v5314_v30 = vpack.c.b16 %v5310_v49, %v5306_v44  ;;  %v5639_v49 = vld [vmem:[%s10130_s8 + $0x68] sm:$0xff]  ;;  %v5636_v17 = vld [vmem:[%s10130_s8 + $0x50] sm:$0xff] }
 0x76d   : > { %v5212_v53 = vadd.f32 %v5211_v43, %v5187_v57  ;;  %v5638_v57 = vld [vmem:[%s10130_s8 + $0x60] sm:$0xff]  ;;  %v5635_v5 = vld [vmem:[%s10130_s8 + $0x48] sm:$0xff] }
 0x76e   : > { %5511 = vmatmul.bf16.gmra.mxu2 %v5313_v23  ;;  %5536 = vmatmul.bf16.gmra.mxu3 %v5314_v30 }
 0x76f   : > { %v5237_v41 = vadd.f32 %v5236_v51, %v5212_v53  ;;  %v3039_v36 = vld [vmem:[#allocation3 + $0x270] sm:$0xff]  ;;  %v5634_v53 = vld [vmem:[%s10130_s8 + $0x40] sm:$0xff] }
 0x770   : > { %v3080_v45 = vpack.c.bf16 %v3040_v47, %v3039_v36  ;;  %v5633_v36 = vld [vmem:[%s10130_s8 + $0x38] sm:$0xff] }
 0x771   : > { %v9905_v63 = vadd.f32 %v5237_v41, %v9837_v19 }
 0x772   : > { %v5163_v21 = vpop.f32.mrf.mxu2  ;;  %v5188_v59 = vpop.f32.mrf.mxu3  ;;  %v5311_v3 = vunpack.c.l.b16 %v3080_v45  ;;  %v5312_v58 = vunpack.c.h.b16 %v3080_v45 }
 0x773   : > { %v5550_v54 = vpop.f32.mrf.mxu0  ;;  %v5575_v10 = vpop.f32.mrf.mxu1  ;;  %v5632_v21 = vld [vmem:[%s10130_s8 + $0x30] sm:$0xff] }
 0x774   : > { %v5315_v9 = vpack.c.b16 %v5311_v3, %v5307_v52  ;;  %v5316_v60 = vpack.c.b16 %v5312_v58, %v5308_v48  ;;  %v7768_v45 = vpop.eup %7767  ;;  %v5631_v52 = vld [vmem:[%s10130_s8 + $0x28] sm:$0xff] }
 0x775   : > { %v5611_v48 = vmul.f32 16.0, %v7768_v45 }
 0x776   : > { %5561 = vmatmul.bf16.gmra.mxu0 %v5315_v9  ;;  %7463 = vmatmul.msk.bf16.gmra.mxu1 %vm1973_vm15, %v5316_v60  ;;  %vm5615_vm15 = vweird.f32 %v7768_v45 }
 0x77a   : > { %v5500_v32 = vpop.f32.mrf.mxu2  ;;  %v5525_v0 = vpop.f32.mrf.mxu3 }
 0x77b   : > { %v5526_v7 = vadd.f32 %v5525_v0, %v5500_v32  ;;  %v5552_v35 = vpop.f32.mrf.mxu0  ;;  %v5577_v33 = vpop.f32.mrf.mxu1  ;;  %v5629_v0 = vld [vmem:[%s10130_s8 + $0x18] sm:$0xff] }
 0x77d   : > { %v5551_v19 = vadd.f32 %v5550_v54, %v5526_v7 }
 0x77f   : > { %v5576_v2 = vadd.f32 %v5575_v10, %v5551_v19  ;;  %v5630_v10 = vld [vmem:[%s10130_s8 + $0x20] sm:$0xff]  ;;  %v5628_v19 = vld [vmem:[%s10130_s8 + $0x10] sm:$0xff] }
 0x781   : > { %v5591_v40 = vadd.f32 %v5576_v2, %v9880_v22 }
 0x782   : > { %v5502_v34 = vpop.f32.mrf.mxu2  ;;  %v5527_v27 = vpop.f32.mrf.mxu3 }
 0x783   : > { %v5554_v8 = vpop.f32.mrf.mxu0  ;;  %v5579_v55 = vpop.f32.mrf.mxu1  ;;  %v5627_v34 = vld [vmem:[%s10130_s8 + $0x8] sm:$0xff] }
 0x78a   : > { %v5504_v38 = vpop.f32.mrf.mxu2  ;;  %v5529_v16 = vpop.f32.mrf.mxu3 }
 0x78b   : > { %v5530_v62 = vadd.f32 %v5529_v16, %v5504_v38  ;;  %v5556_v11 = vpop.f32.mrf.mxu0  ;;  %v5581_v18 = vpop.f32.mrf.mxu1 }
 0x78d   : > { %v5555_v6 = vadd.f32 %v5554_v8, %v5530_v62 }
 0x78f   : > { %v5580_v28 = vadd.f32 %v5579_v55, %v5555_v6  ;;  %v5626_v55 = vld [vmem:[%s10130_s8] sm:$0xff] }
 0x791   : > { %v5592_v24 = vadd.f32 %v5580_v28, %v9888_v12  ;;  %v5640_v12 = vld [vmem:[%s10130_s8 + $0x70] sm:$0xff] }
 0x792   : > { %v5506_v42 = vpop.f32.mrf.mxu2  ;;  %v5531_v22 = vpop.f32.mrf.mxu3  ;;  %5643 = vmatpush.msra.mxu2 %v5640_v12 }
 0x793   : > { %v5596_v14 = vrot.slane %v5592_v24, 4  ;;  %v5558_v39 = vpop.f32.mrf.mxu0  ;;  %v5583_v43 = vpop.f32.mrf.mxu1 }
 0x794   : > { %5644 = vmatpush.msra.mxu2 %v5639_v49 }
 0x795   : > { %v9914_v51 = vsel %vm2591_vm2, %v5591_v40, %v5596_v14 }
 0x796   : > { %5645 = vmatpush.msra.mxu2 %v5638_v57 }
 0x79a   : > { %v5508_v26 = vpop.f32.mrf.mxu2  ;;  %v5533_v50 = vpop.f32.mrf.mxu3 }
 0x79b   : > { %v5534_v46 = vadd.f32 %v5533_v50, %v5508_v26  ;;  %v5560_v61 = vpop.f32.mrf.mxu0  ;;  %v5585_v29 = vpop.f32.mrf.mxu1 }
 0x79d   : > { %v5559_v4 = vadd.f32 %v5558_v39, %v5534_v46 }
 0x79f   : > { %v5584_v31 = vadd.f32 %v5583_v43, %v5559_v4 }
 0x7a1   : > { %v5593_v20 = vadd.f32 %v5584_v31, %v9896_v15  ;;  %v5637_v15 = vld [vmem:[%s10130_s8 + $0x58] sm:$0xff] }
 0x7a2   : > { %v5510_v56 = vpop.f32.mrf.mxu2  ;;  %v5535_v44 = vpop.f32.mrf.mxu3  ;;  %5646 = vmatpush.msra.mxu2 %v5637_v15 }
 0x7a4   : > { %5647 = vmatpush.msra.mxu2 %v5636_v17 }
 0x7a6   : > { %5648 = vmatpush.msra.mxu2 %v5635_v5 }
 0x7a8   : > { %5649 = vmatpush.msra.mxu2 %v5634_v53 }
 0x7aa   : > { %5650 = vmatpush.msra.mxu2 %v5633_v36 }
 0x7ac   : > { %5651 = vmatpush.msra.mxu2 %v5632_v21 }
 0x7ae   : > { %5652 = vmatpush.msra.mxu2 %v5631_v52 }
 0x7b0   : > { %5653 = vmatpush.msra.mxu2 %v5630_v10 }
 0x7b2   : > { %5654 = vmatpush.msra.mxu2 %v5629_v0 }
 0x7b4   : > { %5655 = vmatpush.msra.mxu2 %v5628_v19 }
 0x7b6   : > { %5656 = vmatpush.msra.mxu2 %v5627_v34 }
 0x7b8   : > { %5657 = vmatpush.msra.mxu2 %v5626_v55 }
 0x7f1   : > { %v5512_v23 = vpop.f32.mrf.mxu2  ;;  %v5537_v30 = vpop.f32.mrf.mxu3 }
 0x7f2   : > { %v5538_v13 = vadd.f32 %v5537_v30, %v5512_v23 }
 0x7f3   : > { %v5562_v1 = vpop.f32.mrf.mxu0  ;;  %v5587_v41 = vpop.f32.mrf.mxu1 }
 0x7f4   : > { %v5563_v47 = vadd.f32 %v5562_v1, %v5538_v13 }
 0x7f6   : > { %v5588_v59 = vadd.f32 %v5587_v41, %v5563_v47 }
 0x7f8   : > { %v5594_v3 = vadd.f32 %v5588_v59, %v9905_v63  ;;  %v5612_v63 = vsub.f32 1.0, %v5611_v48 }
 0x7f9   : > { %v5514_v58 = vpop.f32.mrf.mxu2  ;;  %v5539_v54 = vpop.f32.mrf.mxu3 }
 0x7fa   : > { %v5599_v9 = vrot.slane %v5594_v3, 4  ;;  %v5613_v27 = vmul.f32 %v7768_v45, %v5612_v63 }
 0x7fb   : > { %v5564_v60 = vpop.f32.mrf.mxu0  ;;  %v5589_v32 = vpop.f32.mrf.mxu1 }
 0x7fc   : > { %v5602_v7 = vsel %vm2591_vm2, %v5593_v20, %v5599_v9  ;;  %v5614_v62 = vadd.f32 %v7768_v45, %v5613_v27  ;;  %v5684_v20 = vlaneseq }
 0x7fd   : > { %v5603_v35 = vadd.f32 %v5602_v7, %v9914_v51  ;;  %v5618_v33 = vmax.f32 %v9914_v51, %v5602_v7 }
 0x7fe   : > { %v5616_v24 = vsel %vm5615_vm15, %v7768_v45, %v5614_v62  ;;  %v9966_v57 = vand.u32 127, %v5684_v20  ;;  %v7477_v62 = vld [vmem:[%s10131_s9 + $0x28] sm:$0xff] }
 0x7ff   : > { %v5604_v2 = vrot.slane %v5603_v35, 4  ;;  %v5619_v40 = vrot.slane %v5618_v33, 4 }
 0x800   : > { %vm5687_vm4 = vcmp.lt.s32.totalorder %v9966_v57, 32  ;;  %vm5780_vm5 = vcmp.ge.s32.totalorder %v9966_v57, 32  ;;  %vm5781_vm6 = vcmp.lt.s32.totalorder %v9966_v57, 64  ;;  %vm5876_vm1 = vcmp.ge.s32.totalorder %v9966_v57, 64 }
 0x801   : > { %v5605_v25 = vadd.f32 %v5604_v2, %v5603_v35  ;;  %v5620_v8 = vmax.f32 %v5618_v33, %v5619_v40  ;;  %vm9988_vm9 = vmand %vm5780_vm5, %vm5781_vm6  ;;  %v5704_v2 = vld [vmem:[%s10131_s9 + $0x8] sm:$0xff] }
 0x803   : > { %v5606_v38 = vrot.slane %v5605_v25, 2  ;;  %v5621_v16 = vrot.slane %v5620_v8, 2 }
 0x805   : > { %v5607_v11 = vadd.f32 %v5606_v38, %v5605_v25  ;;  %v5622_v18 = vmax.f32 %v5620_v8, %v5621_v16  ;;  %v7476_v8 = vld [vmem:[%s10131_s9 + $0x20] sm:$0xff]  ;;  %v7469_v16 = vld [vmem:[%s10131_s9 + $0x10] sm:$0xff] }
 0x807   : > { %v5608_v6 = vrot.slane %v5607_v11, 1  ;;  %v5623_v28 = vrot.slane %v5622_v18, 1 }
 0x809   : > { %v5609_v42 = vadd.f32 %v5608_v6, %v5607_v11  ;;  %v5624_v14 = vmax.f32 %v5622_v18, %v5623_v28  ;;  %v7470_v11 = vld [vmem:[%s10131_s9 + $0x18] sm:$0xff]  ;;  %v7762_v6 = vld [vmem:[%s10132_s10] ss:$0 sm:$0xff] }
 0x80b   : > { %v5617_v22 = vmul.f32 %v5616_v24, %v5609_v42 }
 0x80d   : > { %v5625_v39 = vadd.f32 %v5624_v14, %v5617_v22  ;;  %v7764_v22 = vld [vmem:[%s10132_s10 + $0x2] ss:$0 sm:$0xff] }
 0x80f   : > { %5658 = vmatmul.f32.vlgmr.msra.gmra.mxu2 %v5625_v39  ;;  %v7811_v39 = vmov 0  }
 0x810   : > { %7757 = vset.pattern.permute.xlu0 %v7811_v39  ;;  %7755 = vset.pattern.permute.xlu1 %v7811_v39 }
 0x811   : > { %7756 = vset.pattern.permute.xlu2 %v7811_v39 }
 0x892   : > { %v5659_v43 = vpop.f32.mrf.mxu2 }
 0x893   : > { %v7464_v26 = vmul.f32 -1.442695, %v5659_v43 }
 0x895   : > { %7769 = vpow2.f32 %v7464_v26 }
 0x89b   : > { %v7770_v50 = vpop.eup %7769 }
 0x89c   : > { %v5665_v46 = vadd.f32 1.0, %v7770_v50 }
 0x89e   : > { %7771 = vrcp.f32 %v5665_v46  ;;  %v5677_v31 = vand.u32 2147483648, %v5665_v46  ;;  %v5675_v44 = vand.u32 2147483647, %v5665_v46  ;;  %vm5671_vm12 = vweird.f32 %v5665_v46 }
 0x8a0   : > { %v5678_v49 = vor.u32 1.1754944e-38, %v5677_v31  ;;  %vm5676_vm3 = vcmp.eq.f32.partialorder %v5675_v44, 8.507059e+37 }
 0x8a4   : > { %v7772_v61 = vpop.eup %7771 }
 0x8a5   : > { %v5667_v29 = vmul.f32 %v7772_v61, %v5665_v46  ;;  %vm5672_vm10 = vweird.f32 %v7772_v61 }
 0x8a6   : > { %vm5673_vm0 = vmor %vm5671_vm12, %vm5672_vm10 }
 0x8a7   : > { %v5668_v4 = vsub.f32 1.0, %v5667_v29 }
 0x8a9   : > { %v5669_v56 = vmul.f32 %v7772_v61, %v5668_v4 }
 0x8ab   : > { %v5670_v12 = vadd.f32 %v7772_v61, %v5669_v56 }
 0x8ad   : > { %v5674_v15 = vsel %vm5673_vm0, %v7772_v61, %v5670_v12  ;;  %v7763_v61 = vld [vmem:[%s10132_s10 + $0x1] ss:$0 sm:$0xff] }
 0x8ae   : > { %v5679_v17 = vsel %vm5676_vm3, %v5678_v49, %v5674_v15 }
 0x8af   : > { %v5681_v5 = vperm.slane %v5679_v17, 0 }
 0x8b1   : > { %v9970_v37 = vmul.f32 %v5681_v5, %v9914_v51  ;;  %v9972_v23 = vmul.f32 %v5681_v5, %v5602_v7  ;;  %v5703_v7 = vld [vmem:[%s10131_s9] sm:$0xff] }
 0x8b3   : > { %v5698_v30 = vsel %vm5687_vm4, %v9972_v23, -3e+38  ;;  %v5690_v53 = vsel %vm5687_vm4, %v9972_v23, 0.0  ;;  %v5697_v13 = vsel %vm5687_vm4, %v9970_v37, -3e+38  ;;  %v5689_v41 = vsel %vm5687_vm4, %v9970_v37, 0.0 }
 0x8b4   : > { %5701 = vmax.xlane.f32.xlu2 %v5698_v30  ;;  %5693 = vadd.xlane.f32.xlu0 %v5690_v53  ;;  %v5888_v1 = vsel %vm5876_vm1, %v9972_v23, -3e+38  ;;  %v5784_v36 = vsel %vm9988_vm9, %v9972_v23, 0.0  ;;  %v5880_v47 = vsel %vm5876_vm1, %v9972_v23, 0.0  ;;  %v5792_v45 = vsel %vm9988_vm9, %v9972_v23, -3e+38 }
 0x8b5   : > { %5699 = vmax.xlane.f32.xlu1 %v5697_v13  ;;  %v5887_v21 = vsel %vm5876_vm1, %v9970_v37, -3e+38  ;;  %v5879_v59 = vsel %vm5876_vm1, %v9970_v37, 0.0  ;;  %v5791_v52 = vsel %vm9988_vm9, %v9970_v37, -3e+38  ;;  %v5783_v3 = vsel %vm9988_vm9, %v9970_v37, 0.0 }
 0x8bc   : > { %5891 = vmax.xlane.f32.xlu0 %v5888_v1  ;;  %5691 = vadd.xlane.f32.xlu2 %v5689_v41 }
 0x8bd   : > { %5787 = vadd.xlane.f32.xlu1 %v5784_v36 }
 0x8c4   : > { %5883 = vadd.xlane.f32.xlu0 %v5880_v47  ;;  %5795 = vmax.xlane.f32.xlu2 %v5792_v45 }
 0x8c5   : > { %5889 = vmax.xlane.f32.xlu1 %v5887_v21 }
 0x8cc   : > { %5881 = vadd.xlane.f32.xlu0 %v5879_v59  ;;  %5793 = vmax.xlane.f32.xlu2 %v5791_v52 }
 0x8d4   : > { %5785 = vadd.xlane.f32.xlu2 %v5783_v3 }
 0x927   : > { %v5702_v48 = vpop.xlane.xlu2 %5701  ;;  %v5694_v58 = vpop.xlane.xlu0 %5693 }
 0x928   : > { %v5700_v54 = vpop.xlane.xlu1 %5699  ;;  %5727 = vmatpush.msra.mxu3 %v5702_v48  ;;  %v5696_v10 = vmul.f32 0.03125, %v5694_v58 }
 0x92a   : > { %5728 = vmatpush.msra.mxu3 %v5700_v54 }
 0x92c   : > { %5729 = vmatpush.msra.mxu3 %v5696_v10 }
 0x92f   : > { %v5892_v9 = vpop.xlane.xlu0 %5891  ;;  %v5692_v60 = vpop.xlane.xlu2 %5691 }
 0x930   : > { %v5788_v32 = vpop.xlane.xlu1 %5787  ;;  %v5695_v0 = vmul.f32 0.03125, %v5692_v60 }
 0x931   : > { %v5790_v27 = vmul.f32 0.03125, %v5788_v32 }
 0x932   : > { %5730 = vmatpush.msra.mxu3 %v5695_v0 }
 0x933   : > { %7465 = vmatmul.msk.f32.vlgmr.msra.gmra.mxu3 %vm1054_vm8, %v5703_v7 }
 0x934   : > { %5919 = vmatpush.msrb.mxu3 %v5892_v9 }
 0x937   : > { %v5884_v63 = vpop.xlane.xlu0 %5883  ;;  %v5796_v35 = vpop.xlane.xlu2 %5795 }
 0x938   : > { %v5886_v33 = vmul.f32 0.015625, %v5884_v63  ;;  %v5890_v19 = vpop.xlane.xlu1 %5889  ;;  %5823 = vmatpush.msrb.mxu2 %v5796_v35 }
 0x939   : > { %5920 = vmatpush.msrb.mxu3 %v5890_v19 }
 0x93b   : > { %5921 = vmatpush.msrb.mxu3 %v5886_v33 }
 0x93c   : > { %7466 = vmatmul.msk.f32.gmra.mxu3 %vm1054_vm8, %v5704_v2 }
 0x93f   : > { %v5882_v40 = vpop.xlane.xlu0 %5881  ;;  %v5794_v34 = vpop.xlane.xlu2 %5793 }
 0x940   : > { %v5885_v25 = vmul.f32 0.015625, %v5882_v40  ;;  %5824 = vmatpush.msrb.mxu2 %v5794_v34 }
 0x942   : > { %5825 = vmatpush.msrb.mxu2 %v5790_v27  ;;  %5922 = vmatpush.msrb.mxu3 %v5885_v25 }
 0x944   : > { %7479 = vmatmul.msk.f32.vlgmr.msrb.gmra.mxu3 %vm1054_vm8, %v7476_v8 }
 0x947   : > { %v5786_v55 = vpop.xlane.xlu2 %5785 }
 0x948   : > { %v5789_v38 = vmul.f32 0.03125, %v5786_v55 }
 0x94a   : > { %5826 = vmatpush.msrb.mxu2 %v5789_v38 }
 0x94b   : > { %7472 = vmatmul.msk.f32.vlgmr.msrb.gmra.mxu2 %vm1054_vm8, %v7469_v16 }
 0x94c   : > { %7480 = vmatmul.msk.f32.gmra.mxu3 %vm1054_vm8, %v7477_v62 }
 0x953   : > { %7473 = vmatmul.msk.f32.gmra.mxu2 %vm1054_vm8, %v7470_v11 }
 0x9b6   : > { %v5732_v18 = vpop.f32.mrf.mxu3 }
 0x9b7   : > { %v5733_v24 = vadd.f32 %v7762_v6, %v5732_v18 }
 0x9b9   : > { %v7467_v14 = vmul.f32 -1.442695, %v5733_v24 }
 0x9bb   : > { %7773 = vpow2.f32 %v7467_v14 }
 0x9bf   : > { %v5735_v28 = vpop.f32.mrf.mxu3 }
 0x9c0   : > { %v5736_v42 = vadd.f32 %v7762_v6, %v5735_v28 }
 0x9c1   : > { %v7774_v4 = vpop.eup %7773 }
 0x9c2   : > { %v7468_v43 = vmul.f32 -1.442695, %v5736_v42  ;;  %v10044_v15 = vadd.f32 1.0, %v7774_v4 }
 0x9c4   : > { %7775 = vpow2.f32 %v7468_v43 }
 0x9c7   : > { %v5924_v26 = vpop.f32.mrf.mxu3 }
 0x9c8   : > { %v5925_v50 = vadd.f32 %v7764_v22, %v5924_v26 }
 0x9ca   : > { %v7481_v46 = vmul.f32 -1.442695, %v5925_v50  ;;  %v7776_v44 = vpop.eup %7775 }
 0x9cb   : > { %v10046_v30 = vadd.f32 1.0, %v7776_v44 }
 0x9cc   : > { %7777 = vpow2.f32 %v7481_v46 }
 0x9ce   : > { %v5828_v29 = vpop.f32.mrf.mxu2 }
 0x9cf   : > { %v5829_v31 = vadd.f32 %v7763_v61, %v5828_v29  ;;  %v5927_v20 = vpop.f32.mrf.mxu3 }
 0x9d0   : > { %v5928_v56 = vadd.f32 %v7764_v22, %v5927_v20 }
 0x9d1   : > { %v7474_v12 = vmul.f32 -1.442695, %v5829_v31 }
 0x9d2   : > { %v7778_v49 = vpop.eup %7777  ;;  %v7482_v17 = vmul.f32 -1.442695, %v5928_v56 }
 0x9d3   : > { %7779 = vpow2.f32 %v7474_v12  ;;  %v5936_v5 = vadd.f32 1.0, %v7778_v49 }
 0x9d4   : > { %7781 = vpow2.f32 %v7482_v17 }
 0x9d5   : > { %7783 = vrcp.f32 %v5936_v5  ;;  %v5949_v48 = vand.u32 2147483648, %v5936_v5  ;;  %vm5943_vm8 = vweird.f32 %v5936_v5  ;;  %v5947_v10 = vand.u32 2147483647, %v5936_v5 }
 0x9d6   : > { %7785 = vrcp.f32 %v10044_v15  ;;  %v5831_v53 = vpop.f32.mrf.mxu2 }
 0x9d7   : > { %v5832_v13 = vadd.f32 %v7763_v61, %v5831_v53  ;;  %7787 = vrcp.f32 %v10046_v30  ;;  %v5950_v35 = vor.u32 1.1754944e-38, %v5949_v48  ;;  %vm5948_vm14 = vcmp.eq.f32.partialorder %v5947_v10, 8.507059e+37 }
 0x9d9   : > { %v7780_v51 = vpop.eup %7779  ;;  %v7475_v1 = vmul.f32 -1.442695, %v5832_v13  ;;  %v5757_v13 = vand.u32 2147483648, %v10044_v15 }
 0x9da   : > { %v7782_v41 = vpop.eup %7781  ;;  %v5840_v36 = vadd.f32 1.0, %v7780_v51  ;;  %v5772_v51 = vand.u32 2147483648, %v10046_v30 }
 0x9db   : > { %v7784_v47 = vpop.eup %7783  ;;  %7789 = vpow2.f32 %v7475_v1  ;;  %v10050_v45 = vadd.f32 1.0, %v7782_v41 }
 0x9dc   : > { %v10052_v21 = vpop.eup %7785  ;;  %7791 = vrcp.f32 %v5840_v36  ;;  %v5939_v59 = vmul.f32 %v7784_v47, %v5936_v5  ;;  %vm5944_vm11 = vweird.f32 %v7784_v47  ;;  %v5851_v25 = vand.u32 2147483647, %v5840_v36 }
 0x9dd   : > { %7793 = vrcp.f32 %v10050_v45  ;;  %v10055_v3 = vpop.eup %7787  ;;  %v5747_v58 = vmul.f32 %v10052_v21, %v10044_v15  ;;  %vm5945_vm13 = vmor %vm5943_vm8, %vm5944_vm11  ;;  %v5853_v8 = vand.u32 2147483648, %v5840_v36  ;;  %vm5847_vm12 = vweird.f32 %v5840_v36 }
 0x9de   : > { %v5940_v52 = vsub.f32 1.0, %v5939_v59  ;;  %v5762_v7 = vmul.f32 %v10055_v3, %v10046_v30  ;;  %vm5958_vm0 = vweird.f32 %v10050_v45  ;;  %v5962_v42 = vand.u32 2147483647, %v10050_v45 }
 0x9df   : > { %v5748_v2 = vsub.f32 1.0, %v5747_v58  ;;  %v5854_v24 = vor.u32 1.1754944e-38, %v5853_v8  ;;  %v5964_v22 = vand.u32 2147483648, %v10050_v45  ;;  %vm5852_vm1 = vcmp.eq.f32.partialorder %v5851_v25, 8.507059e+37 }
 0x9e0   : > { %v5941_v54 = vmul.f32 %v7784_v47, %v5940_v52  ;;  %v5763_v55 = vsub.f32 1.0, %v5762_v7  ;;  %v5773_v10 = vor.u32 1.1754944e-38, %v5772_v51 }
 0x9e1   : > { %v7790_v9 = vpop.eup %7789  ;;  %v5749_v11 = vmul.f32 %v10052_v21, %v5748_v2  ;;  %v5965_v20 = vor.u32 1.1754944e-38, %v5964_v22 }
 0x9e2   : > { %v7792_v60 = vpop.eup %7791  ;;  %v5841_v32 = vadd.f32 1.0, %v7790_v9  ;;  %v5942_v0 = vadd.f32 %v7784_v47, %v5941_v54  ;;  %v5764_v14 = vmul.f32 %v10055_v3, %v5763_v55  ;;  %v5758_v54 = vor.u32 1.1754944e-38, %v5757_v13 }
 0x9e3   : > { %v7794_v63 = vpop.eup %7793  ;;  %v5843_v33 = vmul.f32 %v7792_v60, %v5840_v36  ;;  %vm5848_vm10 = vweird.f32 %v7792_v60  ;;  %v5750_v17 = vadd.f32 %v10052_v21, %v5749_v11  ;;  %v5755_v36 = vand.u32 2147483647, %v10044_v15 }
 0x9e4   : > { %7795 = vrcp.f32 %v5841_v32  ;;  %v5946_v19 = vsel %vm5945_vm13, %v7784_v47, %v5942_v0  ;;  %v5954_v27 = vmul.f32 %v7794_v63, %v10050_v45  ;;  %vm5959_vm3 = vweird.f32 %v7794_v63  ;;  %vm5849_vm5 = vmor %vm5847_vm12, %vm5848_vm10 }
 0x9e5   : > { %v5951_v40 = vsel %vm5948_vm14, %v5950_v35, %v5946_v19  ;;  %v5844_v34 = vsub.f32 1.0, %v5843_v33  ;;  %vm5862_vm9 = vweird.f32 %v5841_v32  ;;  %v5866_v46 = vand.u32 2147483647, %v5841_v32  ;;  %vm5960_vm8 = vmor %vm5958_vm0, %vm5959_vm3  ;;  %v7765_v19 = vld [vmem:[%s10133_s11] ss:$0 sm:$0xff] }
 0x9e6   : > { %vm5968_vm15 = vcmp.ge.f32.partialorder %v5951_v40, 0.2  ;;  %v5955_v62 = vsub.f32 1.0, %v5954_v27  ;;  %v5868_v61 = vand.u32 2147483648, %v5841_v32  ;;  %vm5963_vm14 = vcmp.eq.f32.partialorder %v5962_v42, 8.507059e+37 }
 0x9e7   : > { %v5970_v38 = vsel %vm5968_vm15, %v5951_v40, 0.0  ;;  %v5845_v16 = vmul.f32 %v7792_v60, %v5844_v34  ;;  %vm5751_vm15 = vweird.f32 %v10044_v15  ;;  %vm5752_vm10 = vweird.f32 %v10052_v21  ;;  %v7766_v40 = vld [vmem:[%s10134_s12] ss:$0 sm:$0xff] }
 0x9e8   : > { %5984 = vperm.xlu0 %7757, %v5970_v38   ;;  %v5956_v6 = vmul.f32 %v7794_v63, %v5955_v62  ;;  %v5869_v12 = vor.u32 1.1754944e-38, %v5868_v61  ;;  %vm5766_vm0 = vweird.f32 %v10046_v30  ;;  %vm5867_vm3 = vcmp.eq.f32.partialorder %v5866_v46, 8.507059e+37 }
 0x9e9   : > { %v5846_v18 = vadd.f32 %v7792_v60, %v5845_v16  ;;  %v5765_v53 = vadd.f32 %v10055_v3, %v5764_v14  ;;  %v5770_v47 = vand.u32 2147483647, %v10046_v30 }
 0x9ea   : > { %v7796_v28 = vpop.eup %7795  ;;  %v5957_v26 = vadd.f32 %v7794_v63, %v5956_v6 }
 0x9eb   : > { %v5850_v39 = vsel %vm5849_vm5, %v7792_v60, %v5846_v18  ;;  %v5858_v43 = vmul.f32 %v7796_v28, %v5841_v32  ;;  %vm5863_vm13 = vweird.f32 %v7796_v28  ;;  %vm5767_vm5 = vweird.f32 %v10055_v3 }
 0x9ec   : > { %v5855_v50 = vsel %vm5852_vm1, %v5854_v24, %v5850_v39  ;;  %v5961_v4 = vsel %vm5960_vm8, %v7794_v63, %v5957_v26  ;;  %vm10073_vm12 = vmor %vm5862_vm9, %vm5863_vm13  ;;  %vm5756_vm13 = vcmp.eq.f32.partialorder %v5755_v36, 8.507059e+37 }
 0x9ed   : > { %vm5872_vm11 = vcmp.ge.f32.partialorder %v5855_v50, 0.2  ;;  %v5859_v29 = vsub.f32 1.0, %v5858_v43  ;;  %v5966_v49 = vsel %vm5963_vm14, %v5965_v20, %v5961_v4  ;;  %vm10087_vm9 = vmor %vm5751_vm15, %vm5752_vm10  ;;  %vm5771_vm14 = vcmp.eq.f32.partialorder %v5770_v47, 8.507059e+37 }
 0x9ee   : > { %v5874_v31 = vsel %vm5872_vm11, %v5855_v50, 0.0  ;;  %vm5969_vm1 = vcmp.ge.f32.partialorder %v5966_v49, 0.2  ;;  %vm5768_vm8 = vmor %vm5766_vm0, %vm5767_vm5  ;;  %v5754_v59 = vsel %vm10087_vm9, %v10052_v21, %v5750_v17 }
 0x9ef   : > { %5974 = vperm.xlu1 %7755, %v5874_v31   ;;  %v5860_v56 = vmul.f32 %v7796_v28, %v5859_v29  ;;  %v5769_v52 = vsel %vm5768_vm8, %v10055_v3, %v5765_v53  ;;  %v5971_v58 = vsel %vm5969_vm1, %v5966_v49, 0.0  ;;  %v5759_v15 = vsel %vm5756_vm13, %v5758_v54, %v5754_v59 }
 0x9f0   : > { %v5774_v9 = vsel %vm5771_vm14, %v5773_v10, %v5769_v52  ;;  %vm5776_vm15 = vcmp.ge.f32.partialorder %v5759_v15, 0.2 }
 0x9f1   : > { %v5861_v5 = vadd.f32 %v7796_v28, %v5860_v56  ;;  %vm5777_vm10 = vcmp.ge.f32.partialorder %v5774_v9, 0.2  ;;  %v5778_v30 = vsel %vm5776_vm15, %v5759_v15, 0.0 }
 0x9f2   : > { %v5779_v60 = vsel %vm5777_vm10, %v5774_v9, 0.0 }
 0x9f3   : > { %v5865_v1 = vsel %vm10073_vm12, %v7796_v28, %v5861_v5 }
 0x9f4   : > { %v5870_v45 = vsel %vm5867_vm3, %v5869_v12, %v5865_v1 }
 0x9f5   : > { %vm5873_vm11 = vcmp.ge.f32.partialorder %v5870_v45, 0.2 }
 0x9f6   : > { %v5875_v48 = vsel %vm5873_vm11, %v5870_v45, 0.0 }
 0x9f7   : > { %5979 = vperm.xlu2 %7756, %v5875_v48   ;;  %5989 = vperm.xlu1 %7755, %v5971_v58  }
 0x9ff   : > { %5996 = vperm.xlu2 %7756, %v5778_v30   ;;  %6001 = vperm.xlu1 %7755, %v5779_v60  }
 0xa51   : > { %v5980_v32 = vpop.permute.xlu2 %5979 }
 0xa59   : > { %v5997_v7 = vpop.permute.xlu2 %5996 }
 0xa5a   : > { %v5985_v0 = vpop.permute.xlu0 %5984 }
 0xa61   : > { %v5975_v21 = vpop.permute.xlu1 %5974 }
 0xa62   : > { %v5992_v3 = vsel %vm5781_vm6, %v5975_v21, %v5985_v0 }
 0xa63   : > { %v6004_v63 = vsel %vm5687_vm4, %v5997_v7, %v5992_v3 }
 0xa64   : > { %v6006_v35 = vmul.f32 %v6004_v63, %v9970_v37 }
 0xa66   : > { %v6012_v2 = vmul.f32 %v7765_v19, %v6006_v35 }
 0xa68   : > { %v6018_v27 = vadd.f32 %v7766_v40, %v6012_v2 }
 0xa69   : > { %v5990_v33 = vpop.permute.xlu1 %5989 }
 0xa6a   : > { %v5993_v34 = vsel %vm5781_vm6, %v5980_v32, %v5990_v33  ;;  %v6022_v55 = vmul.f32 0.01, %v6018_v27  ;;  %vm6020_vm12 = vcmp.ge.f32.partialorder %v6018_v27, 0.0 }
 0xa6c   : > { %v6024_v62 = vsel %vm6020_vm12, %v6018_v27, %v6022_v55 }
 0xa6d   : > { %v6028_v6 = vrot.slane %v6024_v62, 4 }
 0xa71   : > { %v6002_v25 = vpop.permute.xlu1 %6001 }
 0xa72   : > { %v6005_v8 = vsel %vm5687_vm4, %v6002_v25, %v5993_v34 }
 0xa73   : > { %v6007_v37 = vmul.f32 %v6005_v8, %v9972_v23 }
 0xa75   : > { %v6013_v38 = vmul.f32 %v7765_v19, %v6007_v37 }
 0xa77   : > { %v6019_v16 = vadd.f32 %v7766_v40, %v6013_v38 }
 0xa79   : > { %vm6021_vm0 = vcmp.ge.f32.partialorder %v6019_v16, 0.0  ;;  %v6023_v11 = vmul.f32 0.01, %v6019_v16 }
 0xa7b   : > { %v6025_v18 = vsel %vm6021_vm0, %v6019_v16, %v6023_v11 }
 0xa7c   : > { %v6029_v28 = vrot.slane %v6025_v18, 4 }
 0xa7e   : > { %v6030_v24 = vsel %vm2591_vm2, %v6028_v6, %v6029_v28  ;;  %v6034_v42 = vmax.f32 %v6025_v18, %v6029_v28 }
 0xa7f   : > { %v6033_v22 = vmax.f32 %v6024_v62, %v6030_v24 }
 0xa80   : > { %v6038_v14 = vrot.slane %v6034_v42, 1 }
 0xa81   : > { %v6037_v57 = vrot.slane %v6033_v22, 1 }
 0xa82   : > { %v6043_v39 = vmax.f32 %v6034_v42, %v6038_v14 }
 0xa83   : > { %v6039_v23 = vsel %vm934_vm7, %v6037_v57, %v6038_v14 }
 0xa84   : > { %v6042_v43 = vmax.f32 %v6033_v22, %v6039_v23  ;;  %6045 = vst [vmem:[#allocation6 + $0x8] sm:$0x7] %v6043_v39 }
 0xa86   : > { %6044 = vst [vmem:[#allocation6] sm:$0xff] %v6042_v43 }
 0xa8b   : > { %v6049_v26 = vld [vmem:[#allocation6 + $0x8] ss:$2 sm:$0x3] }
 0xa8c   : > { %6050 = vst [vmem:[%s438_s19 + $0x2] sm:$0x3] %v6049_v26 }
 0xa8d   : > { %v6046_v50 = vld [vmem:[#allocation6] ss:$2 sm:$0x3] }
 0xa8e   : > { %6047 = vst [vmem:[%s438_s19] sm:$0x3] %v6046_v50 }
 0xa8f PF: > { %s23_s25 = sadd.s32 1, %s7805_s25  }
 0xa90   : > { %p20_p4 = scmp.ge.s32.totalorder %s23_s25, 4  }
 0xa92   :  { %22 = sbr.rel (!%p20_p4) target bundleno = 1 (0x1), region = 125 }

</bundles_post_ra>
